<compile_context>
chip_gen: v7x
topology: tpu7x:2x2x1
jax: 0.10.0
libtpu: 0.0.40
codegen_flags: <defaults>
</compile_context>

<pallas_src>
import functools

import jax
import jax.numpy as jnp
from jax import lax
from jax.experimental import pallas as pl
from jax.experimental.pallas import tpu as pltpu


C_PAD = 128  # lane-dense channel padding (one full vreg lane width)


# ---------------------------------------------------------------------------
# Fused whole-network kernel (one grid step = one batch element)
# ---------------------------------------------------------------------------
def _resnet_fused_kernel(x_ref, w_ref, scale_ref, bias_ref, fcw_ref, fcb_ref,
                         out_ref, pad_ref, tmp_ref, *, pool_path):
    # x_ref:     (H0, W0, C_PAD)        f32   (batch dim squeezed by BlockSpec)
    # w_ref:     (L, 9, C_PAD, C_PAD)   bf16  (tap-major packed conv weights)
    # scale_ref: (L, 1, C_PAD)          f32   (folded BN scale)
    # bias_ref:  (L, 1, C_PAD)          f32   (folded BN bias)
    # fcw_ref:   (C_PAD, C_PAD)         f32   (FC weight, 1/(H*W) folded in)
    # fcb_ref:   (1, C_PAD)             f32
    # out_ref:   (1, C_PAD)             f32   (logits, lane-padded)
    # pad_ref:   (H0+2, W0+2, C_PAD)    f32   VMEM conv slab (zero border)
    # tmp_ref:   (H0, W0, C_PAD)        f32   VMEM max-pool staging buffer
    c = x_ref.shape[-1]
    a = x_ref[...]                                             # (H0, W0, C) f32

    for l, do_pool in enumerate(pool_path):
        if do_pool:
            hi, wi, _ = a.shape
            ho, wo = hi // 2, wi // 2
            # pool along H: split the leading (untiled) dim -> layout-trivial
            ar = a.reshape(ho, 2, wi, c)
            hmax = jnp.maximum(ar[:, 0, :, :], ar[:, 1, :, :])  # (ho, wi, C)
            # pool along W: stride-2 sublane loads from a VMEM staging buffer
            tmp_ref[0:ho, 0:wi, :] = hmax
            a = jnp.maximum(tmp_ref[0:ho, pl.ds(0, wo, stride=2), :],
                            tmp_ref[0:ho, pl.ds(1, wo, stride=2), :])  # (ho, wo, C)

        h, w, _ = a.shape
        # 3x3 conv (stride 1, pad 1): write the activation into a zero-padded
        # VMEM slab; the 9 taps are static shifted windows of that slab.
        pad_ref[0:h + 2, 0:w + 2, :] = jnp.zeros((h + 2, w + 2, c), jnp.float32)
        pad_ref[1:1 + h, 1:1 + w, :] = a

        acc = jnp.zeros((h * w, c), jnp.float32)
        for t in range(9):
            dy, dx = t // 3, t % 3
            tap = pad_ref[dy:dy + h, dx:dx + w, :].reshape(h * w, c)
            acc = acc + jnp.dot(tap.astype(jnp.bfloat16), w_ref[l, t],
                                preferred_element_type=jnp.float32)

        # folded BatchNorm (eval mode) + ReLU, done once on the f32 accumulator
        a = jnp.maximum(acc * scale_ref[l] + bias_ref[l], 0.0)  # (h*w, C)
        a = a.reshape(h, w, c)

    # head: global average pool (1/(H*W) is folded into fcw) + Linear
    h, w, _ = a.shape
    pooled = jnp.sum(a.reshape(h * w, c), axis=0, keepdims=True)  # (1, C)
    logits = jnp.dot(pooled, fcw_ref[...],
                     preferred_element_type=jnp.float32) + fcb_ref[...]
    out_ref[...] = logits.astype(out_ref.dtype)


# ---------------------------------------------------------------------------
# Wrapper: NCHW boundary glue + one pallas_call for the whole network
# ---------------------------------------------------------------------------
def resnet20_forward(x_nchw, packed, *, pool_path, num_classes):
    n, cin, h0, w0 = x_nchw.shape
    # boundary glue: NCHW -> NHWC, zero-pad channels to lane-dense width
    x = jnp.transpose(x_nchw, (0, 2, 3, 1))
    x = jnp.pad(x, ((0, 0), (0, 0), (0, 0), (0, C_PAD - cin)))

    num_layers = packed["w"].shape[0]
    kernel = functools.partial(_resnet_fused_kernel, pool_path=tuple(pool_path))

    out = pl.pallas_call(
        kernel,
        out_shape=jax.ShapeDtypeStruct((n, 1, C_PAD), jnp.float32),
        grid=(n,),
        in_specs=[
            pl.BlockSpec((None, h0, w0, C_PAD), lambda b: (b, 0, 0, 0)),        # x
            pl.BlockSpec((num_layers, 9, C_PAD, C_PAD), lambda b: (0, 0, 0, 0)),  # conv w
            pl.BlockSpec((num_layers, 1, C_PAD), lambda b: (0, 0, 0)),          # bn scale
            pl.BlockSpec((num_layers, 1, C_PAD), lambda b: (0, 0, 0)),          # bn bias
            pl.BlockSpec((C_PAD, C_PAD), lambda b: (0, 0)),                     # fc w
            pl.BlockSpec((1, C_PAD), lambda b: (0, 0)),                         # fc b
        ],
        out_specs=pl.BlockSpec((None, 1, C_PAD), lambda b: (b, 0, 0)),
        scratch_shapes=[
            pltpu.VMEM((h0 + 2, w0 + 2, C_PAD), jnp.float32),   # padded conv slab
            pltpu.VMEM((h0, w0, C_PAD), jnp.float32),           # max-pool staging
        ],
        compiler_params=pltpu.CompilerParams(
            dimension_semantics=("parallel",),
            vmem_limit_bytes=32 * 1024 * 1024,
        ),
    )(x, packed["w"], packed["scale"], packed["bias"], packed["fcw"], packed["fcb"])
    return out[:, 0, :num_classes]


# ---------------------------------------------------------------------------
# Parameter construction (deterministic) and kernel-friendly packing
# ---------------------------------------------------------------------------
def init_params(key, channels, num_classes=10, eps=1e-5):
    layers = []
    in_c = 3
    for out_c in channels:
        key, k_w, k_g, k_b, k_m, k_v = jax.random.split(key, 6)
        w = 0.1 * jax.random.normal(k_w, (out_c, in_c, 3, 3), jnp.float32)
        gamma = 1.0 + 0.1 * jax.random.normal(k_g, (out_c,), jnp.float32)
        beta = 0.1 * jax.random.normal(k_b, (out_c,), jnp.float32)
        running_mean = 0.1 * jax.random.normal(k_m, (out_c,), jnp.float32)
        running_var = jax.random.uniform(k_v, (out_c,), jnp.float32, 0.5, 1.5)
        scale = gamma / jnp.sqrt(running_var + eps)
        bias = beta - running_mean * scale
        layers.append({"w": w, "scale": scale, "bias": bias})
        in_c = out_c
    key, k_fw, k_fb = jax.random.split(key, 3)
    fc_w = 0.1 * jax.random.normal(k_fw, (num_classes, in_c), jnp.float32)
    fc_b = 0.1 * jax.random.normal(k_fb, (num_classes,), jnp.float32)
    return {"layers": layers, "fc_w": fc_w, "fc_b": fc_b}


def pack_params(params, pool_path, spatial_hw):
    """Pack PyTorch-layout params into lane-padded, tap-major kernel arrays."""
    ws, scs, bss = [], [], []
    for layer in params["layers"]:
        w = layer["w"]                                            # (Cout, Cin, 3, 3)
        cout, cin = w.shape[0], w.shape[1]
        wt = jnp.transpose(w, (2, 3, 1, 0)).reshape(9, cin, cout)  # (tap, cin, cout)
        ws.append(jnp.zeros((9, C_PAD, C_PAD), jnp.float32).at[:, :cin, :cout].set(wt))
        scs.append(jnp.zeros((1, C_PAD), jnp.float32).at[0, :cout].set(layer["scale"]))
        bss.append(jnp.zeros((1, C_PAD), jnp.float32).at[0, :cout].set(layer["bias"]))
    w_packed = jnp.stack(ws).astype(jnp.bfloat16)                 # (L, 9, 128, 128)
    scale_packed = jnp.stack(scs)                                 # (L, 1, 128)
    bias_packed = jnp.stack(bss)                                  # (L, 1, 128)

    # final spatial size -> fold 1/(H*W) of the global average pool into fc_w
    h, w = spatial_hw
    for p in pool_path:
        if p:
            h, w = h // 2, w // 2
    inv_hw = 1.0 / float(h * w)

    fc_w, fc_b = params["fc_w"], params["fc_b"]                   # (cls, C_last), (cls,)
    num_classes, c_last = fc_w.shape
    fcw = jnp.zeros((C_PAD, C_PAD), jnp.float32).at[:c_last, :num_classes].set(
        fc_w.T * inv_hw)
    fcb = jnp.zeros((1, C_PAD), jnp.float32).at[0, :num_classes].set(fc_b)
    return {"w": w_packed, "scale": scale_packed, "bias": bias_packed,
            "fcw": fcw, "fcb": fcb}


# ---------------------------------------------------------------------------
# Pure-JAX reference (eval-mode BN), for a correctness self-check
# ---------------------------------------------------------------------------
def resnet20_reference(x_nchw, params, pool_path):
    x = jnp.transpose(x_nchw, (0, 2, 3, 1))
    for layer, do_pool in zip(params["layers"], pool_path):
        if do_pool:
            n, h, w, c = x.shape
            x = x.reshape(n, h // 2, 2, w // 2, 2, c).max(axis=(2, 4))
        w_hwio = jnp.transpose(layer["w"], (2, 3, 1, 0))
        y = lax.conv_general_dilated(
            x, w_hwio, window_strides=(1, 1), padding="SAME",
            dimension_numbers=("NHWC", "HWIO", "NHWC"),
            precision=lax.Precision.HIGHEST)
        x = jnp.maximum(y * layer["scale"] + layer["bias"], 0.0)
    pooled = jnp.mean(x, axis=(1, 2))
    return pooled @ params["fc_w"].T + params["fc_b"]


if __name__ == "__main__":
    key = jax.random.PRNGKey(0)
    k_x, k_p = jax.random.split(key)

    # Small ResNet20-style config: num_layers=3, channels=[8,16,32], CIFAR-sized input.
    channels = [8, 16, 32]
    pool_path = [0, 1, 1]            # model.set_path([0, 1, 1])
    num_classes = 10
    batch, h0 = 2, 32

    x = jax.random.normal(k_x, (batch, 3, h0, h0), jnp.float32)   # NCHW like PyTorch
    params = init_params(k_p, channels, num_classes=num_classes)
    packed = pack_params(params, pool_path, (h0, h0))

    fwd = jax.jit(functools.partial(resnet20_forward,
                                    pool_path=tuple(pool_path),
                                    num_classes=num_classes))
    out = fwd(x, packed)
    jax.block_until_ready(out)

    assert out.shape == (batch, num_classes), out.shape
    assert out.dtype == jnp.float32
    assert bool(jnp.all(jnp.isfinite(out)))

    ref = resnet20_reference(x, params, pool_path)
    assert bool(jnp.allclose(out, ref, rtol=5e-2, atol=5e-2)), \
        float(jnp.max(jnp.abs(out - ref)))

    print("KERNEL_OK")
</pallas_src>

<mosaic_0001>
module attributes {stable_mosaic.version = 11 : i64} {
  func.func @_resnet_fused_kernel(%arg0: i32, %arg1: memref<1x32x32x128xf32, #tpu.memory_space<vmem>>, %arg2: memref<3x9x128x128xbf16, #tpu.memory_space<vmem>>, %arg3: memref<3x1x128xf32, #tpu.memory_space<vmem>>, %arg4: memref<3x1x128xf32, #tpu.memory_space<vmem>>, %arg5: memref<128x128xf32, #tpu.memory_space<vmem>>, %arg6: memref<1x128xf32, #tpu.memory_space<vmem>>, %arg7: memref<1x1x128xf32, #tpu.memory_space<vmem>>, %arg8: memref<34x34x128xf32, #tpu.memory_space<vmem>>, %arg9: memref<32x32x128xf32, #tpu.memory_space<vmem>>) attributes {dimension_semantics = [#tpu.dimension_semantics<parallel>], iteration_bounds = array<i64: 2>, scalar_prefetch = 0 : i64, scratch_operands = 2 : i64, tpu.core_type = #tpu.core_type<tc>, window_params = [{transform_indices = @transform_0, window_bounds = array<i64: 1, 32, 32, 128>}, {pipeline_mode = #tpu.pipeline_mode<synchronous>, transform_indices = @transform_1, window_bounds = array<i64: 3, 9, 128, 128>}, {pipeline_mode = #tpu.pipeline_mode<synchronous>, transform_indices = @transform_2, window_bounds = array<i64: 3, 1, 128>}, {pipeline_mode = #tpu.pipeline_mode<synchronous>, transform_indices = @transform_3, window_bounds = array<i64: 3, 1, 128>}, {pipeline_mode = #tpu.pipeline_mode<synchronous>, transform_indices = @transform_4, window_bounds = array<i64: 128, 128>}, {pipeline_mode = #tpu.pipeline_mode<synchronous>, transform_indices = @transform_5, window_bounds = array<i64: 1, 128>}, {transform_indices = @transform_6, window_bounds = array<i64: 1, 1, 128>}]} {
    %c0 = arith.constant 0 : index
    %c0_0 = arith.constant 0 : index
    %c0_1 = arith.constant 0 : index
    %c0_2 = arith.constant 0 : index
    %0 = vector.load %arg1[%c0, %c0_0, %c0_1, %c0_2] : memref<1x32x32x128xf32, #tpu.memory_space<vmem>>, vector<1x32x32x128xf32>
    %1 = vector.shape_cast %0 : vector<1x32x32x128xf32> to vector<32x32x128xf32>
    %cst = arith.constant 0.000000e+00 : f32
    %2 = vector.broadcast %cst : f32 to vector<34x34x128xf32>
    %c0_3 = arith.constant 0 : index
    %c0_4 = arith.constant 0 : index
    %c0_5 = arith.constant 0 : index
    %3 = vector.load %arg8[%c0_3, %c0_4, %c0_5] : memref<34x34x128xf32, #tpu.memory_space<vmem>>, vector<34x34x128xf32>
    tpu.vector_store %arg8[%c0_3, %c0_4, %c0_5], %2 {strides = array<i32>} : memref<34x34x128xf32, #tpu.memory_space<vmem>>, vector<34x34x128xf32>,
    %c1 = arith.constant 1 : index
    %c1_6 = arith.constant 1 : index
    %c0_7 = arith.constant 0 : index
    %4 = vector.load %arg8[%c1, %c1_6, %c0_7] : memref<34x34x128xf32, #tpu.memory_space<vmem>>, vector<32x32x128xf32>
    tpu.vector_store %arg8[%c1, %c1_6, %c0_7], %1 {strides = array<i32>} : memref<34x34x128xf32, #tpu.memory_space<vmem>>, vector<32x32x128xf32>,
    %cst_8 = arith.constant 0.000000e+00 : f32
    %5 = vector.broadcast %cst_8 : f32 to vector<1024x128xf32>
    %c0_9 = arith.constant 0 : index
    %c0_10 = arith.constant 0 : index
    %c0_11 = arith.constant 0 : index
    %6 = vector.load %arg8[%c0_9, %c0_10, %c0_11] : memref<34x34x128xf32, #tpu.memory_space<vmem>>, vector<32x32x128xf32>
    %7 = vector.shape_cast %6 : vector<32x32x128xf32> to vector<1024x128xf32>
    %8 = arith.truncf %7 : vector<1024x128xf32> to vector<1024x128xbf16>
    %c0_12 = arith.constant 0 : index
    %c0_13 = arith.constant 0 : index
    %c0_14 = arith.constant 0 : index
    %c0_15 = arith.constant 0 : index
    %9 = vector.load %arg2[%c0_12, %c0_13, %c0_14, %c0_15] : memref<3x9x128x128xbf16, #tpu.memory_space<vmem>>, vector<1x1x128x128xbf16>
    %10 = vector.shape_cast %9 : vector<1x1x128x128xbf16> to vector<128x128xbf16>
    %cst_16 = arith.constant dense<0.000000e+00> : vector<1024x128xf32>
    %11 = tpu.matmul %8, %10, %cst_16 {dimension_numbers = #tpu.dot_dimension_numbers<[1], [0], [0], [1], [0, 0, 1, 1], [], []>} : vector<1024x128xbf16>, vector<128x128xbf16>, vector<1024x128xf32> -> vector<1024x128xf32>
    %12 = arith.addf %5, %11 : vector<1024x128xf32>
    %c0_17 = arith.constant 0 : index
    %c1_18 = arith.constant 1 : index
    %c0_19 = arith.constant 0 : index
    %13 = vector.load %arg8[%c0_17, %c1_18, %c0_19] : memref<34x34x128xf32, #tpu.memory_space<vmem>>, vector<32x32x128xf32>
    %14 = vector.shape_cast %13 : vector<32x32x128xf32> to vector<1024x128xf32>
    %15 = arith.truncf %14 : vector<1024x128xf32> to vector<1024x128xbf16>
    %c0_20 = arith.constant 0 : index
    %c1_21 = arith.constant 1 : index
    %c0_22 = arith.constant 0 : index
    %c0_23 = arith.constant 0 : index
    %16 = vector.load %arg2[%c0_20, %c1_21, %c0_22, %c0_23] : memref<3x9x128x128xbf16, #tpu.memory_space<vmem>>, vector<1x1x128x128xbf16>
    %17 = vector.shape_cast %16 : vector<1x1x128x128xbf16> to vector<128x128xbf16>
    %cst_24 = arith.constant dense<0.000000e+00> : vector<1024x128xf32>
    %18 = tpu.matmul %15, %17, %cst_24 {dimension_numbers = #tpu.dot_dimension_numbers<[1], [0], [0], [1], [0, 0, 1, 1], [], []>} : vector<1024x128xbf16>, vector<128x128xbf16>, vector<1024x128xf32> -> vector<1024x128xf32>
    %19 = arith.addf %12, %18 : vector<1024x128xf32>
    %c0_25 = arith.constant 0 : index
    %c2 = arith.constant 2 : index
    %c0_26 = arith.constant 0 : index
    %20 = vector.load %arg8[%c0_25, %c2, %c0_26] : memref<34x34x128xf32, #tpu.memory_space<vmem>>, vector<32x32x128xf32>
    %21 = vector.shape_cast %20 : vector<32x32x128xf32> to vector<1024x128xf32>
    %22 = arith.truncf %21 : vector<1024x128xf32> to vector<1024x128xbf16>
    %c0_27 = arith.constant 0 : index
    %c2_28 = arith.constant 2 : index
    %c0_29 = arith.constant 0 : index
    %c0_30 = arith.constant 0 : index
    %23 = vector.load %arg2[%c0_27, %c2_28, %c0_29, %c0_30] : memref<3x9x128x128xbf16, #tpu.memory_space<vmem>>, vector<1x1x128x128xbf16>
    %24 = vector.shape_cast %23 : vector<1x1x128x128xbf16> to vector<128x128xbf16>
    %cst_31 = arith.constant dense<0.000000e+00> : vector<1024x128xf32>
    %25 = tpu.matmul %22, %24, %cst_31 {dimension_numbers = #tpu.dot_dimension_numbers<[1], [0], [0], [1], [0, 0, 1, 1], [], []>} : vector<1024x128xbf16>, vector<128x128xbf16>, vector<1024x128xf32> -> vector<1024x128xf32>
    %26 = arith.addf %19, %25 : vector<1024x128xf32>
    %c1_32 = arith.constant 1 : index
    %c0_33 = arith.constant 0 : index
    %c0_34 = arith.constant 0 : index
    %27 = vector.load %arg8[%c1_32, %c0_33, %c0_34] : memref<34x34x128xf32, #tpu.memory_space<vmem>>, vector<32x32x128xf32>
    %28 = vector.shape_cast %27 : vector<32x32x128xf32> to vector<1024x128xf32>
    %29 = arith.truncf %28 : vector<1024x128xf32> to vector<1024x128xbf16>
    %c0_35 = arith.constant 0 : index
    %c3 = arith.constant 3 : index
    %c0_36 = arith.constant 0 : index
    %c0_37 = arith.constant 0 : index
    %30 = vector.load %arg2[%c0_35, %c3, %c0_36, %c0_37] : memref<3x9x128x128xbf16, #tpu.memory_space<vmem>>, vector<1x1x128x128xbf16>
    %31 = vector.shape_cast %30 : vector<1x1x128x128xbf16> to vector<128x128xbf16>
    %cst_38 = arith.constant dense<0.000000e+00> : vector<1024x128xf32>
    %32 = tpu.matmul %29, %31, %cst_38 {dimension_numbers = #tpu.dot_dimension_numbers<[1], [0], [0], [1], [0, 0, 1, 1], [], []>} : vector<1024x128xbf16>, vector<128x128xbf16>, vector<1024x128xf32> -> vector<1024x128xf32>
    %33 = arith.addf %26, %32 : vector<1024x128xf32>
    %c1_39 = arith.constant 1 : index
    %c1_40 = arith.constant 1 : index
    %c0_41 = arith.constant 0 : index
    %34 = vector.load %arg8[%c1_39, %c1_40, %c0_41] : memref<34x34x128xf32, #tpu.memory_space<vmem>>, vector<32x32x128xf32>
    %35 = vector.shape_cast %34 : vector<32x32x128xf32> to vector<1024x128xf32>
    %36 = arith.truncf %35 : vector<1024x128xf32> to vector<1024x128xbf16>
    %c0_42 = arith.constant 0 : index
    %c4 = arith.constant 4 : index
    %c0_43 = arith.constant 0 : index
    %c0_44 = arith.constant 0 : index
    %37 = vector.load %arg2[%c0_42, %c4, %c0_43, %c0_44] : memref<3x9x128x128xbf16, #tpu.memory_space<vmem>>, vector<1x1x128x128xbf16>
    %38 = vector.shape_cast %37 : vector<1x1x128x128xbf16> to vector<128x128xbf16>
    %cst_45 = arith.constant dense<0.000000e+00> : vector<1024x128xf32>
    %39 = tpu.matmul %36, %38, %cst_45 {dimension_numbers = #tpu.dot_dimension_numbers<[1], [0], [0], [1], [0, 0, 1, 1], [], []>} : vector<1024x128xbf16>, vector<128x128xbf16>, vector<1024x128xf32> -> vector<1024x128xf32>
    %40 = arith.addf %33, %39 : vector<1024x128xf32>
    %c1_46 = arith.constant 1 : index
    %c2_47 = arith.constant 2 : index
    %c0_48 = arith.constant 0 : index
    %41 = vector.load %arg8[%c1_46, %c2_47, %c0_48] : memref<34x34x128xf32, #tpu.memory_space<vmem>>, vector<32x32x128xf32>
    %42 = vector.shape_cast %41 : vector<32x32x128xf32> to vector<1024x128xf32>
    %43 = arith.truncf %42 : vector<1024x128xf32> to vector<1024x128xbf16>
    %c0_49 = arith.constant 0 : index
    %c5 = arith.constant 5 : index
    %c0_50 = arith.constant 0 : index
    %c0_51 = arith.constant 0 : index
    %44 = vector.load %arg2[%c0_49, %c5, %c0_50, %c0_51] : memref<3x9x128x128xbf16, #tpu.memory_space<vmem>>, vector<1x1x128x128xbf16>
    %45 = vector.shape_cast %44 : vector<1x1x128x128xbf16> to vector<128x128xbf16>
    %cst_52 = arith.constant dense<0.000000e+00> : vector<1024x128xf32>
    %46 = tpu.matmul %43, %45, %cst_52 {dimension_numbers = #tpu.dot_dimension_numbers<[1], [0], [0], [1], [0, 0, 1, 1], [], []>} : vector<1024x128xbf16>, vector<128x128xbf16>, vector<1024x128xf32> -> vector<1024x128xf32>
    %47 = arith.addf %40, %46 : vector<1024x128xf32>
    %c2_53 = arith.constant 2 : index
    %c0_54 = arith.constant 0 : index
    %c0_55 = arith.constant 0 : index
    %48 = vector.load %arg8[%c2_53, %c0_54, %c0_55] : memref<34x34x128xf32, #tpu.memory_space<vmem>>, vector<32x32x128xf32>
    %49 = vector.shape_cast %48 : vector<32x32x128xf32> to vector<1024x128xf32>
    %50 = arith.truncf %49 : vector<1024x128xf32> to vector<1024x128xbf16>
    %c0_56 = arith.constant 0 : index
    %c6 = arith.constant 6 : index
    %c0_57 = arith.constant 0 : index
    %c0_58 = arith.constant 0 : index
    %51 = vector.load %arg2[%c0_56, %c6, %c0_57, %c0_58] : memref<3x9x128x128xbf16, #tpu.memory_space<vmem>>, vector<1x1x128x128xbf16>
    %52 = vector.shape_cast %51 : vector<1x1x128x128xbf16> to vector<128x128xbf16>
    %cst_59 = arith.constant dense<0.000000e+00> : vector<1024x128xf32>
    %53 = tpu.matmul %50, %52, %cst_59 {dimension_numbers = #tpu.dot_dimension_numbers<[1], [0], [0], [1], [0, 0, 1, 1], [], []>} : vector<1024x128xbf16>, vector<128x128xbf16>, vector<1024x128xf32> -> vector<1024x128xf32>
    %54 = arith.addf %47, %53 : vector<1024x128xf32>
    %c2_60 = arith.constant 2 : index
    %c1_61 = arith.constant 1 : index
    %c0_62 = arith.constant 0 : index
    %55 = vector.load %arg8[%c2_60, %c1_61, %c0_62] : memref<34x34x128xf32, #tpu.memory_space<vmem>>, vector<32x32x128xf32>
    %56 = vector.shape_cast %55 : vector<32x32x128xf32> to vector<1024x128xf32>
    %57 = arith.truncf %56 : vector<1024x128xf32> to vector<1024x128xbf16>
    %c0_63 = arith.constant 0 : index
    %c7 = arith.constant 7 : index
    %c0_64 = arith.constant 0 : index
    %c0_65 = arith.constant 0 : index
    %58 = vector.load %arg2[%c0_63, %c7, %c0_64, %c0_65] : memref<3x9x128x128xbf16, #tpu.memory_space<vmem>>, vector<1x1x128x128xbf16>
    %59 = vector.shape_cast %58 : vector<1x1x128x128xbf16> to vector<128x128xbf16>
    %cst_66 = arith.constant dense<0.000000e+00> : vector<1024x128xf32>
    %60 = tpu.matmul %57, %59, %cst_66 {dimension_numbers = #tpu.dot_dimension_numbers<[1], [0], [0], [1], [0, 0, 1, 1], [], []>} : vector<1024x128xbf16>, vector<128x128xbf16>, vector<1024x128xf32> -> vector<1024x128xf32>
    %61 = arith.addf %54, %60 : vector<1024x128xf32>
    %c2_67 = arith.constant 2 : index
    %c2_68 = arith.constant 2 : index
    %c0_69 = arith.constant 0 : index
    %62 = vector.load %arg8[%c2_67, %c2_68, %c0_69] : memref<34x34x128xf32, #tpu.memory_space<vmem>>, vector<32x32x128xf32>
    %63 = vector.shape_cast %62 : vector<32x32x128xf32> to vector<1024x128xf32>
    %64 = arith.truncf %63 : vector<1024x128xf32> to vector<1024x128xbf16>
    %c0_70 = arith.constant 0 : index
    %c8 = arith.constant 8 : index
    %c0_71 = arith.constant 0 : index
    %c0_72 = arith.constant 0 : index
    %65 = vector.load %arg2[%c0_70, %c8, %c0_71, %c0_72] : memref<3x9x128x128xbf16, #tpu.memory_space<vmem>>, vector<1x1x128x128xbf16>
    %66 = vector.shape_cast %65 : vector<1x1x128x128xbf16> to vector<128x128xbf16>
    %cst_73 = arith.constant dense<0.000000e+00> : vector<1024x128xf32>
    %67 = tpu.matmul %64, %66, %cst_73 {dimension_numbers = #tpu.dot_dimension_numbers<[1], [0], [0], [1], [0, 0, 1, 1], [], []>} : vector<1024x128xbf16>, vector<128x128xbf16>, vector<1024x128xf32> -> vector<1024x128xf32>
    %68 = arith.addf %61, %67 : vector<1024x128xf32>
    %c0_74 = arith.constant 0 : index
    %c0_75 = arith.constant 0 : index
    %c0_76 = arith.constant 0 : index
    %69 = vector.load %arg3[%c0_74, %c0_75, %c0_76] : memref<3x1x128xf32, #tpu.memory_space<vmem>>, vector<1x1x128xf32>
    %70 = vector.shape_cast %69 : vector<1x1x128xf32> to vector<1x128xf32>
    %71 = vector.broadcast %70 : vector<1x128xf32> to vector<1024x128xf32>
    %72 = arith.mulf %68, %71 : vector<1024x128xf32>
    %c0_77 = arith.constant 0 : index
    %c0_78 = arith.constant 0 : index
    %c0_79 = arith.constant 0 : index
    %73 = vector.load %arg4[%c0_77, %c0_78, %c0_79] : memref<3x1x128xf32, #tpu.memory_space<vmem>>, vector<1x1x128xf32>
    %74 = vector.shape_cast %73 : vector<1x1x128xf32> to vector<1x128xf32>
    %75 = vector.broadcast %74 : vector<1x128xf32> to vector<1024x128xf32>
    %76 = arith.addf %72, %75 : vector<1024x128xf32>
    %cst_80 = arith.constant 0.000000e+00 : f32
    %77 = vector.broadcast %cst_80 : f32 to vector<1024x128xf32>
    %78 = arith.maximumf %76, %77 : vector<1024x128xf32>
    %79 = vector.shape_cast %78 : vector<1024x128xf32> to vector<32x32x128xf32>
    %80 = vector.shape_cast %79 : vector<32x32x128xf32> to vector<16x2x32x128xf32>
    %81 = vector.extract_strided_slice %80 {offsets = [0, 0, 0, 0], sizes = [16, 1, 32, 128], strides = [1, 1, 1, 1]} : vector<16x2x32x128xf32> to vector<16x1x32x128xf32>
    %82 = vector.shape_cast %81 : vector<16x1x32x128xf32> to vector<16x32x128xf32>
    %83 = vector.extract_strided_slice %80 {offsets = [0, 1, 0, 0], sizes = [16, 1, 32, 128], strides = [1, 1, 1, 1]} : vector<16x2x32x128xf32> to vector<16x1x32x128xf32>
    %84 = vector.shape_cast %83 : vector<16x1x32x128xf32> to vector<16x32x128xf32>
    %85 = arith.maximumf %82, %84 : vector<16x32x128xf32>
    %c0_81 = arith.constant 0 : index
    %c0_82 = arith.constant 0 : index
    %c0_83 = arith.constant 0 : index
    %86 = vector.load %arg9[%c0_81, %c0_82, %c0_83] : memref<32x32x128xf32, #tpu.memory_space<vmem>>, vector<16x32x128xf32>
    tpu.vector_store %arg9[%c0_81, %c0_82, %c0_83], %85 {strides = array<i32>} : memref<32x32x128xf32, #tpu.memory_space<vmem>>, vector<16x32x128xf32>,
    %c0_84 = arith.constant 0 : index
    %c0_85 = arith.constant 0 : index
    %c0_86 = arith.constant 0 : index
    %87 = tpu.strided_load %arg9[%c0_84, %c0_85, %c0_86] {strides = array<i32: 1, 2, 1>} : memref<32x32x128xf32, #tpu.memory_space<vmem>>, vector<16x16x128xf32>
    %c0_87 = arith.constant 0 : index
    %c1_88 = arith.constant 1 : index
    %c0_89 = arith.constant 0 : index
    %88 = tpu.strided_load %arg9[%c0_87, %c1_88, %c0_89] {strides = array<i32: 1, 2, 1>} : memref<32x32x128xf32, #tpu.memory_space<vmem>>, vector<16x16x128xf32>
    %89 = arith.maximumf %87, %88 : vector<16x16x128xf32>
    %cst_90 = arith.constant 0.000000e+00 : f32
    %90 = vector.broadcast %cst_90 : f32 to vector<18x18x128xf32>
    %c0_91 = arith.constant 0 : index
    %c0_92 = arith.constant 0 : index
    %c0_93 = arith.constant 0 : index
    %91 = vector.load %arg8[%c0_91, %c0_92, %c0_93] : memref<34x34x128xf32, #tpu.memory_space<vmem>>, vector<18x18x128xf32>
    tpu.vector_store %arg8[%c0_91, %c0_92, %c0_93], %90 {strides = array<i32>} : memref<34x34x128xf32, #tpu.memory_space<vmem>>, vector<18x18x128xf32>,
    %c1_94 = arith.constant 1 : index
    %c1_95 = arith.constant 1 : index
    %c0_96 = arith.constant 0 : index
    %92 = vector.load %arg8[%c1_94, %c1_95, %c0_96] : memref<34x34x128xf32, #tpu.memory_space<vmem>>, vector<16x16x128xf32>
    tpu.vector_store %arg8[%c1_94, %c1_95, %c0_96], %89 {strides = array<i32>} : memref<34x34x128xf32, #tpu.memory_space<vmem>>, vector<16x16x128xf32>,
    %cst_97 = arith.constant 0.000000e+00 : f32
    %93 = vector.broadcast %cst_97 : f32 to vector<256x128xf32>
    %c0_98 = arith.constant 0 : index
    %c0_99 = arith.constant 0 : index
    %c0_100 = arith.constant 0 : index
    %94 = vector.load %arg8[%c0_98, %c0_99, %c0_100] : memref<34x34x128xf32, #tpu.memory_space<vmem>>, vector<16x16x128xf32>
    %95 = vector.shape_cast %94 : vector<16x16x128xf32> to vector<256x128xf32>
    %96 = arith.truncf %95 : vector<256x128xf32> to vector<256x128xbf16>
    %c1_101 = arith.constant 1 : index
    %c0_102 = arith.constant 0 : index
    %c0_103 = arith.constant 0 : index
    %c0_104 = arith.constant 0 : index
    %97 = vector.load %arg2[%c1_101, %c0_102, %c0_103, %c0_104] : memref<3x9x128x128xbf16, #tpu.memory_space<vmem>>, vector<1x1x128x128xbf16>
    %98 = vector.shape_cast %97 : vector<1x1x128x128xbf16> to vector<128x128xbf16>
    %cst_105 = arith.constant dense<0.000000e+00> : vector<256x128xf32>
    %99 = tpu.matmul %96, %98, %cst_105 {dimension_numbers = #tpu.dot_dimension_numbers<[1], [0], [0], [1], [0, 0, 1, 1], [], []>} : vector<256x128xbf16>, vector<128x128xbf16>, vector<256x128xf32> -> vector<256x128xf32>
    %100 = arith.addf %93, %99 : vector<256x128xf32>
    %c0_106 = arith.constant 0 : index
    %c1_107 = arith.constant 1 : index
    %c0_108 = arith.constant 0 : index
    %101 = vector.load %arg8[%c0_106, %c1_107, %c0_108] : memref<34x34x128xf32, #tpu.memory_space<vmem>>, vector<16x16x128xf32>
    %102 = vector.shape_cast %101 : vector<16x16x128xf32> to vector<256x128xf32>
    %103 = arith.truncf %102 : vector<256x128xf32> to vector<256x128xbf16>
    %c1_109 = arith.constant 1 : index
    %c1_110 = arith.constant 1 : index
    %c0_111 = arith.constant 0 : index
    %c0_112 = arith.constant 0 : index
    %104 = vector.load %arg2[%c1_109, %c1_110, %c0_111, %c0_112] : memref<3x9x128x128xbf16, #tpu.memory_space<vmem>>, vector<1x1x128x128xbf16>
    %105 = vector.shape_cast %104 : vector<1x1x128x128xbf16> to vector<128x128xbf16>
    %cst_113 = arith.constant dense<0.000000e+00> : vector<256x128xf32>
    %106 = tpu.matmul %103, %105, %cst_113 {dimension_numbers = #tpu.dot_dimension_numbers<[1], [0], [0], [1], [0, 0, 1, 1], [], []>} : vector<256x128xbf16>, vector<128x128xbf16>, vector<256x128xf32> -> vector<256x128xf32>
    %107 = arith.addf %100, %106 : vector<256x128xf32>
    %c0_114 = arith.constant 0 : index
    %c2_115 = arith.constant 2 : index
    %c0_116 = arith.constant 0 : index
    %108 = vector.load %arg8[%c0_114, %c2_115, %c0_116] : memref<34x34x128xf32, #tpu.memory_space<vmem>>, vector<16x16x128xf32>
    %109 = vector.shape_cast %108 : vector<16x16x128xf32> to vector<256x128xf32>
    %110 = arith.truncf %109 : vector<256x128xf32> to vector<256x128xbf16>
    %c1_117 = arith.constant 1 : index
    %c2_118 = arith.constant 2 : index
    %c0_119 = arith.constant 0 : index
    %c0_120 = arith.constant 0 : index
    %111 = vector.load %arg2[%c1_117, %c2_118, %c0_119, %c0_120] : memref<3x9x128x128xbf16, #tpu.memory_space<vmem>>, vector<1x1x128x128xbf16>
    %112 = vector.shape_cast %111 : vector<1x1x128x128xbf16> to vector<128x128xbf16>
    %cst_121 = arith.constant dense<0.000000e+00> : vector<256x128xf32>
    %113 = tpu.matmul %110, %112, %cst_121 {dimension_numbers = #tpu.dot_dimension_numbers<[1], [0], [0], [1], [0, 0, 1, 1], [], []>} : vector<256x128xbf16>, vector<128x128xbf16>, vector<256x128xf32> -> vector<256x128xf32>
    %114 = arith.addf %107, %113 : vector<256x128xf32>
    %c1_122 = arith.constant 1 : index
    %c0_123 = arith.constant 0 : index
    %c0_124 = arith.constant 0 : index
    %115 = vector.load %arg8[%c1_122, %c0_123, %c0_124] : memref<34x34x128xf32, #tpu.memory_space<vmem>>, vector<16x16x128xf32>
    %116 = vector.shape_cast %115 : vector<16x16x128xf32> to vector<256x128xf32>
    %117 = arith.truncf %116 : vector<256x128xf32> to vector<256x128xbf16>
    %c1_125 = arith.constant 1 : index
    %c3_126 = arith.constant 3 : index
    %c0_127 = arith.constant 0 : index
    %c0_128 = arith.constant 0 : index
    %118 = vector.load %arg2[%c1_125, %c3_126, %c0_127, %c0_128] : memref<3x9x128x128xbf16, #tpu.memory_space<vmem>>, vector<1x1x128x128xbf16>
    %119 = vector.shape_cast %118 : vector<1x1x128x128xbf16> to vector<128x128xbf16>
    %cst_129 = arith.constant dense<0.000000e+00> : vector<256x128xf32>
    %120 = tpu.matmul %117, %119, %cst_129 {dimension_numbers = #tpu.dot_dimension_numbers<[1], [0], [0], [1], [0, 0, 1, 1], [], []>} : vector<256x128xbf16>, vector<128x128xbf16>, vector<256x128xf32> -> vector<256x128xf32>
    %121 = arith.addf %114, %120 : vector<256x128xf32>
    %c1_130 = arith.constant 1 : index
    %c1_131 = arith.constant 1 : index
    %c0_132 = arith.constant 0 : index
    %122 = vector.load %arg8[%c1_130, %c1_131, %c0_132] : memref<34x34x128xf32, #tpu.memory_space<vmem>>, vector<16x16x128xf32>
    %123 = vector.shape_cast %122 : vector<16x16x128xf32> to vector<256x128xf32>
    %124 = arith.truncf %123 : vector<256x128xf32> to vector<256x128xbf16>
    %c1_133 = arith.constant 1 : index
    %c4_134 = arith.constant 4 : index
    %c0_135 = arith.constant 0 : index
    %c0_136 = arith.constant 0 : index
    %125 = vector.load %arg2[%c1_133, %c4_134, %c0_135, %c0_136] : memref<3x9x128x128xbf16, #tpu.memory_space<vmem>>, vector<1x1x128x128xbf16>
    %126 = vector.shape_cast %125 : vector<1x1x128x128xbf16> to vector<128x128xbf16>
    %cst_137 = arith.constant dense<0.000000e+00> : vector<256x128xf32>
    %127 = tpu.matmul %124, %126, %cst_137 {dimension_numbers = #tpu.dot_dimension_numbers<[1], [0], [0], [1], [0, 0, 1, 1], [], []>} : vector<256x128xbf16>, vector<128x128xbf16>, vector<256x128xf32> -> vector<256x128xf32>
    %128 = arith.addf %121, %127 : vector<256x128xf32>
    %c1_138 = arith.constant 1 : index
    %c2_139 = arith.constant 2 : index
    %c0_140 = arith.constant 0 : index
    %129 = vector.load %arg8[%c1_138, %c2_139, %c0_140] : memref<34x34x128xf32, #tpu.memory_space<vmem>>, vector<16x16x128xf32>
    %130 = vector.shape_cast %129 : vector<16x16x128xf32> to vector<256x128xf32>
    %131 = arith.truncf %130 : vector<256x128xf32> to vector<256x128xbf16>
    %c1_141 = arith.constant 1 : index
    %c5_142 = arith.constant 5 : index
    %c0_143 = arith.constant 0 : index
    %c0_144 = arith.constant 0 : index
    %132 = vector.load %arg2[%c1_141, %c5_142, %c0_143, %c0_144] : memref<3x9x128x128xbf16, #tpu.memory_space<vmem>>, vector<1x1x128x128xbf16>
    %133 = vector.shape_cast %132 : vector<1x1x128x128xbf16> to vector<128x128xbf16>
    %cst_145 = arith.constant dense<0.000000e+00> : vector<256x128xf32>
    %134 = tpu.matmul %131, %133, %cst_145 {dimension_numbers = #tpu.dot_dimension_numbers<[1], [0], [0], [1], [0, 0, 1, 1], [], []>} : vector<256x128xbf16>, vector<128x128xbf16>, vector<256x128xf32> -> vector<256x128xf32>
    %135 = arith.addf %128, %134 : vector<256x128xf32>
    %c2_146 = arith.constant 2 : index
    %c0_147 = arith.constant 0 : index
    %c0_148 = arith.constant 0 : index
    %136 = vector.load %arg8[%c2_146, %c0_147, %c0_148] : memref<34x34x128xf32, #tpu.memory_space<vmem>>, vector<16x16x128xf32>
    %137 = vector.shape_cast %136 : vector<16x16x128xf32> to vector<256x128xf32>
    %138 = arith.truncf %137 : vector<256x128xf32> to vector<256x128xbf16>
    %c1_149 = arith.constant 1 : index
    %c6_150 = arith.constant 6 : index
    %c0_151 = arith.constant 0 : index
    %c0_152 = arith.constant 0 : index
    %139 = vector.load %arg2[%c1_149, %c6_150, %c0_151, %c0_152] : memref<3x9x128x128xbf16, #tpu.memory_space<vmem>>, vector<1x1x128x128xbf16>
    %140 = vector.shape_cast %139 : vector<1x1x128x128xbf16> to vector<128x128xbf16>
    %cst_153 = arith.constant dense<0.000000e+00> : vector<256x128xf32>
    %141 = tpu.matmul %138, %140, %cst_153 {dimension_numbers = #tpu.dot_dimension_numbers<[1], [0], [0], [1], [0, 0, 1, 1], [], []>} : vector<256x128xbf16>, vector<128x128xbf16>, vector<256x128xf32> -> vector<256x128xf32>
    %142 = arith.addf %135, %141 : vector<256x128xf32>
    %c2_154 = arith.constant 2 : index
    %c1_155 = arith.constant 1 : index
    %c0_156 = arith.constant 0 : index
    %143 = vector.load %arg8[%c2_154, %c1_155, %c0_156] : memref<34x34x128xf32, #tpu.memory_space<vmem>>, vector<16x16x128xf32>
    %144 = vector.shape_cast %143 : vector<16x16x128xf32> to vector<256x128xf32>
    %145 = arith.truncf %144 : vector<256x128xf32> to vector<256x128xbf16>
    %c1_157 = arith.constant 1 : index
    %c7_158 = arith.constant 7 : index
    %c0_159 = arith.constant 0 : index
    %c0_160 = arith.constant 0 : index
    %146 = vector.load %arg2[%c1_157, %c7_158, %c0_159, %c0_160] : memref<3x9x128x128xbf16, #tpu.memory_space<vmem>>, vector<1x1x128x128xbf16>
    %147 = vector.shape_cast %146 : vector<1x1x128x128xbf16> to vector<128x128xbf16>
    %cst_161 = arith.constant dense<0.000000e+00> : vector<256x128xf32>
    %148 = tpu.matmul %145, %147, %cst_161 {dimension_numbers = #tpu.dot_dimension_numbers<[1], [0], [0], [1], [0, 0, 1, 1], [], []>} : vector<256x128xbf16>, vector<128x128xbf16>, vector<256x128xf32> -> vector<256x128xf32>
    %149 = arith.addf %142, %148 : vector<256x128xf32>
    %c2_162 = arith.constant 2 : index
    %c2_163 = arith.constant 2 : index
    %c0_164 = arith.constant 0 : index
    %150 = vector.load %arg8[%c2_162, %c2_163, %c0_164] : memref<34x34x128xf32, #tpu.memory_space<vmem>>, vector<16x16x128xf32>
    %151 = vector.shape_cast %150 : vector<16x16x128xf32> to vector<256x128xf32>
    %152 = arith.truncf %151 : vector<256x128xf32> to vector<256x128xbf16>
    %c1_165 = arith.constant 1 : index
    %c8_166 = arith.constant 8 : index
    %c0_167 = arith.constant 0 : index
    %c0_168 = arith.constant 0 : index
    %153 = vector.load %arg2[%c1_165, %c8_166, %c0_167, %c0_168] : memref<3x9x128x128xbf16, #tpu.memory_space<vmem>>, vector<1x1x128x128xbf16>
    %154 = vector.shape_cast %153 : vector<1x1x128x128xbf16> to vector<128x128xbf16>
    %cst_169 = arith.constant dense<0.000000e+00> : vector<256x128xf32>
    %155 = tpu.matmul %152, %154, %cst_169 {dimension_numbers = #tpu.dot_dimension_numbers<[1], [0], [0], [1], [0, 0, 1, 1], [], []>} : vector<256x128xbf16>, vector<128x128xbf16>, vector<256x128xf32> -> vector<256x128xf32>
    %156 = arith.addf %149, %155 : vector<256x128xf32>
    %c1_170 = arith.constant 1 : index
    %c0_171 = arith.constant 0 : index
    %c0_172 = arith.constant 0 : index
    %157 = vector.load %arg3[%c1_170, %c0_171, %c0_172] : memref<3x1x128xf32, #tpu.memory_space<vmem>>, vector<1x1x128xf32>
    %158 = vector.shape_cast %157 : vector<1x1x128xf32> to vector<1x128xf32>
    %159 = vector.broadcast %158 : vector<1x128xf32> to vector<256x128xf32>
    %160 = arith.mulf %156, %159 : vector<256x128xf32>
    %c1_173 = arith.constant 1 : index
    %c0_174 = arith.constant 0 : index
    %c0_175 = arith.constant 0 : index
    %161 = vector.load %arg4[%c1_173, %c0_174, %c0_175] : memref<3x1x128xf32, #tpu.memory_space<vmem>>, vector<1x1x128xf32>
    %162 = vector.shape_cast %161 : vector<1x1x128xf32> to vector<1x128xf32>
    %163 = vector.broadcast %162 : vector<1x128xf32> to vector<256x128xf32>
    %164 = arith.addf %160, %163 : vector<256x128xf32>
    %cst_176 = arith.constant 0.000000e+00 : f32
    %165 = vector.broadcast %cst_176 : f32 to vector<256x128xf32>
    %166 = arith.maximumf %164, %165 : vector<256x128xf32>
    %167 = vector.shape_cast %166 : vector<256x128xf32> to vector<16x16x128xf32>
    %168 = vector.shape_cast %167 : vector<16x16x128xf32> to vector<8x2x16x128xf32>
    %169 = vector.extract_strided_slice %168 {offsets = [0, 0, 0, 0], sizes = [8, 1, 16, 128], strides = [1, 1, 1, 1]} : vector<8x2x16x128xf32> to vector<8x1x16x128xf32>
    %170 = vector.shape_cast %169 : vector<8x1x16x128xf32> to vector<8x16x128xf32>
    %171 = vector.extract_strided_slice %168 {offsets = [0, 1, 0, 0], sizes = [8, 1, 16, 128], strides = [1, 1, 1, 1]} : vector<8x2x16x128xf32> to vector<8x1x16x128xf32>
    %172 = vector.shape_cast %171 : vector<8x1x16x128xf32> to vector<8x16x128xf32>
    %173 = arith.maximumf %170, %172 : vector<8x16x128xf32>
    %c0_177 = arith.constant 0 : index
    %c0_178 = arith.constant 0 : index
    %c0_179 = arith.constant 0 : index
    %174 = vector.load %arg9[%c0_177, %c0_178, %c0_179] : memref<32x32x128xf32, #tpu.memory_space<vmem>>, vector<8x16x128xf32>
    tpu.vector_store %arg9[%c0_177, %c0_178, %c0_179], %173 {strides = array<i32>} : memref<32x32x128xf32, #tpu.memory_space<vmem>>, vector<8x16x128xf32>,
    %c0_180 = arith.constant 0 : index
    %c0_181 = arith.constant 0 : index
    %c0_182 = arith.constant 0 : index
    %175 = tpu.strided_load %arg9[%c0_180, %c0_181, %c0_182] {strides = array<i32: 1, 2, 1>} : memref<32x32x128xf32, #tpu.memory_space<vmem>>, vector<8x8x128xf32>
    %c0_183 = arith.constant 0 : index
    %c1_184 = arith.constant 1 : index
    %c0_185 = arith.constant 0 : index
    %176 = tpu.strided_load %arg9[%c0_183, %c1_184, %c0_185] {strides = array<i32: 1, 2, 1>} : memref<32x32x128xf32, #tpu.memory_space<vmem>>, vector<8x8x128xf32>
    %177 = arith.maximumf %175, %176 : vector<8x8x128xf32>
    %cst_186 = arith.constant 0.000000e+00 : f32
    %178 = vector.broadcast %cst_186 : f32 to vector<10x10x128xf32>
    %c0_187 = arith.constant 0 : index
    %c0_188 = arith.constant 0 : index
    %c0_189 = arith.constant 0 : index
    %179 = vector.load %arg8[%c0_187, %c0_188, %c0_189] : memref<34x34x128xf32, #tpu.memory_space<vmem>>, vector<10x10x128xf32>
    tpu.vector_store %arg8[%c0_187, %c0_188, %c0_189], %178 {strides = array<i32>} : memref<34x34x128xf32, #tpu.memory_space<vmem>>, vector<10x10x128xf32>,
    %c1_190 = arith.constant 1 : index
    %c1_191 = arith.constant 1 : index
    %c0_192 = arith.constant 0 : index
    %180 = vector.load %arg8[%c1_190, %c1_191, %c0_192] : memref<34x34x128xf32, #tpu.memory_space<vmem>>, vector<8x8x128xf32>
    tpu.vector_store %arg8[%c1_190, %c1_191, %c0_192], %177 {strides = array<i32>} : memref<34x34x128xf32, #tpu.memory_space<vmem>>, vector<8x8x128xf32>,
    %cst_193 = arith.constant 0.000000e+00 : f32
    %181 = vector.broadcast %cst_193 : f32 to vector<64x128xf32>
    %c0_194 = arith.constant 0 : index
    %c0_195 = arith.constant 0 : index
    %c0_196 = arith.constant 0 : index
    %182 = vector.load %arg8[%c0_194, %c0_195, %c0_196] : memref<34x34x128xf32, #tpu.memory_space<vmem>>, vector<8x8x128xf32>
    %183 = vector.shape_cast %182 : vector<8x8x128xf32> to vector<64x128xf32>
    %184 = arith.truncf %183 : vector<64x128xf32> to vector<64x128xbf16>
    %c2_197 = arith.constant 2 : index
    %c0_198 = arith.constant 0 : index
    %c0_199 = arith.constant 0 : index
    %c0_200 = arith.constant 0 : index
    %185 = vector.load %arg2[%c2_197, %c0_198, %c0_199, %c0_200] : memref<3x9x128x128xbf16, #tpu.memory_space<vmem>>, vector<1x1x128x128xbf16>
    %186 = vector.shape_cast %185 : vector<1x1x128x128xbf16> to vector<128x128xbf16>
    %cst_201 = arith.constant dense<0.000000e+00> : vector<64x128xf32>
    %187 = tpu.matmul %184, %186, %cst_201 {dimension_numbers = #tpu.dot_dimension_numbers<[1], [0], [0], [1], [0, 0, 1, 1], [], []>} : vector<64x128xbf16>, vector<128x128xbf16>, vector<64x128xf32> -> vector<64x128xf32>
    %188 = arith.addf %181, %187 : vector<64x128xf32>
    %c0_202 = arith.constant 0 : index
    %c1_203 = arith.constant 1 : index
    %c0_204 = arith.constant 0 : index
    %189 = vector.load %arg8[%c0_202, %c1_203, %c0_204] : memref<34x34x128xf32, #tpu.memory_space<vmem>>, vector<8x8x128xf32>
    %190 = vector.shape_cast %189 : vector<8x8x128xf32> to vector<64x128xf32>
    %191 = arith.truncf %190 : vector<64x128xf32> to vector<64x128xbf16>
    %c2_205 = arith.constant 2 : index
    %c1_206 = arith.constant 1 : index
    %c0_207 = arith.constant 0 : index
    %c0_208 = arith.constant 0 : index
    %192 = vector.load %arg2[%c2_205, %c1_206, %c0_207, %c0_208] : memref<3x9x128x128xbf16, #tpu.memory_space<vmem>>, vector<1x1x128x128xbf16>
    %193 = vector.shape_cast %192 : vector<1x1x128x128xbf16> to vector<128x128xbf16>
    %cst_209 = arith.constant dense<0.000000e+00> : vector<64x128xf32>
    %194 = tpu.matmul %191, %193, %cst_209 {dimension_numbers = #tpu.dot_dimension_numbers<[1], [0], [0], [1], [0, 0, 1, 1], [], []>} : vector<64x128xbf16>, vector<128x128xbf16>, vector<64x128xf32> -> vector<64x128xf32>
    %195 = arith.addf %188, %194 : vector<64x128xf32>
    %c0_210 = arith.constant 0 : index
    %c2_211 = arith.constant 2 : index
    %c0_212 = arith.constant 0 : index
    %196 = vector.load %arg8[%c0_210, %c2_211, %c0_212] : memref<34x34x128xf32, #tpu.memory_space<vmem>>, vector<8x8x128xf32>
    %197 = vector.shape_cast %196 : vector<8x8x128xf32> to vector<64x128xf32>
    %198 = arith.truncf %197 : vector<64x128xf32> to vector<64x128xbf16>
    %c2_213 = arith.constant 2 : index
    %c2_214 = arith.constant 2 : index
    %c0_215 = arith.constant 0 : index
    %c0_216 = arith.constant 0 : index
    %199 = vector.load %arg2[%c2_213, %c2_214, %c0_215, %c0_216] : memref<3x9x128x128xbf16, #tpu.memory_space<vmem>>, vector<1x1x128x128xbf16>
    %200 = vector.shape_cast %199 : vector<1x1x128x128xbf16> to vector<128x128xbf16>
    %cst_217 = arith.constant dense<0.000000e+00> : vector<64x128xf32>
    %201 = tpu.matmul %198, %200, %cst_217 {dimension_numbers = #tpu.dot_dimension_numbers<[1], [0], [0], [1], [0, 0, 1, 1], [], []>} : vector<64x128xbf16>, vector<128x128xbf16>, vector<64x128xf32> -> vector<64x128xf32>
    %202 = arith.addf %195, %201 : vector<64x128xf32>
    %c1_218 = arith.constant 1 : index
    %c0_219 = arith.constant 0 : index
    %c0_220 = arith.constant 0 : index
    %203 = vector.load %arg8[%c1_218, %c0_219, %c0_220] : memref<34x34x128xf32, #tpu.memory_space<vmem>>, vector<8x8x128xf32>
    %204 = vector.shape_cast %203 : vector<8x8x128xf32> to vector<64x128xf32>
    %205 = arith.truncf %204 : vector<64x128xf32> to vector<64x128xbf16>
    %c2_221 = arith.constant 2 : index
    %c3_222 = arith.constant 3 : index
    %c0_223 = arith.constant 0 : index
    %c0_224 = arith.constant 0 : index
    %206 = vector.load %arg2[%c2_221, %c3_222, %c0_223, %c0_224] : memref<3x9x128x128xbf16, #tpu.memory_space<vmem>>, vector<1x1x128x128xbf16>
    %207 = vector.shape_cast %206 : vector<1x1x128x128xbf16> to vector<128x128xbf16>
    %cst_225 = arith.constant dense<0.000000e+00> : vector<64x128xf32>
    %208 = tpu.matmul %205, %207, %cst_225 {dimension_numbers = #tpu.dot_dimension_numbers<[1], [0], [0], [1], [0, 0, 1, 1], [], []>} : vector<64x128xbf16>, vector<128x128xbf16>, vector<64x128xf32> -> vector<64x128xf32>
    %209 = arith.addf %202, %208 : vector<64x128xf32>
    %c1_226 = arith.constant 1 : index
    %c1_227 = arith.constant 1 : index
    %c0_228 = arith.constant 0 : index
    %210 = vector.load %arg8[%c1_226, %c1_227, %c0_228] : memref<34x34x128xf32, #tpu.memory_space<vmem>>, vector<8x8x128xf32>
    %211 = vector.shape_cast %210 : vector<8x8x128xf32> to vector<64x128xf32>
    %212 = arith.truncf %211 : vector<64x128xf32> to vector<64x128xbf16>
    %c2_229 = arith.constant 2 : index
    %c4_230 = arith.constant 4 : index
    %c0_231 = arith.constant 0 : index
    %c0_232 = arith.constant 0 : index
    %213 = vector.load %arg2[%c2_229, %c4_230, %c0_231, %c0_232] : memref<3x9x128x128xbf16, #tpu.memory_space<vmem>>, vector<1x1x128x128xbf16>
    %214 = vector.shape_cast %213 : vector<1x1x128x128xbf16> to vector<128x128xbf16>
    %cst_233 = arith.constant dense<0.000000e+00> : vector<64x128xf32>
    %215 = tpu.matmul %212, %214, %cst_233 {dimension_numbers = #tpu.dot_dimension_numbers<[1], [0], [0], [1], [0, 0, 1, 1], [], []>} : vector<64x128xbf16>, vector<128x128xbf16>, vector<64x128xf32> -> vector<64x128xf32>
    %216 = arith.addf %209, %215 : vector<64x128xf32>
    %c1_234 = arith.constant 1 : index
    %c2_235 = arith.constant 2 : index
    %c0_236 = arith.constant 0 : index
    %217 = vector.load %arg8[%c1_234, %c2_235, %c0_236] : memref<34x34x128xf32, #tpu.memory_space<vmem>>, vector<8x8x128xf32>
    %218 = vector.shape_cast %217 : vector<8x8x128xf32> to vector<64x128xf32>
    %219 = arith.truncf %218 : vector<64x128xf32> to vector<64x128xbf16>
    %c2_237 = arith.constant 2 : index
    %c5_238 = arith.constant 5 : index
    %c0_239 = arith.constant 0 : index
    %c0_240 = arith.constant 0 : index
    %220 = vector.load %arg2[%c2_237, %c5_238, %c0_239, %c0_240] : memref<3x9x128x128xbf16, #tpu.memory_space<vmem>>, vector<1x1x128x128xbf16>
    %221 = vector.shape_cast %220 : vector<1x1x128x128xbf16> to vector<128x128xbf16>
    %cst_241 = arith.constant dense<0.000000e+00> : vector<64x128xf32>
    %222 = tpu.matmul %219, %221, %cst_241 {dimension_numbers = #tpu.dot_dimension_numbers<[1], [0], [0], [1], [0, 0, 1, 1], [], []>} : vector<64x128xbf16>, vector<128x128xbf16>, vector<64x128xf32> -> vector<64x128xf32>
    %223 = arith.addf %216, %222 : vector<64x128xf32>
    %c2_242 = arith.constant 2 : index
    %c0_243 = arith.constant 0 : index
    %c0_244 = arith.constant 0 : index
    %224 = vector.load %arg8[%c2_242, %c0_243, %c0_244] : memref<34x34x128xf32, #tpu.memory_space<vmem>>, vector<8x8x128xf32>
    %225 = vector.shape_cast %224 : vector<8x8x128xf32> to vector<64x128xf32>
    %226 = arith.truncf %225 : vector<64x128xf32> to vector<64x128xbf16>
    %c2_245 = arith.constant 2 : index
    %c6_246 = arith.constant 6 : index
    %c0_247 = arith.constant 0 : index
    %c0_248 = arith.constant 0 : index
    %227 = vector.load %arg2[%c2_245, %c6_246, %c0_247, %c0_248] : memref<3x9x128x128xbf16, #tpu.memory_space<vmem>>, vector<1x1x128x128xbf16>
    %228 = vector.shape_cast %227 : vector<1x1x128x128xbf16> to vector<128x128xbf16>
    %cst_249 = arith.constant dense<0.000000e+00> : vector<64x128xf32>
    %229 = tpu.matmul %226, %228, %cst_249 {dimension_numbers = #tpu.dot_dimension_numbers<[1], [0], [0], [1], [0, 0, 1, 1], [], []>} : vector<64x128xbf16>, vector<128x128xbf16>, vector<64x128xf32> -> vector<64x128xf32>
    %230 = arith.addf %223, %229 : vector<64x128xf32>
    %c2_250 = arith.constant 2 : index
    %c1_251 = arith.constant 1 : index
    %c0_252 = arith.constant 0 : index
    %231 = vector.load %arg8[%c2_250, %c1_251, %c0_252] : memref<34x34x128xf32, #tpu.memory_space<vmem>>, vector<8x8x128xf32>
    %232 = vector.shape_cast %231 : vector<8x8x128xf32> to vector<64x128xf32>
    %233 = arith.truncf %232 : vector<64x128xf32> to vector<64x128xbf16>
    %c2_253 = arith.constant 2 : index
    %c7_254 = arith.constant 7 : index
    %c0_255 = arith.constant 0 : index
    %c0_256 = arith.constant 0 : index
    %234 = vector.load %arg2[%c2_253, %c7_254, %c0_255, %c0_256] : memref<3x9x128x128xbf16, #tpu.memory_space<vmem>>, vector<1x1x128x128xbf16>
    %235 = vector.shape_cast %234 : vector<1x1x128x128xbf16> to vector<128x128xbf16>
    %cst_257 = arith.constant dense<0.000000e+00> : vector<64x128xf32>
    %236 = tpu.matmul %233, %235, %cst_257 {dimension_numbers = #tpu.dot_dimension_numbers<[1], [0], [0], [1], [0, 0, 1, 1], [], []>} : vector<64x128xbf16>, vector<128x128xbf16>, vector<64x128xf32> -> vector<64x128xf32>
    %237 = arith.addf %230, %236 : vector<64x128xf32>
    %c2_258 = arith.constant 2 : index
    %c2_259 = arith.constant 2 : index
    %c0_260 = arith.constant 0 : index
    %238 = vector.load %arg8[%c2_258, %c2_259, %c0_260] : memref<34x34x128xf32, #tpu.memory_space<vmem>>, vector<8x8x128xf32>
    %239 = vector.shape_cast %238 : vector<8x8x128xf32> to vector<64x128xf32>
    %240 = arith.truncf %239 : vector<64x128xf32> to vector<64x128xbf16>
    %c2_261 = arith.constant 2 : index
    %c8_262 = arith.constant 8 : index
    %c0_263 = arith.constant 0 : index
    %c0_264 = arith.constant 0 : index
    %241 = vector.load %arg2[%c2_261, %c8_262, %c0_263, %c0_264] : memref<3x9x128x128xbf16, #tpu.memory_space<vmem>>, vector<1x1x128x128xbf16>
    %242 = vector.shape_cast %241 : vector<1x1x128x128xbf16> to vector<128x128xbf16>
    %cst_265 = arith.constant dense<0.000000e+00> : vector<64x128xf32>
    %243 = tpu.matmul %240, %242, %cst_265 {dimension_numbers = #tpu.dot_dimension_numbers<[1], [0], [0], [1], [0, 0, 1, 1], [], []>} : vector<64x128xbf16>, vector<128x128xbf16>, vector<64x128xf32> -> vector<64x128xf32>
    %244 = arith.addf %237, %243 : vector<64x128xf32>
    %c2_266 = arith.constant 2 : index
    %c0_267 = arith.constant 0 : index
    %c0_268 = arith.constant 0 : index
    %245 = vector.load %arg3[%c2_266, %c0_267, %c0_268] : memref<3x1x128xf32, #tpu.memory_space<vmem>>, vector<1x1x128xf32>
    %246 = vector.shape_cast %245 : vector<1x1x128xf32> to vector<1x128xf32>
    %247 = vector.broadcast %246 : vector<1x128xf32> to vector<64x128xf32>
    %248 = arith.mulf %244, %247 : vector<64x128xf32>
    %c2_269 = arith.constant 2 : index
    %c0_270 = arith.constant 0 : index
    %c0_271 = arith.constant 0 : index
    %249 = vector.load %arg4[%c2_269, %c0_270, %c0_271] : memref<3x1x128xf32, #tpu.memory_space<vmem>>, vector<1x1x128xf32>
    %250 = vector.shape_cast %249 : vector<1x1x128xf32> to vector<1x128xf32>
    %251 = vector.broadcast %250 : vector<1x128xf32> to vector<64x128xf32>
    %252 = arith.addf %248, %251 : vector<64x128xf32>
    %cst_272 = arith.constant 0.000000e+00 : f32
    %253 = vector.broadcast %cst_272 : f32 to vector<64x128xf32>
    %254 = arith.maximumf %252, %253 : vector<64x128xf32>
    %255 = vector.shape_cast %254 : vector<64x128xf32> to vector<8x8x128xf32>
    %256 = vector.shape_cast %255 : vector<8x8x128xf32> to vector<64x128xf32>
    %cst_273 = arith.constant dense<0.000000e+00> : vector<128xf32>
    %257 = vector.multi_reduction <add>, %256, %cst_273 [0] : vector<64x128xf32> to vector<128xf32>
    %258 = vector.shape_cast %257 : vector<128xf32> to vector<1x128xf32>
    %c0_274 = arith.constant 0 : index
    %c0_275 = arith.constant 0 : index
    %259 = vector.load %arg5[%c0_274, %c0_275] : memref<128x128xf32, #tpu.memory_space<vmem>>, vector<128x128xf32>
    %cst_276 = arith.constant dense<0.000000e+00> : vector<1x128xf32>
    %260 = tpu.matmul %258, %259, %cst_276 {dimension_numbers = #tpu.dot_dimension_numbers<[1], [0], [0], [1], [0, 0, 1, 1], [], []>} : vector<1x128xf32>, vector<128x128xf32>, vector<1x128xf32> -> vector<1x128xf32>
    %c0_277 = arith.constant 0 : index
    %c0_278 = arith.constant 0 : index
    %261 = vector.load %arg6[%c0_277, %c0_278] : memref<1x128xf32, #tpu.memory_space<vmem>>, vector<1x128xf32>
    %262 = arith.addf %260, %261 : vector<1x128xf32>
    %c0_279 = arith.constant 0 : index
    %c0_280 = arith.constant 0 : index
    %c0_281 = arith.constant 0 : index
    %263 = vector.load %arg7[%c0_279, %c0_280, %c0_281] : memref<1x1x128xf32, #tpu.memory_space<vmem>>, vector<1x1x128xf32>
    %264 = vector.shape_cast %263 : vector<1x1x128xf32> to vector<1x128xf32>
    %265 = vector.shape_cast %262 : vector<1x128xf32> to vector<1x1x128xf32>
    tpu.vector_store %arg7[%c0_279, %c0_280, %c0_281], %265 {strides = array<i32>} : memref<1x1x128xf32, #tpu.memory_space<vmem>>, vector<1x1x128xf32>,
    return
  }
  func.func @transform_0(%arg0: i32) -> (i32, i32, i32, i32) {
    %c0_i32 = arith.constant 0 : i32
    %c0_i32_0 = arith.constant 0 : i32
    %c0_i32_1 = arith.constant 0 : i32
    %c0_i32_2 = arith.constant 0 : i32
    return %arg0, %c0_i32, %c0_i32_0, %c0_i32_1 : i32, i32, i32, i32
  }
  func.func @transform_1(%arg0: i32) -> (i32, i32, i32, i32) {
    %c0_i32 = arith.constant 0 : i32
    %c0_i32_0 = arith.constant 0 : i32
    %c0_i32_1 = arith.constant 0 : i32
    %c0_i32_2 = arith.constant 0 : i32
    %c0_i32_3 = arith.constant 0 : i32
    return %c0_i32, %c0_i32_0, %c0_i32_1, %c0_i32_2 : i32, i32, i32, i32
  }
  func.func @transform_2(%arg0: i32) -> (i32, i32, i32) {
    %c0_i32 = arith.constant 0 : i32
    %c0_i32_0 = arith.constant 0 : i32
    %c0_i32_1 = arith.constant 0 : i32
    %c0_i32_2 = arith.constant 0 : i32
    return %c0_i32, %c0_i32_0, %c0_i32_1 : i32, i32, i32
  }
  func.func @transform_3(%arg0: i32) -> (i32, i32, i32) {
    %c0_i32 = arith.constant 0 : i32
    %c0_i32_0 = arith.constant 0 : i32
    %c0_i32_1 = arith.constant 0 : i32
    %c0_i32_2 = arith.constant 0 : i32
    return %c0_i32, %c0_i32_0, %c0_i32_1 : i32, i32, i32
  }
  func.func @transform_4(%arg0: i32) -> (i32, i32) {
    %c0_i32 = arith.constant 0 : i32
    %c0_i32_0 = arith.constant 0 : i32
    %c0_i32_1 = arith.constant 0 : i32
    return %c0_i32, %c0_i32_0 : i32, i32
  }
  func.func @transform_5(%arg0: i32) -> (i32, i32) {
    %c0_i32 = arith.constant 0 : i32
    %c0_i32_0 = arith.constant 0 : i32
    %c0_i32_1 = arith.constant 0 : i32
    return %c0_i32, %c0_i32_0 : i32, i32
  }
  func.func @transform_6(%arg0: i32) -> (i32, i32, i32) {
    %c0_i32 = arith.constant 0 : i32
    %c0_i32_0 = arith.constant 0 : i32
    %c0_i32_1 = arith.constant 0 : i32
    return %arg0, %c0_i32, %c0_i32_0 : i32, i32, i32
  }
}

</mosaic_0001>

<bundles_post_ra>
// kernel: resnet20_forward.1
= control target key start
LH: loop header
LB: loop body
LE: loop exit
PB: predicated region body
PF: predicated region fallthrough
CT: control target
= control target key end

     0   :  { %11 = vsyncpa [#allocation5], 0  ;;  %s22320_s0 = inlined_call_operand.vmem [shape: f32[2,32,32,128], index: 0, kind: input, shape index: {}]   ;;  %s22321_s1 = inlined_call_operand.vmem [shape: bf16[3,9,128,128], index: 1, kind: input, shape index: {}]   ;;  %s22322_s2 = inlined_call_operand.vmem [shape: f32[3,1,128], index: 2, kind: input, shape index: {}]   ;;  %s22323_s3 = inlined_call_operand.vmem [shape: f32[3,1,128], index: 3, kind: input, shape index: {}]   ;;  %s22324_s4 = inlined_call_operand.vmem [shape: f32[128,128], index: 4, kind: input, shape index: {}]   ;;  %s22325_s5 = inlined_call_operand.vmem [shape: f32[1,128], index: 5, kind: input, shape index: {}]   ;;  %s22326_s6 = inlined_call_operand.hbm [shape: f32[2,1,128], index: 6, kind: output, shape index: {}]  }
   0x1   :  { %13 = vsyncpa [#allocation5 + $0x1], 0  ;;  %s19476_s21 = smov 0   ;;  %s19478_s22 = smov 0  }
   0x2   :  { %s19480_s23 = smov 0   ;;  %s19482_s24 = smov 0  }
   0x3 LB: > { %s19497_s25 = sadd.s32 4294967295, %s19435_s24   ;;  %s13991_s26 = sadd.s32 4294967294, %s19435_s24   ;;  %s19435_s24 = sphi %s19482_s24, %s22641_s24   ;;  %s19431_s23 = sphi %s19480_s23, %s22640_s23   ;;  %s19427_s22 = sphi %s19478_s22, %s22639_s22   ;;  %s19423_s21 = sphi %s19476_s21, %s22638_s21  }
   0x4   : > { %s19501_s27 = sadd.s32 1, %s19435_s24   ;;  %s157_s28 = sadd.s32 1, %s19431_s23 }
   0x5   : > { %s154_s29 = ssub.s32 %s19435_s24, %s19501_s27  ;;  %p167_p0 = scmp.ne.s32.totalorder %s19431_s23, %s19427_s22 }
   0x6   : > { %p155_p1 = scmp.eq.s32.totalorder %s154_s29, 0  ;;  %p168_p2 = scmp.eq.s32.totalorder %s19497_s25, 1 }
   0x7   : > { %p173_p3 = scmp.ne.s32.totalorder %s19427_s22, %s19423_s21  ;;  %p174_p4 = scmp.eq.s32.totalorder %s13991_s26, 1 }
   0x8   : > { %s19512_s30 = scalar_select %p155_p1, %s19431_s23, %s157_s28  }
   0x9   : > { %p19514_p5 = por %p168_p2, %p167_p0  ;;  %p19518_p6 = por %p174_p4, %p173_p3 }
   0xa   : > { %p13994_p7 = scmp.ge.s32.totalorder %s19435_s24, 1  ;;  %p215_p8 = scmp.lt.s32.totalorder %s19435_s24, 3 }
   0xc   : > { %p216_p9 = pnand %p13994_p7, %p215_p8 }
   0xe   : > { %219 = sbr.rel (%p216_p9) target bundleno = 3362 (0xd22), region = 44 }
  0x15   : > { %v19527_v0 = vld [vmem:[%s22321_s1 + $0x80] sm:$0xff]   ;;  %v19532_v1 = vld [vmem:[%s22321_s1 + $0x88] sm:$0xff]   ;;  %v19437_v2 = vmov 0.0   ;;  %p244_p10 = scmp.lt.s32.totalorder %s19497_s25, 1  ;;  %v19039_v3 = vld [vmem:[%s22321_s1 + $0x90] sm:$0xff]   ;;  %vm19439_vm0 = vmmov 0  }
  0x16   : > { %378 = vst [vmem:[#allocation2] sm:$0xff] %v19437_v2  ;;  %379 = vst [vmem:[#allocation2 + $0x8] sm:$0xff] %v19437_v2  ;;  %15920 = vmatprep.subr.bf16.mxu0 %v19527_v0  ;;  %v19040_v4 = vld [vmem:[%s22321_s1 + $0x98] sm:$0xff]   ;;  %v19041_v11 = vld [vmem:[%s22321_s1 + $0xa0] sm:$0xff]   ;;  %s242_s17 = sand.u32 1, %s19427_s22   ;;  %s14639_s20 = sshll.u32 %s19497_s25, 4 }
  0x17   : > { %380 = vst [vmem:[#allocation2 + $0x10] sm:$0xff] %v19437_v2  ;;  %381 = vst [vmem:[#allocation2 + $0x18] sm:$0xff] %v19437_v2  ;;  %15921 = vmatpush3.bf16.msra.mxu0 %v19527_v0  ;;  %s245_s13 = scalar_select %p244_p10, %s19497_s25, 1  ;;  %v19042_v17 = vld [vmem:[%s22321_s1 + $0xa8] sm:$0xff]   ;;  %v19043_v25 = vld [vmem:[%s22321_s1 + $0xb0] sm:$0xff]  }
  0x18   : > { %382 = vst [vmem:[#allocation2 + $0x20] sm:$0x3] %v19437_v2  ;;  %383 = vst [vmem:[#allocation2 + $0x28] sm:$0xff] %v19437_v2  ;;  %15922 = vmatprep.subr.bf16.mxu0 %v19532_v1  ;;  %v19044_v29 = vld [vmem:[%s22321_s1 + $0xb8] sm:$0xff]   ;;  %v19045_v34 = vld [vmem:[%s22321_s1 + $0xc0] sm:$0xff]   ;;  %s243_s26 = scalar_lea.vmem [#allocation4], %s242_s17  ;;  %s22278_s10 = scalar_lea.hbm %s22326_s6, %s14639_s20 }
  0x19   : > { %384 = vst [vmem:[#allocation2 + $0x30] sm:$0xff] %v19437_v2  ;;  %385 = vst [vmem:[#allocation2 + $0x38] sm:$0xff] %v19437_v2  ;;  %s14642_s16 = sshll.u32 %s245_s13, 10  ;;  %v19046_v43 = vld [vmem:[%s22321_s1 + $0xc8] sm:$0xff]   ;;  %v19047_v46 = vld [vmem:[%s22321_s1 + $0xd0] sm:$0xff]   ;;  %s13936_s28 = sshll.u32 %s243_s26, 4  ;;  %s22280_s28 = int_to_ptr.vmem [resolvable:$true] %s13936_s28 }
  0x1a   : > { %386 = vst [vmem:[#allocation2 + $0x40] sm:$0xff] %v19437_v2  ;;  %387 = vst [vmem:[#allocation2 + $0x48] sm:$0x3] %v19437_v2  ;;  %s19716_s19 = scalar_lea.vmem %s22320_s0, %s14642_s16  ;;  %v19048_v51 = vld [vmem:[%s22321_s1 + $0xd8] sm:$0xff]   ;;  %v19049_v55 = vld [vmem:[%s22321_s1 + $0xe0] sm:$0xff]   ;;  %s13924_s11 = scalar_lea.sflag [#allocation5], %s242_s17 }
  0x1b   : > { %388 = vst [vmem:[#allocation2 + $0x50] sm:$0xff] %v19437_v2  ;;  %389 = vst [vmem:[#allocation2 + $0x58] sm:$0xff] %v19437_v2  ;;  %15923 = vmatpush3.bf16.msra.mxu0 %v19532_v1  ;;  %v250_v8 = vld [vmem:[%s19716_s19] sm:$0xff]  ;;  %v251_v9 = vld [vmem:[%s19716_s19 + $0x8] sm:$0xff]  ;;  %s19373_s12 = scalar_lea.vmem %s22280_s28, 16  ;;  %s19440_s25 = smov [#allocation4]  }
  0x1c   : > { %390 = vst [vmem:[#allocation2 + $0x60] sm:$0xff] %v19437_v2  ;;  %391 = vst [vmem:[#allocation2 + $0x68] sm:$0xff] %v19437_v2  ;;  %15924 = vmatprep.subr.bf16.mxu0 %v19039_v3  ;;  %v252_v10 = vld [vmem:[%s19716_s19 + $0x10] sm:$0xff]  ;;  %v253_v12 = vld [vmem:[%s19716_s19 + $0x18] sm:$0xff]  ;;  %p19374_p11 = scmp.ne.s32.totalorder %s22280_s28, %s19373_s12  ;;  %s19377_s13 = sshll.u32 %s19440_s25, 4  ;;  %s19378_s13 = int_to_ptr.vmem [resolvable:$false] %s19377_s13 }
  0x1d   : > { %392 = vst [vmem:[#allocation2 + $0x70] sm:$0x3] %v19437_v2  ;;  %393 = vst [vmem:[#allocation2 + $0x78] sm:$0xff] %v19437_v2  ;;  %v2280_v5 = vld [vmem:[#allocation2 + $0x2] sm:$0xff]  ;;  %v256_v15 = vld [vmem:[%s19716_s19 + $0x30] sm:$0xff]  ;;  %s19379_s14 = scalar_lea.vmem %s19378_s13, 32  ;;  %p19380_p0 = scmp.lt.s32.totalorder %s22280_s28, %s19378_s13 }
  0x1e   : > { %394 = vst [vmem:[#allocation2 + $0x80] sm:$0xff] %v19437_v2  ;;  %395 = vst [vmem:[#allocation2 + $0x88] sm:$0xff] %v19437_v2  ;;  %v2281_v6 = vld [vmem:[#allocation2 + $0xa] sm:$0xff]  ;;  %v254_v13 = vld [vmem:[%s19716_s19 + $0x20] sm:$0xff]  ;;  %p19375_p12 = pnand %p19374_p11, %p19514_p5  ;;  %p19381_p1 = scmp.lt.s32.totalorder %s19379_s14, %s19373_s12 }
  0x1f   : > { %396 = vst [vmem:[#allocation2 + $0x90] sm:$0xff] %v19437_v2  ;;  %397 = vst [vmem:[#allocation2 + $0x98] sm:$0x3] %v19437_v2  ;;  %v2408_v7 = vpack.c.bf16 %v2281_v6, %v2280_v5  ;;  %15925 = vmatpush3.bf16.msra.mxu0 %v19039_v3  ;;  %v255_v14 = vld [vmem:[%s19716_s19 + $0x28] sm:$0xff]  ;;  %v257_v16 = vld [vmem:[%s19716_s19 + $0x38] sm:$0xff] }
  0x20   : > { %398 = vst [vmem:[#allocation2 + $0xa0] sm:$0xff] %v19437_v2  ;;  %399 = vst [vmem:[#allocation2 + $0xa8] sm:$0xff] %v19437_v2  ;;  %15926 = vmatprep.subr.bf16.mxu0 %v19040_v4  ;;  %v258_v18 = vld [vmem:[%s19716_s19 + $0x40] sm:$0xff]  ;;  %v259_v19 = vld [vmem:[%s19716_s19 + $0x48] sm:$0xff]  ;;  %p19376_p13 = pneg %p19375_p12  ;;  %p19382_p2 = por %p19381_p1, %p19380_p0 }
  0x21   : > { %400 = vst [vmem:[#allocation2 + $0xb0] sm:$0xff] %v19437_v2  ;;  %401 = vst [vmem:[#allocation2 + $0xb8] sm:$0xff] %v19437_v2  ;;  %15936 = vmatprep.mubr.bf16.mxu0 %v2408_v7  ;;  %v260_v20 = vld [vmem:[%s19716_s19 + $0x50] sm:$0xff]  ;;  %v261_v21 = vld [vmem:[%s19716_s19 + $0x58] sm:$0xff] }
  0x22   : > { %402 = vst [vmem:[#allocation2 + $0xc0] sm:$0x3] %v19437_v2  ;;  %403 = vst [vmem:[#allocation2 + $0xc8] sm:$0xff] %v19437_v2  ;;  %v262_v22 = vld [vmem:[%s19716_s19 + $0x60] sm:$0xff]  ;;  %v263_v23 = vld [vmem:[%s19716_s19 + $0x68] sm:$0xff]  ;;  %p19383_p3 = pnand %p19382_p2, %p19376_p13 }
  0x23   : > { %404 = vst [vmem:[#allocation2 + $0xd0] sm:$0xff] %v19437_v2  ;;  %405 = vst [vmem:[#allocation2 + $0xd8] sm:$0xff] %v19437_v2  ;;  %15927 = vmatpush3.bf16.msra.mxu0 %v19040_v4  ;;  %v264_v24 = vld [vmem:[%s19716_s19 + $0x70] sm:$0xff]  ;;  %v265_v26 = vld [vmem:[%s19716_s19 + $0x78] sm:$0xff] }
  0x24   : > { %406 = vst [vmem:[#allocation2 + $0xe0] sm:$0xff] %v19437_v2  ;;  %407 = vst [vmem:[#allocation2 + $0xe8] sm:$0x3] %v19437_v2  ;;  %15928 = vmatprep.subr.bf16.mxu0 %v19041_v11  ;;  %v266_v27 = vld [vmem:[%s19716_s19 + $0x80] sm:$0xff]  ;;  %v267_v28 = vld [vmem:[%s19716_s19 + $0x88] sm:$0xff] }
  0x25   : > { %408 = vst [vmem:[#allocation2 + $0xf0] sm:$0xff] %v19437_v2  ;;  %409 = vst [vmem:[#allocation2 + $0xf8] sm:$0xff] %v19437_v2  ;;  %v268_v30 = vld [vmem:[%s19716_s19 + $0x90] sm:$0xff]  ;;  %v269_v31 = vld [vmem:[%s19716_s19 + $0x98] sm:$0xff] }
  0x26   : > { %410 = vst [vmem:[#allocation2 + $0x100] sm:$0xff] %v19437_v2  ;;  %411 = vst [vmem:[#allocation2 + $0x108] sm:$0xff] %v19437_v2  ;;  %v2282_v32 = vld [vmem:[#allocation2 + $0x12] sm:$0xff]  ;;  %v2283_v33 = vld [vmem:[#allocation2 + $0x1a] sm:$0xff] }
  0x27   : > { %412 = vst [vmem:[#allocation2 + $0x110] sm:$0x3] %v19437_v2  ;;  %413 = vst [vmem:[#allocation2 + $0x118] sm:$0xff] %v19437_v2  ;;  %15929 = vmatpush3.bf16.msra.mxu0 %v19041_v11  ;;  %v270_v35 = vld [vmem:[%s19716_s19 + $0xa0] sm:$0xff]  ;;  %v271_v38 = vld [vmem:[%s19716_s19 + $0xa8] sm:$0xff]  ;;  %v2409_v41 = vpack.c.bf16 %v2283_v33, %v2282_v32 }
  0x28   : > { %414 = vst [vmem:[#allocation2 + $0x120] sm:$0xff] %v19437_v2  ;;  %415 = vst [vmem:[#allocation2 + $0x128] sm:$0xff] %v19437_v2  ;;  %15930 = vmatprep.subr.bf16.mxu0 %v19042_v17  ;;  %v272_v39 = vld [vmem:[%s19716_s19 + $0xb0] sm:$0xff]  ;;  %v273_v40 = vld [vmem:[%s19716_s19 + $0xb8] sm:$0xff] }
  0x29   : > { %416 = vst [vmem:[#allocation2 + $0x130] sm:$0xff] %v19437_v2  ;;  %417 = vst [vmem:[#allocation2 + $0x138] sm:$0x3] %v19437_v2  ;;  %v274_v57 = vld [vmem:[%s19716_s19 + $0xc0] sm:$0xff]  ;;  %v275_v58 = vld [vmem:[%s19716_s19 + $0xc8] sm:$0xff] }
  0x2a   : > { %418 = vst [vmem:[#allocation2 + $0x140] sm:$0xff] %v19437_v2  ;;  %419 = vst [vmem:[#allocation2 + $0x148] sm:$0xff] %v19437_v2  ;;  %v276_v59 = vld [vmem:[%s19716_s19 + $0xd0] sm:$0xff]  ;;  %v277_v60 = vld [vmem:[%s19716_s19 + $0xd8] sm:$0xff] }
  0x2b   : > { %420 = vst [vmem:[#allocation2 + $0x150] sm:$0xff] %v19437_v2  ;;  %421 = vst [vmem:[#allocation2 + $0x158] sm:$0xff] %v19437_v2  ;;  %15931 = vmatpush3.bf16.msra.mxu0 %v19042_v17  ;;  %v278_v61 = vld [vmem:[%s19716_s19 + $0xe0] sm:$0xff]  ;;  %v279_v62 = vld [vmem:[%s19716_s19 + $0xe8] sm:$0xff] }
  0x2c   : > { %422 = vst [vmem:[#allocation2 + $0x160] sm:$0x3] %v19437_v2  ;;  %423 = vst [vmem:[#allocation2 + $0x168] sm:$0xff] %v19437_v2  ;;  %15932 = vmatprep.subr.bf16.mxu0 %v19043_v25  ;;  %v280_v63 = vld [vmem:[%s19716_s19 + $0xf0] sm:$0xff]  ;;  %v281_v0 = vld [vmem:[%s19716_s19 + $0xf8] sm:$0xff] }
  0x2d   : > { %424 = vst [vmem:[#allocation2 + $0x170] sm:$0xff] %v19437_v2  ;;  %425 = vst [vmem:[#allocation2 + $0x178] sm:$0xff] %v19437_v2  ;;  %v283_v3 = vld [vmem:[%s19716_s19 + $0x108] sm:$0xff]  ;;  %v284_v4 = vld [vmem:[%s19716_s19 + $0x110] sm:$0xff] }
  0x2e   : > { %426 = vst [vmem:[#allocation2 + $0x180] sm:$0xff] %v19437_v2  ;;  %427 = vst [vmem:[#allocation2 + $0x188] sm:$0x3] %v19437_v2  ;;  %v285_v6 = vld [vmem:[%s19716_s19 + $0x118] sm:$0xff]  ;;  %v19050_v7 = vld [vmem:[%s22321_s1 + $0xe8] sm:$0xff]  }
  0x2f   : > { %428 = vst [vmem:[#allocation2 + $0x190] sm:$0xff] %v19437_v2  ;;  %429 = vst [vmem:[#allocation2 + $0x198] sm:$0xff] %v19437_v2  ;;  %15933 = vmatpush3.bf16.msra.mxu0 %v19043_v25  ;;  %v289_v11 = vld [vmem:[%s19716_s19 + $0x138] sm:$0xff]  ;;  %v296_v25 = vld [vmem:[%s19716_s19 + $0x170] sm:$0xff] }
  0x30   : > { %430 = vst [vmem:[#allocation2 + $0x1a0] sm:$0xff] %v19437_v2  ;;  %431 = vst [vmem:[#allocation2 + $0x1a8] sm:$0xff] %v19437_v2  ;;  %15934 = vmatprep.subr.bf16.mxu0 %v19044_v29  ;;  %v19808_v32 = vld [vmem:[%s22321_s1 + $0x100] sm:$0xff]  }
  0x31   : > { %432 = vst [vmem:[#allocation2 + $0x1b0] sm:$0x3] %v19437_v2  ;;  %433 = vst [vmem:[#allocation2 + $0x1b8] sm:$0xff] %v19437_v2  ;;  %v298_v33 = vld [vmem:[%s19716_s19 + $0x180] sm:$0xff] }
  0x32   : > { %434 = vst [vmem:[#allocation2 + $0x1c0] sm:$0xff] %v19437_v2  ;;  %435 = vst [vmem:[#allocation2 + $0x1c8] sm:$0xff] %v19437_v2 }
  0x33   : > { %436 = vst [vmem:[#allocation2 + $0x1d0] sm:$0xff] %v19437_v2  ;;  %437 = vst [vmem:[#allocation2 + $0x1d8] sm:$0x3] %v19437_v2  ;;  %15935 = vmatpush3.bf16.msra.mxu0 %v19044_v29 }
  0x34   : > { %438 = vst [vmem:[#allocation2 + $0x1e0] sm:$0xff] %v19437_v2  ;;  %439 = vst [vmem:[#allocation2 + $0x1e8] sm:$0xff] %v19437_v2  ;;  %16064 = vmatprep.subr.bf16.mxu0 %v19045_v34 }
  0x35   : > { %440 = vst [vmem:[#allocation2 + $0x1f0] sm:$0xff] %v19437_v2  ;;  %441 = vst [vmem:[#allocation2 + $0x1f8] sm:$0xff] %v19437_v2 }
  0x36   : > { %442 = vst [vmem:[#allocation2 + $0x200] sm:$0x3] %v19437_v2  ;;  %443 = vst [vmem:[#allocation2 + $0x208] sm:$0xff] %v19437_v2  ;;  %15937 = vmatmul.mubr.bf16.vlgmr.msra.gmra.mrb[0].mxu0 %v2409_v41  ;;  %v305_v41 = vld [vmem:[%s19716_s19 + $0x1b8] sm:$0xff] }
  0x37   : > { %444 = vst [vmem:[#allocation2 + $0x210] sm:$0xff] %v19437_v2  ;;  %445 = vst [vmem:[#allocation2 + $0x218] sm:$0xff] %v19437_v2  ;;  %16065 = vmatpush3.bf16.msra.mxu0 %v19045_v34  ;;  %v299_v34 = vld [vmem:[%s19716_s19 + $0x188] sm:$0xff] }
  0x38   : > { %446 = vst [vmem:[#allocation2 + $0x220] sm:$0xff] %v19437_v2  ;;  %447 = vst [vmem:[#allocation2 + $0x228] sm:$0x3] %v19437_v2  ;;  %16066 = vmatprep.subr.bf16.mxu0 %v19046_v43 }
  0x39   : > { %448 = vst [vmem:[#allocation2 + $0x230] sm:$0xff] %v19437_v2  ;;  %449 = vst [vmem:[#allocation2 + $0x238] sm:$0xff] %v19437_v2 }
  0x3a   : > { %450 = vst [vmem:[#allocation2 + $0x240] sm:$0xff] %v19437_v2  ;;  %451 = vst [vmem:[#allocation2 + $0x248] sm:$0xff] %v19437_v2 }
  0x3b   : > { %452 = vst [vmem:[#allocation2 + $0x250] sm:$0x3] %v19437_v2  ;;  %453 = vst [vmem:[#allocation2 + $0x258] sm:$0xff] %v19437_v2  ;;  %16067 = vmatpush3.bf16.msra.mxu0 %v19046_v43  ;;  %v306_v43 = vld [vmem:[%s19716_s19 + $0x1c0] sm:$0xff] }
  0x3c   : > { %454 = vst [vmem:[#allocation2 + $0x260] sm:$0xff] %v19437_v2  ;;  %455 = vst [vmem:[#allocation2 + $0x268] sm:$0xff] %v19437_v2  ;;  %16068 = vmatprep.subr.bf16.mxu0 %v19047_v46 }
  0x3d   : > { %456 = vst [vmem:[#allocation2 + $0x270] sm:$0xff] %v19437_v2  ;;  %457 = vst [vmem:[#allocation2 + $0x278] sm:$0x3] %v19437_v2 }
  0x3e   : > { %458 = vst [vmem:[#allocation2 + $0x280] sm:$0xff] %v19437_v2  ;;  %459 = vst [vmem:[#allocation2 + $0x288] sm:$0xff] %v19437_v2 }
  0x3f   : > { %460 = vst [vmem:[#allocation2 + $0x290] sm:$0xff] %v19437_v2  ;;  %461 = vst [vmem:[#allocation2 + $0x298] sm:$0xff] %v19437_v2  ;;  %16069 = vmatpush3.bf16.msra.mxu0 %v19047_v46  ;;  %v309_v46 = vld [vmem:[%s19716_s19 + $0x1d8] sm:$0xff] }
  0x40   : > { %462 = vst [vmem:[#allocation2 + $0x2a0] sm:$0x3] %v19437_v2  ;;  %463 = vst [vmem:[#allocation2 + $0x2a8] sm:$0xff] %v19437_v2  ;;  %16070 = vmatprep.subr.bf16.mxu0 %v19048_v51 }
  0x41   : > { %464 = vst [vmem:[#allocation2 + $0x2b0] sm:$0xff] %v19437_v2  ;;  %465 = vst [vmem:[#allocation2 + $0x2b8] sm:$0xff] %v19437_v2 }
  0x42   : > { %466 = vst [vmem:[#allocation2 + $0x2c0] sm:$0xff] %v19437_v2  ;;  %467 = vst [vmem:[#allocation2 + $0x2c8] sm:$0x3] %v19437_v2 }
  0x43   : > { %468 = vst [vmem:[#allocation2 + $0x2d0] sm:$0xff] %v19437_v2  ;;  %469 = vst [vmem:[#allocation2 + $0x2d8] sm:$0xff] %v19437_v2  ;;  %16071 = vmatpush3.bf16.msra.mxu0 %v19048_v51 }
  0x44   : > { %470 = vst [vmem:[#allocation2 + $0x2e0] sm:$0xff] %v19437_v2  ;;  %471 = vst [vmem:[#allocation2 + $0x2e8] sm:$0xff] %v19437_v2  ;;  %16072 = vmatprep.subr.bf16.mxu0 %v19049_v55 }
  0x45   : > { %472 = vst [vmem:[#allocation2 + $0x2f0] sm:$0x3] %v19437_v2  ;;  %473 = vst [vmem:[#allocation2 + $0x2f8] sm:$0xff] %v19437_v2 }
  0x46   : > { %474 = vst [vmem:[#allocation2 + $0x300] sm:$0xff] %v19437_v2  ;;  %475 = vst [vmem:[#allocation2 + $0x308] sm:$0xff] %v19437_v2 }
  0x47   : > { %476 = vst [vmem:[#allocation2 + $0x310] sm:$0xff] %v19437_v2  ;;  %477 = vst [vmem:[#allocation2 + $0x318] sm:$0x3] %v19437_v2  ;;  %16073 = vmatpush3.bf16.msra.mxu0 %v19049_v55  ;;  %v312_v55 = vld [vmem:[%s19716_s19 + $0x1f0] sm:$0xff] }
  0x48   : > { %478 = vst [vmem:[#allocation2 + $0x320] sm:$0xff] %v19437_v2  ;;  %479 = vst [vmem:[#allocation2 + $0x328] sm:$0xff] %v19437_v2  ;;  %16074 = vmatprep.subr.bf16.mxu0 %v19050_v7 }
  0x49   : > { %480 = vst [vmem:[#allocation2 + $0x330] sm:$0xff] %v19437_v2  ;;  %481 = vst [vmem:[#allocation2 + $0x338] sm:$0xff] %v19437_v2 }
  0x4a   : > { %482 = vst [vmem:[#allocation2 + $0x340] sm:$0x3] %v19437_v2  ;;  %483 = vst [vmem:[#allocation2 + $0x348] sm:$0xff] %v19437_v2 }
  0x4b   : > { %484 = vst [vmem:[#allocation2 + $0x350] sm:$0xff] %v19437_v2  ;;  %485 = vst [vmem:[#allocation2 + $0x358] sm:$0xff] %v19437_v2  ;;  %16075 = vmatpush3.bf16.msra.mxu0 %v19050_v7 }
  0x4c   : > { %486 = vst [vmem:[#allocation2 + $0x360] sm:$0xff] %v19437_v2  ;;  %487 = vst [vmem:[#allocation2 + $0x368] sm:$0x3] %v19437_v2 }
  0x4d   : > { %488 = vst [vmem:[#allocation2 + $0x370] sm:$0xff] %v19437_v2  ;;  %489 = vst [vmem:[#allocation2 + $0x378] sm:$0xff] %v19437_v2 }
  0x4e   : > { %490 = vst [vmem:[#allocation2 + $0x380] sm:$0xff] %v19437_v2  ;;  %491 = vst [vmem:[#allocation2 + $0x388] sm:$0xff] %v19437_v2 }
  0x4f   : > { %492 = vst [vmem:[#allocation2 + $0x390] sm:$0x3] %v19437_v2  ;;  %493 = vst [vmem:[#allocation2 + $0x398] sm:$0xff] %v19437_v2 }
  0x50   : > { %494 = vst [vmem:[#allocation2 + $0x3a0] sm:$0xff] %v19437_v2  ;;  %495 = vst [vmem:[#allocation2 + $0x3a8] sm:$0xff] %v19437_v2 }
  0x51   : > { %496 = vst [vmem:[#allocation2 + $0x3b0] sm:$0xff] %v19437_v2  ;;  %497 = vst [vmem:[#allocation2 + $0x3b8] sm:$0x3] %v19437_v2 }
  0x52   : > { %498 = vst [vmem:[#allocation2 + $0x3c0] sm:$0xff] %v19437_v2  ;;  %499 = vst [vmem:[#allocation2 + $0x3c8] sm:$0xff] %v19437_v2 }
  0x53   : > { %500 = vst [vmem:[#allocation2 + $0x3d0] sm:$0xff] %v19437_v2  ;;  %501 = vst [vmem:[#allocation2 + $0x3d8] sm:$0xff] %v19437_v2 }
  0x54   : > { %502 = vst [vmem:[#allocation2 + $0x3e0] sm:$0x3] %v19437_v2  ;;  %503 = vst [vmem:[#allocation2 + $0x3e8] sm:$0xff] %v19437_v2 }
  0x55   : > { %504 = vst [vmem:[#allocation2 + $0x3f0] sm:$0xff] %v19437_v2  ;;  %505 = vst [vmem:[#allocation2 + $0x3f8] sm:$0xff] %v19437_v2 }
  0x56   : > { %506 = vst [vmem:[#allocation2 + $0x400] sm:$0xff] %v19437_v2  ;;  %507 = vst [vmem:[#allocation2 + $0x408] sm:$0x3] %v19437_v2 }
  0x57   : > { %508 = vst [vmem:[#allocation2 + $0x410] sm:$0xff] %v19437_v2  ;;  %509 = vst [vmem:[#allocation2 + $0x418] sm:$0xff] %v19437_v2 }
  0x58   : > { %510 = vst [vmem:[#allocation2 + $0x420] sm:$0xff] %v19437_v2  ;;  %511 = vst [vmem:[#allocation2 + $0x428] sm:$0xff] %v19437_v2 }
  0x59   : > { %512 = vst [vmem:[#allocation2 + $0x430] sm:$0x3] %v19437_v2  ;;  %513 = vst [vmem:[#allocation2 + $0x438] sm:$0xff] %v19437_v2 }
  0x5a   : > { %514 = vst [vmem:[#allocation2 + $0x440] sm:$0xff] %v19437_v2  ;;  %515 = vst [vmem:[#allocation2 + $0x448] sm:$0xff] %v19437_v2 }
  0x5b   : > { %516 = vst [vmem:[#allocation2 + $0x450] sm:$0xff] %v19437_v2  ;;  %517 = vst [vmem:[#allocation2 + $0x458] sm:$0x3] %v19437_v2 }
  0x5c   : > { %518 = vst [vmem:[#allocation2 + $0x460] sm:$0xff] %v19437_v2  ;;  %519 = vst [vmem:[#allocation2 + $0x468] sm:$0xff] %v19437_v2 }
  0x5d   : > { %520 = vst [vmem:[#allocation2 + $0x470] sm:$0xff] %v19437_v2  ;;  %521 = vst [vmem:[#allocation2 + $0x478] sm:$0xff] %v19437_v2 }
  0x5e   : > { %522 = vst [vmem:[#allocation2 + $0x480] sm:$0x3] %v19437_v2  ;;  %523 = vst [vmem:[#allocation2 + $0x488] sm:$0xff] %v19437_v2 }
  0x5f   : > { %524 = vst [vmem:[#allocation2 + $0x490] sm:$0xff] %v19437_v2  ;;  %525 = vst [vmem:[#allocation2 + $0x498] sm:$0xff] %v19437_v2 }
  0x60   : > { %526 = vst [vmem:[#allocation2 + $0x4a0] sm:$0xff] %v19437_v2  ;;  %527 = vst [vmem:[#allocation2 + $0x4a8] sm:$0x3] %v19437_v2 }
  0x61   : > { %528 = vst [vmem:[#allocation2 + $0x4b0] sm:$0xff] %v19437_v2  ;;  %529 = vst [vmem:[#allocation2 + $0x4b8] sm:$0xff] %v19437_v2 }
  0x62   : > { %530 = vst [vmem:[#allocation2 + $0x4c0] sm:$0xff] %v19437_v2  ;;  %531 = vst [vmem:[#allocation2 + $0x4c8] sm:$0xff] %v19437_v2 }
  0x63   : > { %532 = vst [vmem:[#allocation2 + $0x4d0] sm:$0x3] %v19437_v2  ;;  %533 = vst [vmem:[#allocation2 + $0x4d8] sm:$0xff] %v19437_v2 }
  0x64   : > { %534 = vst [vmem:[#allocation2 + $0x4e0] sm:$0xff] %v19437_v2  ;;  %535 = vst [vmem:[#allocation2 + $0x4e8] sm:$0xff] %v19437_v2 }
  0x65   : > { %536 = vst [vmem:[#allocation2 + $0x4f0] sm:$0xff] %v19437_v2  ;;  %537 = vst [vmem:[#allocation2 + $0x4f8] sm:$0x3] %v19437_v2 }
  0x66   : > { %538 = vst [vmem:[#allocation2 + $0x500] sm:$0xff] %v19437_v2  ;;  %539 = vst [vmem:[#allocation2 + $0x508] sm:$0xff] %v19437_v2 }
  0x67   : > { %540 = vst [vmem:[#allocation2 + $0x510] sm:$0xff] %v19437_v2  ;;  %541 = vst [vmem:[#allocation2 + $0x518] sm:$0xff] %v19437_v2 }
  0x68   : > { %542 = vst [vmem:[#allocation2 + $0x520] sm:$0x3] %v19437_v2  ;;  %543 = vst [vmem:[#allocation2 + $0x528] sm:$0xff] %v19437_v2 }
  0x69   : > { %544 = vst [vmem:[#allocation2 + $0x530] sm:$0xff] %v19437_v2  ;;  %545 = vst [vmem:[#allocation2 + $0x538] sm:$0xff] %v19437_v2 }
  0x6a   : > { %546 = vst [vmem:[#allocation2 + $0x540] sm:$0xff] %v19437_v2  ;;  %547 = vst [vmem:[#allocation2 + $0x548] sm:$0x3] %v19437_v2  ;;  %v282_v2 = vld [vmem:[%s19716_s19 + $0x100] sm:$0xff] }
  0x6b   : > { %549 = vst [vmem:[#allocation2 + $0x29] sm:$0xff] %v250_v8  ;;  %550 = vst [vmem:[#allocation2 + $0x31] sm:$0xff] %v251_v9  ;;  %v286_v8 = vld [vmem:[%s19716_s19 + $0x120] sm:$0xff]  ;;  %v287_v9 = vld [vmem:[%s19716_s19 + $0x128] sm:$0xff] }
  0x6c   : > { %551 = vst [vmem:[#allocation2 + $0x39] sm:$0xff] %v252_v10  ;;  %552 = vst [vmem:[#allocation2 + $0x41] sm:$0xff] %v253_v12  ;;  %v288_v10 = vld [vmem:[%s19716_s19 + $0x130] sm:$0xff]  ;;  %v290_v12 = vld [vmem:[%s19716_s19 + $0x140] sm:$0xff] }
  0x6d   : > { %553 = vst [vmem:[#allocation2 + $0x51] sm:$0xff] %v254_v13  ;;  %554 = vst [vmem:[#allocation2 + $0x59] sm:$0xff] %v255_v14  ;;  %v291_v13 = vld [vmem:[%s19716_s19 + $0x148] sm:$0xff]  ;;  %v292_v14 = vld [vmem:[%s19716_s19 + $0x150] sm:$0xff] }
  0x6e   : > { %555 = vst [vmem:[#allocation2 + $0x61] sm:$0xff] %v256_v15  ;;  %556 = vst [vmem:[#allocation2 + $0x69] sm:$0xff] %v257_v16  ;;  %v293_v15 = vld [vmem:[%s19716_s19 + $0x158] sm:$0xff] }
  0x6f   : > { %557 = vst [vmem:[#allocation2 + $0x79] sm:$0xff] %v258_v18  ;;  %558 = vst [vmem:[#allocation2 + $0x81] sm:$0xff] %v259_v19  ;;  %v294_v18 = vld [vmem:[%s19716_s19 + $0x160] sm:$0xff] }
  0x70   : > { %559 = vst [vmem:[#allocation2 + $0x89] sm:$0xff] %v260_v20  ;;  %560 = vst [vmem:[#allocation2 + $0x91] sm:$0xff] %v261_v21  ;;  %v19051_v21 = vld [vmem:[%s22321_s1 + $0xf0] sm:$0xff]  }
  0x71   : > { %561 = vst [vmem:[#allocation2 + $0xa1] sm:$0xff] %v262_v22  ;;  %562 = vst [vmem:[#allocation2 + $0xa9] sm:$0xff] %v263_v23  ;;  %16076 = vmatprep.subr.bf16.mxu0 %v19051_v21 }
  0x72   : > { %563 = vst [vmem:[#allocation2 + $0xb1] sm:$0xff] %v264_v24  ;;  %564 = vst [vmem:[#allocation2 + $0xb9] sm:$0xff] %v265_v26  ;;  %v2284_v36 = vld [vmem:[#allocation2 + $0x2a] sm:$0xff]  ;;  %v19052_v26 = vld [vmem:[%s22321_s1 + $0xf8] sm:$0xff]   ;;  %16077 = vmatpush3.bf16.msra.mxu0 %v19051_v21 }
  0x73   : > { %565 = vst [vmem:[#allocation2 + $0xc9] sm:$0xff] %v266_v27  ;;  %566 = vst [vmem:[#allocation2 + $0xd1] sm:$0xff] %v267_v28  ;;  %v2285_v37 = vld [vmem:[#allocation2 + $0x32] sm:$0xff]  ;;  %v2286_v44 = vld [vmem:[#allocation2 + $0x3a] sm:$0xff]  ;;  %16078 = vmatprep.subr.bf16.mxu0 %v19052_v26 }
  0x74   : > { %567 = vst [vmem:[#allocation2 + $0xd9] sm:$0xff] %v268_v30  ;;  %568 = vst [vmem:[#allocation2 + $0xe1] sm:$0xff] %v269_v31  ;;  %v2410_v42 = vpack.c.bf16 %v2285_v37, %v2284_v36  ;;  %v2287_v45 = vld [vmem:[#allocation2 + $0x42] sm:$0xff]  ;;  %v2288_v47 = vld [vmem:[#allocation2 + $0x52] sm:$0xff] }
  0x75   : > { %569 = vst [vmem:[#allocation2 + $0xf1] sm:$0xff] %v270_v35  ;;  %570 = vst [vmem:[#allocation2 + $0xf9] sm:$0xff] %v271_v38  ;;  %v2289_v48 = vld [vmem:[#allocation2 + $0x5a] sm:$0xff]  ;;  %v2411_v49 = vpack.c.bf16 %v2287_v45, %v2286_v44  ;;  %v2290_v52 = vld [vmem:[#allocation2 + $0x62] sm:$0xff] }
  0x76   : > { %571 = vst [vmem:[#allocation2 + $0x101] sm:$0xff] %v272_v39  ;;  %572 = vst [vmem:[#allocation2 + $0x109] sm:$0xff] %v273_v40  ;;  %15940 = vmatprep.mubr.bf16.mxu0 %v2410_v42  ;;  %v2412_v50 = vpack.c.bf16 %v2289_v48, %v2288_v47  ;;  %v2291_v53 = vld [vmem:[#allocation2 + $0x6a] sm:$0xff]  ;;  %v2292_v54 = vld [vmem:[#allocation2 + $0x7a] sm:$0xff]  ;;  %16079 = vmatpush3.bf16.msra.mxu0 %v19052_v26 }
  0x77   : > { %15941 = vmatmul.mubr.bf16.gmra.mrb[4].mxu0 %v2411_v49  ;;  %v2293_v56 = vld [vmem:[#allocation2 + $0x82] sm:$0xff]  ;;  %573 = vst [vmem:[#allocation2 + $0x119] sm:$0xff] %v274_v57  ;;  %574 = vst [vmem:[#allocation2 + $0x121] sm:$0xff] %v275_v58  ;;  %v2413_v1 = vpack.c.bf16 %v2291_v53, %v2290_v52  ;;  %v2294_v16 = vld [vmem:[#allocation2 + $0x8a] sm:$0xff]  ;;  %16208 = vmatprep.subr.bf16.mxu0 %v19808_v32 }
  0x78   : > { %15944 = vmatprep.mubr.bf16.mxu0 %v2412_v50  ;;  %575 = vst [vmem:[#allocation2 + $0x129] sm:$0xff] %v276_v59  ;;  %576 = vst [vmem:[#allocation2 + $0x131] sm:$0xff] %v277_v60  ;;  %v2414_v5 = vpack.c.bf16 %v2293_v56, %v2292_v54  ;;  %v2295_v17 = vld [vmem:[#allocation2 + $0x92] sm:$0xff]  ;;  %v2296_v19 = vld [vmem:[#allocation2 + $0xa2] sm:$0xff] }
  0x79   : > { %577 = vst [vmem:[#allocation2 + $0x141] sm:$0xff] %v278_v61  ;;  %578 = vst [vmem:[#allocation2 + $0x149] sm:$0xff] %v279_v62  ;;  %v2297_v20 = vld [vmem:[#allocation2 + $0xaa] sm:$0xff]  ;;  %v2415_v22 = vpack.c.bf16 %v2295_v17, %v2294_v16  ;;  %v297_v27 = vld [vmem:[%s19716_s19 + $0x178] sm:$0xff] }
  0x7a   : > { %579 = vst [vmem:[#allocation2 + $0x151] sm:$0xff] %v280_v63  ;;  %580 = vst [vmem:[#allocation2 + $0x159] sm:$0xff] %v281_v0  ;;  %v2416_v23 = vpack.c.bf16 %v2297_v20, %v2296_v19  ;;  %v295_v24 = vld [vmem:[%s19716_s19 + $0x168] sm:$0xff]  ;;  %v2298_v28 = vld [vmem:[#allocation2 + $0xb2] sm:$0xff] }
  0x7b   : > { %581 = vst [vmem:[#allocation2 + $0x169] sm:$0xff] %v282_v2  ;;  %582 = vst [vmem:[#allocation2 + $0x171] sm:$0xff] %v283_v3  ;;  %v2299_v29 = vld [vmem:[#allocation2 + $0xba] sm:$0xff]  ;;  %v2300_v30 = vld [vmem:[#allocation2 + $0xca] sm:$0xff] }
  0x7c   : > { %583 = vst [vmem:[#allocation2 + $0x179] sm:$0xff] %v284_v4  ;;  %584 = vst [vmem:[#allocation2 + $0x181] sm:$0xff] %v285_v6  ;;  %v2301_v31 = vld [vmem:[#allocation2 + $0xd2] sm:$0xff]  ;;  %v302_v37 = vld [vmem:[%s19716_s19 + $0x1a0] sm:$0xff]  ;;  %v2417_v38 = vpack.c.bf16 %v2299_v29, %v2298_v28 }
  0x7d   : > { %585 = vst [vmem:[#allocation2 + $0x191] sm:$0xff] %v286_v8  ;;  %586 = vst [vmem:[#allocation2 + $0x199] sm:$0xff] %v287_v9  ;;  %v300_v35 = vld [vmem:[%s19716_s19 + $0x190] sm:$0xff]  ;;  %v301_v36 = vld [vmem:[%s19716_s19 + $0x198] sm:$0xff]  ;;  %v2418_v42 = vpack.c.bf16 %v2301_v31, %v2300_v30 }
  0x7e   : > { %587 = vst [vmem:[#allocation2 + $0x1a1] sm:$0xff] %v288_v10  ;;  %588 = vst [vmem:[#allocation2 + $0x1a9] sm:$0xff] %v289_v11  ;;  %v303_v39 = vld [vmem:[%s19716_s19 + $0x1a8] sm:$0xff]  ;;  %v304_v40 = vld [vmem:[%s19716_s19 + $0x1b0] sm:$0xff] }
  0x7f   : > { %15945 = vmatmul.mubr.bf16.gmra.mrb[8].mxu0 %v2413_v1  ;;  %589 = vst [vmem:[#allocation2 + $0x1b9] sm:$0xff] %v290_v12  ;;  %590 = vst [vmem:[#allocation2 + $0x1c1] sm:$0xff] %v291_v13  ;;  %v307_v44 = vld [vmem:[%s19716_s19 + $0x1c8] sm:$0xff]  ;;  %v308_v45 = vld [vmem:[%s19716_s19 + $0x1d0] sm:$0xff] }
  0x80   : > { %15948 = vmatprep.mubr.bf16.mxu0 %v2414_v5  ;;  %591 = vst [vmem:[#allocation2 + $0x1c9] sm:$0xff] %v292_v14  ;;  %592 = vst [vmem:[#allocation2 + $0x1d1] sm:$0xff] %v293_v15  ;;  %v2302_v47 = vld [vmem:[#allocation2 + $0xda] sm:$0xff]  ;;  %v2303_v48 = vld [vmem:[#allocation2 + $0xe2] sm:$0xff] }
  0x81   : > { %593 = vst [vmem:[#allocation2 + $0x1e1] sm:$0xff] %v294_v18  ;;  %594 = vst [vmem:[#allocation2 + $0x1e9] sm:$0xff] %v295_v24  ;;  %v2304_v49 = vld [vmem:[#allocation2 + $0xf2] sm:$0xff]  ;;  %v2305_v50 = vld [vmem:[#allocation2 + $0xfa] sm:$0xff]  ;;  %v2419_v51 = vpack.c.bf16 %v2303_v48, %v2302_v47 }
  0x82   : > { %595 = vst [vmem:[#allocation2 + $0x1f1] sm:$0xff] %v296_v25  ;;  %596 = vst [vmem:[#allocation2 + $0x1f9] sm:$0xff] %v297_v27  ;;  %v2420_v52 = vpack.c.bf16 %v2305_v50, %v2304_v49  ;;  %v310_v53 = vld [vmem:[%s19716_s19 + $0x1e0] sm:$0xff]  ;;  %v311_v54 = vld [vmem:[%s19716_s19 + $0x1e8] sm:$0xff] }
  0x83   : > { %597 = vst [vmem:[#allocation2 + $0x209] sm:$0xff] %v298_v33  ;;  %598 = vst [vmem:[#allocation2 + $0x211] sm:$0xff] %v299_v34  ;;  %v2306_v56 = vld [vmem:[#allocation2 + $0x102] sm:$0xff]  ;;  %v2307_v57 = vld [vmem:[#allocation2 + $0x10a] sm:$0xff] }
  0x84   : > { %599 = vst [vmem:[#allocation2 + $0x219] sm:$0xff] %v300_v35  ;;  %600 = vst [vmem:[#allocation2 + $0x221] sm:$0xff] %v301_v36  ;;  %v313_v58 = vld [vmem:[%s19716_s19 + $0x1f8] sm:$0xff]  ;;  %v3210_v59 = vld [vmem:[#allocation2 + $0x28] sm:$0xff]  ;;  %v2421_v61 = vpack.c.bf16 %v2307_v57, %v2306_v56 }
  0x85   : > { %601 = vst [vmem:[#allocation2 + $0x231] sm:$0xff] %v302_v37  ;;  %602 = vst [vmem:[#allocation2 + $0x239] sm:$0xff] %v303_v39  ;;  %v3211_v60 = vld [vmem:[#allocation2 + $0x30] sm:$0xff]  ;;  %v314_v62 = vld [vmem:[%s19716_s19 + $0x200] sm:$0xff] }
  0x86   : > { %603 = vst [vmem:[#allocation2 + $0x241] sm:$0xff] %v304_v40  ;;  %604 = vst [vmem:[#allocation2 + $0x249] sm:$0xff] %v305_v41  ;;  %v315_v63 = vld [vmem:[%s19716_s19 + $0x208] sm:$0xff]  ;;  %v3338_v0 = vpack.c.bf16 %v3211_v60, %v3210_v59  ;;  %v316_v1 = vld [vmem:[%s19716_s19 + $0x210] sm:$0xff] }
  0x87   : > { %15949 = vmatmul.mubr.bf16.gmra.mrb[12].mxu0 %v2415_v22  ;;  %605 = vst [vmem:[#allocation2 + $0x259] sm:$0xff] %v306_v43  ;;  %606 = vst [vmem:[#allocation2 + $0x261] sm:$0xff] %v307_v44  ;;  %v317_v2 = vld [vmem:[%s19716_s19 + $0x218] sm:$0xff]  ;;  %v3213_v4 = vld [vmem:[#allocation2 + $0x40] sm:$0xff] }
  0x88   : > { %15952 = vmatprep.mubr.bf16.mxu0 %v2416_v23  ;;  %607 = vst [vmem:[#allocation2 + $0x269] sm:$0xff] %v308_v45  ;;  %608 = vst [vmem:[#allocation2 + $0x271] sm:$0xff] %v309_v46  ;;  %v3212_v3 = vld [vmem:[#allocation2 + $0x38] sm:$0xff]  ;;  %v3214_v5 = vld [vmem:[#allocation2 + $0x50] sm:$0xff] }
  0x89   : > { %609 = vst [vmem:[#allocation2 + $0x281] sm:$0xff] %v310_v53  ;;  %610 = vst [vmem:[#allocation2 + $0x289] sm:$0xff] %v311_v54  ;;  %v3215_v6 = vld [vmem:[#allocation2 + $0x58] sm:$0xff]  ;;  %v3339_v7 = vpack.c.bf16 %v3213_v4, %v3212_v3  ;;  %v318_v8 = vld [vmem:[%s19716_s19 + $0x220] sm:$0xff] }
  0x8a   : > { %611 = vst [vmem:[#allocation2 + $0x291] sm:$0xff] %v312_v55  ;;  %612 = vst [vmem:[#allocation2 + $0x299] sm:$0xff] %v313_v58  ;;  %v3340_v9 = vpack.c.bf16 %v3215_v6, %v3214_v5  ;;  %v319_v10 = vld [vmem:[%s19716_s19 + $0x228] sm:$0xff]  ;;  %v320_v11 = vld [vmem:[%s19716_s19 + $0x230] sm:$0xff] }
  0x8b   : > { %613 = vst [vmem:[#allocation2 + $0x2a9] sm:$0xff] %v314_v62  ;;  %614 = vst [vmem:[#allocation2 + $0x2b1] sm:$0xff] %v315_v63  ;;  %v19054_v12 = vld [vmem:[%s22321_s1 + $0x108] sm:$0xff]   ;;  %v321_v13 = vld [vmem:[%s19716_s19 + $0x238] sm:$0xff] }
  0x8c   : > { %615 = vst [vmem:[#allocation2 + $0x2b9] sm:$0xff] %v316_v1  ;;  %616 = vst [vmem:[#allocation2 + $0x2c1] sm:$0xff] %v317_v2  ;;  %v3216_v14 = vld [vmem:[#allocation2 + $0x60] sm:$0xff]  ;;  %v3217_v15 = vld [vmem:[#allocation2 + $0x68] sm:$0xff] }
  0x8d   : > { %617 = vst [vmem:[#allocation2 + $0x2d1] sm:$0xff] %v318_v8  ;;  %618 = vst [vmem:[#allocation2 + $0x2d9] sm:$0xff] %v319_v10  ;;  %v3218_v16 = vld [vmem:[#allocation2 + $0x78] sm:$0xff]  ;;  %v3219_v17 = vld [vmem:[#allocation2 + $0x80] sm:$0xff]  ;;  %v3341_v19 = vpack.c.bf16 %v3217_v15, %v3216_v14 }
  0x8e   : > { %619 = vst [vmem:[#allocation2 + $0x2e1] sm:$0xff] %v320_v11  ;;  %620 = vst [vmem:[#allocation2 + $0x2e9] sm:$0xff] %v321_v13  ;;  %v19055_v18 = vld [vmem:[%s22321_s1 + $0x110] sm:$0xff]   ;;  %v322_v20 = vld [vmem:[%s19716_s19 + $0x240] sm:$0xff]  ;;  %v3342_v22 = vpack.c.bf16 %v3219_v17, %v3218_v16 }
  0x8f   : > { %15953 = vmatmul.mubr.bf16.gmra.mrb[16].mxu0 %v2417_v38  ;;  %v323_v21 = vld [vmem:[%s19716_s19 + $0x248] sm:$0xff]  ;;  %621 = vst [vmem:[#allocation2 + $0x2f9] sm:$0xff] %v322_v20  ;;  %v324_v23 = vld [vmem:[%s19716_s19 + $0x250] sm:$0xff]  ;;  %v19056_v24 = vld [vmem:[%s22321_s1 + $0x118] sm:$0xff]  }
  0x90   : > { %15956 = vmatprep.mubr.bf16.mxu0 %v2418_v42  ;;  %622 = vst [vmem:[#allocation2 + $0x301] sm:$0xff] %v323_v21  ;;  %v325_v25 = vld [vmem:[%s19716_s19 + $0x258] sm:$0xff]  ;;  %623 = vst [vmem:[#allocation2 + $0x309] sm:$0xff] %v324_v23  ;;  %v3220_v26 = vld [vmem:[#allocation2 + $0x88] sm:$0xff] }
  0x91   : > { %v3221_v27 = vld [vmem:[#allocation2 + $0x90] sm:$0xff]  ;;  %624 = vst [vmem:[#allocation2 + $0x311] sm:$0xff] %v325_v25  ;;  %v3222_v28 = vld [vmem:[#allocation2 + $0xa0] sm:$0xff]  ;;  %v3223_v29 = vld [vmem:[#allocation2 + $0xa8] sm:$0xff] }
  0x92   : > { %v19057_v30 = vld [vmem:[%s22321_s1 + $0x120] sm:$0xff]   ;;  %v3343_v31 = vpack.c.bf16 %v3221_v27, %v3220_v26  ;;  %v3344_v33 = vpack.c.bf16 %v3223_v29, %v3222_v28  ;;  %v327_v34 = vld [vmem:[%s19716_s19 + $0x268] sm:$0xff]  ;;  %v328_v35 = vld [vmem:[%s19716_s19 + $0x270] sm:$0xff] }
  0x93   : > { %626 = vst [vmem:[#allocation2 + $0x329] sm:$0xff] %v327_v34  ;;  %v329_v36 = vld [vmem:[%s19716_s19 + $0x278] sm:$0xff]  ;;  %627 = vst [vmem:[#allocation2 + $0x331] sm:$0xff] %v328_v35  ;;  %v3224_v37 = vld [vmem:[#allocation2 + $0xb0] sm:$0xff] }
  0x94   : > { %v3225_v38 = vld [vmem:[#allocation2 + $0xb8] sm:$0xff]  ;;  %628 = vst [vmem:[#allocation2 + $0x339] sm:$0xff] %v329_v36  ;;  %v3226_v39 = vld [vmem:[#allocation2 + $0xc8] sm:$0xff]  ;;  %v3227_v40 = vld [vmem:[#allocation2 + $0xd0] sm:$0xff] }
  0x95   : > { %v3345_v41 = vpack.c.bf16 %v3225_v38, %v3224_v37  ;;  %v330_v42 = vld [vmem:[%s19716_s19 + $0x280] sm:$0xff]  ;;  %v331_v43 = vld [vmem:[%s19716_s19 + $0x288] sm:$0xff]  ;;  %v3346_v44 = vpack.c.bf16 %v3227_v40, %v3226_v39  ;;  %v332_v45 = vld [vmem:[%s19716_s19 + $0x290] sm:$0xff] }
  0x96   : > { %629 = vst [vmem:[#allocation2 + $0x349] sm:$0xff] %v330_v42  ;;  %630 = vst [vmem:[#allocation2 + $0x351] sm:$0xff] %v331_v43  ;;  %v333_v46 = vld [vmem:[%s19716_s19 + $0x298] sm:$0xff]  ;;  %v3229_v48 = vld [vmem:[#allocation2 + $0xe0] sm:$0xff] }
  0x97   : > { %15957 = vmatmul.mubr.bf16.gmra.mrb[20].mxu0 %v2419_v51  ;;  %631 = vst [vmem:[#allocation2 + $0x359] sm:$0xff] %v332_v45  ;;  %v3228_v47 = vld [vmem:[#allocation2 + $0xd8] sm:$0xff]  ;;  %632 = vst [vmem:[#allocation2 + $0x361] sm:$0xff] %v333_v46  ;;  %v3230_v49 = vld [vmem:[#allocation2 + $0xf0] sm:$0xff] }
  0x98   : > { %15960 = vmatprep.mubr.bf16.mxu0 %v2420_v52  ;;  %v3231_v50 = vld [vmem:[#allocation2 + $0xf8] sm:$0xff]  ;;  %v3347_v51 = vpack.c.bf16 %v3229_v48, %v3228_v47  ;;  %v334_v52 = vld [vmem:[%s19716_s19 + $0x2a0] sm:$0xff]  ;;  %v335_v54 = vld [vmem:[%s19716_s19 + $0x2a8] sm:$0xff] }
  0x99   : > { %v3348_v53 = vpack.c.bf16 %v3231_v50, %v3230_v49  ;;  %633 = vst [vmem:[#allocation2 + $0x371] sm:$0xff] %v334_v52  ;;  %v336_v55 = vld [vmem:[%s19716_s19 + $0x2b0] sm:$0xff]  ;;  %634 = vst [vmem:[#allocation2 + $0x379] sm:$0xff] %v335_v54  ;;  %v337_v56 = vld [vmem:[%s19716_s19 + $0x2b8] sm:$0xff] }
  0x9a   : > { %635 = vst [vmem:[#allocation2 + $0x381] sm:$0xff] %v336_v55  ;;  %v3232_v57 = vld [vmem:[#allocation2 + $0x100] sm:$0xff]  ;;  %v3233_v58 = vld [vmem:[#allocation2 + $0x108] sm:$0xff]  ;;  %636 = vst [vmem:[#allocation2 + $0x389] sm:$0xff] %v337_v56 }
  0x9b   : > { %v3234_v59 = vld [vmem:[#allocation2 + $0x118] sm:$0xff]  ;;  %v3235_v60 = vld [vmem:[#allocation2 + $0x120] sm:$0xff]  ;;  %v3349_v62 = vpack.c.bf16 %v3233_v58, %v3232_v57  ;;  %v340_v2 = vld [vmem:[%s19716_s19 + $0x2d0] sm:$0xff] }
  0x9c   : > { %v338_v63 = vld [vmem:[%s19716_s19 + $0x2c0] sm:$0xff]  ;;  %v3350_v1 = vpack.c.bf16 %v3235_v60, %v3234_v59  ;;  %v341_v3 = vld [vmem:[%s19716_s19 + $0x2d8] sm:$0xff]  ;;  %639 = vst [vmem:[#allocation2 + $0x3a9] sm:$0xff] %v340_v2  ;;  %v3236_v4 = vld [vmem:[#allocation2 + $0x128] sm:$0xff] }
  0x9d   : > { %637 = vst [vmem:[#allocation2 + $0x399] sm:$0xff] %v338_v63  ;;  %v3237_v5 = vld [vmem:[#allocation2 + $0x130] sm:$0xff]  ;;  %640 = vst [vmem:[#allocation2 + $0x3b1] sm:$0xff] %v341_v3  ;;  %v3238_v6 = vld [vmem:[#allocation2 + $0x140] sm:$0xff] }
  0x9e   : > { %v3351_v8 = vpack.c.bf16 %v3237_v5, %v3236_v4  ;;  %v343_v11 = vld [vmem:[%s19716_s19 + $0x2e8] sm:$0xff]  ;;  %v345_v13 = vld [vmem:[%s19716_s19 + $0x2f8] sm:$0xff]  ;;  %v3240_v14 = vld [vmem:[#allocation2 + $0x150] sm:$0xff] }
  0x9f   : > { %15961 = vmatmul.mubr.bf16.gmra.mrb[24].mxu0 %v2421_v61  ;;  %v19058_v61 = vld [vmem:[%s22321_s1 + $0x128] sm:$0xff]   ;;  %642 = vst [vmem:[#allocation2 + $0x3c9] sm:$0xff] %v343_v11  ;;  %v3241_v15 = vld [vmem:[#allocation2 + $0x158] sm:$0xff]  ;;  %644 = vst [vmem:[#allocation2 + $0x3d9] sm:$0xff] %v345_v13 }
  0xa0   : > { %16080 = vmatprep.mubr.bf16.mxu0 %v3338_v0  ;;  %v339_v0 = vld [vmem:[%s19716_s19 + $0x2c8] sm:$0xff]  ;;  %v3243_v17 = vld [vmem:[#allocation2 + $0x170] sm:$0xff]  ;;  %v349_v23 = vld [vmem:[%s19716_s19 + $0x318] sm:$0xff] }
  0xa1   : > { %638 = vst [vmem:[#allocation2 + $0x3a1] sm:$0xff] %v339_v0  ;;  %v3242_v16 = vld [vmem:[#allocation2 + $0x168] sm:$0xff]  ;;  %v3245_v25 = vld [vmem:[#allocation2 + $0x180] sm:$0xff]  ;;  %648 = vst [vmem:[#allocation2 + $0x401] sm:$0xff] %v349_v23 }
  0xa2   : > { %v347_v20 = vld [vmem:[%s19716_s19 + $0x308] sm:$0xff]  ;;  %v3354_v21 = vpack.c.bf16 %v3243_v17, %v3242_v16  ;;  %v3246_v26 = vld [vmem:[#allocation2 + $0x190] sm:$0xff]  ;;  %v3247_v27 = vld [vmem:[#allocation2 + $0x198] sm:$0xff] }
  0xa3   : > { %646 = vst [vmem:[#allocation2 + $0x3f1] sm:$0xff] %v347_v20  ;;  %v350_v29 = vld [vmem:[%s19716_s19 + $0x320] sm:$0xff]  ;;  %v3249_v35 = vld [vmem:[#allocation2 + $0x1a8] sm:$0xff]  ;;  %v3250_v36 = vld [vmem:[#allocation2 + $0x1b8] sm:$0xff] }
  0xa4   : > { %649 = vst [vmem:[#allocation2 + $0x411] sm:$0xff] %v350_v29  ;;  %v3248_v34 = vld [vmem:[#allocation2 + $0x1a0] sm:$0xff]  ;;  %v19059_v38 = vld [vmem:[%s22321_s1 + $0x130] sm:$0xff]   ;;  %v3252_v45 = vld [vmem:[#allocation2 + $0x1c8] sm:$0xff] }
  0xa5   : > { %v3251_v37 = vld [vmem:[#allocation2 + $0x1c0] sm:$0xff]  ;;  %v3357_v39 = vpack.c.bf16 %v3249_v35, %v3248_v34  ;;  %v356_v43 = vld [vmem:[%s19716_s19 + $0x350] sm:$0xff]  ;;  %v3255_v48 = vld [vmem:[#allocation2 + $0x1e8] sm:$0xff] }
  0xa6   : > { %v354_v40 = vld [vmem:[%s19716_s19 + $0x340] sm:$0xff]  ;;  %v3358_v42 = vpack.c.bf16 %v3251_v37, %v3250_v36  ;;  %655 = vst [vmem:[#allocation2 + $0x449] sm:$0xff] %v356_v43  ;;  %v3253_v46 = vld [vmem:[#allocation2 + $0x1d0] sm:$0xff]  ;;  %v359_v52 = vld [vmem:[%s19716_s19 + $0x368] sm:$0xff] }
  0xa7   : > { %16081 = vmatmul.mubr.bf16.vlgmr.msra.gmra.mrb[0].mxu0 %v3339_v7  ;;  %v3239_v7 = vld [vmem:[#allocation2 + $0x148] sm:$0xff]  ;;  %653 = vst [vmem:[#allocation2 + $0x439] sm:$0xff] %v354_v40  ;;  %v3254_v47 = vld [vmem:[#allocation2 + $0x1e0] sm:$0xff]  ;;  %v3359_v49 = vpack.c.bf16 %v3253_v46, %v3252_v45  ;;  %658 = vst [vmem:[#allocation2 + $0x469] sm:$0xff] %v359_v52 }
  0xa8   : > { %16209 = vmatpush3.bf16.msra.mxu0 %v19808_v32  ;;  %16084 = vmatprep.mubr.bf16.mxu0 %v3340_v9  ;;  %v326_v32 = vld [vmem:[%s19716_s19 + $0x260] sm:$0xff]  ;;  %v3352_v10 = vpack.c.bf16 %v3239_v7, %v3238_v6  ;;  %v361_v54 = vld [vmem:[%s19716_s19 + $0x378] sm:$0xff]  ;;  %v3256_v55 = vld [vmem:[#allocation2 + $0x1f0] sm:$0xff] }
  0xa9   : > { %16210 = vmatprep.subr.bf16.mxu0 %v19054_v12  ;;  %625 = vst [vmem:[#allocation2 + $0x321] sm:$0xff] %v326_v32  ;;  %v342_v9 = vld [vmem:[%s19716_s19 + $0x2e0] sm:$0xff]  ;;  %v352_v32 = vld [vmem:[%s19716_s19 + $0x330] sm:$0xff]  ;;  %v3257_v56 = vld [vmem:[#allocation2 + $0x1f8] sm:$0xff] }
  0xaa   : > { %641 = vst [vmem:[#allocation2 + $0x3c1] sm:$0xff] %v342_v9  ;;  %651 = vst [vmem:[#allocation2 + $0x421] sm:$0xff] %v352_v32  ;;  %v358_v50 = vld [vmem:[%s19716_s19 + $0x360] sm:$0xff]  ;;  %v3258_v57 = vld [vmem:[#allocation2 + $0x208] sm:$0xff]  ;;  %v3361_v59 = vpack.c.bf16 %v3257_v56, %v3256_v55 }
  0xab   : > { %657 = vst [vmem:[#allocation2 + $0x461] sm:$0xff] %v358_v50  ;;  %660 = vst [vmem:[#allocation2 + $0x479] sm:$0xff] %v361_v54  ;;  %v3259_v58 = vld [vmem:[#allocation2 + $0x210] sm:$0xff]  ;;  %v362_v60 = vld [vmem:[%s19716_s19 + $0x380] sm:$0xff] }
  0xac   : > { %16211 = vmatpush3.bf16.msra.mxu0 %v19054_v12  ;;  %v344_v12 = vld [vmem:[%s19716_s19 + $0x2f0] sm:$0xff]  ;;  %661 = vst [vmem:[#allocation2 + $0x489] sm:$0xff] %v362_v60  ;;  %v365_v0 = vld [vmem:[%s19716_s19 + $0x398] sm:$0xff]  ;;  %v3261_v2 = vld [vmem:[#allocation2 + $0x220] sm:$0xff] }
  0xad   : > { %16212 = vmatprep.subr.bf16.mxu0 %v19055_v18  ;;  %643 = vst [vmem:[#allocation2 + $0x3d1] sm:$0xff] %v344_v12  ;;  %v364_v63 = vld [vmem:[%s19716_s19 + $0x390] sm:$0xff]  ;;  %664 = vst [vmem:[#allocation2 + $0x4a1] sm:$0xff] %v365_v0  ;;  %v3263_v4 = vld [vmem:[#allocation2 + $0x238] sm:$0xff] }
  0xae   : > { %663 = vst [vmem:[#allocation2 + $0x499] sm:$0xff] %v364_v63  ;;  %v3262_v3 = vld [vmem:[#allocation2 + $0x230] sm:$0xff]  ;;  %v366_v6 = vld [vmem:[%s19716_s19 + $0x3a0] sm:$0xff]  ;;  %v3265_v12 = vld [vmem:[#allocation2 + $0x248] sm:$0xff] }
  0xaf   : > { %16085 = vmatmul.mubr.bf16.gmra.mrb[4].mxu0 %v3341_v19  ;;  %v346_v19 = vld [vmem:[%s19716_s19 + $0x300] sm:$0xff]  ;;  %v3364_v7 = vpack.c.bf16 %v3263_v4, %v3262_v3  ;;  %665 = vst [vmem:[#allocation2 + $0x4b1] sm:$0xff] %v366_v6  ;;  %v368_v9 = vld [vmem:[%s19716_s19 + $0x3b0] sm:$0xff]  ;;  %v3266_v13 = vld [vmem:[#allocation2 + $0x258] sm:$0xff] }
  0xb0   : > { %16088 = vmatprep.mubr.bf16.mxu0 %v3342_v22  ;;  %16213 = vmatpush3.bf16.msra.mxu0 %v19055_v18  ;;  %v3353_v18 = vpack.c.bf16 %v3241_v15, %v3240_v14  ;;  %645 = vst [vmem:[#allocation2 + $0x3e9] sm:$0xff] %v346_v19  ;;  %v348_v22 = vld [vmem:[%s19716_s19 + $0x310] sm:$0xff]  ;;  %667 = vst [vmem:[#allocation2 + $0x4c1] sm:$0xff] %v368_v9  ;;  %v3264_v11 = vld [vmem:[#allocation2 + $0x240] sm:$0xff] }
  0xb1   : > { %16214 = vmatprep.subr.bf16.mxu0 %v19056_v24  ;;  %647 = vst [vmem:[#allocation2 + $0x3f9] sm:$0xff] %v348_v22  ;;  %v3267_v14 = vld [vmem:[#allocation2 + $0x260] sm:$0xff]  ;;  %v19060_v15 = vld [vmem:[%s22321_s1 + $0x138] sm:$0xff]   ;;  %v3365_v16 = vpack.c.bf16 %v3265_v12, %v3264_v11  ;;  %v372_v20 = vld [vmem:[%s19716_s19 + $0x3d0] sm:$0xff] }
  0xb2   : > { %v370_v17 = vld [vmem:[%s19716_s19 + $0x3c0] sm:$0xff]  ;;  %v3366_v19 = vpack.c.bf16 %v3267_v14, %v3266_v13  ;;  %671 = vst [vmem:[#allocation2 + $0x4e9] sm:$0xff] %v372_v20  ;;  %v3268_v22 = vld [vmem:[#allocation2 + $0x268] sm:$0xff]  ;;  %v3269_v23 = vld [vmem:[#allocation2 + $0x270] sm:$0xff] }
  0xb3   : > { %669 = vst [vmem:[#allocation2 + $0x4d9] sm:$0xff] %v370_v17  ;;  %v375_v29 = vld [vmem:[%s19716_s19 + $0x3e8] sm:$0xff]  ;;  %v3272_v32 = vld [vmem:[#allocation2 + $0x290] sm:$0xff]  ;;  %v3280_v45 = vld [vmem:[#allocation2 + $0x2e0] sm:$0xff] }
  0xb4   : > { %16215 = vmatpush3.bf16.msra.mxu0 %v19056_v24  ;;  %v3244_v24 = vld [vmem:[#allocation2 + $0x178] sm:$0xff]  ;;  %674 = vst [vmem:[#allocation2 + $0x509] sm:$0xff] %v375_v29  ;;  %v3274_v34 = vld [vmem:[#allocation2 + $0x2a8] sm:$0xff]  ;;  %v3275_v35 = vld [vmem:[#allocation2 + $0x2b0] sm:$0xff] }
  0xb5   : > { %16216 = vmatprep.subr.bf16.mxu0 %v19057_v30  ;;  %v3355_v28 = vpack.c.bf16 %v3245_v25, %v3244_v24  ;;  %v3270_v24 = vld [vmem:[#allocation2 + $0x280] sm:$0xff]  ;;  %v3271_v25 = vld [vmem:[#allocation2 + $0x288] sm:$0xff]  ;;  %v3370_v37 = vpack.c.bf16 %v3275_v35, %v3274_v34  ;;  %v3278_v40 = vld [vmem:[#allocation2 + $0x2d0] sm:$0xff] }
  0xb6   : > { %v3281_v46 = vld [vmem:[#allocation2 + $0x2e8] sm:$0xff]  ;;  %v3285_v52 = vld [vmem:[#allocation2 + $0x310] sm:$0xff]  ;;  %v3292_v63 = vld [vmem:[#allocation2 + $0x358] sm:$0xff] }
  0xb7   : > { %16089 = vmatmul.mubr.bf16.gmra.mrb[8].mxu0 %v3343_v31  ;;  %v351_v31 = vld [vmem:[%s19716_s19 + $0x328] sm:$0xff]  ;;  %v3291_v60 = vld [vmem:[#allocation2 + $0x350] sm:$0xff]  ;;  %v3293_v0 = vld [vmem:[#allocation2 + $0x360] sm:$0xff] }
  0xb8   : > { %16092 = vmatprep.mubr.bf16.mxu0 %v3344_v33  ;;  %16217 = vmatpush3.bf16.msra.mxu0 %v19057_v30  ;;  %v3356_v30 = vpack.c.bf16 %v3247_v27, %v3246_v26  ;;  %650 = vst [vmem:[#allocation2 + $0x419] sm:$0xff] %v351_v31  ;;  %v353_v33 = vld [vmem:[%s19716_s19 + $0x338] sm:$0xff]  ;;  %v3367_v26 = vpack.c.bf16 %v3269_v23, %v3268_v22  ;;  %v374_v27 = vld [vmem:[%s19716_s19 + $0x3e0] sm:$0xff]  ;;  %v3287_v54 = vld [vmem:[#allocation2 + $0x328] sm:$0xff] }
  0xb9   : > { %16218 = vmatprep.subr.bf16.mxu0 %v19058_v61  ;;  %652 = vst [vmem:[#allocation2 + $0x429] sm:$0xff] %v353_v33  ;;  %673 = vst [vmem:[#allocation2 + $0x501] sm:$0xff] %v374_v27  ;;  %v377_v31 = vld [vmem:[%s19716_s19 + $0x3f8] sm:$0xff]  ;;  %v3379_v3 = vpack.c.bf16 %v3293_v0, %v3292_v63  ;;  %v3297_v6 = vld [vmem:[#allocation2 + $0x388] sm:$0xff] }
  0xba   : > { %v3273_v33 = vld [vmem:[#allocation2 + $0x298] sm:$0xff]  ;;  %676 = vst [vmem:[#allocation2 + $0x519] sm:$0xff] %v377_v31  ;;  %v3300_v11 = vld [vmem:[#allocation2 + $0x3a8] sm:$0xff]  ;;  %v3301_v12 = vld [vmem:[#allocation2 + $0x3b0] sm:$0xff] }
  0xbb   : > { %v3369_v36 = vpack.c.bf16 %v3273_v33, %v3272_v32  ;;  %v3302_v13 = vld [vmem:[#allocation2 + $0x3c0] sm:$0xff]  ;;  %v3303_v14 = vld [vmem:[#allocation2 + $0x3c8] sm:$0xff]  ;;  %v3304_v17 = vld [vmem:[#allocation2 + $0x3d0] sm:$0xff] }
  0xbc   : > { %16219 = vmatpush3.bf16.msra.mxu0 %v19058_v61  ;;  %v363_v61 = vld [vmem:[%s19716_s19 + $0x388] sm:$0xff]  ;;  %v3307_v20 = vld [vmem:[#allocation2 + $0x3f0] sm:$0xff]  ;;  %v3308_v23 = vld [vmem:[#allocation2 + $0x3f8] sm:$0xff] }
  0xbd   : > { %16220 = vmatprep.subr.bf16.mxu0 %v19059_v38  ;;  %662 = vst [vmem:[#allocation2 + $0x491] sm:$0xff] %v363_v61  ;;  %v3314_v31 = vld [vmem:[#allocation2 + $0x438] sm:$0xff]  ;;  %v19064_v35 = vld [vmem:[%s22321_s1 + $0x40] sm:$0xff]  }
  0xbe   : > { %15632 = vmatprep.subr.bf16.mxu1 %v19064_v35  ;;  %v3330_v63 = vld [vmem:[#allocation2 + $0x4d8] sm:$0xff] }
  0xbf   : > { %16093 = vmatmul.mubr.bf16.gmra.mrb[12].mxu0 %v3345_v41  ;;  %v355_v41 = vld [vmem:[%s19716_s19 + $0x348] sm:$0xff]  ;;  %v3312_v29 = vld [vmem:[#allocation2 + $0x420] sm:$0xff]  ;;  %15633 = vmatpush3.bf16.msra.mxu1 %v19064_v35 }
  0xc0   : > { %16096 = vmatprep.mubr.bf16.mxu0 %v3346_v44  ;;  %16221 = vmatpush3.bf16.msra.mxu0 %v19059_v38  ;;  %654 = vst [vmem:[#allocation2 + $0x441] sm:$0xff] %v355_v41  ;;  %v357_v44 = vld [vmem:[%s19716_s19 + $0x358] sm:$0xff]  ;;  %v19062_v35 = vld [vmem:[%s22321_s1 + $0x148] sm:$0xff]  }
  0xc1   : > { %656 = vst [vmem:[#allocation2 + $0x451] sm:$0xff] %v357_v44  ;;  %16222 = vmatprep.subr.bf16.mxu0 %v19060_v15  ;;  %v3276_v38 = vld [vmem:[#allocation2 + $0x2b8] sm:$0xff]  ;;  %v19916_v44 = vld [vmem:[%s22321_s1 + $0x140] sm:$0xff]  }
  0xc2   : > { %v3279_v41 = vld [vmem:[#allocation2 + $0x2d8] sm:$0xff] }
  0xc3   : > { %v3372_v43 = vpack.c.bf16 %v3279_v41, %v3278_v40 }
  0xc4   : > { %16223 = vmatpush3.bf16.msra.mxu0 %v19060_v15  ;;  %v3383_v15 = vpack.c.bf16 %v3301_v12, %v3300_v11  ;;  %v888_v12 = vld [vmem:[#allocation2 + $0x19] sm:$0xff] }
  0xc5   : > { %16352 = vmatprep.subr.bf16.mxu0 %v19916_v44 }
  0xc7   : > { %16097 = vmatmul.mubr.bf16.gmra.mrb[16].mxu0 %v3347_v51  ;;  %v3360_v51 = vpack.c.bf16 %v3255_v48, %v3254_v47  ;;  %v3282_v47 = vld [vmem:[#allocation2 + $0x2f8] sm:$0xff]  ;;  %v3283_v48 = vld [vmem:[#allocation2 + $0x300] sm:$0xff] }
  0xc8   : > { %16100 = vmatprep.mubr.bf16.mxu0 %v3348_v53  ;;  %v360_v53 = vld [vmem:[%s19716_s19 + $0x370] sm:$0xff]  ;;  %v3374_v50 = vpack.c.bf16 %v3283_v48, %v3282_v47  ;;  %v3315_v32 = vld [vmem:[#allocation2 + $0x440] sm:$0xff]  ;;  %v3322_v47 = vld [vmem:[#allocation2 + $0x488] sm:$0xff] }
  0xc9   : > { %659 = vst [vmem:[#allocation2 + $0x471] sm:$0xff] %v360_v53  ;;  %v3286_v53 = vld [vmem:[#allocation2 + $0x320] sm:$0xff]  ;;  %v3390_v34 = vpack.c.bf16 %v3315_v32, %v3314_v31  ;;  %v3323_v48 = vld [vmem:[#allocation2 + $0x490] sm:$0xff] }
  0xca   : > { %v3376_v56 = vpack.c.bf16 %v3287_v54, %v3286_v53  ;;  %v3324_v53 = vld [vmem:[#allocation2 + $0x498] sm:$0xff]  ;;  %v3325_v54 = vld [vmem:[#allocation2 + $0x4a0] sm:$0xff] }
  0xcb   : > { %v4148_v31 = vld [vmem:[#allocation2 + $0x79] sm:$0xff]  ;;  %v4149_v32 = vld [vmem:[#allocation2 + $0x81] sm:$0xff] }
  0xcf   : > { %16101 = vmatmul.mubr.bf16.gmra.mrb[20].mxu0 %v3349_v62  ;;  %v3362_v62 = vpack.c.bf16 %v3259_v58, %v3258_v57  ;;  %v3288_v57 = vld [vmem:[#allocation2 + $0x330] sm:$0xff]  ;;  %v3289_v58 = vld [vmem:[#allocation2 + $0x338] sm:$0xff] }
  0xd0   : > { %16104 = vmatprep.mubr.bf16.mxu0 %v3350_v1  ;;  %v3260_v1 = vld [vmem:[#allocation2 + $0x218] sm:$0xff]  ;;  %v3377_v61 = vpack.c.bf16 %v3289_v58, %v3288_v57  ;;  %v3395_v57 = vpack.c.bf16 %v3325_v54, %v3324_v53 }
  0xd1   : > { %v3363_v5 = vpack.c.bf16 %v3261_v2, %v3260_v1  ;;  %v3294_v1 = vld [vmem:[#allocation2 + $0x370] sm:$0xff]  ;;  %v3295_v2 = vld [vmem:[#allocation2 + $0x378] sm:$0xff] }
  0xd2   : > { %v3380_v4 = vpack.c.bf16 %v3295_v2, %v3294_v1  ;;  %v4160_v53 = vld [vmem:[#allocation2 + $0xf1] sm:$0xff]  ;;  %v4161_v54 = vld [vmem:[#allocation2 + $0xf9] sm:$0xff] }
  0xd7   : > { %16105 = vmatmul.mubr.bf16.gmra.mrb[24].mxu0 %v3351_v8  ;;  %v367_v8 = vld [vmem:[%s19716_s19 + $0x3a8] sm:$0xff] }
  0xd8   : > { %16108 = vmatprep.mubr.bf16.mxu0 %v3352_v10  ;;  %666 = vst [vmem:[#allocation2 + $0x4b9] sm:$0xff] %v367_v8  ;;  %v369_v10 = vld [vmem:[%s19716_s19 + $0x3b8] sm:$0xff]  ;;  %v3299_v8 = vld [vmem:[#allocation2 + $0x3a0] sm:$0xff] }
  0xd9   : > { %668 = vst [vmem:[#allocation2 + $0x4c9] sm:$0xff] %v369_v10 }
  0xdf   : > { %16109 = vmatmul.mubr.bf16.gmra.mrb[28].mxu0 %v3353_v18  ;;  %v371_v18 = vld [vmem:[%s19716_s19 + $0x3c8] sm:$0xff] }
  0xe0   : > { %16112 = vmatprep.mubr.bf16.mxu0 %v3354_v21  ;;  %670 = vst [vmem:[#allocation2 + $0x4e1] sm:$0xff] %v371_v18  ;;  %v373_v21 = vld [vmem:[%s19716_s19 + $0x3d8] sm:$0xff] }
  0xe1   : > { %672 = vst [vmem:[#allocation2 + $0x4f1] sm:$0xff] %v373_v21  ;;  %v3305_v18 = vld [vmem:[#allocation2 + $0x3d8] sm:$0xff] }
  0xe2   : > { %v3385_v21 = vpack.c.bf16 %v3305_v18, %v3304_v17 }
  0xe7   : > { %16113 = vmatmul.mubr.bf16.gmra.mrb[32].mxu0 %v3355_v28  ;;  %v3368_v28 = vpack.c.bf16 %v3271_v25, %v3270_v24  ;;  %v3309_v24 = vld [vmem:[#allocation2 + $0x400] sm:$0xff]  ;;  %v3310_v25 = vld [vmem:[#allocation2 + $0x410] sm:$0xff] }
  0xe8   : > { %16116 = vmatprep.mubr.bf16.mxu0 %v3356_v30  ;;  %v376_v30 = vld [vmem:[%s19716_s19 + $0x3f0] sm:$0xff]  ;;  %v3387_v27 = vpack.c.bf16 %v3309_v24, %v3308_v23  ;;  %v3331_v0 = vld [vmem:[#allocation2 + $0x4e0] sm:$0xff] }
  0xe9   : > { %675 = vst [vmem:[#allocation2 + $0x511] sm:$0xff] %v376_v30  ;;  %v3313_v30 = vld [vmem:[#allocation2 + $0x428] sm:$0xff]  ;;  %v3398_v2 = vpack.c.bf16 %v3331_v0, %v3330_v63  ;;  %v4144_v24 = vld [vmem:[#allocation2 + $0x51] sm:$0xff] }
  0xea   : > { %v3389_v33 = vpack.c.bf16 %v3313_v30, %v3312_v29  ;;  %v4146_v29 = vld [vmem:[#allocation2 + $0x61] sm:$0xff]  ;;  %v4147_v30 = vld [vmem:[#allocation2 + $0x69] sm:$0xff] }
  0xeb   : > { %v915_v0 = vld [vmem:[#allocation2 + $0x129] sm:$0xff] }
  0xef   : > { %16117 = vmatmul.mubr.bf16.gmra.mrb[36].mxu0 %v3357_v39  ;;  %v3277_v39 = vld [vmem:[#allocation2 + $0x2c0] sm:$0xff] }
  0xf0   : > { %16120 = vmatprep.mubr.bf16.mxu0 %v3358_v42  ;;  %v3371_v42 = vpack.c.bf16 %v3277_v39, %v3276_v38  ;;  %v3318_v38 = vld [vmem:[#allocation2 + $0x460] sm:$0xff]  ;;  %v3319_v39 = vld [vmem:[#allocation2 + $0x468] sm:$0xff]  ;;  %v3337_v23 = vld [vmem:[#allocation2 + $0x518] sm:$0xff] }
  0xf1   : > { %v3392_v41 = vpack.c.bf16 %v3319_v39, %v3318_v38  ;;  %v4152_v38 = vld [vmem:[#allocation2 + $0xa1] sm:$0xff]  ;;  %v4153_v39 = vld [vmem:[#allocation2 + $0xa9] sm:$0xff] }
  0xf7   : > { %16121 = vmatmul.mubr.bf16.gmra.mrb[40].mxu0 %v3359_v49  ;;  %v3373_v49 = vpack.c.bf16 %v3281_v46, %v3280_v45  ;;  %v3320_v45 = vld [vmem:[#allocation2 + $0x470] sm:$0xff]  ;;  %v3321_v46 = vld [vmem:[#allocation2 + $0x478] sm:$0xff] }
  0xf8   : > { %16124 = vmatprep.mubr.bf16.mxu0 %v3360_v51  ;;  %v3284_v51 = vld [vmem:[#allocation2 + $0x308] sm:$0xff] }
  0xf9   : > { %v3375_v55 = vpack.c.bf16 %v3285_v52, %v3284_v51  ;;  %v19067_v51 = vld [vmem:[%s22321_s1 + $0x58] sm:$0xff]   ;;  %v19068_v52 = vld [vmem:[%s22321_s1 + $0x60] sm:$0xff]  }
  0xff   : > { %16125 = vmatmul.mubr.bf16.gmra.mrb[44].mxu0 %v3361_v59  ;;  %v3290_v59 = vld [vmem:[#allocation2 + $0x348] sm:$0xff] }
 0x100   : > { %16128 = vmatprep.mubr.bf16.mxu0 %v3362_v62  ;;  %v3378_v62 = vpack.c.bf16 %v3291_v60, %v3290_v59  ;;  %v19070_v59 = vld [vmem:[%s22321_s1 + $0x68] sm:$0xff]   ;;  %v19071_v60 = vld [vmem:[%s22321_s1 + $0x70] sm:$0xff]  }
 0x107   : > { %16129 = vmatmul.mubr.bf16.gmra.mrb[48].mxu0 %v3363_v5  ;;  %v3296_v5 = vld [vmem:[#allocation2 + $0x380] sm:$0xff] }
 0x108   : > { %16132 = vmatprep.mubr.bf16.mxu0 %v3364_v7  ;;  %v3298_v7 = vld [vmem:[#allocation2 + $0x398] sm:$0xff]  ;;  %v3381_v9 = vpack.c.bf16 %v3297_v6, %v3296_v5  ;;  %v885_v6 = vld [vmem:[#allocation2 + $0x1] sm:$0xff] }
 0x109   : > { %v3382_v10 = vpack.c.bf16 %v3299_v8, %v3298_v7  ;;  %v19072_v5 = vld [vmem:[%s22321_s1 + $0x78] sm:$0xff]   ;;  %v886_v7 = vld [vmem:[#allocation2 + $0x9] sm:$0xff] }
 0x10a   : > { %v887_v8 = vld [vmem:[#allocation2 + $0x11] sm:$0xff]  ;;  %v1013_v11 = vpack.c.bf16 %v886_v7, %v885_v6  ;;  %v917_v6 = vld [vmem:[#allocation2 + $0x141] sm:$0xff]  ;;  %v918_v7 = vld [vmem:[#allocation2 + $0x149] sm:$0xff] }
 0x10c   : > { %15648 = vmatprep.mubr.bf16.mxu1 %v1013_v11 }
 0x10f   : > { %16133 = vmatmul.mubr.bf16.gmra.mrb[52].mxu0 %v3365_v16  ;;  %v3384_v16 = vpack.c.bf16 %v3303_v14, %v3302_v13  ;;  %v19943_v13 = vld [vmem:[#allocation2] sm:$0xff] }
 0x110   : > { %16136 = vmatprep.mubr.bf16.mxu0 %v3366_v19  ;;  %v3306_v19 = vld [vmem:[#allocation2 + $0x3e8] sm:$0xff]  ;;  %9478 = vst [vmem:[#allocation2 + $0x10] sm:$0x3] %v19943_v13  ;;  %9476 = vst [vmem:[#allocation2] sm:$0xff] %v19943_v13  ;;  %v3334_v14 = vld [vmem:[#allocation2 + $0x500] sm:$0xff] }
 0x111   : > { %v3386_v22 = vpack.c.bf16 %v3307_v20, %v3306_v19  ;;  %9477 = vst [vmem:[#allocation2 + $0x8] sm:$0xff] %v19943_v13  ;;  %v3336_v20 = vld [vmem:[#allocation2 + $0x510] sm:$0xff] }
 0x117   : > { %16137 = vmatmul.mubr.bf16.gmra.mrb[56].mxu0 %v3367_v26  ;;  %v3311_v26 = vld [vmem:[#allocation2 + $0x418] sm:$0xff] }
 0x118   : > { %16140 = vmatprep.mubr.bf16.mxu0 %v3368_v28  ;;  %v3388_v28 = vpack.c.bf16 %v3311_v26, %v3310_v25  ;;  %v4145_v25 = vld [vmem:[#allocation2 + $0x59] sm:$0xff] }
 0x11f   : > { %16141 = vmatmul.mubr.bf16.gmra.mrb[60].mxu0 %v3369_v36  ;;  %v3316_v36 = vld [vmem:[#allocation2 + $0x448] sm:$0xff] }
 0x120   : > { %16144 = vmatprep.mubr.bf16.mxu0 %v3370_v37  ;;  %v3317_v37 = vld [vmem:[#allocation2 + $0x450] sm:$0xff] }
 0x121   : > { %v3391_v40 = vpack.c.bf16 %v3317_v37, %v3316_v36  ;;  %v4150_v36 = vld [vmem:[#allocation2 + $0x89] sm:$0xff]  ;;  %v4151_v37 = vld [vmem:[#allocation2 + $0x91] sm:$0xff] }
 0x127   : > { %16145 = vmatmul.mubr.bf16.gmra.mrb[64].mxu0 %v3371_v42  ;;  %v19065_v42 = vld [vmem:[%s22321_s1 + $0x48] sm:$0xff]  }
 0x128   : > { %16148 = vmatprep.mubr.bf16.mxu0 %v3372_v43  ;;  %v19066_v43 = vld [vmem:[%s22321_s1 + $0x50] sm:$0xff]   ;;  %15634 = vmatprep.subr.bf16.mxu1 %v19065_v42 }
 0x129   : > { %15635 = vmatpush3.bf16.msra.mxu1 %v19065_v42  ;;  %v4274_v42 = vpack.c.bf16 %v4153_v39, %v4152_v38  ;;  %v19265_v38 = vld [vmem:[#allocation2 + $0x181] sm:$0xff] }
 0x12a   : > { %15636 = vmatprep.subr.bf16.mxu1 %v19066_v43 }
 0x12d   : > { %15637 = vmatpush3.bf16.msra.mxu1 %v19066_v43  ;;  %v19069_v43 = vld [vmem:[%s22321_s1 + $0x158] sm:$0xff]  }
 0x12e   : > { %15638 = vmatprep.subr.bf16.mxu1 %v19067_v51 }
 0x12f   : > { %16149 = vmatmul.mubr.bf16.gmra.mrb[68].mxu0 %v3373_v49  ;;  %v3393_v49 = vpack.c.bf16 %v3321_v46, %v3320_v45  ;;  %v4155_v45 = vld [vmem:[#allocation2 + $0xb9] sm:$0xff]  ;;  %v4156_v46 = vld [vmem:[#allocation2 + $0xc9] sm:$0xff] }
 0x130   : > { %16152 = vmatprep.mubr.bf16.mxu0 %v3374_v50  ;;  %v3394_v50 = vpack.c.bf16 %v3323_v48, %v3322_v47  ;;  %v4157_v47 = vld [vmem:[#allocation2 + $0xd1] sm:$0xff]  ;;  %v19073_v48 = vld [vmem:[%s22321_s1 + $0x160] sm:$0xff]  }
 0x131   : > { %15639 = vmatpush3.bf16.msra.mxu1 %v19067_v51  ;;  %v4158_v51 = vld [vmem:[#allocation2 + $0xd9] sm:$0xff] }
 0x132   : > { %15640 = vmatprep.subr.bf16.mxu1 %v19068_v52 }
 0x135   : > { %15641 = vmatpush3.bf16.msra.mxu1 %v19068_v52  ;;  %v4159_v52 = vld [vmem:[#allocation2 + $0xe1] sm:$0xff] }
 0x136   : > { %15642 = vmatprep.subr.bf16.mxu1 %v19070_v59 }
 0x137   : > { %16153 = vmatmul.mubr.bf16.gmra.mrb[72].mxu0 %v3375_v55  ;;  %v3326_v55 = vld [vmem:[#allocation2 + $0x4b0] sm:$0xff] }
 0x138   : > { %16156 = vmatprep.mubr.bf16.mxu0 %v3376_v56  ;;  %v3327_v56 = vld [vmem:[#allocation2 + $0x4b8] sm:$0xff] }
 0x139   : > { %v3396_v58 = vpack.c.bf16 %v3327_v56, %v3326_v55  ;;  %15643 = vmatpush3.bf16.msra.mxu1 %v19070_v59  ;;  %v4277_v55 = vpack.c.bf16 %v4159_v52, %v4158_v51  ;;  %v4278_v56 = vpack.c.bf16 %v4161_v54, %v4160_v53  ;;  %v19269_v51 = vld [vmem:[#allocation2 + $0x1a9] sm:$0xff]  ;;  %v19270_v53 = vld [vmem:[#allocation2 + $0x1b9] sm:$0xff]  ;;  %v19271_v54 = vld [vmem:[#allocation2 + $0x1c1] sm:$0xff] }
 0x13a   : > { %15644 = vmatprep.subr.bf16.mxu1 %v19071_v60 }
 0x13d   : > { %15645 = vmatpush3.bf16.msra.mxu1 %v19071_v60  ;;  %v19074_v60 = vld [vmem:[%s22321_s1 + $0x168] sm:$0xff]  }
 0x13e   : > { %15646 = vmatprep.subr.bf16.mxu1 %v19072_v5 }
 0x13f   : > { %16157 = vmatmul.mubr.bf16.gmra.mrb[76].mxu0 %v3377_v61  ;;  %v3328_v61 = vld [vmem:[#allocation2 + $0x4c0] sm:$0xff] }
 0x140   : > { %16160 = vmatprep.mubr.bf16.mxu0 %v3378_v62  ;;  %v3329_v62 = vld [vmem:[#allocation2 + $0x4c8] sm:$0xff] }
 0x141   : > { %v3397_v1 = vpack.c.bf16 %v3329_v62, %v3328_v61  ;;  %15647 = vmatpush3.bf16.msra.mxu1 %v19072_v5  ;;  %v913_v61 = vld [vmem:[#allocation2 + $0x119] sm:$0xff]  ;;  %v914_v62 = vld [vmem:[#allocation2 + $0x121] sm:$0xff] }
 0x142   : > { %v1027_v63 = vpack.c.bf16 %v914_v62, %v913_v61  ;;  %v19272_v62 = vld [vmem:[#allocation2 + $0x1c9] sm:$0xff] }
 0x147   : > { %16161 = vmatmul.mubr.bf16.gmra.mrb[80].mxu0 %v3379_v3  ;;  %v3332_v3 = vld [vmem:[#allocation2 + $0x4e8] sm:$0xff] }
 0x148   : > { %16164 = vmatprep.mubr.bf16.mxu0 %v3380_v4  ;;  %v3333_v4 = vld [vmem:[#allocation2 + $0x4f0] sm:$0xff] }
 0x149   : > { %v3399_v17 = vpack.c.bf16 %v3333_v4, %v3332_v3  ;;  %v19254_v3 = vld [vmem:[#allocation2 + $0x119] sm:$0xff]  ;;  %v19255_v4 = vld [vmem:[#allocation2 + $0x121] sm:$0xff] }
 0x14a   : > { %v4280_v5 = vpack.c.bf16 %v19255_v4, %v19254_v3  ;;  %v937_v4 = vld [vmem:[#allocation2 + $0x209] sm:$0xff] }
 0x14f   : > { %16165 = vmatmul.mubr.bf16.gmra.mrb[84].mxu0 %v3381_v9  ;;  %v4140_v9 = vld [vmem:[#allocation2 + $0x29] sm:$0xff] }
 0x150   : > { %16168 = vmatprep.mubr.bf16.mxu0 %v3382_v10  ;;  %v4141_v10 = vld [vmem:[#allocation2 + $0x31] sm:$0xff] }
 0x151   : > { %v4268_v18 = vpack.c.bf16 %v4141_v10, %v4140_v9  ;;  %v1029_v9 = vpack.c.bf16 %v918_v7, %v917_v6  ;;  %v920_v10 = vld [vmem:[#allocation2 + $0x159] sm:$0xff] }
 0x152   : > { %v939_v6 = vld [vmem:[#allocation2 + $0x219] sm:$0xff] }
 0x157   : > { %16169 = vmatmul.mubr.bf16.gmra.mrb[88].mxu0 %v3383_v15  ;;  %v3335_v15 = vld [vmem:[#allocation2 + $0x508] sm:$0xff] }
 0x158   : > { %16172 = vmatprep.mubr.bf16.mxu0 %v3384_v16  ;;  %v1014_v16 = vpack.c.bf16 %v888_v12, %v887_v8  ;;  %v3400_v19 = vpack.c.bf16 %v3335_v15, %v3334_v14  ;;  %v919_v8 = vld [vmem:[#allocation2 + $0x151] sm:$0xff]  ;;  %v19256_v12 = vld [vmem:[#allocation2 + $0x129] sm:$0xff] }
 0x159   : > { %v1030_v11 = vpack.c.bf16 %v920_v10, %v919_v8  ;;  %v19257_v14 = vld [vmem:[#allocation2 + $0x131] sm:$0xff]  ;;  %v940_v8 = vld [vmem:[#allocation2 + $0x221] sm:$0xff] }
 0x15a   : > { %15649 = vmatmul.mubr.bf16.vlgmr.msra.gmra.mrb[0].mxu1 %v1014_v16  ;;  %v4281_v15 = vpack.c.bf16 %v19257_v14, %v19256_v12  ;;  %v19258_v16 = vld [vmem:[#allocation2 + $0x141] sm:$0xff]  ;;  %v19276_v10 = vld [vmem:[#allocation2 + $0x1f1] sm:$0xff]  ;;  %v19278_v14 = vld [vmem:[#allocation2 + $0x209] sm:$0xff] }
 0x15b   : > { %15652 = vmatprep.mubr.bf16.mxu1 %v4268_v18 }
 0x15f   : > { %16173 = vmatmul.mubr.bf16.gmra.mrb[92].mxu0 %v3385_v21  ;;  %v4142_v21 = vld [vmem:[#allocation2 + $0x39] sm:$0xff] }
 0x160   : > { %16176 = vmatprep.mubr.bf16.mxu0 %v3386_v22  ;;  %v4143_v22 = vld [vmem:[#allocation2 + $0x41] sm:$0xff] }
 0x161   : > { %v4269_v26 = vpack.c.bf16 %v4143_v22, %v4142_v21  ;;  %v923_v21 = vld [vmem:[#allocation2 + $0x179] sm:$0xff] }
 0x163   : > { %15653 = vmatmul.mubr.bf16.gmra.mrb[4].mxu1 %v4269_v26 }
 0x167   : > { %16177 = vmatmul.mubr.bf16.gmra.mrb[96].mxu0 %v3387_v27  ;;  %v3401_v27 = vpack.c.bf16 %v3337_v23, %v3336_v20  ;;  %v922_v20 = vld [vmem:[#allocation2 + $0x171] sm:$0xff]  ;;  %v924_v23 = vld [vmem:[#allocation2 + $0x181] sm:$0xff] }
 0x168   : > { %16180 = vmatprep.mubr.bf16.mxu0 %v3388_v28  ;;  %v4270_v28 = vpack.c.bf16 %v4145_v25, %v4144_v24  ;;  %v1032_v24 = vpack.c.bf16 %v924_v23, %v923_v21  ;;  %v19260_v25 = vld [vmem:[#allocation2 + $0x151] sm:$0xff]  ;;  %v944_v21 = vld [vmem:[#allocation2 + $0x249] sm:$0xff]  ;;  %v19280_v23 = vld [vmem:[#allocation2 + $0x219] sm:$0xff] }
 0x16a   : > { %15656 = vmatprep.mubr.bf16.mxu1 %v4270_v28 }
 0x16f   : > { %16181 = vmatmul.mubr.bf16.gmra.mrb[100].mxu0 %v3389_v33  ;;  %v4271_v33 = vpack.c.bf16 %v4147_v30, %v4146_v29  ;;  %v19263_v29 = vld [vmem:[#allocation2 + $0x171] sm:$0xff] }
 0x170   : > { %16184 = vmatprep.mubr.bf16.mxu0 %v3390_v34  ;;  %v4272_v34 = vpack.c.bf16 %v4149_v32, %v4148_v31  ;;  %v925_v31 = vld [vmem:[#allocation2 + $0x191] sm:$0xff]  ;;  %v926_v32 = vld [vmem:[#allocation2 + $0x199] sm:$0xff] }
 0x171   : > { %15657 = vmatmul.mubr.bf16.gmra.mrb[8].mxu1 %v4271_v33 }
 0x172   : > { %15660 = vmatprep.mubr.bf16.mxu1 %v4272_v34 }
 0x177   : > { %16185 = vmatmul.mubr.bf16.gmra.mrb[104].mxu0 %v3391_v40  ;;  %v19063_v40 = vld [vmem:[%s22321_s1 + $0x150] sm:$0xff]  }
 0x178   : > { %16188 = vmatprep.mubr.bf16.mxu0 %v3392_v41  ;;  %v4273_v41 = vpack.c.bf16 %v4151_v37, %v4150_v36  ;;  %v19264_v37 = vld [vmem:[#allocation2 + $0x179] sm:$0xff] }
 0x179   : > { %v4285_v39 = vpack.c.bf16 %v19265_v38, %v19264_v37  ;;  %v19285_v37 = vld [vmem:[#allocation2 + $0x249] sm:$0xff] }
 0x17a   : > { %15661 = vmatmul.mubr.bf16.gmra.mrb[12].mxu1 %v4273_v41 }
 0x17b   : > { %15664 = vmatprep.mubr.bf16.mxu1 %v4274_v42 }
 0x17f   : > { %16189 = vmatmul.mubr.bf16.gmra.mrb[108].mxu0 %v3393_v49 }
 0x180   : > { %16192 = vmatprep.mubr.bf16.mxu0 %v3394_v50  ;;  %v4276_v50 = vpack.c.bf16 %v4157_v47, %v4156_v46  ;;  %v931_v47 = vld [vmem:[#allocation2 + $0x1c9] sm:$0xff] }
 0x187   : > { %16193 = vmatmul.mubr.bf16.gmra.mrb[112].mxu0 %v3395_v57  ;;  %v4162_v57 = vld [vmem:[#allocation2 + $0x101] sm:$0xff] }
 0x188   : > { %16196 = vmatprep.mubr.bf16.mxu0 %v3396_v58  ;;  %v4163_v58 = vld [vmem:[#allocation2 + $0x109] sm:$0xff] }
 0x189   : > { %v4279_v59 = vpack.c.bf16 %v4163_v58, %v4162_v57  ;;  %v934_v57 = vld [vmem:[#allocation2 + $0x1e9] sm:$0xff]  ;;  %v935_v58 = vld [vmem:[#allocation2 + $0x1f1] sm:$0xff] }
 0x18f   : > { %16197 = vmatmul.mubr.bf16.gmra.mrb[116].mxu0 %v3397_v1  ;;  %v916_v1 = vld [vmem:[#allocation2 + $0x131] sm:$0xff] }
 0x190   : > { %16200 = vmatprep.mubr.bf16.mxu0 %v3398_v2  ;;  %v1028_v2 = vpack.c.bf16 %v916_v1, %v915_v0  ;;  %v19274_v1 = vld [vmem:[#allocation2 + $0x1e1] sm:$0xff] }
 0x197   : > { %16201 = vmatmul.mubr.bf16.gmra.mrb[120].mxu0 %v3399_v17  ;;  %v19259_v17 = vld [vmem:[#allocation2 + $0x149] sm:$0xff] }
 0x198   : > { %16204 = vmatprep.mubr.bf16.mxu0 %v3400_v19  ;;  %v921_v19 = vld [vmem:[#allocation2 + $0x169] sm:$0xff] }
 0x199   : > { %v1031_v22 = vpack.c.bf16 %v922_v20, %v921_v19  ;;  %v943_v19 = vld [vmem:[#allocation2 + $0x241] sm:$0xff] }
 0x19f   : > { %16205 = vmatmul.mubr.bf16.gmra.mrb[124].mxu0 %v3401_v27 }
 0x1a0   : > { %16224 = vmatprep.mubr.bf16.mxu0 %v4268_v18  ;;  %v4282_v18 = vpack.c.bf16 %v19259_v17, %v19258_v16  ;;  %v941_v17 = vld [vmem:[#allocation2 + $0x231] sm:$0xff] }
 0x1a7   : > { %16225 = vmatmul.mubr.bf16.vlgmr.msra.gmra.mrb[0].mxu0 %v4269_v26  ;;  %v19261_v26 = vld [vmem:[#allocation2 + $0x159] sm:$0xff] }
 0x1a8   : > { %16353 = vmatpush3.bf16.msra.mxu0 %v19916_v44  ;;  %16228 = vmatprep.mubr.bf16.mxu0 %v4270_v28  ;;  %v4154_v44 = vld [vmem:[#allocation2 + $0xb1] sm:$0xff]  ;;  %v4283_v27 = vpack.c.bf16 %v19261_v26, %v19260_v25  ;;  %v19262_v28 = vld [vmem:[#allocation2 + $0x169] sm:$0xff] }
 0x1a9   : > { %16354 = vmatprep.subr.bf16.mxu0 %v19062_v35  ;;  %v4275_v49 = vpack.c.bf16 %v4155_v45, %v4154_v44  ;;  %v4284_v30 = vpack.c.bf16 %v19263_v29, %v19262_v28  ;;  %v929_v44 = vld [vmem:[#allocation2 + $0x1b9] sm:$0xff]  ;;  %v930_v45 = vld [vmem:[#allocation2 + $0x1c1] sm:$0xff]  ;;  %v19282_v26 = vld [vmem:[#allocation2 + $0x231] sm:$0xff] }
 0x1aa   : > { %v1035_v46 = vpack.c.bf16 %v930_v45, %v929_v44  ;;  %v19076_v29 = vld [vmem:[%s22321_s1 + $0x178] sm:$0xff]  }
 0x1ab   : > { %15665 = vmatmul.mubr.bf16.gmra.mrb[16].mxu1 %v4275_v49  ;;  %v951_v44 = vld [vmem:[#allocation2 + $0x291] sm:$0xff] }
 0x1ac   : > { %16355 = vmatpush3.bf16.msra.mxu0 %v19062_v35  ;;  %15668 = vmatprep.mubr.bf16.mxu1 %v4276_v50  ;;  %v928_v35 = vld [vmem:[#allocation2 + $0x1a9] sm:$0xff] }
 0x1ad   : > { %16356 = vmatprep.subr.bf16.mxu0 %v19063_v40 }
 0x1af   : > { %16229 = vmatmul.mubr.bf16.gmra.mrb[4].mxu0 %v4271_v33  ;;  %v927_v33 = vld [vmem:[#allocation2 + $0x1a1] sm:$0xff] }
 0x1b0   : > { %16232 = vmatprep.mubr.bf16.mxu0 %v4272_v34  ;;  %16357 = vmatpush3.bf16.msra.mxu0 %v19063_v40  ;;  %v1033_v34 = vpack.c.bf16 %v926_v32, %v925_v31  ;;  %v1034_v36 = vpack.c.bf16 %v928_v35, %v927_v33  ;;  %v19266_v40 = vld [vmem:[#allocation2 + $0x191] sm:$0xff]  ;;  %v946_v31 = vld [vmem:[#allocation2 + $0x261] sm:$0xff]  ;;  %v947_v33 = vld [vmem:[#allocation2 + $0x269] sm:$0xff] }
 0x1b1   : > { %16358 = vmatprep.subr.bf16.mxu0 %v19069_v43 }
 0x1b3   : > { %15669 = vmatmul.mubr.bf16.gmra.mrb[20].mxu1 %v4277_v55 }
 0x1b4   : > { %16359 = vmatpush3.bf16.msra.mxu0 %v19069_v43  ;;  %15672 = vmatprep.mubr.bf16.mxu1 %v4278_v56  ;;  %v19075_v43 = vld [vmem:[%s22321_s1 + $0x170] sm:$0xff]  }
 0x1b5   : > { %16360 = vmatprep.subr.bf16.mxu0 %v19073_v48 }
 0x1b7   : > { %16233 = vmatmul.mubr.bf16.gmra.mrb[8].mxu0 %v4273_v41  ;;  %v19267_v41 = vld [vmem:[#allocation2 + $0x199] sm:$0xff] }
 0x1b8   : > { %16236 = vmatprep.mubr.bf16.mxu0 %v4274_v42  ;;  %16361 = vmatpush3.bf16.msra.mxu0 %v19073_v48  ;;  %v4286_v42 = vpack.c.bf16 %v19267_v41, %v19266_v40  ;;  %v932_v48 = vld [vmem:[#allocation2 + $0x1d1] sm:$0xff]  ;;  %v19287_v40 = vld [vmem:[#allocation2 + $0x261] sm:$0xff] }
 0x1b9   : > { %16362 = vmatprep.subr.bf16.mxu0 %v19074_v60 }
 0x1bb   : > { %15673 = vmatmul.mubr.bf16.gmra.mrb[24].mxu1 %v4279_v59 }
 0x1bc   : > { %16363 = vmatpush3.bf16.msra.mxu0 %v19074_v60  ;;  %15676 = vmatprep.mubr.bf16.mxu1 %v1027_v63  ;;  %v936_v60 = vld [vmem:[#allocation2 + $0x1f9] sm:$0xff]  ;;  %v19273_v63 = vld [vmem:[#allocation2 + $0x1d1] sm:$0xff] }
 0x1bd   : > { %16364 = vmatprep.subr.bf16.mxu0 %v19075_v43  ;;  %v1038_v61 = vpack.c.bf16 %v936_v60, %v935_v58  ;;  %v4289_v0 = vpack.c.bf16 %v19273_v63, %v19272_v62  ;;  %v956_v58 = vld [vmem:[#allocation2 + $0x2c1] sm:$0xff]  ;;  %v19292_v60 = vld [vmem:[#allocation2 + $0x291] sm:$0xff]  ;;  %v19294_v63 = vld [vmem:[#allocation2 + $0x2a9] sm:$0xff] }
 0x1bf   : > { %16237 = vmatmul.mubr.bf16.gmra.mrb[12].mxu0 %v4275_v49  ;;  %v1036_v49 = vpack.c.bf16 %v932_v48, %v931_v47  ;;  %v19288_v48 = vld [vmem:[#allocation2 + $0x269] sm:$0xff] }
 0x1c0   : > { %16240 = vmatprep.mubr.bf16.mxu0 %v4276_v50  ;;  %16365 = vmatpush3.bf16.msra.mxu0 %v19075_v43  ;;  %v19268_v50 = vld [vmem:[#allocation2 + $0x1a1] sm:$0xff]  ;;  %v950_v43 = vld [vmem:[#allocation2 + $0x289] sm:$0xff] }
 0x1c1   : > { %v4287_v52 = vpack.c.bf16 %v19269_v51, %v19268_v50  ;;  %16366 = vmatprep.subr.bf16.mxu0 %v19076_v29  ;;  %v19290_v51 = vld [vmem:[#allocation2 + $0x281] sm:$0xff] }
 0x1c3   : > { %15677 = vmatmul.mubr.bf16.gmra.mrb[28].mxu1 %v1028_v2  ;;  %v19275_v2 = vld [vmem:[#allocation2 + $0x1e9] sm:$0xff] }
 0x1c4   : > { %15680 = vmatprep.mubr.bf16.mxu1 %v1029_v9  ;;  %v4290_v3 = vpack.c.bf16 %v19275_v2, %v19274_v1  ;;  %v1040_v9 = vpack.c.bf16 %v940_v8, %v939_v6  ;;  %16367 = vmatpush3.bf16.msra.mxu0 %v19076_v29  ;;  %v957_v2 = vld [vmem:[#allocation2 + $0x2d1] sm:$0xff]  ;;  %v960_v6 = vld [vmem:[#allocation2 + $0x2e9] sm:$0xff]  ;;  %v19296_v8 = vld [vmem:[#allocation2 + $0x2b9] sm:$0xff] }
 0x1c5   : > { %v966_v29 = vld [vmem:[#allocation2 + $0x329] sm:$0xff] }
 0x1c7   : > { %16241 = vmatmul.mubr.bf16.gmra.mrb[16].mxu0 %v4277_v55  ;;  %v4288_v55 = vpack.c.bf16 %v19271_v54, %v19270_v53  ;;  %v953_v54 = vld [vmem:[#allocation2 + $0x2a9] sm:$0xff] }
 0x1c8   : > { %16244 = vmatprep.mubr.bf16.mxu0 %v4278_v56  ;;  %v933_v56 = vld [vmem:[#allocation2 + $0x1e1] sm:$0xff] }
 0x1cb   : > { %15681 = vmatmul.mubr.bf16.gmra.mrb[32].mxu1 %v1030_v11  ;;  %v19277_v11 = vld [vmem:[#allocation2 + $0x1f9] sm:$0xff] }
 0x1cc   : > { %15684 = vmatprep.mubr.bf16.mxu1 %v1031_v22  ;;  %v4291_v12 = vpack.c.bf16 %v19277_v11, %v19276_v10  ;;  %v1042_v22 = vpack.c.bf16 %v944_v21, %v943_v19  ;;  %v19298_v11 = vld [vmem:[#allocation2 + $0x2d1] sm:$0xff] }
 0x1cf   : > { %16245 = vmatmul.mubr.bf16.gmra.mrb[20].mxu0 %v4279_v59  ;;  %v1037_v59 = vpack.c.bf16 %v934_v57, %v933_v56  ;;  %v955_v56 = vld [vmem:[#allocation2 + $0x2b9] sm:$0xff] }
 0x1d0   : > { %16248 = vmatprep.mubr.bf16.mxu0 %v4280_v5  ;;  %v938_v5 = vld [vmem:[#allocation2 + $0x211] sm:$0xff] }
 0x1d1   : > { %v1039_v7 = vpack.c.bf16 %v938_v5, %v937_v4  ;;  %v959_v4 = vld [vmem:[#allocation2 + $0x2e1] sm:$0xff] }
 0x1d3   : > { %15685 = vmatmul.mubr.bf16.gmra.mrb[36].mxu1 %v1032_v24  ;;  %v19281_v24 = vld [vmem:[#allocation2 + $0x221] sm:$0xff] }
 0x1d4   : > { %15688 = vmatprep.mubr.bf16.mxu1 %v1033_v34  ;;  %v4293_v25 = vpack.c.bf16 %v19281_v24, %v19280_v23  ;;  %v948_v34 = vld [vmem:[#allocation2 + $0x271] sm:$0xff]  ;;  %v19301_v23 = vld [vmem:[#allocation2 + $0x2e9] sm:$0xff] }
 0x1d5   : > { %v1044_v35 = vpack.c.bf16 %v948_v34, %v947_v33  ;;  %v19304_v34 = vld [vmem:[#allocation2 + $0x309] sm:$0xff] }
 0x1d7   : > { %16249 = vmatmul.mubr.bf16.gmra.mrb[24].mxu0 %v4281_v15  ;;  %v19279_v15 = vld [vmem:[#allocation2 + $0x211] sm:$0xff] }
 0x1d8   : > { %16252 = vmatprep.mubr.bf16.mxu0 %v4282_v18  ;;  %v4292_v16 = vpack.c.bf16 %v19279_v15, %v19278_v14  ;;  %v942_v18 = vld [vmem:[#allocation2 + $0x239] sm:$0xff] }
 0x1d9   : > { %v1041_v20 = vpack.c.bf16 %v942_v18, %v941_v17  ;;  %v19973_v15 = vld [vmem:[%s22321_s1 + $0x180] sm:$0xff]   ;;  %v963_v18 = vld [vmem:[#allocation2 + $0x309] sm:$0xff] }
 0x1da   : > { %v962_v17 = vld [vmem:[#allocation2 + $0x301] sm:$0xff]  ;;  %16496 = vmatprep.subr.bf16.mxu0 %v19973_v15 }
 0x1db   : > { %15689 = vmatmul.mubr.bf16.gmra.mrb[40].mxu1 %v1034_v36  ;;  %v19284_v36 = vld [vmem:[#allocation2 + $0x241] sm:$0xff] }
 0x1dc   : > { %15692 = vmatprep.mubr.bf16.mxu1 %v1035_v46  ;;  %v4295_v38 = vpack.c.bf16 %v19285_v37, %v19284_v36  ;;  %v952_v46 = vld [vmem:[#allocation2 + $0x299] sm:$0xff]  ;;  %v19306_v37 = vld [vmem:[#allocation2 + $0x321] sm:$0xff] }
 0x1dd   : > { %v1046_v47 = vpack.c.bf16 %v952_v46, %v951_v44  ;;  %v972_v44 = vld [vmem:[#allocation2 + $0x361] sm:$0xff]  ;;  %v19308_v46 = vld [vmem:[#allocation2 + $0x331] sm:$0xff] }
 0x1df   : > { %16253 = vmatmul.mubr.bf16.gmra.mrb[28].mxu0 %v4283_v27  ;;  %v19283_v27 = vld [vmem:[#allocation2 + $0x239] sm:$0xff] }
 0x1e0   : > { %16256 = vmatprep.mubr.bf16.mxu0 %v4284_v30  ;;  %v4294_v28 = vpack.c.bf16 %v19283_v27, %v19282_v26  ;;  %v945_v30 = vld [vmem:[#allocation2 + $0x259] sm:$0xff]  ;;  %v19303_v26 = vld [vmem:[#allocation2 + $0x301] sm:$0xff] }
 0x1e1   : > { %v1043_v32 = vpack.c.bf16 %v946_v31, %v945_v30  ;;  %v967_v30 = vld [vmem:[#allocation2 + $0x331] sm:$0xff] }
 0x1e3   : > { %15693 = vmatmul.mubr.bf16.gmra.mrb[44].mxu1 %v1036_v49  ;;  %v19289_v49 = vld [vmem:[#allocation2 + $0x271] sm:$0xff] }
 0x1e4   : > { %15696 = vmatprep.mubr.bf16.mxu1 %v1037_v59  ;;  %v4297_v50 = vpack.c.bf16 %v19289_v49, %v19288_v48  ;;  %v1048_v59 = vpack.c.bf16 %v956_v58, %v955_v56  ;;  %v19310_v49 = vld [vmem:[#allocation2 + $0x349] sm:$0xff]  ;;  %v19312_v58 = vld [vmem:[#allocation2 + $0x359] sm:$0xff] }
 0x1e5   : > { %v976_v56 = vld [vmem:[#allocation2 + $0x389] sm:$0xff] }
 0x1e7   : > { %16257 = vmatmul.mubr.bf16.gmra.mrb[32].mxu0 %v4285_v39  ;;  %v19286_v39 = vld [vmem:[#allocation2 + $0x259] sm:$0xff] }
 0x1e8   : > { %16260 = vmatprep.mubr.bf16.mxu0 %v4286_v42  ;;  %v4296_v41 = vpack.c.bf16 %v19287_v40, %v19286_v39  ;;  %v949_v42 = vld [vmem:[#allocation2 + $0x281] sm:$0xff]  ;;  %v969_v40 = vld [vmem:[#allocation2 + $0x349] sm:$0xff] }
 0x1e9   : > { %v1045_v45 = vpack.c.bf16 %v950_v43, %v949_v42  ;;  %v971_v42 = vld [vmem:[#allocation2 + $0x359] sm:$0xff] }
 0x1eb   : > { %15697 = vmatmul.mubr.bf16.gmra.mrb[48].mxu1 %v1038_v61  ;;  %v19293_v61 = vld [vmem:[#allocation2 + $0x299] sm:$0xff] }
 0x1ec   : > { %15700 = vmatprep.mubr.bf16.mxu1 %v1039_v7  ;;  %v4299_v62 = vpack.c.bf16 %v19293_v61, %v19292_v60  ;;  %v1050_v7 = vpack.c.bf16 %v960_v6, %v959_v4  ;;  %v19314_v61 = vld [vmem:[#allocation2 + $0x371] sm:$0xff]  ;;  %v19316_v6 = vld [vmem:[#allocation2 + $0x381] sm:$0xff] }
 0x1ed   : > { %v980_v4 = vld [vmem:[#allocation2 + $0x3b1] sm:$0xff] }
 0x1ef   : > { %16261 = vmatmul.mubr.bf16.gmra.mrb[36].mxu0 %v4287_v52  ;;  %v19291_v52 = vld [vmem:[#allocation2 + $0x289] sm:$0xff] }
 0x1f0   : > { %16264 = vmatprep.mubr.bf16.mxu0 %v4288_v55  ;;  %v4298_v53 = vpack.c.bf16 %v19291_v52, %v19290_v51  ;;  %v954_v55 = vld [vmem:[#allocation2 + $0x2b1] sm:$0xff] }
 0x1f1   : > { %v1047_v57 = vpack.c.bf16 %v954_v55, %v953_v54  ;;  %v973_v52 = vld [vmem:[#allocation2 + $0x371] sm:$0xff]  ;;  %v975_v54 = vld [vmem:[#allocation2 + $0x381] sm:$0xff] }
 0x1f3   : > { %15701 = vmatmul.mubr.bf16.gmra.mrb[52].mxu1 %v1040_v9  ;;  %v19297_v9 = vld [vmem:[#allocation2 + $0x2c1] sm:$0xff] }
 0x1f4   : > { %15704 = vmatprep.mubr.bf16.mxu1 %v1041_v20  ;;  %v4301_v10 = vpack.c.bf16 %v19297_v9, %v19296_v8  ;;  %v964_v20 = vld [vmem:[#allocation2 + $0x311] sm:$0xff]  ;;  %v19318_v9 = vld [vmem:[#allocation2 + $0x399] sm:$0xff] }
 0x1f5   : > { %v1052_v21 = vpack.c.bf16 %v964_v20, %v963_v18  ;;  %v984_v18 = vld [vmem:[#allocation2 + $0x3d9] sm:$0xff]  ;;  %v19320_v20 = vld [vmem:[#allocation2 + $0x3a9] sm:$0xff] }
 0x1f7   : > { %16265 = vmatmul.mubr.bf16.gmra.mrb[40].mxu0 %v4289_v0  ;;  %v19295_v0 = vld [vmem:[#allocation2 + $0x2b1] sm:$0xff] }
 0x1f8   : > { %16268 = vmatprep.mubr.bf16.mxu0 %v4290_v3  ;;  %v4300_v1 = vpack.c.bf16 %v19295_v0, %v19294_v63  ;;  %v958_v3 = vld [vmem:[#allocation2 + $0x2d9] sm:$0xff] }
 0x1f9   : > { %v1049_v5 = vpack.c.bf16 %v958_v3, %v957_v2  ;;  %v977_v0 = vld [vmem:[#allocation2 + $0x399] sm:$0xff]  ;;  %v979_v3 = vld [vmem:[#allocation2 + $0x3a9] sm:$0xff] }
 0x1fb   : > { %15705 = vmatmul.mubr.bf16.gmra.mrb[56].mxu1 %v1042_v22  ;;  %v19300_v22 = vld [vmem:[#allocation2 + $0x2e1] sm:$0xff] }
 0x1fc   : > { %15708 = vmatprep.mubr.bf16.mxu1 %v1043_v32  ;;  %v4303_v24 = vpack.c.bf16 %v19301_v23, %v19300_v22  ;;  %v968_v32 = vld [vmem:[#allocation2 + $0x339] sm:$0xff]  ;;  %v19322_v23 = vld [vmem:[#allocation2 + $0x3c1] sm:$0xff] }
 0x1fd   : > { %v1054_v33 = vpack.c.bf16 %v968_v32, %v967_v30  ;;  %v988_v30 = vld [vmem:[#allocation2 + $0x401] sm:$0xff]  ;;  %v19324_v32 = vld [vmem:[#allocation2 + $0x3d1] sm:$0xff] }
 0x1ff   : > { %16269 = vmatmul.mubr.bf16.gmra.mrb[44].mxu0 %v4291_v12  ;;  %v19299_v12 = vld [vmem:[#allocation2 + $0x2d9] sm:$0xff] }
 0x200   : > { %16272 = vmatprep.mubr.bf16.mxu0 %v4292_v16  ;;  %v4302_v14 = vpack.c.bf16 %v19299_v12, %v19298_v11  ;;  %v961_v16 = vld [vmem:[#allocation2 + $0x2f9] sm:$0xff]  ;;  %v981_v12 = vld [vmem:[#allocation2 + $0x3c1] sm:$0xff] }
 0x201   : > { %v1051_v19 = vpack.c.bf16 %v962_v17, %v961_v16  ;;  %v983_v16 = vld [vmem:[#allocation2 + $0x3d1] sm:$0xff] }
 0x203   : > { %15709 = vmatmul.mubr.bf16.gmra.mrb[60].mxu1 %v1044_v35  ;;  %v19305_v35 = vld [vmem:[#allocation2 + $0x311] sm:$0xff] }
 0x204   : > { %15712 = vmatprep.mubr.bf16.mxu1 %v1045_v45  ;;  %v4305_v36 = vpack.c.bf16 %v19305_v35, %v19304_v34  ;;  %v1056_v45 = vpack.c.bf16 %v972_v44, %v971_v42  ;;  %v19326_v35 = vld [vmem:[#allocation2 + $0x3e9] sm:$0xff]  ;;  %v19328_v44 = vld [vmem:[#allocation2 + $0x3f9] sm:$0xff] }
 0x205   : > { %v992_v42 = vld [vmem:[#allocation2 + $0x429] sm:$0xff] }
 0x207   : > { %16273 = vmatmul.mubr.bf16.gmra.mrb[48].mxu0 %v4293_v25  ;;  %v19302_v25 = vld [vmem:[#allocation2 + $0x2f9] sm:$0xff] }
 0x208   : > { %16276 = vmatprep.mubr.bf16.mxu0 %v4294_v28  ;;  %v4304_v27 = vpack.c.bf16 %v19303_v26, %v19302_v25  ;;  %v965_v28 = vld [vmem:[#allocation2 + $0x321] sm:$0xff]  ;;  %v985_v26 = vld [vmem:[#allocation2 + $0x3e9] sm:$0xff] }
 0x209   : > { %v1053_v31 = vpack.c.bf16 %v966_v29, %v965_v28  ;;  %v987_v28 = vld [vmem:[#allocation2 + $0x3f9] sm:$0xff] }
 0x20b   : > { %15713 = vmatmul.mubr.bf16.gmra.mrb[64].mxu1 %v1046_v47  ;;  %v19309_v47 = vld [vmem:[#allocation2 + $0x339] sm:$0xff] }
 0x20c   : > { %15716 = vmatprep.mubr.bf16.mxu1 %v1047_v57  ;;  %v4307_v48 = vpack.c.bf16 %v19309_v47, %v19308_v46  ;;  %v1058_v57 = vpack.c.bf16 %v976_v56, %v975_v54  ;;  %v19330_v47 = vld [vmem:[#allocation2 + $0x411] sm:$0xff]  ;;  %v19332_v56 = vld [vmem:[#allocation2 + $0x421] sm:$0xff] }
 0x20d   : > { %v996_v54 = vld [vmem:[#allocation2 + $0x451] sm:$0xff] }
 0x20f   : > { %16277 = vmatmul.mubr.bf16.gmra.mrb[52].mxu0 %v4295_v38  ;;  %v19307_v38 = vld [vmem:[#allocation2 + $0x329] sm:$0xff] }
 0x210   : > { %16280 = vmatprep.mubr.bf16.mxu0 %v4296_v41  ;;  %v4306_v39 = vpack.c.bf16 %v19307_v38, %v19306_v37  ;;  %v970_v41 = vld [vmem:[#allocation2 + $0x351] sm:$0xff] }
 0x211   : > { %v1055_v43 = vpack.c.bf16 %v970_v41, %v969_v40  ;;  %v989_v38 = vld [vmem:[#allocation2 + $0x411] sm:$0xff]  ;;  %v991_v40 = vld [vmem:[#allocation2 + $0x421] sm:$0xff] }
 0x213   : > { %15717 = vmatmul.mubr.bf16.gmra.mrb[68].mxu1 %v1048_v59  ;;  %v19313_v59 = vld [vmem:[#allocation2 + $0x361] sm:$0xff] }
 0x214   : > { %15720 = vmatprep.mubr.bf16.mxu1 %v1049_v5  ;;  %v4309_v60 = vpack.c.bf16 %v19313_v59, %v19312_v58  ;;  %v1060_v5 = vpack.c.bf16 %v980_v4, %v979_v3  ;;  %v19334_v59 = vld [vmem:[#allocation2 + $0x439] sm:$0xff] }
 0x215   : > { %v19080_v3 = vld [vmem:[%s22321_s1] sm:$0xff]  }
 0x216   : > { %15776 = vmatprep.subr.bf16.mxu1 %v19080_v3 }
 0x217   : > { %16281 = vmatmul.mubr.bf16.gmra.mrb[56].mxu0 %v4297_v50  ;;  %v19311_v50 = vld [vmem:[#allocation2 + $0x351] sm:$0xff]  ;;  %15777 = vmatpush3.bf16.msra.mxu1 %v19080_v3  ;;  %v681_v3 = vld [vmem:[#allocation2 + $0x28] sm:$0xff] }
 0x218   : > { %16284 = vmatprep.mubr.bf16.mxu0 %v4298_v53  ;;  %v4308_v51 = vpack.c.bf16 %v19311_v50, %v19310_v49  ;;  %v974_v53 = vld [vmem:[#allocation2 + $0x379] sm:$0xff] }
 0x219   : > { %v1057_v55 = vpack.c.bf16 %v974_v53, %v973_v52  ;;  %v993_v50 = vld [vmem:[#allocation2 + $0x439] sm:$0xff]  ;;  %v995_v53 = vld [vmem:[#allocation2 + $0x449] sm:$0xff] }
 0x21b   : > { %15721 = vmatmul.mubr.bf16.gmra.mrb[72].mxu1 %v1050_v7  ;;  %v19317_v7 = vld [vmem:[#allocation2 + $0x389] sm:$0xff] }
 0x21c   : > { %15724 = vmatprep.mubr.bf16.mxu1 %v1051_v19  ;;  %v4311_v8 = vpack.c.bf16 %v19317_v7, %v19316_v6  ;;  %v1062_v19 = vpack.c.bf16 %v984_v18, %v983_v16  ;;  %v19337_v6 = vld [vmem:[#allocation2 + $0x451] sm:$0xff]  ;;  %v1003_v16 = vld [vmem:[#allocation2 + $0x499] sm:$0xff]  ;;  %v1004_v18 = vld [vmem:[#allocation2 + $0x4a1] sm:$0xff] }
 0x21f   : > { %16285 = vmatmul.mubr.bf16.gmra.mrb[60].mxu0 %v4299_v62  ;;  %v19315_v62 = vld [vmem:[#allocation2 + $0x379] sm:$0xff] }
 0x220   : > { %16288 = vmatprep.mubr.bf16.mxu0 %v4300_v1  ;;  %v4310_v63 = vpack.c.bf16 %v19315_v62, %v19314_v61  ;;  %v978_v1 = vld [vmem:[#allocation2 + $0x3a1] sm:$0xff] }
 0x221   : > { %v1059_v2 = vpack.c.bf16 %v978_v1, %v977_v0  ;;  %v997_v62 = vld [vmem:[#allocation2 + $0x461] sm:$0xff]  ;;  %v999_v0 = vld [vmem:[#allocation2 + $0x471] sm:$0xff] }
 0x223   : > { %15725 = vmatmul.mubr.bf16.gmra.mrb[76].mxu1 %v1052_v21  ;;  %v19321_v21 = vld [vmem:[#allocation2 + $0x3b1] sm:$0xff] }
 0x224   : > { %15728 = vmatprep.mubr.bf16.mxu1 %v1053_v31  ;;  %v4313_v22 = vpack.c.bf16 %v19321_v21, %v19320_v20  ;;  %v1064_v31 = vpack.c.bf16 %v988_v30, %v987_v28  ;;  %v1072_v20 = vpack.c.bf16 %v1004_v18, %v1003_v16  ;;  %v19340_v21 = vld [vmem:[#allocation2 + $0x471] sm:$0xff]  ;;  %v1007_v30 = vld [vmem:[#allocation2 + $0x4c1] sm:$0xff] }
 0x225   : > { %v1005_v28 = vld [vmem:[#allocation2 + $0x4b1] sm:$0xff]  ;;  %v687_v18 = vld [vmem:[#allocation2 + $0x60] sm:$0xff] }
 0x226   : > { %v19361_v16 = vld [vmem:[%s22321_s1 + $0x98] sm:$0xff]  }
 0x227   : > { %16289 = vmatmul.mubr.bf16.gmra.mrb[64].mxu0 %v4301_v10  ;;  %v19319_v10 = vld [vmem:[#allocation2 + $0x3a1] sm:$0xff] }
 0x228   : > { %16292 = vmatprep.mubr.bf16.mxu0 %v4302_v14  ;;  %v4312_v11 = vpack.c.bf16 %v19319_v10, %v19318_v9  ;;  %v982_v14 = vld [vmem:[#allocation2 + $0x3c9] sm:$0xff] }
 0x229   : > { %v1061_v17 = vpack.c.bf16 %v982_v14, %v981_v12  ;;  %v19339_v9 = vld [vmem:[#allocation2 + $0x469] sm:$0xff]  ;;  %v1002_v14 = vld [vmem:[#allocation2 + $0x491] sm:$0xff] }
 0x22a   : > { %v1001_v12 = vld [vmem:[#allocation2 + $0x489] sm:$0xff] }
 0x22b   : > { %15729 = vmatmul.mubr.bf16.gmra.mrb[80].mxu1 %v1054_v33  ;;  %v19325_v33 = vld [vmem:[#allocation2 + $0x3d9] sm:$0xff] }
 0x22c   : > { %15732 = vmatprep.mubr.bf16.mxu1 %v1055_v43  ;;  %v4315_v34 = vpack.c.bf16 %v19325_v33, %v19324_v32  ;;  %v1066_v43 = vpack.c.bf16 %v992_v42, %v991_v40  ;;  %v1008_v32 = vld [vmem:[#allocation2 + $0x4c9] sm:$0xff]  ;;  %v19084_v33 = vld [vmem:[%s22321_s1 + $0x20] sm:$0xff]  }
 0x22d   : > { %v1009_v42 = vld [vmem:[#allocation2 + $0x4d9] sm:$0xff] }
 0x22f   : > { %16293 = vmatmul.mubr.bf16.gmra.mrb[68].mxu0 %v4303_v24  ;;  %v19323_v24 = vld [vmem:[#allocation2 + $0x3c9] sm:$0xff] }
 0x230   : > { %16296 = vmatprep.mubr.bf16.mxu0 %v4304_v27  ;;  %v4314_v25 = vpack.c.bf16 %v19323_v24, %v19322_v23  ;;  %v986_v27 = vld [vmem:[#allocation2 + $0x3f1] sm:$0xff]  ;;  %v19342_v24 = vld [vmem:[#allocation2 + $0x489] sm:$0xff] }
 0x231   : > { %v1063_v29 = vpack.c.bf16 %v986_v27, %v985_v26  ;;  %v19083_v27 = vld [vmem:[%s22321_s1 + $0x18] sm:$0xff]  }
 0x233   : > { %15733 = vmatmul.mubr.bf16.gmra.mrb[84].mxu1 %v1056_v45  ;;  %v19329_v45 = vld [vmem:[#allocation2 + $0x401] sm:$0xff] }
 0x234   : > { %15736 = vmatprep.mubr.bf16.mxu1 %v1057_v55  ;;  %v4317_v46 = vpack.c.bf16 %v19329_v45, %v19328_v44  ;;  %v1068_v55 = vpack.c.bf16 %v996_v54, %v995_v53  ;;  %v1011_v45 = vld [vmem:[#allocation2 + $0x4e9] sm:$0xff]  ;;  %v19351_v53 = vld [vmem:[#allocation2 + $0x4e1] sm:$0xff] }
 0x237   : > { %16297 = vmatmul.mubr.bf16.gmra.mrb[72].mxu0 %v4305_v36  ;;  %v19327_v36 = vld [vmem:[#allocation2 + $0x3f1] sm:$0xff] }
 0x238   : > { %16300 = vmatprep.mubr.bf16.mxu0 %v4306_v39  ;;  %v4316_v37 = vpack.c.bf16 %v19327_v36, %v19326_v35  ;;  %v990_v39 = vld [vmem:[#allocation2 + $0x419] sm:$0xff]  ;;  %v19345_v36 = vld [vmem:[#allocation2 + $0x4a1] sm:$0xff] }
 0x239   : > { %v1065_v41 = vpack.c.bf16 %v990_v39, %v989_v38  ;;  %v19344_v35 = vld [vmem:[#allocation2 + $0x499] sm:$0xff]  ;;  %v19346_v38 = vld [vmem:[#allocation2 + $0x4b1] sm:$0xff] }
 0x23a   : > { %v19347_v39 = vld [vmem:[#allocation2 + $0x4b9] sm:$0xff] }
 0x23b   : > { %15737 = vmatmul.mubr.bf16.gmra.mrb[88].mxu1 %v1058_v57  ;;  %v19333_v57 = vld [vmem:[#allocation2 + $0x429] sm:$0xff]  ;;  %v4326_v40 = vpack.c.bf16 %v19347_v39, %v19346_v38  ;;  %v5078_v38 = vld [vmem:[#allocation2 + $0x7a] sm:$0xff] }
 0x23c   : > { %15740 = vmatprep.mubr.bf16.mxu1 %v1059_v2  ;;  %v4319_v58 = vpack.c.bf16 %v19333_v57, %v19332_v56  ;;  %v1000_v2 = vld [vmem:[#allocation2 + $0x479] sm:$0xff]  ;;  %v805_v56 = vpack.c.bf16 %v19943_v13, %v19943_v13  ;;  %v5079_v39 = vld [vmem:[#allocation2 + $0x82] sm:$0xff] }
 0x23d   : > { %v1070_v4 = vpack.c.bf16 %v1000_v2, %v999_v0  ;;  %v19352_v57 = vld [vmem:[%s22321_s1 + $0x80] sm:$0xff]   ;;  %v5070_v0 = vld [vmem:[#allocation2 + $0x2a] sm:$0xff] }
 0x23e   : > { %v19357_v2 = vld [vmem:[%s22321_s1 + $0x88] sm:$0xff]   ;;  %9479 = vst [vmem:[#allocation2 + $0x28] sm:$0xff] %v19943_v13 }
 0x23f   : > { %16301 = vmatmul.mubr.bf16.gmra.mrb[76].mxu0 %v4307_v48  ;;  %v19331_v48 = vld [vmem:[#allocation2 + $0x419] sm:$0xff] }
 0x240   : > { %16304 = vmatprep.mubr.bf16.mxu0 %v4308_v51  ;;  %v4318_v49 = vpack.c.bf16 %v19331_v48, %v19330_v47  ;;  %v994_v51 = vld [vmem:[#allocation2 + $0x441] sm:$0xff]  ;;  %v19087_v47 = vld [vmem:[%s22321_s1 + $0x30] sm:$0xff]  }
 0x241   : > { %v1067_v52 = vpack.c.bf16 %v994_v51, %v993_v50  ;;  %v19349_v50 = vld [vmem:[#allocation2 + $0x4c9] sm:$0xff] }
 0x243   : > { %15741 = vmatmul.mubr.bf16.gmra.mrb[92].mxu1 %v1060_v5  ;;  %v19336_v5 = vld [vmem:[#allocation2 + $0x449] sm:$0xff] }
 0x244   : > { %15744 = vmatprep.mubr.bf16.mxu1 %v1061_v17  ;;  %v4321_v7 = vpack.c.bf16 %v19337_v6, %v19336_v5  ;;  %v1071_v17 = vpack.c.bf16 %v1002_v14, %v1001_v12  ;;  %v683_v5 = vld [vmem:[#allocation2 + $0x38] sm:$0xff] }
 0x247   : > { %16305 = vmatmul.mubr.bf16.gmra.mrb[80].mxu0 %v4309_v60  ;;  %v19335_v60 = vld [vmem:[#allocation2 + $0x441] sm:$0xff] }
 0x248   : > { %16308 = vmatprep.mubr.bf16.mxu0 %v4310_v63  ;;  %v4320_v61 = vpack.c.bf16 %v19335_v60, %v19334_v59  ;;  %v998_v63 = vld [vmem:[#allocation2 + $0x469] sm:$0xff]  ;;  %v19354_v59 = vld [vmem:[#allocation2 + $0x4f1] sm:$0xff] }
 0x249   : > { %v1069_v1 = vpack.c.bf16 %v998_v63, %v997_v62  ;;  %v19356_v62 = vld [vmem:[#allocation2 + $0x509] sm:$0xff] }
 0x24b   : > { %15745 = vmatmul.mubr.bf16.gmra.mrb[96].mxu1 %v1062_v19  ;;  %v19082_v19 = vld [vmem:[%s22321_s1 + $0x10] sm:$0xff]  }
 0x24c   : > { %15748 = vmatprep.mubr.bf16.mxu1 %v1063_v29  ;;  %v1006_v29 = vld [vmem:[#allocation2 + $0x4b9] sm:$0xff] }
 0x24f   : > { %16309 = vmatmul.mubr.bf16.gmra.mrb[84].mxu0 %v4311_v8  ;;  %v19338_v8 = vld [vmem:[#allocation2 + $0x461] sm:$0xff] }
 0x250   : > { %16312 = vmatprep.mubr.bf16.mxu0 %v4312_v11  ;;  %v4322_v10 = vpack.c.bf16 %v19339_v9, %v19338_v8  ;;  %v19081_v11 = vld [vmem:[%s22321_s1 + $0x8] sm:$0xff]   ;;  %v19358_v9 = vld [vmem:[%s22321_s1 + $0x90] sm:$0xff]  }
 0x251   : > { %15778 = vmatprep.subr.bf16.mxu1 %v19081_v11 }
 0x252   : > { %15779 = vmatpush3.bf16.msra.mxu1 %v19081_v11  ;;  %v19360_v11 = vld [vmem:[#allocation2 + $0x519] sm:$0xff] }
 0x253   : > { %15749 = vmatmul.mubr.bf16.gmra.mrb[100].mxu1 %v1064_v31  ;;  %15780 = vmatprep.subr.bf16.mxu1 %v19082_v19  ;;  %v1073_v31 = vpack.c.bf16 %v1006_v29, %v1005_v28  ;;  %v19078_v29 = vld [vmem:[%s22321_s1 + $0x188] sm:$0xff]  }
 0x254   : > { %15752 = vmatprep.mubr.bf16.mxu1 %v1065_v41  ;;  %v19086_v41 = vld [vmem:[%s22321_s1 + $0x28] sm:$0xff]  }
 0x256   : > { %15781 = vmatpush3.bf16.msra.mxu1 %v19082_v19  ;;  %v5072_v19 = vld [vmem:[#allocation2 + $0x3a] sm:$0xff] }
 0x257   : > { %16313 = vmatmul.mubr.bf16.gmra.mrb[88].mxu0 %v4313_v22  ;;  %v19341_v22 = vld [vmem:[#allocation2 + $0x479] sm:$0xff]  ;;  %15782 = vmatprep.subr.bf16.mxu1 %v19083_v27 }
 0x258   : > { %16316 = vmatprep.mubr.bf16.mxu0 %v4314_v25  ;;  %v4323_v23 = vpack.c.bf16 %v19341_v22, %v19340_v21  ;;  %v19343_v25 = vld [vmem:[#allocation2 + $0x491] sm:$0xff]  ;;  %v688_v22 = vld [vmem:[#allocation2 + $0x68] sm:$0xff] }
 0x259   : > { %v4324_v26 = vpack.c.bf16 %v19343_v25, %v19342_v24  ;;  %v5075_v24 = vld [vmem:[#allocation2 + $0x5a] sm:$0xff]  ;;  %v20019_v25 = vpack.c.bf16 %v688_v22, %v687_v18  ;;  %v19090_v22 = vld [vmem:[%s22321_s1 + $0x1a8] sm:$0xff]  }
 0x25a   : > { %15783 = vmatpush3.bf16.msra.mxu1 %v19083_v27 }
 0x25b   : > { %15753 = vmatmul.mubr.bf16.gmra.mrb[104].mxu1 %v1066_v43  ;;  %15784 = vmatprep.subr.bf16.mxu1 %v19084_v33  ;;  %v1010_v43 = vld [vmem:[#allocation2 + $0x4e1] sm:$0xff] }
 0x25c   : > { %15756 = vmatprep.mubr.bf16.mxu1 %v1067_v52  ;;  %v1075_v44 = vpack.c.bf16 %v1010_v43, %v1009_v42  ;;  %v19350_v52 = vld [vmem:[#allocation2 + $0x4d9] sm:$0xff]  ;;  %v5202_v43 = vpack.c.bf16 %v5079_v39, %v5078_v38  ;;  %v711_v38 = vld [vmem:[#allocation2 + $0x150] sm:$0xff] }
 0x25d   : > { %v4328_v54 = vpack.c.bf16 %v19351_v53, %v19350_v52  ;;  %v696_v52 = vld [vmem:[#allocation2 + $0xb8] sm:$0xff]  ;;  %v5082_v53 = vld [vmem:[#allocation2 + $0xa2] sm:$0xff]  ;;  %v5096_v39 = vld [vmem:[#allocation2 + $0x12a] sm:$0xff] }
 0x25e   : > { %15785 = vmatpush3.bf16.msra.mxu1 %v19084_v33  ;;  %v690_v33 = vld [vmem:[#allocation2 + $0x80] sm:$0xff] }
 0x25f   : > { %16317 = vmatmul.mubr.bf16.gmra.mrb[92].mxu0 %v4315_v34  ;;  %v1074_v34 = vpack.c.bf16 %v1008_v32, %v1007_v30  ;;  %15786 = vmatprep.subr.bf16.mxu1 %v19086_v41  ;;  %v19363_v30 = vld [vmem:[%s22321_s1 + $0xa8] sm:$0xff]   ;;  %v689_v32 = vld [vmem:[#allocation2 + $0x78] sm:$0xff] }
 0x260   : > { %16320 = vmatprep.mubr.bf16.mxu0 %v4316_v37  ;;  %v4325_v37 = vpack.c.bf16 %v19345_v36, %v19344_v35  ;;  %v20033_v35 = vpack.c.bf16 %v690_v33, %v689_v32  ;;  %v691_v36 = vld [vmem:[#allocation2 + $0x88] sm:$0xff] }
 0x262   : > { %15787 = vmatpush3.bf16.msra.mxu1 %v19086_v41 }
 0x263   : > { %15757 = vmatmul.mubr.bf16.gmra.mrb[108].mxu1 %v1068_v55  ;;  %15788 = vmatprep.subr.bf16.mxu1 %v19087_v47  ;;  %v19088_v55 = vld [vmem:[%s22321_s1 + $0x38] sm:$0xff]  }
 0x264   : > { %15760 = vmatprep.mubr.bf16.mxu1 %v1069_v1  ;;  %v5071_v1 = vld [vmem:[#allocation2 + $0x32] sm:$0xff] }
 0x265   : > { %9481 = vst [vmem:[#allocation2 + $0x38] sm:$0x3] %v19943_v13  ;;  %v5198_v14 = vpack.c.bf16 %v5071_v1, %v5070_v0  ;;  %v700_v1 = vld [vmem:[#allocation2 + $0xe0] sm:$0xff] }
 0x266   : > { %15789 = vmatpush3.bf16.msra.mxu1 %v19087_v47  ;;  %v694_v47 = vld [vmem:[#allocation2 + $0xa8] sm:$0xff] }
 0x267   : > { %16321 = vmatmul.mubr.bf16.gmra.mrb[96].mxu0 %v4317_v46  ;;  %v1012_v46 = vld [vmem:[#allocation2 + $0x4f1] sm:$0xff]  ;;  %15790 = vmatprep.subr.bf16.mxu1 %v19088_v55 }
 0x268   : > { %16324 = vmatprep.mubr.bf16.mxu0 %v4318_v49  ;;  %v1076_v48 = vpack.c.bf16 %v1012_v46, %v1011_v45  ;;  %v19348_v49 = vld [vmem:[#allocation2 + $0x4c1] sm:$0xff]  ;;  %v19365_v45 = vld [vmem:[%s22321_s1 + $0xb8] sm:$0xff]  }
 0x269   : > { %v4327_v51 = vpack.c.bf16 %v19349_v50, %v19348_v49  ;;  %v693_v46 = vld [vmem:[#allocation2 + $0xa0] sm:$0xff]  ;;  %v5080_v49 = vld [vmem:[#allocation2 + $0x8a] sm:$0xff]  ;;  %v5081_v50 = vld [vmem:[#allocation2 + $0x92] sm:$0xff] }
 0x26a   : > { %15791 = vmatpush3.bf16.msra.mxu1 %v19088_v55  ;;  %v19089_v55 = vld [vmem:[%s22321_s1 + $0x1a0] sm:$0xff]  }
 0x26b   : > { %15761 = vmatmul.mubr.bf16.gmra.mrb[112].mxu1 %v1070_v4  ;;  %17635 = vmatprep.subr.bf16.mxu1 %v19352_v57  ;;  %v682_v4 = vld [vmem:[#allocation2 + $0x30] sm:$0xff] }
 0x26c   : > { %15764 = vmatprep.mubr.bf16.mxu1 %v1071_v17  ;;  %v807_v6 = vpack.c.bf16 %v682_v4, %v681_v3  ;;  %9480 = vst [vmem:[#allocation2 + $0x30] sm:$0xff] %v19943_v13  ;;  %v685_v13 = vld [vmem:[#allocation2 + $0x50] sm:$0xff]  ;;  %v686_v17 = vld [vmem:[#allocation2 + $0x58] sm:$0xff] }
 0x26d   : > { %v20017_v21 = vpack.c.bf16 %v686_v17, %v685_v13  ;;  %v5087_v3 = vld [vmem:[#allocation2 + $0xd2] sm:$0xff]  ;;  %v5091_v13 = vld [vmem:[#allocation2 + $0xfa] sm:$0xff] }
 0x26f   : > { %16325 = vmatmul.mubr.bf16.gmra.mrb[100].mxu0 %v4319_v58  ;;  %v19353_v58 = vld [vmem:[#allocation2 + $0x4e9] sm:$0xff] }
 0x270   : > { %16328 = vmatprep.mubr.bf16.mxu0 %v4320_v61  ;;  %v4329_v60 = vpack.c.bf16 %v19354_v59, %v19353_v58  ;;  %v19355_v61 = vld [vmem:[#allocation2 + $0x501] sm:$0xff] }
 0x271   : > { %v4330_v63 = vpack.c.bf16 %v19356_v62, %v19355_v61  ;;  %v697_v59 = vld [vmem:[#allocation2 + $0xc8] sm:$0xff]  ;;  %v699_v61 = vld [vmem:[#allocation2 + $0xd8] sm:$0xff] }
 0x272   : > { %v5084_v62 = vld [vmem:[#allocation2 + $0xb2] sm:$0xff]  ;;  %v20062_v4 = vpack.c.bf16 %v700_v1, %v699_v61  ;;  %v719_v1 = vld [vmem:[#allocation2 + $0x1a0] sm:$0xff] }
 0x273   : > { %15765 = vmatmul.mubr.bf16.gmra.mrb[116].mxu1 %v1072_v20  ;;  %v5073_v20 = vld [vmem:[#allocation2 + $0x42] sm:$0xff] }
 0x274   : > { %15768 = vmatprep.mubr.bf16.mxu1 %v1073_v31  ;;  %v5199_v27 = vpack.c.bf16 %v5073_v20, %v5072_v19  ;;  %v5076_v31 = vld [vmem:[#allocation2 + $0x62] sm:$0xff] }
 0x275   : > { %v5092_v20 = vld [vmem:[#allocation2 + $0x102] sm:$0xff] }
 0x277   : > { %16329 = vmatmul.mubr.bf16.gmra.mrb[104].mxu0 %v4321_v7  ;;  %v684_v7 = vld [vmem:[#allocation2 + $0x40] sm:$0xff] }
 0x278   : > { %16332 = vmatprep.mubr.bf16.mxu0 %v4322_v10  ;;  %v808_v8 = vpack.c.bf16 %v684_v7, %v683_v5  ;;  %v19359_v10 = vld [vmem:[#allocation2 + $0x511] sm:$0xff] }
 0x279   : > { %v4331_v12 = vpack.c.bf16 %v19360_v11, %v19359_v10  ;;  %v701_v7 = vld [vmem:[#allocation2 + $0xf0] sm:$0xff]  ;;  %v5088_v10 = vld [vmem:[#allocation2 + $0xda] sm:$0xff]  ;;  %v5089_v11 = vld [vmem:[#allocation2 + $0xe2] sm:$0xff] }
 0x27a   : > { %v5207_v18 = vpack.c.bf16 %v5089_v11, %v5088_v10 }
 0x27b   : > { %15769 = vmatmul.mubr.bf16.gmra.mrb[120].mxu1 %v1074_v34  ;;  %v5077_v34 = vld [vmem:[#allocation2 + $0x6a] sm:$0xff] }
 0x27c   : > { %15772 = vmatprep.mubr.bf16.mxu1 %v1075_v44  ;;  %v5201_v42 = vpack.c.bf16 %v5077_v34, %v5076_v31  ;;  %v19085_v44 = vld [vmem:[%s22321_s1 + $0x198] sm:$0xff]   ;;  %v5095_v31 = vld [vmem:[#allocation2 + $0x122] sm:$0xff] }
 0x27f   : > { %16333 = vmatmul.mubr.bf16.gmra.mrb[108].mxu0 %v4323_v23  ;;  %v5074_v23 = vld [vmem:[#allocation2 + $0x52] sm:$0xff] }
 0x280   : > { %16336 = vmatprep.mubr.bf16.mxu0 %v4324_v26  ;;  %v19362_v26 = vld [vmem:[%s22321_s1 + $0xa0] sm:$0xff]   ;;  %v5200_v28 = vpack.c.bf16 %v5075_v24, %v5074_v23  ;;  %v705_v23 = vld [vmem:[#allocation2 + $0x118] sm:$0xff] }
 0x281   : > { %v706_v24 = vld [vmem:[#allocation2 + $0x120] sm:$0xff] }
 0x283   : > { %15773 = vmatmul.mubr.bf16.gmra.mrb[124].mxu1 %v1076_v48  ;;  %v695_v48 = vld [vmem:[#allocation2 + $0xb0] sm:$0xff] }
 0x284   : > { %15792 = vmatprep.mubr.bf16.mxu1 %v805_v56 }
 0x287   : > { %16337 = vmatmul.mubr.bf16.gmra.mrb[112].mxu0 %v4325_v37  ;;  %v692_v37 = vld [vmem:[#allocation2 + $0x90] sm:$0xff] }
 0x288   : > { %16340 = vmatprep.mubr.bf16.mxu0 %v4326_v40  ;;  %v19079_v40 = vld [vmem:[%s22321_s1 + $0x190] sm:$0xff]   ;;  %v20038_v41 = vpack.c.bf16 %v692_v37, %v691_v36  ;;  %v709_v36 = vld [vmem:[#allocation2 + $0x140] sm:$0xff]  ;;  %v710_v37 = vld [vmem:[#allocation2 + $0x148] sm:$0xff] }
 0x28b   : > { %15793 = vmatmul.mubr.bf16.vlgmr.msra.gmra.mrb[0].mxu1 %v805_v56  ;;  %v20056_v56 = vpack.c.bf16 %v696_v52, %v695_v48  ;;  %v713_v48 = vld [vmem:[#allocation2 + $0x168] sm:$0xff]  ;;  %v5100_v52 = vld [vmem:[#allocation2 + $0x152] sm:$0xff] }
 0x28c   : > { %17643 = vmatpush3.bf16.msra.mxu1 %v19352_v57  ;;  %15796 = vmatprep.mubr.bf16.mxu1 %v807_v6  ;;  %v5203_v57 = vpack.c.bf16 %v5081_v50, %v5080_v49  ;;  %v714_v49 = vld [vmem:[#allocation2 + $0x170] sm:$0xff]  ;;  %v715_v50 = vld [vmem:[#allocation2 + $0x178] sm:$0xff] }
 0x28d   : > { %17636 = vmatprep.subr.bf16.mxu1 %v19357_v2 }
 0x28f   : > { %16341 = vmatmul.mubr.bf16.gmra.mrb[116].mxu0 %v4327_v51  ;;  %v20051_v51 = vpack.c.bf16 %v694_v47, %v693_v46 }
 0x290   : > { %16344 = vmatprep.mubr.bf16.mxu0 %v4328_v54  ;;  %17644 = vmatpush3.bf16.msra.mxu1 %v19357_v2  ;;  %v5083_v54 = vld [vmem:[#allocation2 + $0xaa] sm:$0xff] }
 0x291   : > { %17637 = vmatprep.subr.bf16.mxu1 %v19358_v9  ;;  %v5204_v58 = vpack.c.bf16 %v5083_v54, %v5082_v53  ;;  %v5086_v2 = vld [vmem:[#allocation2 + $0xca] sm:$0xff]  ;;  %v5101_v53 = vld [vmem:[#allocation2 + $0x15a] sm:$0xff]  ;;  %v20087_v54 = vpack.c.bf16 %v714_v49, %v713_v48 }
 0x292   : > { %v5206_v6 = vpack.c.bf16 %v5087_v3, %v5086_v2  ;;  %v5104_v2 = vld [vmem:[#allocation2 + $0x17a] sm:$0xff]  ;;  %v5105_v3 = vld [vmem:[#allocation2 + $0x182] sm:$0xff]  ;;  %v730_v48 = vld [vmem:[#allocation2 + $0x210] sm:$0xff] }
 0x293   : > { %15797 = vmatmul.mubr.bf16.gmra.mrb[4].mxu1 %v808_v8  ;;  %v702_v8 = vld [vmem:[#allocation2 + $0xf8] sm:$0xff]  ;;  %v5215_v10 = vpack.c.bf16 %v5105_v3, %v5104_v2  ;;  %v735_v2 = vld [vmem:[#allocation2 + $0x240] sm:$0xff] }
 0x294   : > { %17645 = vmatpush3.bf16.msra.mxu1 %v19358_v9  ;;  %15800 = vmatprep.mubr.bf16.mxu1 %v20017_v21  ;;  %v703_v9 = vld [vmem:[#allocation2 + $0x100] sm:$0xff]  ;;  %v731_v49 = vld [vmem:[#allocation2 + $0x218] sm:$0xff] }
 0x295   : > { %17638 = vmatprep.subr.bf16.mxu1 %v19361_v16  ;;  %v5120_v3 = vld [vmem:[#allocation2 + $0x21a] sm:$0xff] }
 0x297   : > { %16345 = vmatmul.mubr.bf16.gmra.mrb[120].mxu0 %v4329_v60  ;;  %v698_v60 = vld [vmem:[#allocation2 + $0xd0] sm:$0xff] }
 0x298   : > { %16348 = vmatprep.mubr.bf16.mxu0 %v4330_v63  ;;  %17646 = vmatpush3.bf16.msra.mxu1 %v19361_v16  ;;  %v5085_v63 = vld [vmem:[#allocation2 + $0xba] sm:$0xff]  ;;  %v20060_v0 = vpack.c.bf16 %v698_v60, %v697_v59  ;;  %v5090_v16 = vld [vmem:[#allocation2 + $0xf2] sm:$0xff]  ;;  %v5213_v60 = vpack.c.bf16 %v5101_v53, %v5100_v52 }
 0x299   : > { %17639 = vmatprep.subr.bf16.mxu1 %v19362_v26  ;;  %v5205_v5 = vpack.c.bf16 %v5085_v63, %v5084_v62  ;;  %v5208_v19 = vpack.c.bf16 %v5091_v13, %v5090_v16  ;;  %v717_v62 = vld [vmem:[#allocation2 + $0x190] sm:$0xff]  ;;  %v718_v63 = vld [vmem:[#allocation2 + $0x198] sm:$0xff] }
 0x29a   : > { %v19091_v16 = vld [vmem:[%s22321_s1 + $0x1b0] sm:$0xff]   ;;  %v721_v13 = vld [vmem:[#allocation2 + $0x1b8] sm:$0xff] }
 0x29b   : > { %15801 = vmatmul.mubr.bf16.gmra.mrb[8].mxu1 %v20019_v25  ;;  %v5117_v52 = vld [vmem:[#allocation2 + $0x1fa] sm:$0xff] }
 0x29c   : > { %17647 = vmatpush3.bf16.msra.mxu1 %v19362_v26  ;;  %15804 = vmatprep.mubr.bf16.mxu1 %v20033_v35  ;;  %v5093_v26 = vld [vmem:[#allocation2 + $0x10a] sm:$0xff] }
 0x29d   : > { %17640 = vmatprep.subr.bf16.mxu1 %v19363_v30  ;;  %v5209_v33 = vpack.c.bf16 %v5093_v26, %v5092_v20  ;;  %v5111_v26 = vld [vmem:[#allocation2 + $0x1c2] sm:$0xff] }
 0x29f   : > { %16349 = vmatmul.mubr.bf16.gmra.mrb[124].mxu0 %v4331_v12  ;;  %v20066_v12 = vpack.c.bf16 %v702_v8, %v701_v7  ;;  %v5106_v7 = vld [vmem:[#allocation2 + $0x192] sm:$0xff]  ;;  %v5107_v8 = vld [vmem:[#allocation2 + $0x19a] sm:$0xff] }
 0x2a0   : > { %16368 = vmatprep.mubr.bf16.mxu0 %v5198_v14  ;;  %17648 = vmatpush3.bf16.msra.mxu1 %v19363_v30  ;;  %v704_v14 = vld [vmem:[#allocation2 + $0x108] sm:$0xff]  ;;  %v5094_v30 = vld [vmem:[#allocation2 + $0x11a] sm:$0xff]  ;;  %v5216_v11 = vpack.c.bf16 %v5107_v8, %v5106_v7 }
 0x2a1   : > { %v20068_v17 = vpack.c.bf16 %v704_v14, %v703_v9  ;;  %v5210_v34 = vpack.c.bf16 %v5095_v31, %v5094_v30  ;;  %v5108_v14 = vld [vmem:[#allocation2 + $0x1a2] sm:$0xff] }
 0x2a2   : > { %v725_v31 = vld [vmem:[#allocation2 + $0x1e0] sm:$0xff]  ;;  %v736_v8 = vld [vmem:[#allocation2 + $0x248] sm:$0xff] }
 0x2a3   : > { %15805 = vmatmul.mubr.bf16.gmra.mrb[12].mxu1 %v20038_v41 }
 0x2a4   : > { %15808 = vmatprep.mubr.bf16.mxu1 %v20051_v51 }
 0x2a7   : > { %16369 = vmatmul.mubr.bf16.vlgmr.msra.gmra.mrb[0].mxu0 %v5199_v27  ;;  %v20075_v27 = vpack.c.bf16 %v706_v24, %v705_v23  ;;  %v724_v23 = vld [vmem:[#allocation2 + $0x1d0] sm:$0xff]  ;;  %v5110_v24 = vld [vmem:[#allocation2 + $0x1ba] sm:$0xff] }
 0x2a8   : > { %16497 = vmatpush3.bf16.msra.mxu0 %v19973_v15  ;;  %16372 = vmatprep.mubr.bf16.mxu0 %v5200_v28  ;;  %v19364_v15 = vld [vmem:[%s22321_s1 + $0xb0] sm:$0xff]   ;;  %v707_v28 = vld [vmem:[#allocation2 + $0x128] sm:$0xff]  ;;  %v5218_v30 = vpack.c.bf16 %v5111_v26, %v5110_v24 }
 0x2a9   : > { %16498 = vmatprep.subr.bf16.mxu0 %v19078_v29  ;;  %17641 = vmatprep.subr.bf16.mxu1 %v19364_v15  ;;  %v5125_v24 = vld [vmem:[#allocation2 + $0x24a] sm:$0xff] }
 0x2aa   : > { %17649 = vmatpush3.bf16.msra.mxu1 %v19364_v15  ;;  %v20081_v15 = vpack.c.bf16 %v710_v37, %v709_v36  ;;  %v5112_v36 = vld [vmem:[#allocation2 + $0x1ca] sm:$0xff]  ;;  %v5113_v37 = vld [vmem:[#allocation2 + $0x1d2] sm:$0xff] }
 0x2ab   : > { %17642 = vmatprep.subr.bf16.mxu1 %v19365_v45  ;;  %15809 = vmatmul.mubr.bf16.gmra.mrb[16].mxu1 %v20056_v56 }
 0x2ac   : > { %16499 = vmatpush3.bf16.msra.mxu0 %v19078_v29  ;;  %15812 = vmatprep.mubr.bf16.mxu1 %v20060_v0  ;;  %v708_v29 = vld [vmem:[#allocation2 + $0x130] sm:$0xff] }
 0x2ad   : > { %16500 = vmatprep.subr.bf16.mxu0 %v19079_v40  ;;  %v20077_v32 = vpack.c.bf16 %v708_v29, %v707_v28 }
 0x2ae   : > { %17650 = vmatpush3.bf16.msra.mxu1 %v19365_v45 }
 0x2af   : > { %16373 = vmatmul.mubr.bf16.gmra.mrb[4].mxu0 %v5201_v42  ;;  %v712_v42 = vld [vmem:[#allocation2 + $0x158] sm:$0xff] }
 0x2b0   : > { %16376 = vmatprep.mubr.bf16.mxu0 %v5202_v43  ;;  %16501 = vmatpush3.bf16.msra.mxu0 %v19079_v40  ;;  %v5097_v40 = vld [vmem:[#allocation2 + $0x132] sm:$0xff]  ;;  %v5098_v43 = vld [vmem:[#allocation2 + $0x142] sm:$0xff]  ;;  %v20083_v45 = vpack.c.bf16 %v712_v42, %v711_v38  ;;  %v5115_v42 = vld [vmem:[#allocation2 + $0x1ea] sm:$0xff] }
 0x2b1   : > { %16502 = vmatprep.subr.bf16.mxu0 %v19085_v44  ;;  %v5211_v46 = vpack.c.bf16 %v5097_v40, %v5096_v39  ;;  %v728_v39 = vld [vmem:[#allocation2 + $0x1f8] sm:$0xff]  ;;  %v5114_v40 = vld [vmem:[#allocation2 + $0x1e2] sm:$0xff] }
 0x2b3   : > { %15813 = vmatmul.mubr.bf16.gmra.mrb[20].mxu1 %v20062_v4 }
 0x2b4   : > { %16503 = vmatpush3.bf16.msra.mxu0 %v19085_v44  ;;  %15816 = vmatprep.mubr.bf16.mxu1 %v20066_v12  ;;  %v5099_v44 = vld [vmem:[#allocation2 + $0x14a] sm:$0xff] }
 0x2b5   : > { %16504 = vmatprep.subr.bf16.mxu0 %v19089_v55  ;;  %v5212_v47 = vpack.c.bf16 %v5099_v44, %v5098_v43  ;;  %v5219_v44 = vpack.c.bf16 %v5113_v37, %v5112_v36 }
 0x2b7   : > { %16377 = vmatmul.mubr.bf16.gmra.mrb[8].mxu0 %v5203_v57  ;;  %v5102_v57 = vld [vmem:[#allocation2 + $0x16a] sm:$0xff] }
 0x2b8   : > { %16380 = vmatprep.mubr.bf16.mxu0 %v5204_v58  ;;  %16505 = vmatpush3.bf16.msra.mxu0 %v19089_v55  ;;  %v716_v55 = vld [vmem:[#allocation2 + $0x180] sm:$0xff]  ;;  %v5103_v58 = vld [vmem:[#allocation2 + $0x172] sm:$0xff] }
 0x2b9   : > { %16506 = vmatprep.subr.bf16.mxu0 %v19090_v22  ;;  %v20089_v59 = vpack.c.bf16 %v716_v55, %v715_v50  ;;  %v5214_v61 = vpack.c.bf16 %v5103_v58, %v5102_v57  ;;  %v5116_v50 = vld [vmem:[#allocation2 + $0x1f2] sm:$0xff]  ;;  %v732_v55 = vld [vmem:[#allocation2 + $0x220] sm:$0xff]  ;;  %v5118_v57 = vld [vmem:[#allocation2 + $0x20a] sm:$0xff] }
 0x2ba   : > { %v5119_v58 = vld [vmem:[#allocation2 + $0x212] sm:$0xff] }
 0x2bb   : > { %15817 = vmatmul.mubr.bf16.gmra.mrb[24].mxu1 %v20068_v17 }
 0x2bc   : > { %16507 = vmatpush3.bf16.msra.mxu0 %v19090_v22  ;;  %15820 = vmatprep.mubr.bf16.mxu1 %v20075_v27  ;;  %v723_v22 = vld [vmem:[#allocation2 + $0x1c8] sm:$0xff] }
 0x2bd   : > { %16508 = vmatprep.subr.bf16.mxu0 %v19091_v16  ;;  %v20104_v28 = vpack.c.bf16 %v724_v23, %v723_v22  ;;  %v737_v22 = vld [vmem:[#allocation2 + $0x258] sm:$0xff]  ;;  %v738_v23 = vld [vmem:[#allocation2 + $0x260] sm:$0xff] }
 0x2be   : > { %v20129_v26 = vpack.c.bf16 %v738_v23, %v737_v22  ;;  %v5136_v22 = vld [vmem:[#allocation2 + $0x2ba] sm:$0xff]  ;;  %v5137_v23 = vld [vmem:[#allocation2 + $0x2c2] sm:$0xff] }
 0x2bf   : > { %16381 = vmatmul.mubr.bf16.gmra.mrb[12].mxu0 %v5205_v5  ;;  %v20093_v5 = vpack.c.bf16 %v718_v63, %v717_v62  ;;  %v5222_v62 = vpack.c.bf16 %v5119_v58, %v5118_v57  ;;  %v733_v63 = vld [vmem:[#allocation2 + $0x230] sm:$0xff]  ;;  %v745_v58 = vld [vmem:[#allocation2 + $0x2a8] sm:$0xff] }
 0x2c0   : > { %16384 = vmatprep.mubr.bf16.mxu0 %v5206_v6  ;;  %v720_v6 = vld [vmem:[#allocation2 + $0x1a8] sm:$0xff]  ;;  %16509 = vmatpush3.bf16.msra.mxu0 %v19091_v16 }
 0x2c1   : > { %v20095_v9 = vpack.c.bf16 %v720_v6, %v719_v1  ;;  %v734_v1 = vld [vmem:[#allocation2 + $0x238] sm:$0xff]  ;;  %v5121_v6 = vld [vmem:[#allocation2 + $0x222] sm:$0xff] }
 0x2c2   : > { %v20120_v7 = vpack.c.bf16 %v734_v1, %v733_v63  ;;  %v5223_v16 = vpack.c.bf16 %v5121_v6, %v5120_v3  ;;  %v5132_v63 = vld [vmem:[#allocation2 + $0x292] sm:$0xff]  ;;  %v5133_v1 = vld [vmem:[#allocation2 + $0x29a] sm:$0xff]  ;;  %v5134_v6 = vld [vmem:[#allocation2 + $0x2aa] sm:$0xff] }
 0x2c3   : > { %15821 = vmatmul.mubr.bf16.gmra.mrb[28].mxu1 %v20077_v32  ;;  %v748_v3 = vld [vmem:[#allocation2 + $0x2c0] sm:$0xff] }
 0x2c4   : > { %15824 = vmatprep.mubr.bf16.mxu1 %v20081_v15 }
 0x2c7   : > { %16385 = vmatmul.mubr.bf16.gmra.mrb[16].mxu0 %v5207_v18  ;;  %v722_v18 = vld [vmem:[#allocation2 + $0x1c0] sm:$0xff] }
 0x2c8   : > { %16388 = vmatprep.mubr.bf16.mxu0 %v5208_v19  ;;  %v5109_v19 = vld [vmem:[#allocation2 + $0x1aa] sm:$0xff]  ;;  %v20102_v20 = vpack.c.bf16 %v722_v18, %v721_v13  ;;  %v5124_v18 = vld [vmem:[#allocation2 + $0x242] sm:$0xff] }
 0x2c9   : > { %v5217_v29 = vpack.c.bf16 %v5109_v19, %v5108_v14  ;;  %v20122_v14 = vpack.c.bf16 %v736_v8, %v735_v2  ;;  %v19092_v19 = vld [vmem:[%s22321_s1 + $0x1b8] sm:$0xff]   ;;  %v5225_v36 = vpack.c.bf16 %v5125_v24, %v5124_v18 }
 0x2ca   : > { %16510 = vmatprep.subr.bf16.mxu0 %v19092_v19  ;;  %v5135_v8 = vld [vmem:[#allocation2 + $0x2b2] sm:$0xff] }
 0x2cb   : > { %15825 = vmatmul.mubr.bf16.gmra.mrb[32].mxu1 %v20083_v45  ;;  %16511 = vmatpush3.bf16.msra.mxu0 %v19092_v19  ;;  %v750_v18 = vld [vmem:[#allocation2 + $0x2d8] sm:$0xff]  ;;  %v751_v19 = vld [vmem:[#allocation2 + $0x2e0] sm:$0xff] }
 0x2cc   : > { %15828 = vmatprep.mubr.bf16.mxu1 %v20087_v54 }
 0x2cf   : > { %16389 = vmatmul.mubr.bf16.gmra.mrb[20].mxu0 %v5209_v33  ;;  %v726_v33 = vld [vmem:[#allocation2 + $0x1e8] sm:$0xff] }
 0x2d0   : > { %16392 = vmatprep.mubr.bf16.mxu0 %v5210_v34  ;;  %v727_v34 = vld [vmem:[#allocation2 + $0x1f0] sm:$0xff]  ;;  %v20108_v38 = vpack.c.bf16 %v726_v33, %v725_v31  ;;  %v5126_v31 = vld [vmem:[#allocation2 + $0x25a] sm:$0xff]  ;;  %v5127_v33 = vld [vmem:[#allocation2 + $0x262] sm:$0xff] }
 0x2d1   : > { %v20110_v43 = vpack.c.bf16 %v728_v39, %v727_v34  ;;  %v5226_v37 = vpack.c.bf16 %v5127_v33, %v5126_v31  ;;  %v741_v39 = vld [vmem:[#allocation2 + $0x280] sm:$0xff] }
 0x2d2   : > { %v5139_v31 = vld [vmem:[#allocation2 + $0x2da] sm:$0xff] }
 0x2d3   : > { %15829 = vmatmul.mubr.bf16.gmra.mrb[36].mxu1 %v20089_v59 }
 0x2d4   : > { %15832 = vmatprep.mubr.bf16.mxu1 %v20093_v5 }
 0x2d7   : > { %16393 = vmatmul.mubr.bf16.gmra.mrb[24].mxu0 %v5211_v46  ;;  %v5220_v46 = vpack.c.bf16 %v5115_v42, %v5114_v40  ;;  %v742_v40 = vld [vmem:[#allocation2 + $0x288] sm:$0xff]  ;;  %v743_v42 = vld [vmem:[#allocation2 + $0x290] sm:$0xff] }
 0x2d8   : > { %16396 = vmatprep.mubr.bf16.mxu0 %v5212_v47  ;;  %v729_v47 = vld [vmem:[#allocation2 + $0x208] sm:$0xff] }
 0x2d9   : > { %v20114_v53 = vpack.c.bf16 %v730_v48, %v729_v47  ;;  %v20135_v47 = vpack.c.bf16 %v742_v40, %v741_v39  ;;  %v744_v48 = vld [vmem:[#allocation2 + $0x298] sm:$0xff]  ;;  %v5140_v39 = vld [vmem:[#allocation2 + $0x2e2] sm:$0xff]  ;;  %v5141_v40 = vld [vmem:[#allocation2 + $0x2ea] sm:$0xff] }
 0x2db   : > { %15833 = vmatmul.mubr.bf16.gmra.mrb[40].mxu1 %v20095_v9 }
 0x2dc   : > { %15836 = vmatprep.mubr.bf16.mxu1 %v20102_v20 }
 0x2df   : > { %16397 = vmatmul.mubr.bf16.gmra.mrb[28].mxu0 %v5213_v60  ;;  %v20116_v60 = vpack.c.bf16 %v732_v55, %v731_v49  ;;  %v5130_v49 = vld [vmem:[#allocation2 + $0x282] sm:$0xff] }
 0x2e0   : > { %16400 = vmatprep.mubr.bf16.mxu0 %v5214_v61  ;;  %v5221_v61 = vpack.c.bf16 %v5117_v52, %v5116_v50  ;;  %v5131_v50 = vld [vmem:[#allocation2 + $0x28a] sm:$0xff]  ;;  %v20137_v52 = vpack.c.bf16 %v744_v48, %v743_v42  ;;  %v20156_v42 = vld [vmem:[%s22321_s1 + $0x1c0] sm:$0xff]  }
 0x2e1   : > { %v5228_v57 = vpack.c.bf16 %v5131_v50, %v5130_v49  ;;  %v755_v48 = vld [vmem:[#allocation2 + $0x308] sm:$0xff]  ;;  %v5142_v49 = vld [vmem:[#allocation2 + $0x2fa] sm:$0xff]  ;;  %16640 = vmatprep.subr.bf16.mxu0 %v20156_v42 }
 0x2e2   : > { %v5143_v50 = vld [vmem:[#allocation2 + $0x302] sm:$0xff] }
 0x2e3   : > { %15837 = vmatmul.mubr.bf16.gmra.mrb[44].mxu1 %v20104_v28 }
 0x2e4   : > { %15840 = vmatprep.mubr.bf16.mxu1 %v20108_v38 }
 0x2e7   : > { %16401 = vmatmul.mubr.bf16.gmra.mrb[32].mxu0 %v5215_v10  ;;  %v5122_v10 = vld [vmem:[#allocation2 + $0x232] sm:$0xff] }
 0x2e8   : > { %16404 = vmatprep.mubr.bf16.mxu0 %v5216_v11  ;;  %v5123_v11 = vld [vmem:[#allocation2 + $0x23a] sm:$0xff] }
 0x2e9   : > { %v5224_v13 = vpack.c.bf16 %v5123_v11, %v5122_v10  ;;  %v5229_v11 = vpack.c.bf16 %v5133_v1, %v5132_v63  ;;  %v757_v63 = vld [vmem:[#allocation2 + $0x320] sm:$0xff]  ;;  %v758_v1 = vld [vmem:[#allocation2 + $0x328] sm:$0xff] }
 0x2eb   : > { %15841 = vmatmul.mubr.bf16.gmra.mrb[48].mxu1 %v20110_v43 }
 0x2ec   : > { %15844 = vmatprep.mubr.bf16.mxu1 %v20114_v53 }
 0x2ef   : > { %16405 = vmatmul.mubr.bf16.gmra.mrb[36].mxu0 %v5217_v29  ;;  %v739_v29 = vld [vmem:[#allocation2 + $0x268] sm:$0xff] }
 0x2f0   : > { %16408 = vmatprep.mubr.bf16.mxu0 %v5218_v30  ;;  %v740_v30 = vld [vmem:[#allocation2 + $0x270] sm:$0xff] }
 0x2f1   : > { %v20131_v34 = vpack.c.bf16 %v740_v30, %v739_v29  ;;  %v752_v29 = vld [vmem:[#allocation2 + $0x2e8] sm:$0xff]  ;;  %v5138_v30 = vld [vmem:[#allocation2 + $0x2d2] sm:$0xff] }
 0x2f2   : > { %v20149_v33 = vpack.c.bf16 %v752_v29, %v751_v19  ;;  %v761_v29 = vld [vmem:[#allocation2 + $0x348] sm:$0xff] }
 0x2f3   : > { %15845 = vmatmul.mubr.bf16.gmra.mrb[52].mxu1 %v20116_v60 }
 0x2f4   : > { %15848 = vmatprep.mubr.bf16.mxu1 %v20120_v7 }
 0x2f7   : > { %16409 = vmatmul.mubr.bf16.gmra.mrb[40].mxu0 %v5219_v44  ;;  %v5128_v44 = vld [vmem:[#allocation2 + $0x26a] sm:$0xff] }
 0x2f8   : > { %16412 = vmatprep.mubr.bf16.mxu0 %v5220_v46  ;;  %v5129_v46 = vld [vmem:[#allocation2 + $0x272] sm:$0xff] }
 0x2f9   : > { %v5227_v55 = vpack.c.bf16 %v5129_v46, %v5128_v44  ;;  %v753_v44 = vld [vmem:[#allocation2 + $0x2f8] sm:$0xff]  ;;  %v754_v46 = vld [vmem:[#allocation2 + $0x300] sm:$0xff] }
 0x2fb   : > { %15849 = vmatmul.mubr.bf16.gmra.mrb[56].mxu1 %v20122_v14 }
 0x2fc   : > { %15852 = vmatprep.mubr.bf16.mxu1 %v20129_v26 }
 0x2ff   : > { %16413 = vmatmul.mubr.bf16.gmra.mrb[44].mxu0 %v5221_v61  ;;  %v746_v61 = vld [vmem:[#allocation2 + $0x2b0] sm:$0xff] }
 0x300   : > { %16416 = vmatprep.mubr.bf16.mxu0 %v5222_v62  ;;  %v747_v62 = vld [vmem:[#allocation2 + $0x2b8] sm:$0xff]  ;;  %v20141_v2 = vpack.c.bf16 %v746_v61, %v745_v58  ;;  %v5233_v61 = vpack.c.bf16 %v5141_v40, %v5140_v39  ;;  %v764_v40 = vld [vmem:[#allocation2 + $0x360] sm:$0xff] }
 0x301   : > { %v20143_v10 = vpack.c.bf16 %v748_v3, %v747_v62  ;;  %v5234_v62 = vpack.c.bf16 %v5143_v50, %v5142_v49  ;;  %v759_v3 = vld [vmem:[#allocation2 + $0x330] sm:$0xff] }
 0x303   : > { %15853 = vmatmul.mubr.bf16.gmra.mrb[60].mxu1 %v20131_v34 }
 0x304   : > { %15856 = vmatprep.mubr.bf16.mxu1 %v20135_v47 }
 0x307   : > { %16417 = vmatmul.mubr.bf16.gmra.mrb[48].mxu0 %v5223_v16  ;;  %v5230_v16 = vpack.c.bf16 %v5135_v8, %v5134_v6  ;;  %v5144_v6 = vld [vmem:[#allocation2 + $0x30a] sm:$0xff]  ;;  %v5145_v8 = vld [vmem:[#allocation2 + $0x312] sm:$0xff] }
 0x308   : > { %16420 = vmatprep.mubr.bf16.mxu0 %v5224_v13  ;;  %v749_v13 = vld [vmem:[#allocation2 + $0x2d0] sm:$0xff] }
 0x309   : > { %v20147_v24 = vpack.c.bf16 %v750_v18, %v749_v13  ;;  %v5146_v13 = vld [vmem:[#allocation2 + $0x322] sm:$0xff]  ;;  %v5147_v18 = vld [vmem:[#allocation2 + $0x32a] sm:$0xff] }
 0x30b   : > { %15857 = vmatmul.mubr.bf16.gmra.mrb[64].mxu1 %v20137_v52 }
 0x30c   : > { %15860 = vmatprep.mubr.bf16.mxu1 %v20141_v2 }
 0x30f   : > { %16421 = vmatmul.mubr.bf16.gmra.mrb[52].mxu0 %v5225_v36  ;;  %v5231_v36 = vpack.c.bf16 %v5137_v23, %v5136_v22  ;;  %v5235_v22 = vpack.c.bf16 %v5145_v8, %v5144_v6  ;;  %v5236_v23 = vpack.c.bf16 %v5147_v18, %v5146_v13  ;;  %v768_v6 = vld [vmem:[#allocation2 + $0x388] sm:$0xff]  ;;  %v5154_v8 = vld [vmem:[#allocation2 + $0x372] sm:$0xff] }
 0x310   : > { %16424 = vmatprep.mubr.bf16.mxu0 %v5226_v37  ;;  %v5232_v37 = vpack.c.bf16 %v5139_v31, %v5138_v30  ;;  %v762_v30 = vld [vmem:[#allocation2 + $0x350] sm:$0xff]  ;;  %v763_v31 = vld [vmem:[#allocation2 + $0x358] sm:$0xff] }
 0x311   : > { %v20171_v39 = vpack.c.bf16 %v762_v30, %v761_v29  ;;  %v769_v29 = vld [vmem:[#allocation2 + $0x398] sm:$0xff]  ;;  %v770_v30 = vld [vmem:[#allocation2 + $0x3a0] sm:$0xff] }
 0x313   : > { %15861 = vmatmul.mubr.bf16.gmra.mrb[68].mxu1 %v20143_v10 }
 0x314   : > { %15864 = vmatprep.mubr.bf16.mxu1 %v20147_v24 }
 0x317   : > { %16425 = vmatmul.mubr.bf16.gmra.mrb[56].mxu0 %v5227_v55  ;;  %v20159_v55 = vpack.c.bf16 %v754_v46, %v753_v44  ;;  %v5150_v44 = vld [vmem:[#allocation2 + $0x34a] sm:$0xff]  ;;  %v5151_v46 = vld [vmem:[#allocation2 + $0x352] sm:$0xff] }
 0x318   : > { %16428 = vmatprep.mubr.bf16.mxu0 %v5228_v57  ;;  %v756_v57 = vld [vmem:[#allocation2 + $0x310] sm:$0xff]  ;;  %v5238_v50 = vpack.c.bf16 %v5151_v46, %v5150_v44  ;;  %v5158_v44 = vld [vmem:[#allocation2 + $0x39a] sm:$0xff]  ;;  %v5159_v46 = vld [vmem:[#allocation2 + $0x3a2] sm:$0xff] }
 0x319   : > { %v20161_v58 = vpack.c.bf16 %v756_v57, %v755_v48  ;;  %v20173_v48 = vpack.c.bf16 %v764_v40, %v763_v31  ;;  %v765_v57 = vld [vmem:[#allocation2 + $0x370] sm:$0xff] }
 0x31a   : > { %v5157_v31 = vld [vmem:[#allocation2 + $0x38a] sm:$0xff] }
 0x31b   : > { %15865 = vmatmul.mubr.bf16.gmra.mrb[72].mxu1 %v20149_v33  ;;  %v772_v40 = vld [vmem:[#allocation2 + $0x3b0] sm:$0xff] }
 0x31c   : > { %15868 = vmatprep.mubr.bf16.mxu1 %v20159_v55 }
 0x31f   : > { %16429 = vmatmul.mubr.bf16.gmra.mrb[60].mxu0 %v5229_v11  ;;  %v20165_v11 = vpack.c.bf16 %v758_v1, %v757_v63  ;;  %v5152_v63 = vld [vmem:[#allocation2 + $0x35a] sm:$0xff]  ;;  %v5153_v1 = vld [vmem:[#allocation2 + $0x362] sm:$0xff] }
 0x320   : > { %16432 = vmatprep.mubr.bf16.mxu0 %v5230_v16  ;;  %v760_v16 = vld [vmem:[#allocation2 + $0x338] sm:$0xff]  ;;  %v5239_v18 = vpack.c.bf16 %v5153_v1, %v5152_v63  ;;  %v775_v63 = vld [vmem:[#allocation2 + $0x3d0] sm:$0xff] }
 0x321   : > { %v20167_v19 = vpack.c.bf16 %v760_v16, %v759_v3  ;;  %v5155_v16 = vld [vmem:[#allocation2 + $0x37a] sm:$0xff]  ;;  %v5160_v1 = vld [vmem:[#allocation2 + $0x3aa] sm:$0xff] }
 0x323   : > { %15869 = vmatmul.mubr.bf16.gmra.mrb[76].mxu1 %v20161_v58 }
 0x324   : > { %15872 = vmatprep.mubr.bf16.mxu1 %v20165_v11 }
 0x327   : > { %16433 = vmatmul.mubr.bf16.gmra.mrb[64].mxu0 %v5231_v36  ;;  %v5148_v36 = vld [vmem:[#allocation2 + $0x332] sm:$0xff] }
 0x328   : > { %16436 = vmatprep.mubr.bf16.mxu0 %v5232_v37  ;;  %v5149_v37 = vld [vmem:[#allocation2 + $0x33a] sm:$0xff] }
 0x329   : > { %v5237_v49 = vpack.c.bf16 %v5149_v37, %v5148_v36  ;;  %v20183_v36 = vpack.c.bf16 %v770_v30, %v769_v29  ;;  %v771_v37 = vld [vmem:[#allocation2 + $0x3a8] sm:$0xff] }
 0x32b   : > { %15873 = vmatmul.mubr.bf16.gmra.mrb[80].mxu1 %v20167_v19 }
 0x32c   : > { %15876 = vmatprep.mubr.bf16.mxu1 %v20171_v39 }
 0x32f   : > { %16437 = vmatmul.mubr.bf16.gmra.mrb[68].mxu0 %v5233_v61  ;;  %v766_v61 = vld [vmem:[#allocation2 + $0x378] sm:$0xff] }
 0x330   : > { %16440 = vmatprep.mubr.bf16.mxu0 %v5234_v62  ;;  %v767_v62 = vld [vmem:[#allocation2 + $0x380] sm:$0xff]  ;;  %v20177_v3 = vpack.c.bf16 %v766_v61, %v765_v57  ;;  %v5242_v57 = vpack.c.bf16 %v5159_v46, %v5158_v44  ;;  %v5164_v44 = vld [vmem:[#allocation2 + $0x3d2] sm:$0xff] }
 0x331   : > { %v20179_v13 = vpack.c.bf16 %v768_v6, %v767_v62  ;;  %v773_v61 = vld [vmem:[#allocation2 + $0x3c0] sm:$0xff]  ;;  %v774_v62 = vld [vmem:[#allocation2 + $0x3c8] sm:$0xff]  ;;  %v5161_v6 = vld [vmem:[#allocation2 + $0x3b2] sm:$0xff] }
 0x332   : > { %v5165_v46 = vld [vmem:[#allocation2 + $0x3da] sm:$0xff] }
 0x333   : > { %15877 = vmatmul.mubr.bf16.gmra.mrb[84].mxu1 %v20173_v48 }
 0x334   : > { %15880 = vmatprep.mubr.bf16.mxu1 %v20177_v3 }
 0x337   : > { %16441 = vmatmul.mubr.bf16.gmra.mrb[72].mxu0 %v5235_v22  ;;  %v5240_v22 = vpack.c.bf16 %v5155_v16, %v5154_v8  ;;  %v20189_v8 = vpack.c.bf16 %v774_v62, %v773_v61  ;;  %v776_v16 = vld [vmem:[#allocation2 + $0x3d8] sm:$0xff]  ;;  %v5166_v61 = vld [vmem:[#allocation2 + $0x3ea] sm:$0xff] }
 0x338   : > { %16444 = vmatprep.mubr.bf16.mxu0 %v5236_v23  ;;  %v5156_v23 = vld [vmem:[#allocation2 + $0x382] sm:$0xff]  ;;  %v20191_v29 = vpack.c.bf16 %v776_v16, %v775_v63  ;;  %v5167_v62 = vld [vmem:[#allocation2 + $0x3f2] sm:$0xff] }
 0x339   : > { %22348 = vst [vmem:[#allocation8_spill] sm:$0xff] %v20189_v8  ;;  %v781_v16 = vld [vmem:[#allocation2 + $0x410] sm:$0xff] }
 0x33a   : > { %22349 = vst [vmem:[#allocation9_spill] sm:$0xff] %v20191_v29 }
 0x33b   : > { %15881 = vmatmul.mubr.bf16.gmra.mrb[88].mxu1 %v20179_v13 }
 0x33c   : > { %15884 = vmatprep.mubr.bf16.mxu1 %v20183_v36 }
 0x33f   : > { %16445 = vmatmul.mubr.bf16.gmra.mrb[76].mxu0 %v5237_v49  ;;  %v20185_v49 = vpack.c.bf16 %v772_v40, %v771_v37  ;;  %v778_v37 = vld [vmem:[#allocation2 + $0x3f0] sm:$0xff]  ;;  %v779_v40 = vld [vmem:[#allocation2 + $0x3f8] sm:$0xff] }
 0x340   : > { %16448 = vmatprep.mubr.bf16.mxu0 %v5238_v50  ;;  %v5241_v50 = vpack.c.bf16 %v5157_v31, %v5156_v23  ;;  %v5243_v23 = vpack.c.bf16 %v5161_v6, %v5160_v1  ;;  %v777_v31 = vld [vmem:[#allocation2 + $0x3e8] sm:$0xff]  ;;  %v5245_v1 = vpack.c.bf16 %v5165_v46, %v5164_v44  ;;  %v5246_v6 = vpack.c.bf16 %v5167_v62, %v5166_v61  ;;  %v785_v61 = vld [vmem:[#allocation2 + $0x438] sm:$0xff]  ;;  %v786_v62 = vld [vmem:[#allocation2 + $0x440] sm:$0xff] }
 0x341   : > { %22347 = vst [vmem:[#allocation7_spill] sm:$0xff] %v20185_v49 }
 0x343   : > { %15885 = vmatmul.mubr.bf16.gmra.mrb[92].mxu1 %v20185_v49 }
 0x344   : > { %15888 = vmatprep.mubr.bf16.mxu1 %v20189_v8  ;;  %v5171_v8 = vld [vmem:[#allocation2 + $0x41a] sm:$0xff] }
 0x347   : > { %16449 = vmatmul.mubr.bf16.gmra.mrb[80].mxu0 %v5239_v18  ;;  %v5162_v18 = vld [vmem:[#allocation2 + $0x3c2] sm:$0xff] }
 0x348   : > { %16452 = vmatprep.mubr.bf16.mxu0 %v5240_v22  ;;  %v5163_v22 = vld [vmem:[#allocation2 + $0x3ca] sm:$0xff] }
 0x349   : > { %v5244_v30 = vpack.c.bf16 %v5163_v22, %v5162_v18  ;;  %v782_v18 = vld [vmem:[#allocation2 + $0x418] sm:$0xff]  ;;  %v783_v22 = vld [vmem:[#allocation2 + $0x420] sm:$0xff] }
 0x34b   : > { %15889 = vmatmul.mubr.bf16.gmra.mrb[96].mxu1 %v20191_v29  ;;  %v5170_v29 = vld [vmem:[#allocation2 + $0x412] sm:$0xff] }
 0x34c   : > { %v5248_v46 = vpack.c.bf16 %v5171_v8, %v5170_v29  ;;  %v789_v29 = vld [vmem:[#allocation2 + $0x460] sm:$0xff] }
 0x34f   : > { %16453 = vmatmul.mubr.bf16.gmra.mrb[84].mxu0 %v5241_v50  ;;  %v20195_v50 = vpack.c.bf16 %v778_v37, %v777_v31  ;;  %v20201_v31 = vpack.c.bf16 %v782_v18, %v781_v16  ;;  %v784_v37 = vld [vmem:[#allocation2 + $0x428] sm:$0xff]  ;;  %v788_v18 = vld [vmem:[#allocation2 + $0x450] sm:$0xff] }
 0x350   : > { %16456 = vmatprep.mubr.bf16.mxu0 %v5242_v57  ;;  %v780_v57 = vld [vmem:[#allocation2 + $0x400] sm:$0xff]  ;;  %v787_v16 = vld [vmem:[#allocation2 + $0x448] sm:$0xff] }
 0x351   : > { %22350 = vst [vmem:[#allocation10_spill] sm:$0xff] %v20195_v50  ;;  %v20197_v63 = vpack.c.bf16 %v780_v57, %v779_v40  ;;  %15892 = vmatprep.mubr.bf16.mxu1 %v20195_v50  ;;  %22352 = vst [vmem:[#allocation12_spill] sm:$0xff] %v20201_v31  ;;  %v20203_v40 = vpack.c.bf16 %v784_v37, %v783_v22  ;;  %v5172_v57 = vld [vmem:[#allocation2 + $0x422] sm:$0xff]  ;;  %v20209_v22 = vpack.c.bf16 %v788_v18, %v787_v16  ;;  %v791_v37 = vld [vmem:[#allocation2 + $0x470] sm:$0xff] }
 0x352   : > { %v5175_v50 = vld [vmem:[#allocation2 + $0x442] sm:$0xff]  ;;  %v795_v18 = vld [vmem:[#allocation2 + $0x498] sm:$0xff] }
 0x353   : > { %22351 = vst [vmem:[#allocation11_spill] sm:$0xff] %v20197_v63  ;;  %15893 = vmatmul.mubr.bf16.gmra.mrb[100].mxu1 %v20197_v63  ;;  %22353 = vst [vmem:[#allocation13_spill] sm:$0xff] %v20203_v40  ;;  %v5174_v63 = vld [vmem:[#allocation2 + $0x43a] sm:$0xff] }
 0x354   : > { %15896 = vmatprep.mubr.bf16.mxu1 %v20201_v31  ;;  %22355 = vst [vmem:[#allocation15_spill] sm:$0xff] %v20209_v22  ;;  %v5250_v8 = vpack.c.bf16 %v5175_v50, %v5174_v63  ;;  %v5179_v31 = vld [vmem:[#allocation2 + $0x46a] sm:$0xff] }
 0x355   : > { %v793_v63 = vld [vmem:[#allocation2 + $0x488] sm:$0xff] }
 0x357   : > { %16457 = vmatmul.mubr.bf16.gmra.mrb[88].mxu0 %v5243_v23  ;;  %v5168_v23 = vld [vmem:[#allocation2 + $0x3fa] sm:$0xff] }
 0x358   : > { %16460 = vmatprep.mubr.bf16.mxu0 %v5244_v30  ;;  %v5169_v30 = vld [vmem:[#allocation2 + $0x402] sm:$0xff] }
 0x359   : > { %v5247_v44 = vpack.c.bf16 %v5169_v30, %v5168_v23  ;;  %v790_v30 = vld [vmem:[#allocation2 + $0x468] sm:$0xff] }
 0x35b   : > { %15897 = vmatmul.mubr.bf16.gmra.mrb[104].mxu1 %v20203_v40  ;;  %v5178_v40 = vld [vmem:[#allocation2 + $0x462] sm:$0xff] }
 0x35c   : > { %v5252_v50 = vpack.c.bf16 %v5179_v31, %v5178_v40  ;;  %v797_v40 = vld [vmem:[#allocation2 + $0x4b0] sm:$0xff] }
 0x35f   : > { %16461 = vmatmul.mubr.bf16.gmra.mrb[92].mxu0 %v5245_v1  ;;  %v5173_v1 = vld [vmem:[#allocation2 + $0x42a] sm:$0xff] }
 0x360   : > { %16464 = vmatprep.mubr.bf16.mxu0 %v5246_v6  ;;  %v20207_v6 = vpack.c.bf16 %v786_v62, %v785_v61  ;;  %v5249_v23 = vpack.c.bf16 %v5173_v1, %v5172_v57  ;;  %v20213_v61 = vpack.c.bf16 %v790_v30, %v789_v29  ;;  %v792_v62 = vld [vmem:[#allocation2 + $0x478] sm:$0xff]  ;;  %v794_v1 = vld [vmem:[#allocation2 + $0x490] sm:$0xff]  ;;  %v796_v30 = vld [vmem:[#allocation2 + $0x4a0] sm:$0xff] }
 0x361   : > { %v20215_v16 = vpack.c.bf16 %v792_v62, %v791_v37  ;;  %v20219_v29 = vpack.c.bf16 %v794_v1, %v793_v63  ;;  %v20221_v37 = vpack.c.bf16 %v796_v30, %v795_v18  ;;  %v799_v62 = vld [vmem:[#allocation2 + $0x4c0] sm:$0xff]  ;;  %v800_v1 = vld [vmem:[#allocation2 + $0x4c8] sm:$0xff] }
 0x362   : > { %22354 = vst [vmem:[#allocation14_spill] sm:$0xff] %v20207_v6  ;;  %15900 = vmatprep.mubr.bf16.mxu1 %v20207_v6  ;;  %22356 = vst [vmem:[#allocation16_spill] sm:$0xff] %v20213_v61  ;;  %v5183_v6 = vld [vmem:[#allocation2 + $0x492] sm:$0xff]  ;;  %v20227_v18 = vpack.c.bf16 %v800_v1, %v799_v62  ;;  %v802_v30 = vld [vmem:[#allocation2 + $0x4e0] sm:$0xff] }
 0x363   : > { %15901 = vmatmul.mubr.bf16.gmra.mrb[108].mxu1 %v20209_v22  ;;  %22357 = vst [vmem:[#allocation17_spill] sm:$0xff] %v20215_v16  ;;  %22358 = vst [vmem:[#allocation18_spill] sm:$0xff] %v20219_v29  ;;  %v5182_v22 = vld [vmem:[#allocation2 + $0x48a] sm:$0xff] }
 0x364   : > { %15904 = vmatprep.mubr.bf16.mxu1 %v20213_v61  ;;  %22359 = vst [vmem:[#allocation19_spill] sm:$0xff] %v20221_v37  ;;  %v5254_v31 = vpack.c.bf16 %v5183_v6, %v5182_v22  ;;  %v5187_v61 = vld [vmem:[#allocation2 + $0x4ba] sm:$0xff]  ;;  %22361 = vst [vmem:[#allocation21_spill] sm:$0xff] %v20227_v18  ;;  %v5188_v22 = vld [vmem:[#allocation2 + $0x4c2] sm:$0xff] }
 0x365   : > { %v2310_v1 = vld [vmem:[#allocation2 + $0x12a] sm:$0xff] }
 0x367   : > { %16465 = vmatmul.mubr.bf16.gmra.mrb[96].mxu0 %v5247_v44  ;;  %v5176_v44 = vld [vmem:[#allocation2 + $0x44a] sm:$0xff] }
 0x368   : > { %16468 = vmatprep.mubr.bf16.mxu0 %v5248_v46  ;;  %v5177_v46 = vld [vmem:[#allocation2 + $0x452] sm:$0xff] }
 0x369   : > { %v5251_v57 = vpack.c.bf16 %v5177_v46, %v5176_v44  ;;  %v798_v46 = vld [vmem:[#allocation2 + $0x4b8] sm:$0xff] }
 0x36a   : > { %v20225_v63 = vpack.c.bf16 %v798_v46, %v797_v40  ;;  %v803_v40 = vld [vmem:[#allocation2 + $0x4e8] sm:$0xff]  ;;  %v804_v46 = vld [vmem:[#allocation2 + $0x4f0] sm:$0xff] }
 0x36b   : > { %15905 = vmatmul.mubr.bf16.gmra.mrb[112].mxu1 %v20215_v16  ;;  %v5186_v16 = vld [vmem:[#allocation2 + $0x4b2] sm:$0xff]  ;;  %v20233_v62 = vpack.c.bf16 %v804_v46, %v803_v40 }
 0x36c   : > { %15908 = vmatprep.mubr.bf16.mxu1 %v20219_v29  ;;  %22360 = vst [vmem:[#allocation20_spill] sm:$0xff] %v20225_v63  ;;  %v5256_v6 = vpack.c.bf16 %v5187_v61, %v5186_v16  ;;  %v5191_v29 = vld [vmem:[#allocation2 + $0x4e2] sm:$0xff]  ;;  %v2308_v16 = vld [vmem:[#allocation2 + $0x11a] sm:$0xff] }
 0x36d   : > { %22363 = vst [vmem:[#allocation23_spill] sm:$0xff] %v20233_v62 }
 0x36f   : > { %16469 = vmatmul.mubr.bf16.gmra.mrb[100].mxu0 %v5249_v23  ;;  %v5180_v23 = vld [vmem:[#allocation2 + $0x472] sm:$0xff] }
 0x370   : > { %16472 = vmatprep.mubr.bf16.mxu0 %v5250_v8  ;;  %v5181_v8 = vld [vmem:[#allocation2 + $0x47a] sm:$0xff] }
 0x371   : > { %v5253_v44 = vpack.c.bf16 %v5181_v8, %v5180_v23  ;;  %v801_v8 = vld [vmem:[#allocation2 + $0x4d8] sm:$0xff] }
 0x373   : > { %15909 = vmatmul.mubr.bf16.gmra.mrb[116].mxu1 %v20221_v37  ;;  %v5190_v37 = vld [vmem:[#allocation2 + $0x4da] sm:$0xff] }
 0x374   : > { %15912 = vmatprep.mubr.bf16.mxu1 %v20225_v63  ;;  %v5258_v61 = vpack.c.bf16 %v5191_v29, %v5190_v37  ;;  %v5195_v63 = vld [vmem:[#allocation2 + $0x50a] sm:$0xff]  ;;  %v2312_v29 = vld [vmem:[#allocation2 + $0x142] sm:$0xff] }
 0x375   : > { %v2313_v37 = vld [vmem:[#allocation2 + $0x14a] sm:$0xff] }
 0x377   : > { %16473 = vmatmul.mubr.bf16.gmra.mrb[104].mxu0 %v5251_v57  ;;  %v5184_v57 = vld [vmem:[#allocation2 + $0x49a] sm:$0xff] }
 0x378   : > { %16476 = vmatprep.mubr.bf16.mxu0 %v5252_v50  ;;  %v5185_v50 = vld [vmem:[#allocation2 + $0x4a2] sm:$0xff] }
 0x379   : > { %v5255_v23 = vpack.c.bf16 %v5185_v50, %v5184_v57  ;;  %v2309_v50 = vld [vmem:[#allocation2 + $0x122] sm:$0xff] }
 0x37b   : > { %15913 = vmatmul.mubr.bf16.gmra.mrb[120].mxu1 %v20227_v18  ;;  %v5194_v18 = vld [vmem:[#allocation2 + $0x502] sm:$0xff] }
 0x37c   : > { %v5260_v46 = vpack.c.bf16 %v5195_v63, %v5194_v18  ;;  %v2319_v63 = vld [vmem:[#allocation2 + $0x182] sm:$0xff] }
 0x37f   : > { %16477 = vmatmul.mubr.bf16.gmra.mrb[108].mxu0 %v5253_v44  ;;  %v5189_v44 = vld [vmem:[#allocation2 + $0x4ca] sm:$0xff] }
 0x380   : > { %16480 = vmatprep.mubr.bf16.mxu0 %v5254_v31  ;;  %v20231_v31 = vpack.c.bf16 %v802_v30, %v801_v8  ;;  %v5257_v57 = vpack.c.bf16 %v5189_v44, %v5188_v22  ;;  %v2422_v8 = vpack.c.bf16 %v2309_v50, %v2308_v16  ;;  %v2311_v30 = vld [vmem:[#allocation2 + $0x132] sm:$0xff]  ;;  %v2316_v50 = vld [vmem:[#allocation2 + $0x16a] sm:$0xff] }
 0x381   : > { %v2423_v49 = vpack.c.bf16 %v2311_v30, %v2310_v1  ;;  %v2314_v22 = vld [vmem:[#allocation2 + $0x152] sm:$0xff]  ;;  %v2322_v30 = vld [vmem:[#allocation2 + $0x1a2] sm:$0xff] }
 0x382   : > { %22362 = vst [vmem:[#allocation22_spill] sm:$0xff] %v20231_v31  ;;  %15916 = vmatprep.mubr.bf16.mxu1 %v20231_v31  ;;  %v5196_v44 = vld [vmem:[#allocation2 + $0x512] sm:$0xff] }
 0x383   : > { %15917 = vmatmul.mubr.bf16.gmra.mrb[124].mxu1 %v20233_v62  ;;  %v2424_v62 = vpack.c.bf16 %v2313_v37, %v2312_v29  ;;  %v2317_v1 = vld [vmem:[#allocation2 + $0x172] sm:$0xff]  ;;  %v2326_v29 = vld [vmem:[#allocation2 + $0x1ca] sm:$0xff] }
 0x384   : > { %15964 = vmatprep.mubr.bf16.mxu1 %v2422_v8  ;;  %v2318_v8 = vld [vmem:[#allocation2 + $0x17a] sm:$0xff] }
 0x385   : > { %v2427_v18 = vpack.c.bf16 %v2319_v63, %v2318_v8  ;;  %v2332_v8 = vld [vmem:[#allocation2 + $0x20a] sm:$0xff]  ;;  %v2334_v63 = vld [vmem:[#allocation2 + $0x21a] sm:$0xff] }
 0x387   : > { %16481 = vmatmul.mubr.bf16.gmra.mrb[112].mxu0 %v5255_v23  ;;  %v5192_v23 = vld [vmem:[#allocation2 + $0x4ea] sm:$0xff] }
 0x388   : > { %16484 = vmatprep.mubr.bf16.mxu0 %v5256_v6  ;;  %v5193_v6 = vld [vmem:[#allocation2 + $0x4f2] sm:$0xff] }
 0x389   : > { %v5259_v40 = vpack.c.bf16 %v5193_v6, %v5192_v23  ;;  %v19094_v23 = vld [vmem:[%s22321_s1 + $0x1c8] sm:$0xff]   ;;  %v2321_v6 = vld [vmem:[#allocation2 + $0x19a] sm:$0xff] }
 0x38b   : > { %15965 = vmatmul.mubr.bf16.vlgmr.msra.gmra.mrb[28].mxu1 %v2423_v49  ;;  %v2426_v49 = vpack.c.bf16 %v2317_v1, %v2316_v50  ;;  %v2331_v50 = vld [vmem:[#allocation2 + $0x1fa] sm:$0xff] }
 0x38c   : > { %15968 = vmatprep.mubr.bf16.mxu1 %v2424_v62  ;;  %v2320_v62 = vld [vmem:[#allocation2 + $0x192] sm:$0xff] }
 0x38f   : > { %16485 = vmatmul.mubr.bf16.gmra.mrb[116].mxu0 %v5257_v57  ;;  %v5197_v57 = vld [vmem:[#allocation2 + $0x51a] sm:$0xff] }
 0x390   : > { %16488 = vmatprep.mubr.bf16.mxu0 %v5258_v61  ;;  %v2315_v61 = vld [vmem:[#allocation2 + $0x15a] sm:$0xff]  ;;  %v5261_v16 = vpack.c.bf16 %v5197_v57, %v5196_v44 }
 0x391   : > { %v2425_v31 = vpack.c.bf16 %v2315_v61, %v2314_v22  ;;  %v2327_v22 = vld [vmem:[#allocation2 + $0x1d2] sm:$0xff]  ;;  %v19097_v44 = vld [vmem:[%s22321_s1 + $0x1e0] sm:$0xff]   ;;  %v2329_v61 = vld [vmem:[#allocation2 + $0x1ea] sm:$0xff] }
 0x392   : > { %v2431_v57 = vpack.c.bf16 %v2327_v22, %v2326_v29  ;;  %v2346_v29 = vld [vmem:[#allocation2 + $0x292] sm:$0xff]  ;;  %v2347_v22 = vld [vmem:[#allocation2 + $0x29a] sm:$0xff] }
 0x393   : > { %15969 = vmatmul.mubr.bf16.gmra.mrb[32].mxu1 %v2425_v31  ;;  %v2428_v31 = vpack.c.bf16 %v2321_v6, %v2320_v62  ;;  %v2336_v62 = vld [vmem:[#allocation2 + $0x232] sm:$0xff]  ;;  %v2337_v6 = vld [vmem:[#allocation2 + $0x23a] sm:$0xff] }
 0x394   : > { %15972 = vmatprep.mubr.bf16.mxu1 %v2426_v49  ;;  %v2333_v49 = vld [vmem:[#allocation2 + $0x212] sm:$0xff] }
 0x397   : > { %16489 = vmatmul.mubr.bf16.gmra.mrb[120].mxu0 %v5259_v40  ;;  %v19095_v40 = vld [vmem:[%s22321_s1 + $0x1d0] sm:$0xff]  }
 0x398   : > { %16492 = vmatprep.mubr.bf16.mxu0 %v5260_v46 }
 0x39b   : > { %15973 = vmatmul.mubr.bf16.gmra.mrb[36].mxu1 %v2427_v18  ;;  %v2434_v18 = vpack.c.bf16 %v2333_v49, %v2332_v8  ;;  %v2356_v8 = vld [vmem:[#allocation2 + $0x2fa] sm:$0xff]  ;;  %v2358_v49 = vld [vmem:[#allocation2 + $0x30a] sm:$0xff] }
 0x39c   : > { %15976 = vmatprep.mubr.bf16.mxu1 %v2428_v31  ;;  %v2338_v31 = vld [vmem:[#allocation2 + $0x242] sm:$0xff] }
 0x39f   : > { %16493 = vmatmul.mubr.bf16.gmra.mrb[124].mxu0 %v5261_v16  ;;  %v2330_v16 = vld [vmem:[#allocation2 + $0x1f2] sm:$0xff] }
 0x3a0   : > { %16512 = vmatprep.mubr.bf16.mxu0 %v20017_v21  ;;  %v2323_v21 = vld [vmem:[#allocation2 + $0x1aa] sm:$0xff]  ;;  %v2433_v1 = vpack.c.bf16 %v2331_v50, %v2330_v16  ;;  %v2352_v16 = vld [vmem:[#allocation2 + $0x2d2] sm:$0xff]  ;;  %v2354_v50 = vld [vmem:[#allocation2 + $0x2e2] sm:$0xff] }
 0x3a1   : > { %v2429_v46 = vpack.c.bf16 %v2323_v21, %v2322_v30  ;;  %v2339_v30 = vld [vmem:[#allocation2 + $0x24a] sm:$0xff]  ;;  %v2340_v21 = vld [vmem:[#allocation2 + $0x25a] sm:$0xff] }
 0x3a3   : > { %15977 = vmatmul.mubr.bf16.gmra.mrb[40].mxu1 %v2429_v46 }
 0x3a7   : > { %16513 = vmatmul.mubr.bf16.vlgmr.msra.gmra.mrb[0].mxu0 %v20019_v25  ;;  %v19096_v25 = vld [vmem:[%s22321_s1 + $0x1d8] sm:$0xff]  }
 0x3a8   : > { %16641 = vmatpush3.bf16.msra.mxu0 %v20156_v42  ;;  %16516 = vmatprep.mubr.bf16.mxu0 %v20033_v35  ;;  %v2324_v35 = vld [vmem:[#allocation2 + $0x1ba] sm:$0xff]  ;;  %v2325_v42 = vld [vmem:[#allocation2 + $0x1c2] sm:$0xff] }
 0x3a9   : > { %16642 = vmatprep.subr.bf16.mxu0 %v19094_v23  ;;  %v2430_v37 = vpack.c.bf16 %v2325_v42, %v2324_v35  ;;  %v2345_v42 = vld [vmem:[#allocation2 + $0x28a] sm:$0xff] }
 0x3ab   : > { %15980 = vmatprep.mubr.bf16.mxu1 %v2430_v37 }
 0x3ac   : > { %16643 = vmatpush3.bf16.msra.mxu0 %v19094_v23  ;;  %15981 = vmatmul.mubr.bf16.gmra.mrb[44].mxu1 %v2431_v57  ;;  %v2350_v57 = vld [vmem:[#allocation2 + $0x2ba] sm:$0xff] }
 0x3ad   : > { %16644 = vmatprep.subr.bf16.mxu0 %v19095_v40 }
 0x3af   : > { %16517 = vmatmul.mubr.bf16.gmra.mrb[4].mxu0 %v20038_v41  ;;  %v2328_v41 = vld [vmem:[#allocation2 + $0x1e2] sm:$0xff] }
 0x3b0   : > { %16520 = vmatprep.mubr.bf16.mxu0 %v20051_v51  ;;  %16645 = vmatpush3.bf16.msra.mxu0 %v19095_v40  ;;  %v2432_v51 = vpack.c.bf16 %v2329_v61, %v2328_v41  ;;  %v2342_v40 = vld [vmem:[#allocation2 + $0x26a] sm:$0xff]  ;;  %v2351_v61 = vld [vmem:[#allocation2 + $0x2c2] sm:$0xff] }
 0x3b1   : > { %16646 = vmatprep.subr.bf16.mxu0 %v19096_v25 }
 0x3b2   : > { %15984 = vmatprep.mubr.bf16.mxu1 %v2432_v51  ;;  %v2353_v51 = vld [vmem:[#allocation2 + $0x2da] sm:$0xff] }
 0x3b4   : > { %16647 = vmatpush3.bf16.msra.mxu0 %v19096_v25  ;;  %15985 = vmatmul.mubr.bf16.gmra.mrb[48].mxu1 %v2433_v1  ;;  %v2343_v25 = vld [vmem:[#allocation2 + $0x272] sm:$0xff]  ;;  %v2355_v1 = vld [vmem:[#allocation2 + $0x2ea] sm:$0xff] }
 0x3b5   : > { %16648 = vmatprep.subr.bf16.mxu0 %v19097_v44  ;;  %15988 = vmatprep.mubr.bf16.mxu1 %v2434_v18  ;;  %v2439_v35 = vpack.c.bf16 %v2343_v25, %v2342_v40  ;;  %v2359_v18 = vld [vmem:[#allocation2 + $0x312] sm:$0xff]  ;;  %v2370_v40 = vld [vmem:[#allocation2 + $0x382] sm:$0xff]  ;;  %v2372_v25 = vld [vmem:[#allocation2 + $0x39a] sm:$0xff] }
 0x3b7   : > { %16521 = vmatmul.mubr.bf16.gmra.mrb[8].mxu0 %v20056_v56  ;;  %v2335_v56 = vld [vmem:[#allocation2 + $0x222] sm:$0xff] }
 0x3b8   : > { %16524 = vmatprep.mubr.bf16.mxu0 %v20060_v0  ;;  %16649 = vmatpush3.bf16.msra.mxu0 %v19097_v44  ;;  %v2435_v23 = vpack.c.bf16 %v2335_v56, %v2334_v63  ;;  %v19098_v0 = vld [vmem:[%s22321_s1 + $0x1e8] sm:$0xff]   ;;  %v2349_v44 = vld [vmem:[#allocation2 + $0x2b2] sm:$0xff]  ;;  %v2447_v56 = vpack.c.bf16 %v2359_v18, %v2358_v49 }
 0x3b9   : > { %16650 = vmatprep.subr.bf16.mxu0 %v19098_v0  ;;  %v2392_v18 = vld [vmem:[#allocation2 + $0x462] sm:$0xff] }
 0x3bc   : > { %15989 = vmatmul.mubr.bf16.gmra.mrb[52].mxu1 %v2435_v23  ;;  %16651 = vmatpush3.bf16.msra.mxu0 %v19098_v0  ;;  %v2361_v23 = vld [vmem:[#allocation2 + $0x32a] sm:$0xff]  ;;  %v2362_v0 = vld [vmem:[#allocation2 + $0x332] sm:$0xff] }
 0x3bf   : > { %16525 = vmatmul.mubr.bf16.gmra.mrb[12].mxu0 %v20062_v4  ;;  %v2436_v4 = vpack.c.bf16 %v2337_v6, %v2336_v62  ;;  %v2363_v6 = vld [vmem:[#allocation2 + $0x33a] sm:$0xff] }
 0x3c0   : > { %16528 = vmatprep.mubr.bf16.mxu0 %v20066_v12  ;;  %v2437_v12 = vpack.c.bf16 %v2339_v30, %v2338_v31  ;;  %v2366_v31 = vld [vmem:[#allocation2 + $0x35a] sm:$0xff] }
 0x3c1   : > { %15992 = vmatprep.mubr.bf16.mxu1 %v2436_v4  ;;  %v2365_v4 = vld [vmem:[#allocation2 + $0x352] sm:$0xff] }
 0x3c4   : > { %15993 = vmatmul.mubr.bf16.gmra.mrb[56].mxu1 %v2437_v12  ;;  %v2367_v12 = vld [vmem:[#allocation2 + $0x362] sm:$0xff] }
 0x3c7   : > { %16529 = vmatmul.mubr.bf16.gmra.mrb[16].mxu0 %v20068_v17  ;;  %v2341_v17 = vld [vmem:[#allocation2 + $0x262] sm:$0xff] }
 0x3c8   : > { %16532 = vmatprep.mubr.bf16.mxu0 %v20075_v27  ;;  %v2438_v46 = vpack.c.bf16 %v2341_v17, %v2340_v21  ;;  %v2344_v27 = vld [vmem:[#allocation2 + $0x282] sm:$0xff]  ;;  %v2368_v21 = vld [vmem:[#allocation2 + $0x372] sm:$0xff]  ;;  %v2369_v17 = vld [vmem:[#allocation2 + $0x37a] sm:$0xff] }
 0x3c9   : > { %v2440_v37 = vpack.c.bf16 %v2345_v42, %v2344_v27  ;;  %v2375_v42 = vld [vmem:[#allocation2 + $0x3b2] sm:$0xff] }
 0x3ca   : > { %15996 = vmatprep.mubr.bf16.mxu1 %v2438_v46  ;;  %v2371_v46 = vld [vmem:[#allocation2 + $0x38a] sm:$0xff] }
 0x3cc   : > { %15997 = vmatmul.mubr.bf16.gmra.mrb[60].mxu1 %v2439_v35  ;;  %v2374_v35 = vld [vmem:[#allocation2 + $0x3aa] sm:$0xff] }
 0x3cd   : > { %16000 = vmatprep.mubr.bf16.mxu1 %v2440_v37  ;;  %v2377_v37 = vld [vmem:[#allocation2 + $0x3ca] sm:$0xff] }
 0x3cf   : > { %16533 = vmatmul.mubr.bf16.gmra.mrb[20].mxu0 %v20077_v32  ;;  %v2441_v32 = vpack.c.bf16 %v2347_v22, %v2346_v29  ;;  %v2455_v29 = vpack.c.bf16 %v2375_v42, %v2374_v35  ;;  %v2378_v22 = vld [vmem:[#allocation2 + $0x3d2] sm:$0xff]  ;;  %v2404_v42 = vld [vmem:[#allocation2 + $0x4da] sm:$0xff] }
 0x3d0   : > { %16536 = vmatprep.mubr.bf16.mxu0 %v20081_v15  ;;  %v2348_v15 = vld [vmem:[#allocation2 + $0x2aa] sm:$0xff] }
 0x3d1   : > { %v2442_v41 = vpack.c.bf16 %v2349_v44, %v2348_v15  ;;  %v2379_v15 = vld [vmem:[#allocation2 + $0x3da] sm:$0xff]  ;;  %v2381_v44 = vld [vmem:[#allocation2 + $0x3f2] sm:$0xff] }
 0x3d4   : > { %16001 = vmatmul.mubr.bf16.gmra.mrb[64].mxu1 %v2441_v32 }
 0x3d5   : > { %16004 = vmatprep.mubr.bf16.mxu1 %v2442_v41 }
 0x3d7   : > { %16537 = vmatmul.mubr.bf16.gmra.mrb[24].mxu0 %v20083_v45  ;;  %v2443_v45 = vpack.c.bf16 %v2351_v61, %v2350_v57  ;;  %v2382_v57 = vld [vmem:[#allocation2 + $0x3fa] sm:$0xff]  ;;  %v2383_v61 = vld [vmem:[#allocation2 + $0x402] sm:$0xff] }
 0x3d8   : > { %16540 = vmatprep.mubr.bf16.mxu0 %v20087_v54  ;;  %v19099_v54 = vld [vmem:[%s22321_s1 + $0x1f0] sm:$0xff]  }
 0x3d9   : > { %16652 = vmatprep.subr.bf16.mxu0 %v19099_v54 }
 0x3da   : > { %16653 = vmatpush3.bf16.msra.mxu0 %v19099_v54  ;;  %v2386_v54 = vld [vmem:[#allocation2 + $0x422] sm:$0xff] }
 0x3dc   : > { %16005 = vmatmul.mubr.bf16.gmra.mrb[68].mxu1 %v2443_v45  ;;  %v2385_v45 = vld [vmem:[#allocation2 + $0x41a] sm:$0xff] }
 0x3df   : > { %16541 = vmatmul.mubr.bf16.gmra.mrb[28].mxu0 %v20089_v59  ;;  %v2444_v59 = vpack.c.bf16 %v2353_v51, %v2352_v16  ;;  %v2387_v16 = vld [vmem:[#allocation2 + $0x42a] sm:$0xff] }
 0x3e0   : > { %16544 = vmatprep.mubr.bf16.mxu0 %v20093_v5  ;;  %v2445_v5 = vpack.c.bf16 %v2355_v1, %v2354_v50  ;;  %v2461_v51 = vpack.c.bf16 %v2387_v16, %v2386_v54  ;;  %v2389_v50 = vld [vmem:[#allocation2 + $0x442] sm:$0xff]  ;;  %v2390_v1 = vld [vmem:[#allocation2 + $0x44a] sm:$0xff] }
 0x3e1   : > { %16008 = vmatprep.mubr.bf16.mxu1 %v2444_v59  ;;  %v2388_v59 = vld [vmem:[#allocation2 + $0x43a] sm:$0xff] }
 0x3e4   : > { %16009 = vmatmul.mubr.bf16.gmra.mrb[72].mxu1 %v2445_v5  ;;  %v2462_v5 = vpack.c.bf16 %v2389_v50, %v2388_v59  ;;  %v22378_v50 = vld [vmem:[#allocation13_spill] sm:$0xff] }
 0x3e7   : > { %16545 = vmatmul.mubr.bf16.gmra.mrb[32].mxu0 %v20095_v9  ;;  %v2357_v9 = vld [vmem:[#allocation2 + $0x302] sm:$0xff] }
 0x3e8   : > { %16548 = vmatprep.mubr.bf16.mxu0 %v20102_v20  ;;  %v2446_v63 = vpack.c.bf16 %v2357_v9, %v2356_v8  ;;  %v2360_v20 = vld [vmem:[#allocation2 + $0x322] sm:$0xff]  ;;  %v2391_v8 = vld [vmem:[#allocation2 + $0x452] sm:$0xff] }
 0x3e9   : > { %v2448_v62 = vpack.c.bf16 %v2361_v23, %v2360_v20  ;;  %v2463_v49 = vpack.c.bf16 %v2391_v8, %v2390_v1  ;;  %v2394_v20 = vld [vmem:[#allocation2 + $0x472] sm:$0xff] }
 0x3ea   : > { %16012 = vmatprep.mubr.bf16.mxu1 %v2446_v63 }
 0x3ec   : > { %16013 = vmatmul.mubr.bf16.gmra.mrb[76].mxu1 %v2447_v56  ;;  %v2393_v56 = vld [vmem:[#allocation2 + $0x46a] sm:$0xff] }
 0x3ed   : > { %16016 = vmatprep.mubr.bf16.mxu1 %v2448_v62  ;;  %v2464_v23 = vpack.c.bf16 %v2393_v56, %v2392_v18  ;;  %v22384_v56 = vld [vmem:[#allocation15_spill] sm:$0xff] }
 0x3ef   : > { %16549 = vmatmul.mubr.bf16.gmra.mrb[36].mxu0 %v20104_v28  ;;  %v2449_v28 = vpack.c.bf16 %v2363_v6, %v2362_v0  ;;  %v2395_v0 = vld [vmem:[#allocation2 + $0x47a] sm:$0xff] }
 0x3f0   : > { %16552 = vmatprep.mubr.bf16.mxu0 %v20108_v38  ;;  %v2364_v38 = vld [vmem:[#allocation2 + $0x34a] sm:$0xff]  ;;  %v2465_v6 = vpack.c.bf16 %v2395_v0, %v2394_v20 }
 0x3f1   : > { %v2450_v30 = vpack.c.bf16 %v2365_v4, %v2364_v38  ;;  %v2396_v38 = vld [vmem:[#allocation2 + $0x48a] sm:$0xff]  ;;  %v2397_v4 = vld [vmem:[#allocation2 + $0x492] sm:$0xff] }
 0x3f4   : > { %16017 = vmatmul.mubr.bf16.gmra.mrb[80].mxu1 %v2449_v28 }
 0x3f5   : > { %16020 = vmatprep.mubr.bf16.mxu1 %v2450_v30  ;;  %v2466_v30 = vpack.c.bf16 %v2397_v4, %v2396_v38  ;;  %v22390_v4 = vld [vmem:[#allocation17_spill] sm:$0xff] }
 0x3f7   : > { %16553 = vmatmul.mubr.bf16.gmra.mrb[40].mxu0 %v20110_v43  ;;  %v2451_v43 = vpack.c.bf16 %v2367_v12, %v2366_v31  ;;  %v2398_v31 = vld [vmem:[#allocation2 + $0x49a] sm:$0xff]  ;;  %v2399_v12 = vld [vmem:[#allocation2 + $0x4a2] sm:$0xff] }
 0x3f8   : > { %16556 = vmatprep.mubr.bf16.mxu0 %v20114_v53  ;;  %v19100_v53 = vld [vmem:[%s22321_s1 + $0x1f8] sm:$0xff]  }
 0x3f9   : > { %16654 = vmatprep.subr.bf16.mxu0 %v19100_v53 }
 0x3fa   : > { %16655 = vmatpush3.bf16.msra.mxu0 %v19100_v53  ;;  %v2467_v53 = vpack.c.bf16 %v2399_v12, %v2398_v31 }
 0x3fc   : > { %16021 = vmatmul.mubr.bf16.gmra.mrb[84].mxu1 %v2451_v43 }
 0x3ff   : > { %16557 = vmatmul.mubr.bf16.gmra.mrb[44].mxu0 %v20116_v60  ;;  %v2452_v60 = vpack.c.bf16 %v2369_v17, %v2368_v21  ;;  %v2400_v17 = vld [vmem:[#allocation2 + $0x4b2] sm:$0xff] }
 0x400   : > { %16560 = vmatprep.mubr.bf16.mxu0 %v20120_v7  ;;  %v2453_v7 = vpack.c.bf16 %v2371_v46, %v2370_v40  ;;  %v2402_v46 = vld [vmem:[#allocation2 + $0x4c2] sm:$0xff] }
 0x401   : > { %16024 = vmatprep.mubr.bf16.mxu1 %v2452_v60  ;;  %v2401_v60 = vld [vmem:[#allocation2 + $0x4ba] sm:$0xff] }
 0x402   : > { %v2468_v40 = vpack.c.bf16 %v2401_v60, %v2400_v17  ;;  %v22396_v60 = vld [vmem:[#allocation19_spill] sm:$0xff] }
 0x404   : > { %16025 = vmatmul.mubr.bf16.gmra.mrb[88].mxu1 %v2453_v7  ;;  %v2403_v7 = vld [vmem:[#allocation2 + $0x4ca] sm:$0xff] }
 0x407   : > { %16561 = vmatmul.mubr.bf16.gmra.mrb[48].mxu0 %v20122_v14  ;;  %v2373_v14 = vld [vmem:[#allocation2 + $0x3a2] sm:$0xff] }
 0x408   : > { %16564 = vmatprep.mubr.bf16.mxu0 %v20129_v26  ;;  %v2454_v27 = vpack.c.bf16 %v2373_v14, %v2372_v25  ;;  %v2376_v26 = vld [vmem:[#allocation2 + $0x3c2] sm:$0xff]  ;;  %v2469_v14 = vpack.c.bf16 %v2403_v7, %v2402_v46  ;;  %v22398_v46 = vld [vmem:[#allocation20_spill] sm:$0xff] }
 0x409   : > { %v2456_v32 = vpack.c.bf16 %v2377_v37, %v2376_v26  ;;  %v2406_v26 = vld [vmem:[#allocation2 + $0x4ea] sm:$0xff] }
 0x40a   : > { %16028 = vmatprep.mubr.bf16.mxu1 %v2454_v27  ;;  %v22364_v27 = vld [vmem:[#allocation7_spill] sm:$0xff] }
 0x40c   : > { %16029 = vmatmul.mubr.bf16.gmra.mrb[92].mxu1 %v2455_v29  ;;  %v2405_v29 = vld [vmem:[#allocation2 + $0x4e2] sm:$0xff] }
 0x40d   : > { %16032 = vmatprep.mubr.bf16.mxu1 %v2456_v32  ;;  %v2407_v32 = vld [vmem:[#allocation2 + $0x4f2] sm:$0xff] }
 0x40f   : > { %16565 = vmatmul.mubr.bf16.gmra.mrb[52].mxu0 %v20131_v34  ;;  %v2457_v34 = vpack.c.bf16 %v2379_v15, %v2378_v22  ;;  %v2470_v22 = vpack.c.bf16 %v2405_v29, %v2404_v42  ;;  %v22402_v42 = vld [vmem:[#allocation21_spill] sm:$0xff] }
 0x410   : > { %16568 = vmatprep.mubr.bf16.mxu0 %v20135_v47  ;;  %v2380_v47 = vld [vmem:[#allocation2 + $0x3ea] sm:$0xff] }
 0x411   : > { %v2458_v41 = vpack.c.bf16 %v2381_v44, %v2380_v47  ;;  %v22366_v44 = vld [vmem:[#allocation9_spill] sm:$0xff] }
 0x414   : > { %16033 = vmatmul.mubr.bf16.gmra.mrb[96].mxu1 %v2457_v34  ;;  %v2471_v34 = vpack.c.bf16 %v2407_v32, %v2406_v26  ;;  %v22404_v26 = vld [vmem:[#allocation22_spill] sm:$0xff] }
 0x415   : > { %16036 = vmatprep.mubr.bf16.mxu1 %v2458_v41  ;;  %v22368_v41 = vld [vmem:[#allocation10_spill] sm:$0xff] }
 0x416   : > { %v6122_v32 = vld [vmem:[#allocation2 + $0x508] sm:$0xff] }
 0x417   : > { %16569 = vmatmul.mubr.bf16.gmra.mrb[56].mxu0 %v20137_v52  ;;  %v2459_v52 = vpack.c.bf16 %v2383_v61, %v2382_v57 }
 0x418   : > { %16572 = vmatprep.mubr.bf16.mxu0 %v20141_v2  ;;  %v20296_v2 = vld [vmem:[%s22321_s1 + $0x200] sm:$0xff]  }
 0x419   : > { %16784 = vmatprep.subr.bf16.mxu0 %v20296_v2 }
 0x41c   : > { %16037 = vmatmul.mubr.bf16.gmra.mrb[100].mxu1 %v2459_v52 }
 0x41f   : > { %16573 = vmatmul.mubr.bf16.gmra.mrb[60].mxu0 %v20143_v10  ;;  %v2384_v10 = vld [vmem:[#allocation2 + $0x412] sm:$0xff] }
 0x420   : > { %16576 = vmatprep.mubr.bf16.mxu0 %v20147_v24  ;;  %v2460_v24 = vpack.c.bf16 %v2385_v45, %v2384_v10  ;;  %v22372_v45 = vld [vmem:[#allocation11_spill] sm:$0xff] }
 0x422   : > { %16040 = vmatprep.mubr.bf16.mxu1 %v2460_v24  ;;  %v22374_v24 = vld [vmem:[#allocation12_spill] sm:$0xff] }
 0x424   : > { %16041 = vmatmul.mubr.bf16.gmra.mrb[104].mxu1 %v2461_v51 }
 0x425   : > { %16044 = vmatprep.mubr.bf16.mxu1 %v2462_v5  ;;  %v22380_v5 = vld [vmem:[#allocation14_spill] sm:$0xff] }
 0x427   : > { %16577 = vmatmul.mubr.bf16.gmra.mrb[64].mxu0 %v20149_v33  ;;  %v20301_v33 = vpop.f32.mrb[0].mxu1 }
 0x428   : > { %16580 = vmatprep.mubr.bf16.mxu0 %v20159_v55  ;;  %v20304_v55 = vpop.f32.mrb[1].mxu1 }
 0x429   : > { %v20306_v9 = vpop.f32.mrb[2].mxu1 }
 0x42a   : > { %v20308_v63 = vpop.f32.mrb[3].mxu1 }
 0x42c   : > { %16045 = vmatmul.mubr.bf16.gmra.mrb[108].mxu1 %v2463_v49 }
 0x42d   : > { %16048 = vmatprep.mubr.bf16.mxu1 %v2464_v23  ;;  %v22386_v23 = vld [vmem:[#allocation16_spill] sm:$0xff] }
 0x42f   : > { %16581 = vmatmul.mubr.bf16.gmra.mrb[68].mxu0 %v20161_v58  ;;  %v20311_v58 = vpop.f32.mrb[4].mxu1 }
 0x430   : > { %16584 = vmatprep.mubr.bf16.mxu0 %v20165_v11  ;;  %v20314_v11 = vpop.f32.mrb[5].mxu1 }
 0x431   : > { %v20316_v62 = vpop.f32.mrb[6].mxu1 }
 0x432   : > { %v20318_v28 = vpop.f32.mrb[7].mxu1 }
 0x434   : > { %16049 = vmatmul.mubr.bf16.gmra.mrb[112].mxu1 %v2465_v6 }
 0x435   : > { %16052 = vmatprep.mubr.bf16.mxu1 %v2466_v30  ;;  %v22392_v30 = vld [vmem:[#allocation18_spill] sm:$0xff] }
 0x437   : > { %16585 = vmatmul.mubr.bf16.gmra.mrb[72].mxu0 %v20167_v19  ;;  %v20321_v19 = vpop.f32.mrb[8].mxu1 }
 0x438   : > { %16588 = vmatprep.mubr.bf16.mxu0 %v20171_v39  ;;  %v20324_v39 = vpop.f32.mrb[9].mxu1 }
 0x439   : > { %v20326_v43 = vpop.f32.mrb[10].mxu1 }
 0x43a   : > { %v20328_v21 = vpop.f32.mrb[11].mxu1 }
 0x43c   : > { %16053 = vmatmul.mubr.bf16.gmra.mrb[116].mxu1 %v2467_v53 }
 0x43d   : > { %16056 = vmatprep.mubr.bf16.mxu1 %v2468_v40 }
 0x43f   : > { %16589 = vmatmul.mubr.bf16.gmra.mrb[76].mxu0 %v20173_v48  ;;  %v20331_v48 = vpop.f32.mrb[12].mxu1 }
 0x440   : > { %16592 = vmatprep.mubr.bf16.mxu0 %v20177_v3  ;;  %v20334_v3 = vpop.f32.mrb[13].mxu1 }
 0x441   : > { %v20336_v25 = vpop.f32.mrb[14].mxu1 }
 0x442   : > { %v20338_v35 = vpop.f32.mrb[15].mxu1 }
 0x444   : > { %16057 = vmatmul.mubr.bf16.gmra.mrb[120].mxu1 %v2469_v14 }
 0x445   : > { %16060 = vmatprep.mubr.bf16.mxu1 %v2470_v22  ;;  %v6121_v22 = vld [vmem:[#allocation2 + $0x500] sm:$0xff] }
 0x447   : > { %16593 = vmatmul.mubr.bf16.gmra.mrb[80].mxu0 %v20179_v13  ;;  %v20341_v13 = vpop.f32.mrb[16].mxu1 }
 0x448   : > { %16596 = vmatprep.mubr.bf16.mxu0 %v20183_v36  ;;  %v22365_v36 = vld [vmem:[#allocation8_spill] sm:$0xff]  ;;  %v20344_v37 = vpop.f32.mrb[17].mxu1 }
 0x449   : > { %v20346_v15 = vpop.f32.mrb[18].mxu1 }
 0x44a   : > { %v20348_v47 = vpop.f32.mrb[19].mxu1 }
 0x44b   : > { %v20351_v57 = vpop.f32.mrb[20].mxu1 }
 0x44c   : > { %16061 = vmatmul.mubr.bf16.gmra.mrb[124].mxu1 %v2471_v34  ;;  %22367 = vst [vmem:[#allocation7_spill] sm:$0xff] %v20351_v57  ;;  %v20354_v61 = vpop.f32.mrb[21].mxu1 }
 0x44d   : > { %22369 = vst [vmem:[#allocation8_spill] sm:$0xff] %v20354_v61  ;;  %v20356_v52 = vpop.f32.mrb[22].mxu1 }
 0x44e   : > { %22370 = vst [vmem:[#allocation9_spill] sm:$0xff] %v20356_v52  ;;  %v20358_v10 = vpop.f32.mrb[23].mxu1 }
 0x44f   : > { %16597 = vmatmul.mubr.bf16.gmra.mrb[84].mxu0 %v22364_v27  ;;  %22371 = vst [vmem:[#allocation10_spill] sm:$0xff] %v20358_v10  ;;  %v20361_v54 = vpop.f32.mrb[24].mxu1 }
 0x450   : > { %16600 = vmatprep.mubr.bf16.mxu0 %v22365_v36  ;;  %22373 = vst [vmem:[#allocation11_spill] sm:$0xff] %v20361_v54  ;;  %v20364_v16 = vpop.f32.mrb[25].mxu1 }
 0x451   : > { %22375 = vst [vmem:[#allocation12_spill] sm:$0xff] %v20364_v16  ;;  %v20366_v51 = vpop.f32.mrb[26].mxu1 }
 0x452   : > { %22376 = vst [vmem:[#allocation24_spill] sm:$0xff] %v20366_v51  ;;  %v20368_v59 = vpop.f32.mrb[27].mxu1 }
 0x453   : > { %22377 = vst [vmem:[#allocation25_spill] sm:$0xff] %v20368_v59 }
 0x457   : > { %16601 = vmatmul.mubr.bf16.gmra.mrb[88].mxu0 %v22366_v44 }
 0x458   : > { %16604 = vmatprep.mubr.bf16.mxu0 %v22368_v41  ;;  %v6189_v41 = vpack.c.bf16 %v6122_v32, %v6121_v22  ;;  %v6931_v22 = vld [vmem:[#allocation2 + $0x51] sm:$0xff]  ;;  %v6932_v32 = vld [vmem:[#allocation2 + $0x59] sm:$0xff] }
 0x45e   : > { %v20371_v1 = vpop.f32.mrb[28].mxu1 }
 0x45f   : > { %16605 = vmatmul.mubr.bf16.gmra.mrb[92].mxu0 %v22372_v45  ;;  %22379 = vst [vmem:[#allocation13_spill] sm:$0xff] %v20371_v1  ;;  %v20374_v8 = vpop.f32.mrb[29].mxu1  ;;  %v22408_v45 = vld [vmem:[#allocation23_spill] sm:$0xff] }
 0x460   : > { %16608 = vmatprep.mubr.bf16.mxu0 %v22374_v24  ;;  %22381 = vst [vmem:[#allocation14_spill] sm:$0xff] %v20374_v8  ;;  %v20376_v49 = vpop.f32.mrb[30].mxu1 }
 0x461   : > { %22382 = vst [vmem:[#allocation26_spill] sm:$0xff] %v20376_v49  ;;  %v20378_v18 = vpop.f32.mrb[31].mxu1 }
 0x462   : > { %22383 = vst [vmem:[#allocation27_spill] sm:$0xff] %v20378_v18 }
 0x466   : > { %v20381_v20 = vpop.f32.mrb[32].mxu1 }
 0x467   : > { %16609 = vmatmul.mubr.bf16.gmra.mrb[96].mxu0 %v22378_v50  ;;  %22385 = vst [vmem:[#allocation15_spill] sm:$0xff] %v20381_v20  ;;  %v20384_v0 = vpop.f32.mrb[33].mxu1  ;;  %v6123_v50 = vld [vmem:[#allocation2 + $0x510] sm:$0xff] }
 0x468   : > { %16612 = vmatprep.mubr.bf16.mxu0 %v22380_v5  ;;  %22387 = vst [vmem:[#allocation16_spill] sm:$0xff] %v20384_v0  ;;  %v20386_v6 = vpop.f32.mrb[34].mxu1  ;;  %v6124_v5 = vld [vmem:[#allocation2 + $0x518] sm:$0xff] }
 0x469   : > { %22388 = vst [vmem:[#allocation28_spill] sm:$0xff] %v20386_v6  ;;  %v20388_v38 = vpop.f32.mrb[35].mxu1 }
 0x46a   : > { %22389 = vst [vmem:[#allocation29_spill] sm:$0xff] %v20388_v38 }
 0x46e   : > { %v20391_v31 = vpop.f32.mrb[36].mxu1 }
 0x46f   : > { %16613 = vmatmul.mubr.bf16.gmra.mrb[100].mxu0 %v22384_v56  ;;  %22391 = vst [vmem:[#allocation17_spill] sm:$0xff] %v20391_v31  ;;  %v20394_v12 = vpop.f32.mrb[37].mxu1 }
 0x470   : > { %16616 = vmatprep.mubr.bf16.mxu0 %v22386_v23  ;;  %22393 = vst [vmem:[#allocation18_spill] sm:$0xff] %v20394_v12  ;;  %v20396_v53 = vpop.f32.mrb[38].mxu1 }
 0x471   : > { %22394 = vst [vmem:[#allocation30_spill] sm:$0xff] %v20396_v53  ;;  %v20398_v17 = vpop.f32.mrb[39].mxu1 }
 0x472   : > { %22395 = vst [vmem:[#allocation31_spill] sm:$0xff] %v20398_v17 }
 0x476   : > { %v20401_v40 = vpop.f32.mrb[40].mxu1 }
 0x477   : > { %16617 = vmatmul.mubr.bf16.gmra.mrb[104].mxu0 %v22390_v4  ;;  %22397 = vst [vmem:[#allocation19_spill] sm:$0xff] %v20401_v40  ;;  %v20404_v7 = vpop.f32.mrb[41].mxu1 }
 0x478   : > { %16620 = vmatprep.mubr.bf16.mxu0 %v22392_v30  ;;  %22399 = vst [vmem:[#allocation20_spill] sm:$0xff] %v20404_v7  ;;  %v20406_v14 = vpop.f32.mrb[42].mxu1  ;;  %v6190_v30 = vpack.c.bf16 %v6124_v5, %v6123_v50  ;;  %v6933_v5 = vld [vmem:[#allocation2 + $0x61] sm:$0xff] }
 0x479   : > { %22400 = vst [vmem:[#allocation32_spill] sm:$0xff] %v20406_v14  ;;  %v20408_v27 = vpop.f32.mrb[43].mxu1 }
 0x47a   : > { %22401 = vst [vmem:[#allocation33_spill] sm:$0xff] %v20408_v27 }
 0x47f   : > { %16621 = vmatmul.mubr.bf16.gmra.mrb[108].mxu0 %v22396_v60  ;;  %v20411_v29 = vpop.f32.mrb[44].mxu1  ;;  %v20429_v60 = vld [vmem:[#allocation2 + $0x18] sm:$0xff] }
 0x480   : > { %16624 = vmatprep.mubr.bf16.mxu0 %v22398_v46  ;;  %22403 = vst [vmem:[#allocation21_spill] sm:$0xff] %v20411_v29  ;;  %v20414_v36 = vpop.f32.mrb[45].mxu1  ;;  %v6191_v46 = vpack.c.bf16 %v20429_v60, %v20429_v60 }
 0x481   : > { %22405 = vst [vmem:[#allocation22_spill] sm:$0xff] %v20414_v36  ;;  %v20416_v34 = vpop.f32.mrb[46].mxu1 }
 0x482   : > { %22406 = vst [vmem:[#allocation34_spill] sm:$0xff] %v20416_v34  ;;  %v20418_v44 = vpop.f32.mrb[47].mxu1 }
 0x483   : > { %22407 = vst [vmem:[#allocation35_spill] sm:$0xff] %v20418_v44 }
 0x487   : > { %16625 = vmatmul.mubr.bf16.gmra.mrb[112].mxu0 %v22402_v42  ;;  %v20421_v24 = vpop.f32.mrb[48].mxu1 }
 0x488   : > { %16628 = vmatprep.mubr.bf16.mxu0 %v22404_v26  ;;  %22409 = vst [vmem:[#allocation23_spill] sm:$0xff] %v20421_v24  ;;  %v20423_v56 = vpop.f32.mrb[49].mxu1 }
 0x489   : > { %22410 = vst [vmem:[#allocation36_spill] sm:$0xff] %v20423_v56  ;;  %v20425_v23 = vpop.f32.mrb[50].mxu1 }
 0x48a   : > { %22411 = vst [vmem:[#allocation37_spill] sm:$0xff] %v20425_v23  ;;  %v20427_v4 = vpop.f32.mrb[51].mxu1  ;;  %v7059_v23 = vpack.c.bf16 %v6932_v32, %v6931_v22  ;;  %v19102_v22 = vld [vmem:[%s22321_s1 + $0x208] sm:$0xff]   ;;  %v6938_v32 = vld [vmem:[#allocation2 + $0x91] sm:$0xff] }
 0x48b   : > { %22412 = vst [vmem:[#allocation38_spill] sm:$0xff] %v20427_v4  ;;  %v6934_v4 = vld [vmem:[#allocation2 + $0x69] sm:$0xff] }
 0x48c   : > { %v7060_v44 = vpack.c.bf16 %v6934_v4, %v6933_v5  ;;  %v19103_v4 = vld [vmem:[%s22321_s1 + $0x210] sm:$0xff]  }
 0x48f   : > { %16629 = vmatmul.mubr.bf16.gmra.mrb[116].mxu0 %v22408_v45  ;;  %v20433_v42 = vpop.f32.mrb[52].mxu1 }
 0x490   : > { %16632 = vmatprep.mubr.bf16.mxu0 %v6189_v41  ;;  %22413 = vst [vmem:[#allocation39_spill] sm:$0xff] %v20433_v42  ;;  %v20435_v26 = vpop.f32.mrb[53].mxu1  ;;  %v6936_v42 = vld [vmem:[#allocation2 + $0x81] sm:$0xff] }
 0x491   : > { %22414 = vst [vmem:[#allocation40_spill] sm:$0xff] %v20435_v26  ;;  %v20437_v41 = vpop.f32.mrb[54].mxu1 }
 0x492   : > { %22415 = vst [vmem:[#allocation41_spill] sm:$0xff] %v20437_v41  ;;  %v20439_v45 = vpop.f32.mrb[55].mxu1 }
 0x493   : > { %22416 = vst [vmem:[#allocation42_spill] sm:$0xff] %v20439_v45  ;;  %v6944_v45 = vld [vmem:[#allocation2 + $0xd1] sm:$0xff] }
 0x497   : > { %16633 = vmatmul.mubr.bf16.gmra.mrb[120].mxu0 %v6190_v30  ;;  %v20441_v50 = vpop.f32.mrb[56].mxu1  ;;  %v6935_v30 = vld [vmem:[#allocation2 + $0x79] sm:$0xff] }
 0x498   : > { %16636 = vmatprep.mubr.bf16.mxu0 %v6191_v46  ;;  %22417 = vst [vmem:[#allocation43_spill] sm:$0xff] %v20441_v50  ;;  %v20443_v56 = vpop.f32.mrb[57].mxu1  ;;  %v7061_v34 = vpack.c.bf16 %v6936_v42, %v6935_v30  ;;  %v6939_v50 = vld [vmem:[#allocation2 + $0xa1] sm:$0xff] }
 0x499   : > { %22418 = vst [vmem:[#allocation44_spill] sm:$0xff] %v20443_v56  ;;  %v20445_v24 = vpop.f32.mrb[58].mxu1 }
 0x49a   : > { %22419 = vst [vmem:[#allocation45_spill] sm:$0xff] %v20445_v24  ;;  %v20447_v26 = vpop.f32.mrb[59].mxu1  ;;  %v6940_v24 = vld [vmem:[#allocation2 + $0xa9] sm:$0xff] }
 0x49b   : > { %22420 = vst [vmem:[#allocation46_spill] sm:$0xff] %v20447_v26  ;;  %v7063_v30 = vpack.c.bf16 %v6940_v24, %v6939_v50  ;;  %v19105_v24 = vld [vmem:[%s22321_s1 + $0x220] sm:$0xff]  }
 0x49f   : > { %16637 = vmatmul.mubr.bf16.gmra.mrb[124].mxu0 %v6191_v46  ;;  %v20452_v46 = vpop.f32.mrb[60].mxu1 }
 0x4a0   : > { %16656 = vmatprep.mubr.bf16.mxu0 %v7059_v23  ;;  %22421 = vst [vmem:[#allocation47_spill] sm:$0xff] %v20452_v46  ;;  %v6937_v23 = vld [vmem:[#allocation2 + $0x89] sm:$0xff]  ;;  %v20455_v56 = vpop.f32.mrb[61].mxu1  ;;  %v6942_v46 = vld [vmem:[#allocation2 + $0xb9] sm:$0xff] }
 0x4a1   : > { %22422 = vst [vmem:[#allocation48_spill] sm:$0xff] %v20455_v56  ;;  %v20460_v42 = vpop.f32.mrb[62].mxu1  ;;  %v6941_v56 = vld [vmem:[#allocation2 + $0xb1] sm:$0xff] }
 0x4a2   : > { %22423 = vst [vmem:[#allocation49_spill] sm:$0xff] %v20460_v42  ;;  %v20462_v5 = vpop.f32.mrb[63].mxu1  ;;  %v6943_v42 = vld [vmem:[#allocation2 + $0xc9] sm:$0xff] }
 0x4a3   : > { %22424 = vst [vmem:[#allocation50_spill] sm:$0xff] %v20462_v5  ;;  %v6948_v5 = vld [vmem:[#allocation2 + $0xf9] sm:$0xff] }
 0x4a7   : > { %16657 = vmatmul.mubr.bf16.vlgmr.msra.gmra.mrb[0].mxu0 %v7060_v44  ;;  %v7062_v44 = vpack.c.bf16 %v6938_v32, %v6937_v23  ;;  %v7064_v23 = vpack.c.bf16 %v6942_v46, %v6941_v56  ;;  %v7065_v32 = vpack.c.bf16 %v6944_v45, %v6943_v42  ;;  %v6949_v46 = vld [vmem:[#allocation2 + $0x101] sm:$0xff]  ;;  %v6950_v42 = vld [vmem:[#allocation2 + $0x109] sm:$0xff] }
 0x4a8   : > { %16785 = vmatpush3.bf16.msra.mxu0 %v20296_v2  ;;  %16660 = vmatprep.mubr.bf16.mxu0 %v7061_v34  ;;  %v19104_v2 = vld [vmem:[%s22321_s1 + $0x218] sm:$0xff]   ;;  %v20467_v34 = vpop.f32.mrb[64].mxu1 }
 0x4a9   : > { %16786 = vmatprep.subr.bf16.mxu0 %v19102_v22  ;;  %22425 = vst [vmem:[#allocation51_spill] sm:$0xff] %v20467_v34  ;;  %v20469_v26 = vpop.f32.mrb[65].mxu1  ;;  %v6947_v34 = vld [vmem:[#allocation2 + $0xf1] sm:$0xff] }
 0x4aa   : > { %22426 = vst [vmem:[#allocation52_spill] sm:$0xff] %v20469_v26  ;;  %v20474_v50 = vpop.f32.mrb[66].mxu1  ;;  %v7067_v56 = vpack.c.bf16 %v6948_v5, %v6947_v34  ;;  %v19106_v5 = vld [vmem:[%s22321_s1 + $0x228] sm:$0xff]  }
 0x4ab   : > { %22427 = vst [vmem:[#allocation53_spill] sm:$0xff] %v20474_v50 }
 0x4ac   : > { %16787 = vmatpush3.bf16.msra.mxu0 %v19102_v22  ;;  %v20476_v22 = vpop.f32.mrb[67].mxu1 }
 0x4ad   : > { %16788 = vmatprep.subr.bf16.mxu0 %v19103_v4  ;;  %22428 = vst [vmem:[#allocation54_spill] sm:$0xff] %v20476_v22 }
 0x4af   : > { %16661 = vmatmul.mubr.bf16.gmra.mrb[4].mxu0 %v7062_v44  ;;  %v20478_v44 = vpop.f32.mrb[68].mxu1 }
 0x4b0   : > { %16664 = vmatprep.mubr.bf16.mxu0 %v7063_v30  ;;  %16789 = vmatpush3.bf16.msra.mxu0 %v19103_v4  ;;  %22429 = vst [vmem:[#allocation55_spill] sm:$0xff] %v20478_v44  ;;  %v6945_v4 = vld [vmem:[#allocation2 + $0xd9] sm:$0xff]  ;;  %v6946_v30 = vld [vmem:[#allocation2 + $0xe1] sm:$0xff]  ;;  %v20480_v26 = vpop.f32.mrb[69].mxu1  ;;  %v7068_v44 = vpack.c.bf16 %v6950_v42, %v6949_v46 }
 0x4b1   : > { %16790 = vmatprep.subr.bf16.mxu0 %v19104_v2  ;;  %22430 = vst [vmem:[#allocation56_spill] sm:$0xff] %v20480_v26  ;;  %v20482_v41 = vpop.f32.mrb[70].mxu1  ;;  %v7066_v22 = vpack.c.bf16 %v6946_v30, %v6945_v4  ;;  %v6954_v4 = vld [vmem:[#allocation2 + $0x131] sm:$0xff] }
 0x4b2   : > { %22431 = vst [vmem:[#allocation57_spill] sm:$0xff] %v20482_v41  ;;  %v20484_v50 = vpop.f32.mrb[71].mxu1 }
 0x4b3   : > { %22432 = vst [vmem:[#allocation58_spill] sm:$0xff] %v20484_v50 }
 0x4b4   : > { %16791 = vmatpush3.bf16.msra.mxu0 %v19104_v2 }
 0x4b5   : > { %16792 = vmatprep.subr.bf16.mxu0 %v19105_v24 }
 0x4b7   : > { %16665 = vmatmul.mubr.bf16.gmra.mrb[8].mxu0 %v7064_v23  ;;  %v20486_v45 = vpop.f32.mrb[72].mxu1  ;;  %v6951_v23 = vld [vmem:[#allocation2 + $0x119] sm:$0xff] }
 0x4b8   : > { %16668 = vmatprep.mubr.bf16.mxu0 %v7065_v32  ;;  %16793 = vmatpush3.bf16.msra.mxu0 %v19105_v24  ;;  %22433 = vst [vmem:[#allocation59_spill] sm:$0xff] %v20486_v45  ;;  %v20488_v2 = vpop.f32.mrb[73].mxu1  ;;  %v6952_v24 = vld [vmem:[#allocation2 + $0x121] sm:$0xff] }
 0x4b9   : > { %22434 = vst [vmem:[#allocation60_spill] sm:$0xff] %v20488_v2  ;;  %v20490_v32 = vpop.f32.mrb[74].mxu1  ;;  %v7069_v41 = vpack.c.bf16 %v6952_v24, %v6951_v23  ;;  %v6956_v2 = vld [vmem:[#allocation2 + $0x149] sm:$0xff]  ;;  %16794 = vmatprep.subr.bf16.mxu0 %v19106_v5  ;;  %v6957_v24 = vld [vmem:[#allocation2 + $0x151] sm:$0xff] }
 0x4ba   : > { %22435 = vst [vmem:[#allocation61_spill] sm:$0xff] %v20490_v32  ;;  %v20492_v26 = vpop.f32.mrb[75].mxu1 }
 0x4bb   : > { %22436 = vst [vmem:[#allocation62_spill] sm:$0xff] %v20492_v26  ;;  %v6959_v26 = vld [vmem:[#allocation2 + $0x169] sm:$0xff] }
 0x4bc   : > { %16795 = vmatpush3.bf16.msra.mxu0 %v19106_v5 }
 0x4bf   : > { %16669 = vmatmul.mubr.bf16.gmra.mrb[12].mxu0 %v7066_v22  ;;  %v20497_v34 = vpop.f32.mrb[76].mxu1  ;;  %v6953_v22 = vld [vmem:[#allocation2 + $0x129] sm:$0xff] }
 0x4c0   : > { %16672 = vmatprep.mubr.bf16.mxu0 %v7067_v56  ;;  %22437 = vst [vmem:[#allocation63_spill] sm:$0xff] %v20497_v34  ;;  %v20499_v30 = vpop.f32.mrb[77].mxu1  ;;  %v6955_v56 = vld [vmem:[#allocation2 + $0x141] sm:$0xff] }
 0x4c1   : > { %22438 = vst [vmem:[#allocation64_spill] sm:$0xff] %v20499_v30  ;;  %v20501_v32 = vpop.f32.mrb[78].mxu1  ;;  %v7071_v42 = vpack.c.bf16 %v6956_v2, %v6955_v56  ;;  %v6960_v30 = vld [vmem:[#allocation2 + $0x171] sm:$0xff]  ;;  %v6961_v2 = vld [vmem:[#allocation2 + $0x179] sm:$0xff] }
 0x4c2   : > { %22439 = vst [vmem:[#allocation65_spill] sm:$0xff] %v20501_v32  ;;  %v20503_v46 = vpop.f32.mrb[79].mxu1  ;;  %v7073_v5 = vpack.c.bf16 %v6960_v30, %v6959_v26  ;;  %v6963_v56 = vld [vmem:[#allocation2 + $0x191] sm:$0xff]  ;;  %v6965_v26 = vld [vmem:[#allocation2 + $0x1a1] sm:$0xff] }
 0x4c3   : > { %22440 = vst [vmem:[#allocation66_spill] sm:$0xff] %v20503_v46 }
 0x4c7   : > { %16673 = vmatmul.mubr.bf16.gmra.mrb[16].mxu0 %v7068_v44  ;;  %v7070_v44 = vpack.c.bf16 %v6954_v4, %v6953_v22  ;;  %v20505_v23 = vpop.f32.mrb[80].mxu1  ;;  %v6962_v22 = vld [vmem:[#allocation2 + $0x181] sm:$0xff] }
 0x4c8   : > { %16676 = vmatprep.mubr.bf16.mxu0 %v7069_v41  ;;  %22441 = vst [vmem:[#allocation67_spill] sm:$0xff] %v20505_v23  ;;  %v6958_v41 = vld [vmem:[#allocation2 + $0x159] sm:$0xff]  ;;  %v20507_v34 = vpop.f32.mrb[81].mxu1  ;;  %v7074_v23 = vpack.c.bf16 %v6962_v22, %v6961_v2  ;;  %v6970_v22 = vld [vmem:[#allocation2 + $0x1d1] sm:$0xff] }
 0x4c9   : > { %22442 = vst [vmem:[#allocation68_spill] sm:$0xff] %v20507_v34  ;;  %v20509_v45 = vpop.f32.mrb[82].mxu1  ;;  %v7072_v32 = vpack.c.bf16 %v6958_v41, %v6957_v24  ;;  %v6967_v24 = vld [vmem:[#allocation2 + $0x1b9] sm:$0xff]  ;;  %v6968_v41 = vld [vmem:[#allocation2 + $0x1c1] sm:$0xff] }
 0x4ca   : > { %22443 = vst [vmem:[#allocation69_spill] sm:$0xff] %v20509_v45  ;;  %v20511_v50 = vpop.f32.mrb[83].mxu1 }
 0x4cb   : > { %22444 = vst [vmem:[#allocation70_spill] sm:$0xff] %v20511_v50 }
 0x4cf   : > { %16677 = vmatmul.mubr.bf16.gmra.mrb[20].mxu0 %v7070_v44  ;;  %v20513_v46 = vpop.f32.mrb[84].mxu1  ;;  %v6964_v44 = vld [vmem:[#allocation2 + $0x199] sm:$0xff] }
 0x4d0   : > { %16680 = vmatprep.mubr.bf16.mxu0 %v7071_v42  ;;  %22445 = vst [vmem:[#allocation71_spill] sm:$0xff] %v20513_v46  ;;  %v20515_v4 = vpop.f32.mrb[85].mxu1  ;;  %v7075_v45 = vpack.c.bf16 %v6964_v44, %v6963_v56  ;;  %v6971_v44 = vld [vmem:[#allocation2 + $0x1e1] sm:$0xff] }
 0x4d1   : > { %22446 = vst [vmem:[#allocation72_spill] sm:$0xff] %v20515_v4  ;;  %v20517_v42 = vpop.f32.mrb[86].mxu1 }
 0x4d2   : > { %22447 = vst [vmem:[#allocation73_spill] sm:$0xff] %v20517_v42  ;;  %v20519_v34 = vpop.f32.mrb[87].mxu1  ;;  %v7077_v42 = vpack.c.bf16 %v6968_v41, %v6967_v24  ;;  %v6973_v41 = vld [vmem:[#allocation2 + $0x1f1] sm:$0xff] }
 0x4d3   : > { %22448 = vst [vmem:[#allocation74_spill] sm:$0xff] %v20519_v34 }
 0x4d7   : > { %16681 = vmatmul.mubr.bf16.gmra.mrb[24].mxu0 %v7072_v32  ;;  %v20521_v50 = vpop.f32.mrb[88].mxu1  ;;  %v6966_v32 = vld [vmem:[#allocation2 + $0x1a9] sm:$0xff] }
 0x4d8   : > { %16684 = vmatprep.mubr.bf16.mxu0 %v7073_v5  ;;  %22449 = vst [vmem:[#allocation75_spill] sm:$0xff] %v20521_v50  ;;  %v20523_v30 = vpop.f32.mrb[89].mxu1  ;;  %v7076_v46 = vpack.c.bf16 %v6966_v32, %v6965_v26 }
 0x4d9   : > { %22450 = vst [vmem:[#allocation76_spill] sm:$0xff] %v20523_v30  ;;  %v20525_v5 = vpop.f32.mrb[90].mxu1  ;;  %v6972_v30 = vld [vmem:[#allocation2 + $0x1e9] sm:$0xff] }
 0x4da   : > { %22451 = vst [vmem:[#allocation77_spill] sm:$0xff] %v20525_v5  ;;  %v20527_v4 = vpop.f32.mrb[91].mxu1  ;;  %v7079_v32 = vpack.c.bf16 %v6972_v30, %v6971_v44  ;;  %v6977_v30 = vld [vmem:[#allocation2 + $0x219] sm:$0xff]  ;;  %v6979_v44 = vld [vmem:[#allocation2 + $0x231] sm:$0xff] }
 0x4db   : > { %22452 = vst [vmem:[#allocation78_spill] sm:$0xff] %v20527_v4  ;;  %v6975_v4 = vld [vmem:[#allocation2 + $0x209] sm:$0xff] }
 0x4df   : > { %16685 = vmatmul.mubr.bf16.gmra.mrb[28].mxu0 %v7074_v23  ;;  %v19107_v23 = vld [vmem:[%s22321_s1 + $0x230] sm:$0xff]   ;;  %v20532_v2 = vpop.f32.mrb[92].mxu1 }
 0x4e0   : > { %16688 = vmatprep.mubr.bf16.mxu0 %v7075_v45  ;;  %22453 = vst [vmem:[#allocation79_spill] sm:$0xff] %v20532_v2  ;;  %v6969_v45 = vld [vmem:[#allocation2 + $0x1c9] sm:$0xff]  ;;  %v20534_v56 = vpop.f32.mrb[93].mxu1  ;;  %16796 = vmatprep.subr.bf16.mxu0 %v19107_v23 }
 0x4e1   : > { %22454 = vst [vmem:[#allocation80_spill] sm:$0xff] %v20534_v56  ;;  %v20536_v5 = vpop.f32.mrb[94].mxu1  ;;  %16797 = vmatpush3.bf16.msra.mxu0 %v19107_v23  ;;  %v6976_v56 = vld [vmem:[#allocation2 + $0x211] sm:$0xff] }
 0x4e2   : > { %22455 = vst [vmem:[#allocation81_spill] sm:$0xff] %v20536_v5  ;;  %v20538_v26 = vpop.f32.mrb[95].mxu1  ;;  %v7081_v23 = vpack.c.bf16 %v6976_v56, %v6975_v4  ;;  %v6981_v4 = vld [vmem:[#allocation2 + $0x241] sm:$0xff] }
 0x4e3   : > { %22456 = vst [vmem:[#allocation82_spill] sm:$0xff] %v20538_v26 }
 0x4e7   : > { %16689 = vmatmul.mubr.bf16.gmra.mrb[32].mxu0 %v7076_v46  ;;  %v7078_v46 = vpack.c.bf16 %v6970_v22, %v6969_v45  ;;  %v20540_v24 = vpop.f32.mrb[96].mxu1  ;;  %v6978_v45 = vld [vmem:[#allocation2 + $0x221] sm:$0xff] }
 0x4e8   : > { %16692 = vmatprep.mubr.bf16.mxu0 %v7077_v42  ;;  %22457 = vst [vmem:[#allocation83_spill] sm:$0xff] %v20540_v24  ;;  %v6974_v42 = vld [vmem:[#allocation2 + $0x1f9] sm:$0xff]  ;;  %v20542_v2 = vpop.f32.mrb[97].mxu1  ;;  %v7082_v24 = vpack.c.bf16 %v6978_v45, %v6977_v30  ;;  %v6986_v45 = vld [vmem:[#allocation2 + $0x271] sm:$0xff] }
 0x4e9   : > { %22458 = vst [vmem:[#allocation84_spill] sm:$0xff] %v20542_v2  ;;  %v20544_v50 = vpop.f32.mrb[98].mxu1  ;;  %v7080_v5 = vpack.c.bf16 %v6974_v42, %v6973_v41  ;;  %v6983_v41 = vld [vmem:[#allocation2 + $0x259] sm:$0xff]  ;;  %v6984_v42 = vld [vmem:[#allocation2 + $0x261] sm:$0xff] }
 0x4ea   : > { %22459 = vst [vmem:[#allocation85_spill] sm:$0xff] %v20544_v50  ;;  %v20546_v34 = vpop.f32.mrb[99].mxu1 }
 0x4eb   : > { %22460 = vst [vmem:[#allocation86_spill] sm:$0xff] %v20546_v34 }
 0x4ef   : > { %16693 = vmatmul.mubr.bf16.gmra.mrb[36].mxu0 %v7078_v46  ;;  %v20548_v26 = vpop.f32.mrb[100].mxu1  ;;  %v6980_v46 = vld [vmem:[#allocation2 + $0x239] sm:$0xff] }
 0x4f0   : > { %16696 = vmatprep.mubr.bf16.mxu0 %v7079_v32  ;;  %22461 = vst [vmem:[#allocation87_spill] sm:$0xff] %v20548_v26  ;;  %v20550_v22 = vpop.f32.mrb[101].mxu1  ;;  %v7083_v50 = vpack.c.bf16 %v6980_v46, %v6979_v44  ;;  %v6987_v46 = vld [vmem:[#allocation2 + $0x281] sm:$0xff] }
 0x4f1   : > { %22462 = vst [vmem:[#allocation88_spill] sm:$0xff] %v20550_v22  ;;  %v20552_v32 = vpop.f32.mrb[102].mxu1 }
 0x4f2   : > { %22463 = vst [vmem:[#allocation89_spill] sm:$0xff] %v20552_v32  ;;  %v20554_v2 = vpop.f32.mrb[103].mxu1  ;;  %v7085_v32 = vpack.c.bf16 %v6984_v42, %v6983_v41  ;;  %v6989_v42 = vld [vmem:[#allocation2 + $0x291] sm:$0xff] }
 0x4f3   : > { %22464 = vst [vmem:[#allocation90_spill] sm:$0xff] %v20554_v2 }
 0x4f7   : > { %16697 = vmatmul.mubr.bf16.gmra.mrb[40].mxu0 %v7080_v5  ;;  %v20556_v34 = vpop.f32.mrb[104].mxu1  ;;  %v6982_v5 = vld [vmem:[#allocation2 + $0x249] sm:$0xff] }
 0x4f8   : > { %16700 = vmatprep.mubr.bf16.mxu0 %v7081_v23  ;;  %22465 = vst [vmem:[#allocation91_spill] sm:$0xff] %v20556_v34  ;;  %v20558_v56 = vpop.f32.mrb[105].mxu1  ;;  %v7084_v26 = vpack.c.bf16 %v6982_v5, %v6981_v4 }
 0x4f9   : > { %22466 = vst [vmem:[#allocation92_spill] sm:$0xff] %v20558_v56  ;;  %v20560_v23 = vpop.f32.mrb[106].mxu1  ;;  %v6988_v56 = vld [vmem:[#allocation2 + $0x289] sm:$0xff] }
 0x4fa   : > { %22467 = vst [vmem:[#allocation93_spill] sm:$0xff] %v20560_v23  ;;  %v20562_v22 = vpop.f32.mrb[107].mxu1  ;;  %v7087_v5 = vpack.c.bf16 %v6988_v56, %v6987_v46  ;;  %v6993_v56 = vld [vmem:[#allocation2 + $0x2b9] sm:$0xff]  ;;  %v6995_v46 = vld [vmem:[#allocation2 + $0x2d1] sm:$0xff] }
 0x4fb   : > { %22468 = vst [vmem:[#allocation94_spill] sm:$0xff] %v20562_v22  ;;  %v6991_v22 = vld [vmem:[#allocation2 + $0x2a9] sm:$0xff] }
 0x4ff   : > { %16701 = vmatmul.mubr.bf16.gmra.mrb[44].mxu0 %v7082_v24  ;;  %v19108_v24 = vld [vmem:[%s22321_s1 + $0x238] sm:$0xff]   ;;  %v20567_v30 = vpop.f32.mrb[108].mxu1 }
 0x500   : > { %16704 = vmatprep.mubr.bf16.mxu0 %v7083_v50  ;;  %22469 = vst [vmem:[#allocation95_spill] sm:$0xff] %v20567_v30  ;;  %v6985_v50 = vld [vmem:[#allocation2 + $0x269] sm:$0xff]  ;;  %v20569_v44 = vpop.f32.mrb[109].mxu1  ;;  %16798 = vmatprep.subr.bf16.mxu0 %v19108_v24 }
 0x501   : > { %22470 = vst [vmem:[#allocation96_spill] sm:$0xff] %v20569_v44  ;;  %v20571_v23 = vpop.f32.mrb[110].mxu1  ;;  %16799 = vmatpush3.bf16.msra.mxu0 %v19108_v24  ;;  %v6992_v44 = vld [vmem:[#allocation2 + $0x2b1] sm:$0xff] }
 0x502   : > { %22471 = vst [vmem:[#allocation97_spill] sm:$0xff] %v20571_v23  ;;  %v20573_v4 = vpop.f32.mrb[111].mxu1  ;;  %v7089_v24 = vpack.c.bf16 %v6992_v44, %v6991_v22  ;;  %v20593_v22 = vld [vmem:[#allocation2 + $0x52] sm:$0xff]  ;;  %v6997_v44 = vld [vmem:[#allocation2 + $0x2e1] sm:$0xff] }
 0x503   : > { %22472 = vst [vmem:[#allocation98_spill] sm:$0xff] %v20573_v4  ;;  %9482 = vst [vmem:[#allocation2 + $0x50] sm:$0xff] %v20429_v60 }
 0x507   : > { %16705 = vmatmul.mubr.bf16.gmra.mrb[48].mxu0 %v7084_v26  ;;  %v7086_v26 = vpack.c.bf16 %v6986_v45, %v6985_v50  ;;  %v20575_v41 = vpop.f32.mrb[112].mxu1  ;;  %v6994_v50 = vld [vmem:[#allocation2 + $0x2c1] sm:$0xff] }
 0x508   : > { %16708 = vmatprep.mubr.bf16.mxu0 %v7085_v32  ;;  %22473 = vst [vmem:[#allocation99_spill] sm:$0xff] %v20575_v41  ;;  %v6990_v32 = vld [vmem:[#allocation2 + $0x299] sm:$0xff]  ;;  %v20577_v30 = vpop.f32.mrb[113].mxu1  ;;  %v7090_v41 = vpack.c.bf16 %v6994_v50, %v6993_v56  ;;  %v7000_v56 = vld [vmem:[#allocation2 + $0x301] sm:$0xff] }
 0x509   : > { %22474 = vst [vmem:[#allocation100_spill] sm:$0xff] %v20577_v30  ;;  %v20579_v34 = vpop.f32.mrb[114].mxu1  ;;  %v7088_v23 = vpack.c.bf16 %v6990_v32, %v6989_v42  ;;  %v6998_v42 = vld [vmem:[#allocation2 + $0x2e9] sm:$0xff] }
 0x50a   : > { %22475 = vst [vmem:[#allocation101_spill] sm:$0xff] %v20579_v34  ;;  %v20581_v2 = vpop.f32.mrb[115].mxu1 }
 0x50b   : > { %22476 = vst [vmem:[#allocation102_spill] sm:$0xff] %v20581_v2 }
 0x50f   : > { %16709 = vmatmul.mubr.bf16.gmra.mrb[52].mxu0 %v7086_v26  ;;  %v20583_v4 = vpop.f32.mrb[116].mxu1  ;;  %v6996_v26 = vld [vmem:[#allocation2 + $0x2d9] sm:$0xff] }
 0x510   : > { %16712 = vmatprep.mubr.bf16.mxu0 %v7087_v5  ;;  %22477 = vst [vmem:[#allocation103_spill] sm:$0xff] %v20583_v4  ;;  %v20585_v45 = vpop.f32.mrb[117].mxu1  ;;  %v7091_v34 = vpack.c.bf16 %v6996_v26, %v6995_v46  ;;  %v7092_v46 = vpack.c.bf16 %v6998_v42, %v6997_v44  ;;  %v7003_v44 = vld [vmem:[#allocation2 + $0x321] sm:$0xff]  ;;  %v7004_v42 = vld [vmem:[#allocation2 + $0x329] sm:$0xff] }
 0x511   : > { %22478 = vst [vmem:[#allocation104_spill] sm:$0xff] %v20585_v45  ;;  %v20587_v5 = vpop.f32.mrb[118].mxu1  ;;  %v7007_v4 = vld [vmem:[#allocation2 + $0x349] sm:$0xff] }
 0x512   : > { %22479 = vst [vmem:[#allocation105_spill] sm:$0xff] %v20587_v5  ;;  %v20589_v30 = vpop.f32.mrb[119].mxu1  ;;  %v7002_v5 = vld [vmem:[#allocation2 + $0x311] sm:$0xff] }
 0x513   : > { %22480 = vst [vmem:[#allocation106_spill] sm:$0xff] %v20589_v30  ;;  %v7001_v30 = vld [vmem:[#allocation2 + $0x309] sm:$0xff] }
 0x517   : > { %16713 = vmatmul.mubr.bf16.gmra.mrb[56].mxu0 %v7088_v23  ;;  %v20591_v2 = vpop.f32.mrb[120].mxu1  ;;  %v20595_v23 = vld [vmem:[#allocation2 + $0x5a] sm:$0xff] }
 0x518   : > { %16716 = vmatprep.mubr.bf16.mxu0 %v7089_v24  ;;  %22481 = vst [vmem:[#allocation107_spill] sm:$0xff] %v20591_v2  ;;  %v20597_v32 = vpop.f32.mrb[121].mxu1  ;;  %9484 = vst [vmem:[#allocation2 + $0x60] sm:$0x3] %v20429_v60  ;;  %v6999_v24 = vld [vmem:[#allocation2 + $0x2f9] sm:$0xff] }
 0x519   : > { %22482 = vst [vmem:[#allocation108_spill] sm:$0xff] %v20597_v32  ;;  %9483 = vst [vmem:[#allocation2 + $0x58] sm:$0xff] %v20429_v60  ;;  %v7093_v26 = vpack.c.bf16 %v7000_v56, %v6999_v24  ;;  %v20608_v2 = vld [vmem:[#allocation2 + $0x7a] sm:$0xff]  ;;  %v20610_v32 = vld [vmem:[#allocation2 + $0x82] sm:$0xff] }
 0x51a   : > { %9485 = vst [vmem:[#allocation2 + $0x78] sm:$0xff] %v20429_v60  ;;  %9487 = vst [vmem:[#allocation2 + $0x88] sm:$0x3] %v20429_v60 }
 0x51b   : > { %9486 = vst [vmem:[#allocation2 + $0x80] sm:$0xff] %v20429_v60 }
 0x51f   : > { %16717 = vmatmul.mubr.bf16.gmra.mrb[60].mxu0 %v7090_v41  ;;  %v20602_v41 = vpop.f32.mrb[122].mxu1 }
 0x520   : > { %16720 = vmatprep.mubr.bf16.mxu0 %v7091_v34  ;;  %22483 = vst [vmem:[#allocation109_spill] sm:$0xff] %v20602_v41  ;;  %v20604_v50 = vpop.f32.mrb[123].mxu1  ;;  %v7006_v41 = vld [vmem:[#allocation2 + $0x339] sm:$0xff] }
 0x521   : > { %22484 = vst [vmem:[#allocation110_spill] sm:$0xff] %v20604_v50  ;;  %v20606_v34 = vpop.f32.mrb[124].mxu1  ;;  %v20623_v50 = vld [vmem:[#allocation2 + $0xaa] sm:$0xff] }
 0x522   : > { %22485 = vst [vmem:[#allocation111_spill] sm:$0xff] %v20606_v34  ;;  %v20612_v45 = vpop.f32.mrb[125].mxu1  ;;  %v7095_v34 = vpack.c.bf16 %v7004_v42, %v7003_v44  ;;  %9490 = vst [vmem:[#allocation2 + $0xb0] sm:$0x3] %v20429_v60  ;;  %v7009_v44 = vld [vmem:[#allocation2 + $0x359] sm:$0xff]  ;;  %v7011_v42 = vld [vmem:[#allocation2 + $0x371] sm:$0xff] }
 0x523   : > { %22486 = vst [vmem:[#allocation112_spill] sm:$0xff] %v20612_v45  ;;  %v20617_v24 = vpop.f32.mrb[126].mxu1  ;;  %v7005_v45 = vld [vmem:[#allocation2 + $0x331] sm:$0xff] }
 0x524   : > { %22487 = vst [vmem:[#allocation113_spill] sm:$0xff] %v20617_v24  ;;  %v20619_v56 = vpop.f32.mrb[127].mxu1  ;;  %v7008_v24 = vld [vmem:[#allocation2 + $0x351] sm:$0xff]  ;;  %v7096_v36 = vpack.c.bf16 %v7006_v41, %v7005_v45  ;;  %v7013_v45 = vld [vmem:[#allocation2 + $0x381] sm:$0xff]  ;;  %v7014_v41 = vld [vmem:[#allocation2 + $0x389] sm:$0xff] }
 0x525   : > { %22488 = vst [vmem:[#allocation114_spill] sm:$0xff] %v20619_v56  ;;  %v7097_v56 = vpack.c.bf16 %v7008_v24, %v7007_v4  ;;  %v20635_v4 = vld [vmem:[#allocation2 + $0xf2] sm:$0xff]  ;;  %v7100_v14 = vpack.c.bf16 %v7014_v41, %v7013_v45  ;;  %v20649_v45 = vld [vmem:[#allocation2 + $0x142] sm:$0xff] }
 0x526   : > { %9494 = vst [vmem:[#allocation2 + $0xf0] sm:$0xff] %v20429_v60  ;;  %v7015_v24 = vld [vmem:[#allocation2 + $0x399] sm:$0xff]  ;;  %v7021_v41 = vld [vmem:[#allocation2 + $0x3d1] sm:$0xff]  ;;  %9500 = vst [vmem:[#allocation2 + $0x140] sm:$0xff] %v20429_v60 }
 0x527   : > { %16721 = vmatmul.mubr.bf16.gmra.mrb[64].mxu0 %v7092_v46  ;;  %v7094_v46 = vpack.c.bf16 %v7002_v5, %v7001_v30  ;;  %v20628_v30 = vld [vmem:[#allocation2 + $0xca] sm:$0xff]  ;;  %v20630_v5 = vld [vmem:[#allocation2 + $0xd2] sm:$0xff] }
 0x528   : > { %16724 = vmatprep.mubr.bf16.mxu0 %v7093_v26  ;;  %v20621_v26 = vld [vmem:[#allocation2 + $0xa2] sm:$0xff]  ;;  %9491 = vst [vmem:[#allocation2 + $0xc8] sm:$0xff] %v20429_v60  ;;  %9493 = vst [vmem:[#allocation2 + $0xd8] sm:$0x3] %v20429_v60 }
 0x529   : > { %9488 = vst [vmem:[#allocation2 + $0xa0] sm:$0xff] %v20429_v60  ;;  %9489 = vst [vmem:[#allocation2 + $0xa8] sm:$0xff] %v20429_v60 }
 0x52a   : > { %9492 = vst [vmem:[#allocation2 + $0xd0] sm:$0xff] %v20429_v60 }
 0x52f   : > { %16725 = vmatmul.mubr.bf16.gmra.mrb[68].mxu0 %v7094_v46  ;;  %v7012_v46 = vld [vmem:[#allocation2 + $0x379] sm:$0xff] }
 0x530   : > { %16728 = vmatprep.mubr.bf16.mxu0 %v7095_v34  ;;  %v7010_v34 = vld [vmem:[#allocation2 + $0x361] sm:$0xff]  ;;  %v7099_v27 = vpack.c.bf16 %v7012_v46, %v7011_v42  ;;  %v7020_v46 = vld [vmem:[#allocation2 + $0x3c9] sm:$0xff] }
 0x531   : > { %v7098_v29 = vpack.c.bf16 %v7010_v34, %v7009_v44  ;;  %v20642_v44 = vld [vmem:[#allocation2 + $0x11a] sm:$0xff]  ;;  %v7017_v34 = vld [vmem:[#allocation2 + $0x3a9] sm:$0xff] }
 0x532   : > { %9497 = vst [vmem:[#allocation2 + $0x118] sm:$0xff] %v20429_v60  ;;  %v7019_v42 = vld [vmem:[#allocation2 + $0x3c1] sm:$0xff] }
 0x533   : > { %v7103_v17 = vpack.c.bf16 %v7020_v46, %v7019_v42  ;;  %v7027_v42 = vld [vmem:[#allocation2 + $0x411] sm:$0xff]  ;;  %v7028_v46 = vld [vmem:[#allocation2 + $0x419] sm:$0xff] }
 0x534   : > { %v7107_v38 = vpack.c.bf16 %v7028_v46, %v7027_v42  ;;  %v7035_v42 = vld [vmem:[#allocation2 + $0x461] sm:$0xff]  ;;  %v7036_v46 = vld [vmem:[#allocation2 + $0x469] sm:$0xff] }
 0x535   : > { %v7111_v18 = vpack.c.bf16 %v7036_v46, %v7035_v42  ;;  %v7043_v42 = vld [vmem:[#allocation2 + $0x4b1] sm:$0xff]  ;;  %v7044_v46 = vld [vmem:[#allocation2 + $0x4b9] sm:$0xff] }
 0x536   : > { %v7115_v59 = vpack.c.bf16 %v7044_v46, %v7043_v42  ;;  %v7051_v42 = vld [vmem:[#allocation2 + $0x501] sm:$0xff]  ;;  %v7052_v46 = vld [vmem:[#allocation2 + $0x509] sm:$0xff] }
 0x537   : > { %16729 = vmatmul.mubr.bf16.gmra.mrb[72].mxu0 %v7096_v36  ;;  %v20637_v36 = vld [vmem:[#allocation2 + $0xfa] sm:$0xff]  ;;  %v7119_v10 = vpack.c.bf16 %v7052_v46, %v7051_v42  ;;  %v7868_v42 = vld [vmem:[#allocation2 + $0x92] sm:$0xff] }
 0x538   : > { %16732 = vmatprep.mubr.bf16.mxu0 %v7097_v56  ;;  %9496 = vst [vmem:[#allocation2 + $0x100] sm:$0x3] %v20429_v60  ;;  %9495 = vst [vmem:[#allocation2 + $0xf8] sm:$0xff] %v20429_v60  ;;  %v7016_v56 = vld [vmem:[#allocation2 + $0x3a1] sm:$0xff] }
 0x539   : > { %v7101_v7 = vpack.c.bf16 %v7016_v56, %v7015_v24  ;;  %v7023_v24 = vld [vmem:[#allocation2 + $0x3e9] sm:$0xff]  ;;  %v7024_v56 = vld [vmem:[#allocation2 + $0x3f1] sm:$0xff] }
 0x53a   : > { %v7105_v12 = vpack.c.bf16 %v7024_v56, %v7023_v24  ;;  %v7031_v24 = vld [vmem:[#allocation2 + $0x439] sm:$0xff]  ;;  %v7032_v56 = vld [vmem:[#allocation2 + $0x441] sm:$0xff] }
 0x53b   : > { %v7109_v0 = vpack.c.bf16 %v7032_v56, %v7031_v24  ;;  %v7039_v24 = vld [vmem:[#allocation2 + $0x489] sm:$0xff]  ;;  %v7040_v56 = vld [vmem:[#allocation2 + $0x491] sm:$0xff] }
 0x53c   : > { %v7113_v8 = vpack.c.bf16 %v7040_v56, %v7039_v24  ;;  %v7047_v24 = vld [vmem:[#allocation2 + $0x4d9] sm:$0xff]  ;;  %v7048_v56 = vld [vmem:[#allocation2 + $0x4e1] sm:$0xff] }
 0x53d   : > { %v7117_v16 = vpack.c.bf16 %v7048_v56, %v7047_v24  ;;  %v7055_v24 = vld [vmem:[#allocation2 + $0x529] sm:$0xff]  ;;  %v7056_v56 = vld [vmem:[#allocation2 + $0x531] sm:$0xff] }
 0x53e   : > { %v7121_v61 = vpack.c.bf16 %v7056_v56, %v7055_v24  ;;  %v7991_v24 = vpack.c.bf16 %v20610_v32, %v20608_v2  ;;  %v7867_v56 = vld [vmem:[#allocation2 + $0x8a] sm:$0xff]  ;;  %v7876_v2 = vld [vmem:[#allocation2 + $0xe2] sm:$0xff] }
 0x53f   : > { %16733 = vmatmul.mubr.bf16.gmra.mrb[76].mxu0 %v7098_v29  ;;  %v20644_v29 = vld [vmem:[#allocation2 + $0x122] sm:$0xff]  ;;  %v7992_v57 = vpack.c.bf16 %v7868_v42, %v7867_v56  ;;  %v7891_v56 = vld [vmem:[#allocation2 + $0x17a] sm:$0xff] }
 0x540   : > { %16736 = vmatprep.mubr.bf16.mxu0 %v7099_v27  ;;  %v7018_v27 = vld [vmem:[#allocation2 + $0x3b1] sm:$0xff]  ;;  %9499 = vst [vmem:[#allocation2 + $0x128] sm:$0x3] %v20429_v60  ;;  %9498 = vst [vmem:[#allocation2 + $0x120] sm:$0xff] %v20429_v60  ;;  %v7879_v42 = vld [vmem:[#allocation2 + $0x102] sm:$0xff] }
 0x541   : > { %v7102_v40 = vpack.c.bf16 %v7018_v27, %v7017_v34  ;;  %v20656_v34 = vld [vmem:[#allocation2 + $0x16a] sm:$0xff]  ;;  %v7025_v27 = vld [vmem:[#allocation2 + $0x3f9] sm:$0xff] }
 0x542   : > { %9503 = vst [vmem:[#allocation2 + $0x168] sm:$0xff] %v20429_v60 }
 0x547   : > { %16737 = vmatmul.mubr.bf16.gmra.mrb[80].mxu0 %v7100_v14  ;;  %v20651_v14 = vld [vmem:[#allocation2 + $0x14a] sm:$0xff] }
 0x548   : > { %16740 = vmatprep.mubr.bf16.mxu0 %v7101_v7  ;;  %v7022_v7 = vld [vmem:[#allocation2 + $0x3d9] sm:$0xff]  ;;  %9502 = vst [vmem:[#allocation2 + $0x150] sm:$0x3] %v20429_v60  ;;  %9501 = vst [vmem:[#allocation2 + $0x148] sm:$0xff] %v20429_v60 }
 0x549   : > { %v7104_v53 = vpack.c.bf16 %v7022_v7, %v7021_v41  ;;  %v20663_v41 = vld [vmem:[#allocation2 + $0x192] sm:$0xff]  ;;  %v7029_v7 = vld [vmem:[#allocation2 + $0x421] sm:$0xff] }
 0x54a   : > { %9506 = vst [vmem:[#allocation2 + $0x190] sm:$0xff] %v20429_v60 }
 0x54f   : > { %16741 = vmatmul.mubr.bf16.gmra.mrb[84].mxu0 %v7102_v40  ;;  %v20658_v40 = vld [vmem:[#allocation2 + $0x172] sm:$0xff] }
 0x550   : > { %16744 = vmatprep.mubr.bf16.mxu0 %v7103_v17  ;;  %v7026_v17 = vld [vmem:[#allocation2 + $0x401] sm:$0xff]  ;;  %9505 = vst [vmem:[#allocation2 + $0x178] sm:$0x3] %v20429_v60  ;;  %9504 = vst [vmem:[#allocation2 + $0x170] sm:$0xff] %v20429_v60 }
 0x551   : > { %v7106_v31 = vpack.c.bf16 %v7026_v17, %v7025_v27  ;;  %v20670_v27 = vld [vmem:[#allocation2 + $0x1ba] sm:$0xff]  ;;  %v7033_v17 = vld [vmem:[#allocation2 + $0x449] sm:$0xff] }
 0x552   : > { %9509 = vst [vmem:[#allocation2 + $0x1b8] sm:$0xff] %v20429_v60 }
 0x557   : > { %16745 = vmatmul.mubr.bf16.gmra.mrb[88].mxu0 %v7104_v53  ;;  %v20665_v53 = vld [vmem:[#allocation2 + $0x19a] sm:$0xff] }
 0x558   : > { %16748 = vmatprep.mubr.bf16.mxu0 %v7105_v12  ;;  %v7030_v12 = vld [vmem:[#allocation2 + $0x429] sm:$0xff]  ;;  %9508 = vst [vmem:[#allocation2 + $0x1a0] sm:$0x3] %v20429_v60  ;;  %9507 = vst [vmem:[#allocation2 + $0x198] sm:$0xff] %v20429_v60 }
 0x559   : > { %v7108_v6 = vpack.c.bf16 %v7030_v12, %v7029_v7  ;;  %v20677_v7 = vld [vmem:[#allocation2 + $0x1e2] sm:$0xff]  ;;  %v7037_v12 = vld [vmem:[#allocation2 + $0x471] sm:$0xff] }
 0x55a   : > { %9512 = vst [vmem:[#allocation2 + $0x1e0] sm:$0xff] %v20429_v60 }
 0x55f   : > { %16749 = vmatmul.mubr.bf16.gmra.mrb[92].mxu0 %v7106_v31  ;;  %v20672_v31 = vld [vmem:[#allocation2 + $0x1c2] sm:$0xff] }
 0x560   : > { %16752 = vmatprep.mubr.bf16.mxu0 %v7107_v38  ;;  %v7034_v38 = vld [vmem:[#allocation2 + $0x451] sm:$0xff]  ;;  %9511 = vst [vmem:[#allocation2 + $0x1c8] sm:$0x3] %v20429_v60  ;;  %9510 = vst [vmem:[#allocation2 + $0x1c0] sm:$0xff] %v20429_v60 }
 0x561   : > { %v7110_v20 = vpack.c.bf16 %v7034_v38, %v7033_v17  ;;  %v20684_v17 = vld [vmem:[#allocation2 + $0x20a] sm:$0xff]  ;;  %v7041_v38 = vld [vmem:[#allocation2 + $0x499] sm:$0xff] }
 0x562   : > { %9515 = vst [vmem:[#allocation2 + $0x208] sm:$0xff] %v20429_v60 }
 0x567   : > { %16753 = vmatmul.mubr.bf16.gmra.mrb[96].mxu0 %v7108_v6  ;;  %v20679_v6 = vld [vmem:[#allocation2 + $0x1ea] sm:$0xff] }
 0x568   : > { %16756 = vmatprep.mubr.bf16.mxu0 %v7109_v0  ;;  %v7038_v0 = vld [vmem:[#allocation2 + $0x479] sm:$0xff]  ;;  %9514 = vst [vmem:[#allocation2 + $0x1f0] sm:$0x3] %v20429_v60  ;;  %9513 = vst [vmem:[#allocation2 + $0x1e8] sm:$0xff] %v20429_v60 }
 0x569   : > { %v7112_v49 = vpack.c.bf16 %v7038_v0, %v7037_v12  ;;  %v20691_v12 = vld [vmem:[#allocation2 + $0x232] sm:$0xff]  ;;  %v7045_v0 = vld [vmem:[#allocation2 + $0x4c1] sm:$0xff] }
 0x56a   : > { %9518 = vst [vmem:[#allocation2 + $0x230] sm:$0xff] %v20429_v60 }
 0x56f   : > { %16757 = vmatmul.mubr.bf16.gmra.mrb[100].mxu0 %v7110_v20  ;;  %v20686_v20 = vld [vmem:[#allocation2 + $0x212] sm:$0xff] }
 0x570   : > { %16760 = vmatprep.mubr.bf16.mxu0 %v7111_v18  ;;  %v7042_v18 = vld [vmem:[#allocation2 + $0x4a1] sm:$0xff]  ;;  %9517 = vst [vmem:[#allocation2 + $0x218] sm:$0x3] %v20429_v60  ;;  %9516 = vst [vmem:[#allocation2 + $0x210] sm:$0xff] %v20429_v60 }
 0x571   : > { %v7114_v1 = vpack.c.bf16 %v7042_v18, %v7041_v38  ;;  %v20698_v38 = vld [vmem:[#allocation2 + $0x25a] sm:$0xff]  ;;  %v7049_v18 = vld [vmem:[#allocation2 + $0x4e9] sm:$0xff] }
 0x572   : > { %9521 = vst [vmem:[#allocation2 + $0x258] sm:$0xff] %v20429_v60 }
 0x577   : > { %16761 = vmatmul.mubr.bf16.gmra.mrb[104].mxu0 %v7112_v49  ;;  %v20693_v49 = vld [vmem:[#allocation2 + $0x23a] sm:$0xff] }
 0x578   : > { %16764 = vmatprep.mubr.bf16.mxu0 %v7113_v8  ;;  %v7046_v8 = vld [vmem:[#allocation2 + $0x4c9] sm:$0xff]  ;;  %9520 = vst [vmem:[#allocation2 + $0x240] sm:$0x3] %v20429_v60  ;;  %9519 = vst [vmem:[#allocation2 + $0x238] sm:$0xff] %v20429_v60 }
 0x579   : > { %v7116_v51 = vpack.c.bf16 %v7046_v8, %v7045_v0  ;;  %v20705_v0 = vld [vmem:[#allocation2 + $0x282] sm:$0xff]  ;;  %v7053_v8 = vld [vmem:[#allocation2 + $0x511] sm:$0xff] }
 0x57a   : > { %9524 = vst [vmem:[#allocation2 + $0x280] sm:$0xff] %v20429_v60 }
 0x57f   : > { %16765 = vmatmul.mubr.bf16.gmra.mrb[108].mxu0 %v7114_v1  ;;  %v20700_v1 = vld [vmem:[#allocation2 + $0x262] sm:$0xff] }
 0x580   : > { %16768 = vmatprep.mubr.bf16.mxu0 %v7115_v59  ;;  %v7050_v59 = vld [vmem:[#allocation2 + $0x4f1] sm:$0xff]  ;;  %9523 = vst [vmem:[#allocation2 + $0x268] sm:$0x3] %v20429_v60  ;;  %9522 = vst [vmem:[#allocation2 + $0x260] sm:$0xff] %v20429_v60 }
 0x581   : > { %v7118_v54 = vpack.c.bf16 %v7050_v59, %v7049_v18  ;;  %v20712_v18 = vld [vmem:[#allocation2 + $0x2aa] sm:$0xff]  ;;  %v7057_v59 = vld [vmem:[#allocation2 + $0x539] sm:$0xff] }
 0x582   : > { %9527 = vst [vmem:[#allocation2 + $0x2a8] sm:$0xff] %v20429_v60 }
 0x587   : > { %16769 = vmatmul.mubr.bf16.gmra.mrb[112].mxu0 %v7116_v51  ;;  %v20707_v51 = vld [vmem:[#allocation2 + $0x28a] sm:$0xff] }
 0x588   : > { %16772 = vmatprep.mubr.bf16.mxu0 %v7117_v16  ;;  %v7054_v16 = vld [vmem:[#allocation2 + $0x519] sm:$0xff]  ;;  %9526 = vst [vmem:[#allocation2 + $0x290] sm:$0x3] %v20429_v60  ;;  %9525 = vst [vmem:[#allocation2 + $0x288] sm:$0xff] %v20429_v60 }
 0x589   : > { %v7120_v52 = vpack.c.bf16 %v7054_v16, %v7053_v8  ;;  %v7863_v8 = vld [vmem:[#allocation2 + $0x62] sm:$0xff]  ;;  %v7864_v16 = vld [vmem:[#allocation2 + $0x6a] sm:$0xff] }
 0x58f   : > { %16773 = vmatmul.mubr.bf16.gmra.mrb[116].mxu0 %v7118_v54  ;;  %v20714_v54 = vld [vmem:[#allocation2 + $0x2b2] sm:$0xff] }
 0x590   : > { %16776 = vmatprep.mubr.bf16.mxu0 %v7119_v10  ;;  %v7058_v10 = vld [vmem:[#allocation2 + $0x541] sm:$0xff]  ;;  %9528 = vst [vmem:[#allocation2 + $0x2b0] sm:$0xff] %v20429_v60  ;;  %9529 = vst [vmem:[#allocation2 + $0x2b8] sm:$0x3] %v20429_v60  ;;  %v7993_v60 = vpack.c.bf16 %v20623_v50, %v20621_v26  ;;  %v7880_v50 = vld [vmem:[#allocation2 + $0x10a] sm:$0xff]  ;;  %v7999_v26 = vpack.c.bf16 %v20644_v29, %v20642_v44 }
 0x591   : > { %v7122_v46 = vpack.c.bf16 %v7058_v10, %v7057_v59  ;;  %v7871_v59 = vld [vmem:[#allocation2 + $0xb2] sm:$0xff]  ;;  %v7995_v10 = vpack.c.bf16 %v20630_v5, %v20628_v30  ;;  %v7892_v44 = vld [vmem:[#allocation2 + $0x182] sm:$0xff] }
 0x592   : > { %v7884_v30 = vld [vmem:[#allocation2 + $0x132] sm:$0xff]  ;;  %v8004_v29 = vpack.c.bf16 %v7892_v44, %v7891_v56  ;;  %v9627_v56 = vld [vmem:[#allocation2 + $0x1] sm:$0xff]  ;;  %v9628_v44 = vld [vmem:[#allocation2 + $0x9] sm:$0xff] }
 0x597   : > { %16777 = vmatmul.mubr.bf16.gmra.mrb[120].mxu0 %v7120_v52  ;;  %v7989_v52 = vpack.c.bf16 %v20595_v23, %v20593_v22  ;;  %v7872_v22 = vld [vmem:[#allocation2 + $0xba] sm:$0xff] }
 0x598   : > { %16780 = vmatprep.mubr.bf16.mxu0 %v7121_v61  ;;  %v7990_v61 = vpack.c.bf16 %v7864_v16, %v7863_v8  ;;  %v7994_v23 = vpack.c.bf16 %v7872_v22, %v7871_v59  ;;  %v7883_v8 = vld [vmem:[#allocation2 + $0x12a] sm:$0xff]  ;;  %v8001_v16 = vpack.c.bf16 %v20651_v14, %v20649_v45  ;;  %v7895_v59 = vld [vmem:[#allocation2 + $0x1a2] sm:$0xff]  ;;  %v8007_v22 = vpack.c.bf16 %v20672_v31, %v20670_v27 }
 0x599   : > { %v8000_v5 = vpack.c.bf16 %v7884_v30, %v7883_v8  ;;  %v7896_v45 = vld [vmem:[#allocation2 + $0x1aa] sm:$0xff]  ;;  %v7908_v27 = vld [vmem:[#allocation2 + $0x222] sm:$0xff] }
 0x59a   : > { %v8006_v14 = vpack.c.bf16 %v7896_v45, %v7895_v59  ;;  %v19109_v31 = vld [vmem:[%s22321_s1 + $0x280] sm:$0xff]   ;;  %v9659_v59 = vpack.c.bf16 %v9628_v44, %v9627_v56  ;;  %v7953_v44 = vld [vmem:[#allocation2 + $0x3ea] sm:$0xff] }
 0x59b   : > { %16928 = vmatprep.subr.bf16.mxu1 %v19109_v31  ;;  %v19113_v8 = vld [vmem:[%s22321_s1 + $0x2a0] sm:$0xff]  }
 0x59c   : > { %16929 = vmatpush3.bf16.msra.mxu1 %v19109_v31  ;;  %16944 = vmatprep.mubr.bf16.mxu1 %v9659_v59  ;;  %v7936_v31 = vld [vmem:[#allocation2 + $0x33a] sm:$0xff] }
 0x59d   : > { %v7952_v56 = vld [vmem:[#allocation2 + $0x3da] sm:$0xff] }
 0x59f   : > { %16781 = vmatmul.mubr.bf16.gmra.mrb[124].mxu0 %v7122_v46  ;;  %v7875_v46 = vld [vmem:[#allocation2 + $0xda] sm:$0xff] }
 0x5a0   : > { %16800 = vmatprep.mubr.bf16.mxu0 %v7989_v52  ;;  %v7996_v32 = vpack.c.bf16 %v7876_v2, %v7875_v46  ;;  %v7997_v52 = vpack.c.bf16 %v20637_v36, %v20635_v4  ;;  %v7888_v4 = vld [vmem:[#allocation2 + $0x15a] sm:$0xff]  ;;  %v7903_v46 = vld [vmem:[#allocation2 + $0x1f2] sm:$0xff]  ;;  %v8011_v2 = vpack.c.bf16 %v20686_v20, %v20684_v17  ;;  %v7911_v17 = vld [vmem:[#allocation2 + $0x242] sm:$0xff] }
 0x5a1   : > { %v7912_v20 = vld [vmem:[#allocation2 + $0x24a] sm:$0xff] }
 0x5a7   : > { %16801 = vmatmul.mubr.bf16.vlgmr.msra.gmra.mrb[0].mxu0 %v7990_v61  ;;  %v7887_v61 = vld [vmem:[#allocation2 + $0x152] sm:$0xff] }
 0x5a8   : > { %16804 = vmatprep.mubr.bf16.mxu0 %v7991_v24  ;;  %v8002_v36 = vpack.c.bf16 %v7888_v4, %v7887_v61  ;;  %v8003_v24 = vpack.c.bf16 %v20658_v40, %v20656_v34  ;;  %v7900_v34 = vld [vmem:[#allocation2 + $0x1d2] sm:$0xff] }
 0x5a9   : > { %v19115_v61 = vld [vmem:[%s22321_s1 + $0x2b0] sm:$0xff]  }
 0x5af   : > { %16805 = vmatmul.mubr.bf16.gmra.mrb[4].mxu0 %v7992_v57  ;;  %v7998_v57 = vpack.c.bf16 %v7880_v50, %v7879_v42  ;;  %v19111_v42 = vld [vmem:[%s22321_s1 + $0x290] sm:$0xff]   ;;  %v8014_v50 = vpack.c.bf16 %v7912_v20, %v7911_v17  ;;  %v7939_v20 = vld [vmem:[#allocation2 + $0x35a] sm:$0xff] }
 0x5b0   : > { %16808 = vmatprep.mubr.bf16.mxu0 %v7993_v60  ;;  %v8005_v60 = vpack.c.bf16 %v20665_v53, %v20663_v41  ;;  %v7904_v41 = vld [vmem:[#allocation2 + $0x1fa] sm:$0xff] }
 0x5b1   : > { %v8010_v53 = vpack.c.bf16 %v7904_v41, %v7903_v46  ;;  %v7932_v46 = vld [vmem:[#allocation2 + $0x312] sm:$0xff]  ;;  %v7933_v41 = vld [vmem:[#allocation2 + $0x322] sm:$0xff] }
 0x5b7   : > { %16809 = vmatmul.mubr.bf16.gmra.mrb[8].mxu0 %v7994_v23  ;;  %v7899_v23 = vld [vmem:[#allocation2 + $0x1ca] sm:$0xff] }
 0x5b8   : > { %16812 = vmatprep.mubr.bf16.mxu0 %v7995_v10  ;;  %v8008_v40 = vpack.c.bf16 %v7900_v34, %v7899_v23  ;;  %v8009_v10 = vpack.c.bf16 %v20679_v6, %v20677_v7  ;;  %v8013_v7 = vpack.c.bf16 %v20693_v49, %v20691_v12  ;;  %v19110_v6 = vld [vmem:[%s22321_s1 + $0x288] sm:$0xff]   ;;  %v8015_v12 = vpack.c.bf16 %v20700_v1, %v20698_v38  ;;  %v19112_v49 = vld [vmem:[%s22321_s1 + $0x298] sm:$0xff]  }
 0x5b9   : > { %16930 = vmatprep.subr.bf16.mxu1 %v19110_v6  ;;  %v8017_v38 = vpack.c.bf16 %v20707_v51, %v20705_v0  ;;  %v19114_v1 = vld [vmem:[%s22321_s1 + $0x2a8] sm:$0xff]   ;;  %v19116_v0 = vld [vmem:[%s22321_s1 + $0x2b8] sm:$0xff]  }
 0x5ba   : > { %16931 = vmatpush3.bf16.msra.mxu1 %v19110_v6  ;;  %v7923_v51 = vld [vmem:[#allocation2 + $0x2ba] sm:$0xff]  ;;  %v7928_v23 = vld [vmem:[#allocation2 + $0x2ea] sm:$0xff] }
 0x5bb   : > { %16932 = vmatprep.subr.bf16.mxu1 %v19111_v42  ;;  %v7929_v34 = vld [vmem:[#allocation2 + $0x2fa] sm:$0xff] }
 0x5be   : > { %16933 = vmatpush3.bf16.msra.mxu1 %v19111_v42  ;;  %v7940_v42 = vld [vmem:[#allocation2 + $0x362] sm:$0xff] }
 0x5bf   : > { %16813 = vmatmul.mubr.bf16.gmra.mrb[12].mxu0 %v7996_v32  ;;  %v7907_v32 = vld [vmem:[#allocation2 + $0x21a] sm:$0xff]  ;;  %16934 = vmatprep.subr.bf16.mxu1 %v19112_v49 }
 0x5c0   : > { %16816 = vmatprep.mubr.bf16.mxu0 %v7997_v52  ;;  %v8012_v52 = vpack.c.bf16 %v7908_v27, %v7907_v32  ;;  %v7935_v27 = vld [vmem:[#allocation2 + $0x332] sm:$0xff] }
 0x5c1   : > { %v8026_v6 = vpack.c.bf16 %v7936_v31, %v7935_v27  ;;  %v7965_v27 = vld [vmem:[#allocation2 + $0x462] sm:$0xff]  ;;  %v7966_v31 = vld [vmem:[#allocation2 + $0x46a] sm:$0xff] }
 0x5c2   : > { %16935 = vmatpush3.bf16.msra.mxu1 %v19112_v49  ;;  %v8028_v49 = vpack.c.bf16 %v7940_v42, %v7939_v20  ;;  %v7969_v20 = vld [vmem:[#allocation2 + $0x48a] sm:$0xff]  ;;  %v7970_v42 = vld [vmem:[#allocation2 + $0x492] sm:$0xff] }
 0x5c3   : > { %16936 = vmatprep.subr.bf16.mxu1 %v19113_v8 }
 0x5c6   : > { %16937 = vmatpush3.bf16.msra.mxu1 %v19113_v8  ;;  %v7944_v8 = vld [vmem:[#allocation2 + $0x38a] sm:$0xff] }
 0x5c7   : > { %16817 = vmatmul.mubr.bf16.gmra.mrb[16].mxu0 %v7998_v57  ;;  %v7915_v57 = vld [vmem:[#allocation2 + $0x26a] sm:$0xff]  ;;  %16938 = vmatprep.subr.bf16.mxu1 %v19114_v1 }
 0x5c8   : > { %16820 = vmatprep.mubr.bf16.mxu0 %v7999_v26  ;;  %v7916_v26 = vld [vmem:[#allocation2 + $0x272] sm:$0xff] }
 0x5c9   : > { %v8016_v30 = vpack.c.bf16 %v7916_v26, %v7915_v57  ;;  %v7943_v26 = vld [vmem:[#allocation2 + $0x382] sm:$0xff] }
 0x5ca   : > { %16939 = vmatpush3.bf16.msra.mxu1 %v19114_v1  ;;  %v8030_v1 = vpack.c.bf16 %v7944_v8, %v7943_v26  ;;  %v7973_v26 = vld [vmem:[#allocation2 + $0x4b2] sm:$0xff]  ;;  %v7974_v8 = vld [vmem:[#allocation2 + $0x4ba] sm:$0xff] }
 0x5cb   : > { %16940 = vmatprep.subr.bf16.mxu1 %v19115_v61 }
 0x5ce   : > { %16941 = vmatpush3.bf16.msra.mxu1 %v19115_v61  ;;  %v7948_v61 = vld [vmem:[#allocation2 + $0x3b2] sm:$0xff] }
 0x5cf   : > { %16821 = vmatmul.mubr.bf16.gmra.mrb[20].mxu0 %v8000_v5  ;;  %v7919_v5 = vld [vmem:[#allocation2 + $0x292] sm:$0xff]  ;;  %16942 = vmatprep.subr.bf16.mxu1 %v19116_v0 }
 0x5d0   : > { %16824 = vmatprep.mubr.bf16.mxu0 %v8001_v16  ;;  %v7920_v16 = vld [vmem:[#allocation2 + $0x29a] sm:$0xff] }
 0x5d1   : > { %v8018_v4 = vpack.c.bf16 %v7920_v16, %v7919_v5  ;;  %v7947_v16 = vld [vmem:[#allocation2 + $0x3aa] sm:$0xff] }
 0x5d2   : > { %16943 = vmatpush3.bf16.msra.mxu1 %v19116_v0  ;;  %v7950_v0 = vld [vmem:[#allocation2 + $0x3ca] sm:$0xff] }
 0x5d7   : > { %16825 = vmatmul.mubr.bf16.gmra.mrb[24].mxu0 %v8002_v36  ;;  %v22489_v36 = vpack.c.bf16 %v20714_v54, %v20712_v18  ;;  %v7931_v54 = vld [vmem:[#allocation2 + $0x30a] sm:$0xff] }
 0x5d8   : > { %16828 = vmatprep.mubr.bf16.mxu0 %v8003_v24  ;;  %v7924_v24 = vld [vmem:[#allocation2 + $0x2c2] sm:$0xff] }
 0x5d9   : > { %v8020_v45 = vpack.c.bf16 %v7924_v24, %v7923_v51  ;;  %v8032_v51 = vpack.c.bf16 %v7948_v61, %v7947_v16  ;;  %v7951_v24 = vld [vmem:[#allocation2 + $0x3d2] sm:$0xff] }
 0x5df   : > { %16829 = vmatmul.mubr.bf16.gmra.mrb[28].mxu0 %v8004_v29  ;;  %v7925_v29 = vld [vmem:[#allocation2 + $0x2d2] sm:$0xff] }
 0x5e0   : > { %16832 = vmatprep.mubr.bf16.mxu0 %v8005_v60  ;;  %v7926_v60 = vld [vmem:[#allocation2 + $0x2da] sm:$0xff] }
 0x5e7   : > { %16833 = vmatmul.mubr.bf16.gmra.mrb[32].mxu0 %v8006_v14  ;;  %v8021_v14 = vpack.c.bf16 %v7926_v60, %v7925_v29  ;;  %v7954_v29 = vld [vmem:[#allocation2 + $0x3f2] sm:$0xff]  ;;  %v8034_v60 = vpack.c.bf16 %v7952_v56, %v7951_v24  ;;  %v7975_v56 = vld [vmem:[#allocation2 + $0x4c2] sm:$0xff] }
 0x5e8   : > { %16836 = vmatprep.mubr.bf16.mxu0 %v8007_v22  ;;  %v7927_v22 = vld [vmem:[#allocation2 + $0x2e2] sm:$0xff]  ;;  %v8035_v59 = vpack.c.bf16 %v7954_v29, %v7953_v44  ;;  %v7977_v29 = vld [vmem:[#allocation2 + $0x4da] sm:$0xff] }
 0x5ef   : > { %16837 = vmatmul.mubr.bf16.gmra.mrb[36].mxu0 %v8008_v40  ;;  %v7930_v40 = vld [vmem:[#allocation2 + $0x302] sm:$0xff] }
 0x5f0   : > { %16840 = vmatprep.mubr.bf16.mxu0 %v8009_v10  ;;  %v8022_v10 = vpack.c.bf16 %v7928_v23, %v7927_v22  ;;  %v8023_v18 = vpack.c.bf16 %v7930_v40, %v7929_v34  ;;  %v7957_v22 = vld [vmem:[#allocation2 + $0x412] sm:$0xff]  ;;  %v7958_v23 = vld [vmem:[#allocation2 + $0x41a] sm:$0xff] }
 0x5f1   : > { %v8037_v40 = vpack.c.bf16 %v7958_v23, %v7957_v22 }
 0x5f7   : > { %16841 = vmatmul.mubr.bf16.gmra.mrb[40].mxu0 %v8010_v53  ;;  %v7934_v53 = vld [vmem:[#allocation2 + $0x32a] sm:$0xff] }
 0x5f8   : > { %16844 = vmatprep.mubr.bf16.mxu0 %v8011_v2  ;;  %v8024_v2 = vpack.c.bf16 %v7932_v46, %v7931_v54  ;;  %v8025_v32 = vpack.c.bf16 %v7934_v53, %v7933_v41  ;;  %v7961_v54 = vld [vmem:[#allocation2 + $0x43a] sm:$0xff]  ;;  %v7962_v46 = vld [vmem:[#allocation2 + $0x442] sm:$0xff] }
 0x5f9   : > { %v8039_v53 = vpack.c.bf16 %v7962_v46, %v7961_v54 }
 0x5ff   : > { %16845 = vmatmul.mubr.bf16.gmra.mrb[44].mxu0 %v8012_v52  ;;  %v7937_v52 = vld [vmem:[#allocation2 + $0x34a] sm:$0xff] }
 0x600   : > { %16848 = vmatprep.mubr.bf16.mxu0 %v8013_v7  ;;  %v7938_v7 = vld [vmem:[#allocation2 + $0x352] sm:$0xff] }
 0x601   : > { %v8027_v17 = vpack.c.bf16 %v7938_v7, %v7937_v52  ;;  %v8041_v7 = vpack.c.bf16 %v7966_v31, %v7965_v27  ;;  %v7980_v27 = vld [vmem:[#allocation2 + $0x4f2] sm:$0xff] }
 0x607   : > { %16849 = vmatmul.mubr.bf16.gmra.mrb[48].mxu0 %v8014_v50  ;;  %v7941_v50 = vld [vmem:[#allocation2 + $0x372] sm:$0xff] }
 0x608   : > { %16852 = vmatprep.mubr.bf16.mxu0 %v8015_v12  ;;  %v7942_v12 = vld [vmem:[#allocation2 + $0x37a] sm:$0xff] }
 0x609   : > { %v8029_v57 = vpack.c.bf16 %v7942_v12, %v7941_v50  ;;  %v8043_v12 = vpack.c.bf16 %v7970_v42, %v7969_v20 }
 0x60f   : > { %16853 = vmatmul.mubr.bf16.gmra.mrb[52].mxu0 %v8016_v30  ;;  %v7945_v30 = vld [vmem:[#allocation2 + $0x39a] sm:$0xff] }
 0x610   : > { %16856 = vmatprep.mubr.bf16.mxu0 %v8017_v38  ;;  %v7946_v38 = vld [vmem:[#allocation2 + $0x3a2] sm:$0xff] }
 0x611   : > { %v8031_v5 = vpack.c.bf16 %v7946_v38, %v7945_v30 }
 0x617   : > { %16857 = vmatmul.mubr.bf16.gmra.mrb[56].mxu0 %v8018_v4  ;;  %v7949_v4 = vld [vmem:[#allocation2 + $0x3c2] sm:$0xff] }
 0x618   : > { %16860 = vmatprep.mubr.bf16.mxu0 %v22489_v36  ;;  %v8033_v36 = vpack.c.bf16 %v7950_v0, %v7949_v4  ;;  %v8045_v4 = vpack.c.bf16 %v7974_v8, %v7973_v26 }
 0x61f   : > { %16861 = vmatmul.mubr.bf16.gmra.mrb[60].mxu0 %v8020_v45  ;;  %v7955_v45 = vld [vmem:[#allocation2 + $0x3fa] sm:$0xff] }
 0x620   : > { %16864 = vmatprep.mubr.bf16.mxu0 %v8021_v14  ;;  %v7956_v14 = vld [vmem:[#allocation2 + $0x402] sm:$0xff] }
 0x621   : > { %v8036_v34 = vpack.c.bf16 %v7956_v14, %v7955_v45 }
 0x627   : > { %16865 = vmatmul.mubr.bf16.gmra.mrb[64].mxu0 %v8022_v10  ;;  %v7959_v10 = vld [vmem:[#allocation2 + $0x422] sm:$0xff] }
 0x628   : > { %16868 = vmatprep.mubr.bf16.mxu0 %v8023_v18  ;;  %v7960_v18 = vld [vmem:[#allocation2 + $0x42a] sm:$0xff] }
 0x629   : > { %v8038_v41 = vpack.c.bf16 %v7960_v18, %v7959_v10 }
 0x62f   : > { %16869 = vmatmul.mubr.bf16.gmra.mrb[68].mxu0 %v8024_v2  ;;  %v7963_v2 = vld [vmem:[#allocation2 + $0x44a] sm:$0xff] }
 0x630   : > { %16872 = vmatprep.mubr.bf16.mxu0 %v8025_v32  ;;  %v7964_v32 = vld [vmem:[#allocation2 + $0x452] sm:$0xff] }
 0x631   : > { %v8040_v52 = vpack.c.bf16 %v7964_v32, %v7963_v2  ;;  %v7979_v32 = vld [vmem:[#allocation2 + $0x4ea] sm:$0xff] }
 0x637   : > { %16873 = vmatmul.mubr.bf16.gmra.mrb[72].mxu0 %v8026_v6  ;;  %v7967_v6 = vld [vmem:[#allocation2 + $0x472] sm:$0xff] }
 0x638   : > { %16876 = vmatprep.mubr.bf16.mxu0 %v8027_v17  ;;  %v7968_v17 = vld [vmem:[#allocation2 + $0x47a] sm:$0xff] }
 0x639   : > { %v8042_v50 = vpack.c.bf16 %v7968_v17, %v7967_v6  ;;  %v7982_v6 = vld [vmem:[#allocation2 + $0x50a] sm:$0xff] }
 0x63f   : > { %16877 = vmatmul.mubr.bf16.gmra.mrb[76].mxu0 %v8028_v49  ;;  %v7971_v49 = vld [vmem:[#allocation2 + $0x49a] sm:$0xff] }
 0x640   : > { %16880 = vmatprep.mubr.bf16.mxu0 %v8029_v57  ;;  %v7972_v57 = vld [vmem:[#allocation2 + $0x4a2] sm:$0xff] }
 0x647   : > { %16881 = vmatmul.mubr.bf16.gmra.mrb[80].mxu0 %v8030_v1 }
 0x648   : > { %16884 = vmatprep.mubr.bf16.mxu0 %v8031_v5  ;;  %v8044_v5 = vpack.c.bf16 %v7972_v57, %v7971_v49 }
 0x64f   : > { %16885 = vmatmul.mubr.bf16.gmra.mrb[84].mxu0 %v8032_v51 }
 0x650   : > { %16888 = vmatprep.mubr.bf16.mxu0 %v8033_v36  ;;  %v20784_v36 = vld [vmem:[%s22322_s2] ss:$0 sm:$0xff] }
 0x657   : > { %16889 = vmatmul.mubr.bf16.gmra.mrb[88].mxu0 %v8034_v60 }
 0x658   : > { %16892 = vmatprep.mubr.bf16.mxu0 %v8035_v59 }
 0x65f   : > { %16893 = vmatmul.mubr.bf16.gmra.mrb[92].mxu0 %v8036_v34 }
 0x660   : > { %16896 = vmatprep.mubr.bf16.mxu0 %v8037_v40 }
 0x667   : > { %16897 = vmatmul.mubr.bf16.gmra.mrb[96].mxu0 %v8038_v41 }
 0x668   : > { %16900 = vmatprep.mubr.bf16.mxu0 %v8039_v53 }
 0x66f   : > { %16901 = vmatmul.mubr.bf16.gmra.mrb[100].mxu0 %v8040_v52 }
 0x670   : > { %16904 = vmatprep.mubr.bf16.mxu0 %v8041_v7  ;;  %v7981_v7 = vld [vmem:[#allocation2 + $0x502] sm:$0xff] }
 0x677   : > { %16905 = vmatmul.mubr.bf16.gmra.mrb[104].mxu0 %v8042_v50 }
 0x678   : > { %16908 = vmatprep.mubr.bf16.mxu0 %v8043_v12  ;;  %v8048_v12 = vpack.c.bf16 %v7980_v27, %v7979_v32 }
 0x67a   : > { %v16802_v30 = vpop.f32.mrb[0].mxu0 }
 0x67b   : > { %v17651_v38 = vadd.f32 %v16802_v30, %v20301_v33  ;;  %v8152_v1 = vpop.f32.mrb[1].mxu0  ;;  %v7976_v33 = vld [vmem:[#allocation2 + $0x4ca] sm:$0xff]  ;;  %v8049_v30 = vpack.c.bf16 %v7982_v6, %v7981_v7 }
 0x67c   : > { %v17652_v16 = vadd.f32 %v8152_v1, %v20304_v55  ;;  %v16803_v61 = vpop.f32.mrb[2].mxu0  ;;  %v7978_v55 = vld [vmem:[#allocation2 + $0x4e2] sm:$0xff]  ;;  %v8046_v22 = vpack.c.bf16 %v7976_v33, %v7975_v56 }
 0x67d   : > { %v17653_v0 = vadd.f32 %v16803_v61, %v20306_v9  ;;  %v8155_v51 = vpop.f32.mrb[3].mxu0  ;;  %v8800_v44 = vmul.f32 %v17651_v38, %v20784_v36  ;;  %v20791_v9 = vld [vmem:[%s22323_s3] ss:$0 sm:$0xff]  ;;  %v8047_v10 = vpack.c.bf16 %v7978_v55, %v7977_v29 }
 0x67e   : > { %v17654_v24 = vadd.f32 %v8155_v51, %v20308_v63  ;;  %v8798_v60 = vmul.f32 %v17652_v16, %v20784_v36 }
 0x67f   : > { %16909 = vmatmul.mubr.bf16.gmra.mrb[108].mxu0 %v8044_v5  ;;  %v8801_v45 = vmul.f32 %v17653_v0, %v20784_v36  ;;  %v8935_v18 = vadd.f32 %v20791_v9, %v8800_v44 }
 0x680   : > { %16912 = vmatprep.mubr.bf16.mxu0 %v8045_v4  ;;  %v8799_v23 = vmul.f32 %v17654_v24, %v20784_v36  ;;  %v8933_v53 = vadd.f32 %v20791_v9, %v8798_v60 }
 0x681   : > { %v8936_v31 = vadd.f32 %v20791_v9, %v8801_v45  ;;  %v9063_v42 = vmax.f32 %v8935_v18, 0.0 }
 0x682   : > { %v16806_v59 = vpop.f32.mrb[4].mxu0  ;;  %v9061_v49 = vmax.f32 %v8933_v53, 0.0 }
 0x683   : > { %v17655_v63 = vadd.f32 %v16806_v59, %v20311_v58  ;;  %v8168_v14 = vpop.f32.mrb[5].mxu0  ;;  %v9064_v38 = vmax.f32 %v8936_v31, 0.0  ;;  %v7984_v59 = vld [vmem:[#allocation2 + $0x51a] sm:$0xff] }
 0x684   : > { %v17656_v34 = vadd.f32 %v8168_v14, %v20314_v11  ;;  %v16807_v40 = vpop.f32.mrb[6].mxu0 }
 0x685   : > { %v8804_v54 = vmul.f32 %v17655_v63, %v20784_v36  ;;  %v17657_v46 = vadd.f32 %v16807_v40, %v20316_v62  ;;  %v8171_v41 = vpop.f32.mrb[7].mxu0  ;;  %v8934_v62 = vadd.f32 %v20791_v9, %v8799_v23  ;;  %v7985_v63 = vld [vmem:[#allocation2 + $0x52a] sm:$0xff] }
 0x686   : > { %v8802_v2 = vmul.f32 %v17656_v34, %v20784_v36  ;;  %v17658_v58 = vadd.f32 %v8171_v41, %v20318_v28 }
 0x687   : > { %v8939_v11 = vadd.f32 %v20791_v9, %v8804_v54  ;;  %v8805_v52 = vmul.f32 %v17657_v46, %v20784_v36  ;;  %16913 = vmatmul.mubr.bf16.gmra.mrb[112].mxu0 %v8046_v22  ;;  %v9062_v4 = vmax.f32 %v8934_v62, 0.0 }
 0x688   : > { %v8937_v17 = vadd.f32 %v20791_v9, %v8802_v2  ;;  %v8803_v20 = vmul.f32 %v17658_v58, %v20784_v36  ;;  %16916 = vmatprep.mubr.bf16.mxu0 %v8047_v10  ;;  %v7987_v58 = vld [vmem:[#allocation2 + $0x53a] sm:$0xff] }
 0x689   : > { %v9067_v28 = vmax.f32 %v8939_v11, 0.0  ;;  %v8940_v50 = vadd.f32 %v20791_v9, %v8805_v52  ;;  %v7988_v52 = vld [vmem:[#allocation2 + $0x542] sm:$0xff] }
 0x68a   : > { %v9065_v57 = vmax.f32 %v8937_v17, 0.0  ;;  %v8938_v26 = vadd.f32 %v20791_v9, %v8803_v20  ;;  %v16810_v8 = vpop.f32.mrb[8].mxu0 }
 0x68b   : > { %v9191_v1 = vmax.f32 %v9063_v42, %v9067_v28  ;;  %v9068_v5 = vmax.f32 %v8940_v50, 0.0  ;;  %v17659_v16 = vadd.f32 %v16810_v8, %v20321_v19  ;;  %v8184_v61 = vpop.f32.mrb[9].mxu0  ;;  %v7983_v19 = vld [vmem:[#allocation2 + $0x512] sm:$0xff] }
 0x68c   : > { %v9189_v0 = vmax.f32 %v9061_v49, %v9065_v57  ;;  %v9066_v51 = vmax.f32 %v8938_v26, 0.0  ;;  %v17660_v24 = vadd.f32 %v8184_v61, %v20324_v39  ;;  %v16811_v56 = vpop.f32.mrb[10].mxu0  ;;  %v7986_v39 = vld [vmem:[#allocation2 + $0x532] sm:$0xff]  ;;  %v8050_v40 = vpack.c.bf16 %v7984_v59, %v7983_v19 }
 0x68d   : > { %9255 = vst [vmem:[#allocation3 + $0x10] sm:$0xff] %v9191_v1  ;;  %v9192_v33 = vmax.f32 %v9064_v38, %v9068_v5  ;;  %v17661_v44 = vadd.f32 %v16811_v56, %v20326_v43  ;;  %v8187_v29 = vpop.f32.mrb[11].mxu0  ;;  %v8808_v45 = vmul.f32 %v17659_v16, %v20784_v36  ;;  %v8051_v54 = vpack.c.bf16 %v7986_v39, %v7985_v63 }
 0x68e   : > { %9253 = vst [vmem:[#allocation3] sm:$0xff] %v9189_v0  ;;  %v9190_v55 = vmax.f32 %v9062_v4, %v9066_v51  ;;  %v17662_v60 = vadd.f32 %v8187_v29, %v20328_v21  ;;  %v8806_v14 = vmul.f32 %v17660_v24, %v20784_v36  ;;  %v8052_v57 = vpack.c.bf16 %v7988_v52, %v7987_v58 }
 0x68f   : > { %9256 = vst [vmem:[#allocation3 + $0x18] sm:$0xff] %v9192_v33  ;;  %16917 = vmatmul.mubr.bf16.gmra.mrb[116].mxu0 %v8048_v12  ;;  %v8809_v43 = vmul.f32 %v17661_v44, %v20784_v36  ;;  %v8943_v46 = vadd.f32 %v20791_v9, %v8808_v45 }
 0x690   : > { %9254 = vst [vmem:[#allocation3 + $0x8] sm:$0xff] %v9190_v55  ;;  %16920 = vmatprep.mubr.bf16.mxu0 %v8049_v30  ;;  %v8807_v21 = vmul.f32 %v17662_v60, %v20784_v36 }
 0x691   : > { %v8944_v62 = vadd.f32 %v20791_v9, %v8809_v43  ;;  %v22490_v43 = vld [vmem:[#allocation7_spill] sm:$0xff] }
 0x692   : > { %v16814_v22 = vpop.f32.mrb[12].mxu0  ;;  %v8942_v42 = vadd.f32 %v20791_v9, %v8807_v21 }
 0x693   : > { %v17663_v23 = vadd.f32 %v16814_v22, %v20331_v48  ;;  %v8200_v34 = vpop.f32.mrb[13].mxu0  ;;  %v8941_v48 = vadd.f32 %v20791_v9, %v8806_v14  ;;  %v9072_v5 = vmax.f32 %v8944_v62, 0.0 }
 0x694   : > { %v17664_v10 = vadd.f32 %v8200_v34, %v20334_v3  ;;  %v16815_v18 = vpop.f32.mrb[14].mxu0  ;;  %v9070_v51 = vmax.f32 %v8942_v42, 0.0 }
 0x695   : > { %v8812_v41 = vmul.f32 %v17663_v23, %v20784_v36  ;;  %v17665_v53 = vadd.f32 %v16815_v18, %v20336_v25  ;;  %v8203_v2 = vpop.f32.mrb[15].mxu0  ;;  %v9069_v26 = vmax.f32 %v8941_v48, 0.0 }
 0x696   : > { %v9319_v32 = vld [vmem:[#allocation3 + $0x10] ss:$2 sm:$0xff]  ;;  %v9383_v27 = vld [vmem:[#allocation3 + $0x11] ss:$2 sm:$0xff]  ;;  %v8810_v31 = vmul.f32 %v17664_v10, %v20784_v36  ;;  %v17666_v11 = vadd.f32 %v8203_v2, %v20338_v35  ;;  %v9071_v35 = vmax.f32 %v8943_v46, 0.0 }
 0x697   : > { %v9445_v3 = vmax.f32 %v9319_v32, %v9383_v27  ;;  %v9317_v7 = vld [vmem:[#allocation3] ss:$2 sm:$0xff]  ;;  %v9381_v6 = vld [vmem:[#allocation3 + $0x1] ss:$2 sm:$0xff]  ;;  %v8947_v17 = vadd.f32 %v20791_v9, %v8812_v41  ;;  %v8813_v25 = vmul.f32 %v17665_v53, %v20784_v36  ;;  %16921 = vmatmul.mubr.bf16.gmra.mrb[120].mxu0 %v8050_v40  ;;  %v22492_v53 = vld [vmem:[#allocation9_spill] sm:$0xff] }
 0x698   : > { %v9444_v20 = vmax.f32 %v9317_v7, %v9381_v6  ;;  %v8945_v28 = vadd.f32 %v20791_v9, %v8810_v31  ;;  %v8811_v50 = vmul.f32 %v17666_v11, %v20784_v36  ;;  %16924 = vmatprep.mubr.bf16.mxu0 %v8051_v54  ;;  %v20854_v40 = vld [vmem:[#allocation2 + $0x18] sm:$0xff]  ;;  %v22493_v11 = vld [vmem:[#allocation10_spill] sm:$0xff] }
 0x699   : > { %9531 = vst [vmem:[#allocation2 + $0x31] sm:$0xff] %v9445_v3  ;;  %v9075_v12 = vmax.f32 %v8947_v17, 0.0  ;;  %v8948_v49 = vadd.f32 %v20791_v9, %v8813_v25  ;;  %v22491_v10 = vld [vmem:[#allocation8_spill] sm:$0xff] }
 0x69a   : > { %9530 = vst [vmem:[#allocation2 + $0x29] sm:$0xff] %v9444_v20  ;;  %v9073_v8 = vmax.f32 %v8945_v28, 0.0  ;;  %v8946_v30 = vadd.f32 %v20791_v9, %v8811_v50  ;;  %v16818_v38 = vpop.f32.mrb[16].mxu0  ;;  %v9660_v1 = vpack.c.bf16 %v9445_v3, %v9444_v20 }
 0x69b   : > { %v9195_v16 = vmax.f32 %v9071_v35, %v9075_v12  ;;  %v9076_v61 = vmax.f32 %v8948_v49, 0.0  ;;  %v17667_v4 = vadd.f32 %v16818_v38, %v20341_v13  ;;  %v8216_v0 = vpop.f32.mrb[17].mxu0 }
 0x69c   : > { %v9193_v24 = vmax.f32 %v9069_v26, %v9073_v8  ;;  %v9074_v56 = vmax.f32 %v8946_v30, 0.0  ;;  %v17668_v33 = vadd.f32 %v8216_v0, %v20344_v37  ;;  %v16819_v44 = vpop.f32.mrb[18].mxu0  ;;  %16945 = vmatmul.mubr.bf16.vlgmr.msra.gmra.mrb[128].mxu1 %v9660_v1 }
 0x69d   : > { %9259 = vst [vmem:[#allocation3 + $0x30] sm:$0xff] %v9195_v16  ;;  %v9196_v29 = vmax.f32 %v9072_v5, %v9076_v61  ;;  %v17669_v55 = vadd.f32 %v16819_v44, %v20346_v15  ;;  %v8219_v60 = vpop.f32.mrb[19].mxu0  ;;  %v8816_v13 = vmul.f32 %v17667_v4, %v20784_v36  ;;  %v22494_v61 = vld [vmem:[#allocation11_spill] sm:$0xff] }
 0x69e   : > { %9257 = vst [vmem:[#allocation3 + $0x20] sm:$0xff] %v9193_v24  ;;  %v9194_v19 = vmax.f32 %v9070_v51, %v9074_v56  ;;  %v17670_v59 = vadd.f32 %v8219_v60, %v20348_v47  ;;  %v8814_v37 = vmul.f32 %v17668_v33, %v20784_v36  ;;  %v22495_v33 = vld [vmem:[#allocation12_spill] sm:$0xff] }
 0x69f   : > { %9260 = vst [vmem:[#allocation3 + $0x38] sm:$0xff] %v9196_v29  ;;  %16925 = vmatmul.mubr.bf16.gmra.mrb[124].mxu0 %v8052_v57  ;;  %v8817_v47 = vmul.f32 %v17669_v55, %v20784_v36  ;;  %v8951_v46 = vadd.f32 %v20791_v9, %v8816_v13  ;;  %v22496_v60 = vld [vmem:[#allocation24_spill] sm:$0xff] }
 0x6a0   : > { %9258 = vst [vmem:[#allocation3 + $0x28] sm:$0xff] %v9194_v19  ;;  %v20843_v63 = vld [vmem:[#allocation2 + $0x31] sm:$0xff]  ;;  %v8815_v21 = vmul.f32 %v17670_v59, %v20784_v36  ;;  %v8949_v48 = vadd.f32 %v20791_v9, %v8814_v37  ;;  %v22497_v37 = vld [vmem:[#allocation25_spill] sm:$0xff] }
 0x6a1   : > { %v20841_v45 = vld [vmem:[#allocation2 + $0x28] sm:$0xff]  ;;  %v20846_v14 = vld [vmem:[#allocation2 + $0x30] sm:$0xff]  ;;  %v8952_v62 = vadd.f32 %v20791_v9, %v8817_v47  ;;  %v9079_v35 = vmax.f32 %v8951_v46, 0.0 }
 0x6a2   : > { %v16822_v39 = vpop.f32.mrb[20].mxu0  ;;  %v20848_v15 = vld [vmem:[#allocation2 + $0x2a] sm:$0xff]  ;;  %v8950_v42 = vadd.f32 %v20791_v9, %v8815_v21  ;;  %v9077_v57 = vmax.f32 %v8949_v48, 0.0 }
 0x6a3   : > { %v20850_v22 = vld [vmem:[#allocation2 + $0x29] sm:$0xff]  ;;  %v17671_v23 = vadd.f32 %v16822_v39, %v22490_v43  ;;  %v8232_v34 = vpop.f32.mrb[21].mxu0  ;;  %v9080_v1 = vmax.f32 %v8952_v62, 0.0 }
 0x6a4   : > { %12422 = vst [vmem:[#allocation2 + $0x28] sm:$0xff] %v20854_v40  ;;  %12423 = vst [vmem:[#allocation2 + $0x30] sm:$0x3] %v20854_v40  ;;  %v17672_v18 = vadd.f32 %v8232_v34, %v22491_v10  ;;  %v16823_v54 = vpop.f32.mrb[22].mxu0  ;;  %v9078_v51 = vmax.f32 %v8950_v42, 0.0  ;;  %v22502_v42 = vld [vmem:[#allocation27_spill] sm:$0xff] }
 0x6a5   : > { %v8820_v41 = vmul.f32 %v17671_v23, %v20784_v36  ;;  %v17673_v2 = vadd.f32 %v16823_v54, %v22492_v53  ;;  %v8235_v58 = vpop.f32.mrb[23].mxu0  ;;  %v22499_v53 = vld [vmem:[#allocation13_spill] sm:$0xff] }
 0x6a6   : > { %v9323_v32 = vld [vmem:[#allocation3 + $0x30] ss:$2 sm:$0xff]  ;;  %v9387_v27 = vld [vmem:[#allocation3 + $0x31] ss:$2 sm:$0xff]  ;;  %v8818_v31 = vmul.f32 %v17672_v18, %v20784_v36  ;;  %v17674_v52 = vadd.f32 %v8235_v58, %v22493_v11 }
 0x6a7   : > { %v9447_v3 = vmax.f32 %v9323_v32, %v9387_v27  ;;  %v9321_v7 = vld [vmem:[#allocation3 + $0x20] ss:$2 sm:$0xff]  ;;  %v9385_v6 = vld [vmem:[#allocation3 + $0x21] ss:$2 sm:$0xff]  ;;  %v8955_v17 = vadd.f32 %v20791_v9, %v8820_v41  ;;  %v8821_v25 = vmul.f32 %v17673_v2, %v20784_v36 }
 0x6a8   : > { %v9446_v20 = vmax.f32 %v9321_v7, %v9385_v6  ;;  %v8953_v28 = vadd.f32 %v20791_v9, %v8818_v31  ;;  %v8819_v50 = vmul.f32 %v17674_v52, %v20784_v36  ;;  %v22500_v27 = vld [vmem:[#allocation14_spill] sm:$0xff] }
 0x6a9   : > { %9533 = vst [vmem:[#allocation2 + $0x59] sm:$0xff] %v9447_v3  ;;  %v9083_v12 = vmax.f32 %v8955_v17, 0.0  ;;  %v8956_v49 = vadd.f32 %v20791_v9, %v8821_v25 }
 0x6aa   : > { %9532 = vst [vmem:[#allocation2 + $0x51] sm:$0xff] %v9446_v20  ;;  %v9081_v26 = vmax.f32 %v8953_v28, 0.0  ;;  %v8954_v8 = vadd.f32 %v20791_v9, %v8819_v50  ;;  %v16826_v30 = vpop.f32.mrb[24].mxu0  ;;  %v9661_v38 = vpack.c.bf16 %v9447_v3, %v9446_v20  ;;  %v22501_v3 = vld [vmem:[#allocation26_spill] sm:$0xff] }
 0x6ab   : > { %v9199_v5 = vmax.f32 %v9079_v35, %v9083_v12  ;;  %v9084_v16 = vmax.f32 %v8956_v49, 0.0  ;;  %v17675_v4 = vadd.f32 %v16826_v30, %v22494_v61  ;;  %v8248_v0 = vpop.f32.mrb[25].mxu0 }
 0x6ac   : > { %v9197_v24 = vmax.f32 %v9077_v57, %v9081_v26  ;;  %v9082_v56 = vmax.f32 %v8954_v8, 0.0  ;;  %v17676_v44 = vadd.f32 %v8248_v0, %v22495_v33  ;;  %v16827_v29 = vpop.f32.mrb[26].mxu0  ;;  %16948 = vmatprep.mubr.bf16.mxu1 %v9661_v38 }
 0x6ad   : > { %9263 = vst [vmem:[#allocation3 + $0x50] sm:$0xff] %v9199_v5  ;;  %v9200_v55 = vmax.f32 %v9080_v1, %v9084_v16  ;;  %v17677_v19 = vadd.f32 %v16827_v29, %v22496_v60  ;;  %v8251_v59 = vpop.f32.mrb[27].mxu0  ;;  %v8824_v47 = vmul.f32 %v17675_v4, %v20784_v36 }
 0x6ae   : > { %9261 = vst [vmem:[#allocation3 + $0x40] sm:$0xff] %v9197_v24  ;;  %v9198_v13 = vmax.f32 %v9078_v51, %v9082_v56  ;;  %v17678_v39 = vadd.f32 %v8251_v59, %v22497_v37  ;;  %v8822_v21 = vmul.f32 %v17676_v44, %v20784_v36 }
 0x6af   : > { %9264 = vst [vmem:[#allocation3 + $0x58] sm:$0xff] %v9200_v55  ;;  %v8825_v41 = vmul.f32 %v17677_v19, %v20784_v36  ;;  %v8959_v11 = vadd.f32 %v20791_v9, %v8824_v47  ;;  %v22503_v55 = vld [vmem:[#allocation15_spill] sm:$0xff] }
 0x6b0   : > { %9262 = vst [vmem:[#allocation3 + $0x48] sm:$0xff] %v9198_v13  ;;  %v20883_v34 = vld [vmem:[#allocation2 + $0x59] sm:$0xff]  ;;  %v8823_v32 = vmul.f32 %v17678_v39, %v20784_v36  ;;  %v8957_v25 = vadd.f32 %v20791_v9, %v8822_v21 }
 0x6b1   : > { %v20879_v43 = vld [vmem:[#allocation2 + $0x50] sm:$0xff]  ;;  %v20881_v23 = vld [vmem:[#allocation2 + $0x58] sm:$0xff]  ;;  %v8960_v49 = vadd.f32 %v20791_v9, %v8825_v41  ;;  %v9087_v5 = vmax.f32 %v8959_v11, 0.0 }
 0x6b2   : > { %v16830_v10 = vpop.f32.mrb[28].mxu0  ;;  %v20886_v18 = vld [vmem:[#allocation2 + $0x52] sm:$0xff]  ;;  %v8958_v30 = vadd.f32 %v20791_v9, %v8823_v32  ;;  %v9085_v4 = vmax.f32 %v8957_v25, 0.0  ;;  %v22504_v39 = vld [vmem:[#allocation16_spill] sm:$0xff]  ;;  %v22506_v32 = vld [vmem:[#allocation29_spill] sm:$0xff] }
 0x6b3   : > { %v20888_v54 = vld [vmem:[#allocation2 + $0x51] sm:$0xff]  ;;  %v17679_v2 = vadd.f32 %v16830_v10, %v22499_v53  ;;  %v8264_v58 = vpop.f32.mrb[29].mxu0  ;;  %v9088_v33 = vmax.f32 %v8960_v49, 0.0  ;;  %v22505_v41 = vld [vmem:[#allocation28_spill] sm:$0xff] }
 0x6b4   : > { %v20890_v46 = vld [vmem:[#allocation2 + $0x52] sm:$0xff]  ;;  %v17680_v48 = vadd.f32 %v8264_v58, %v22500_v27  ;;  %v16831_v31 = vpop.f32.mrb[30].mxu0  ;;  %v9086_v59 = vmax.f32 %v8958_v30, 0.0 }
 0x6b5   : > { %22498 = vst [vmem:[#allocation7_spill] sm:$0xff] %v20890_v46  ;;  %12424 = vst [vmem:[#allocation2 + $0x50] sm:$0xff] %v20854_v40  ;;  %v8828_v52 = vmul.f32 %v17679_v2, %v20784_v36  ;;  %v17681_v7 = vadd.f32 %v16831_v31, %v22501_v3  ;;  %v8267_v6 = vpop.f32.mrb[31].mxu0 }
 0x6b6   : > { %12425 = vst [vmem:[#allocation2 + $0x58] sm:$0x3] %v20854_v40  ;;  %v9327_v62 = vld [vmem:[#allocation3 + $0x50] ss:$2 sm:$0xff]  ;;  %v9391_v17 = vld [vmem:[#allocation3 + $0x51] ss:$2 sm:$0xff]  ;;  %v8826_v20 = vmul.f32 %v17680_v48, %v20784_v36  ;;  %v17682_v28 = vadd.f32 %v8267_v6, %v22502_v42 }
 0x6b7   : > { %v9449_v50 = vmax.f32 %v9327_v62, %v9391_v17  ;;  %v9325_v35 = vld [vmem:[#allocation3 + $0x40] ss:$2 sm:$0xff]  ;;  %v9389_v12 = vld [vmem:[#allocation3 + $0x41] ss:$2 sm:$0xff]  ;;  %v8963_v57 = vadd.f32 %v20791_v9, %v8828_v52  ;;  %v8829_v26 = vmul.f32 %v17681_v7, %v20784_v36 }
 0x6b8   : > { %v9448_v8 = vmax.f32 %v9325_v35, %v9389_v12  ;;  %v8961_v38 = vadd.f32 %v20791_v9, %v8826_v20  ;;  %v8827_v1 = vmul.f32 %v17682_v28, %v20784_v36  ;;  %v22509_v20 = vld [vmem:[#allocation17_spill] sm:$0xff]  ;;  %v22510_v35 = vld [vmem:[#allocation18_spill] sm:$0xff] }
 0x6b9   : > { %9535 = vst [vmem:[#allocation2 + $0x81] sm:$0xff] %v9449_v50  ;;  %v9091_v16 = vmax.f32 %v8963_v57, 0.0  ;;  %v8964_v61 = vadd.f32 %v20791_v9, %v8829_v26 }
 0x6ba   : > { %9534 = vst [vmem:[#allocation2 + $0x79] sm:$0xff] %v9448_v8  ;;  %v9089_v0 = vmax.f32 %v8961_v38, 0.0  ;;  %v8962_v51 = vadd.f32 %v20791_v9, %v8827_v1  ;;  %v16834_v24 = vpop.f32.mrb[32].mxu0  ;;  %v9662_v56 = vpack.c.bf16 %v9449_v50, %v9448_v8  ;;  %v22511_v8 = vld [vmem:[#allocation30_spill] sm:$0xff] }
 0x6bb   : > { %v9203_v44 = vmax.f32 %v9087_v5, %v9091_v16  ;;  %v9092_v29 = vmax.f32 %v8964_v61, 0.0  ;;  %v17683_v60 = vadd.f32 %v16834_v24, %v22503_v55  ;;  %v8280_v19 = vpop.f32.mrb[33].mxu0 }
 0x6bc   : > { %v9201_v13 = vmax.f32 %v9085_v4, %v9089_v0  ;;  %v9090_v37 = vmax.f32 %v8962_v51, 0.0  ;;  %v17684_v47 = vadd.f32 %v8280_v19, %v22504_v39  ;;  %v16835_v21 = vpop.f32.mrb[34].mxu0  ;;  %16949 = vmatmul.mubr.bf16.gmra.mrb[132].mxu1 %v9662_v56  ;;  %v22512_v4 = vld [vmem:[#allocation31_spill] sm:$0xff] }
 0x6bd   : > { %9267 = vst [vmem:[#allocation3 + $0x70] sm:$0xff] %v9203_v44  ;;  %v9204_v10 = vmax.f32 %v9088_v33, %v9092_v29  ;;  %v17685_v53 = vadd.f32 %v16835_v21, %v22505_v41  ;;  %v8283_v2 = vpop.f32.mrb[35].mxu0  ;;  %v8832_v48 = vmul.f32 %v17683_v60, %v20784_v36 }
 0x6be   : > { %9265 = vst [vmem:[#allocation3 + $0x60] sm:$0xff] %v9201_v13  ;;  %v9202_v58 = vmax.f32 %v9086_v59, %v9090_v37  ;;  %v17686_v27 = vadd.f32 %v8283_v2, %v22506_v32  ;;  %v8830_v3 = vmul.f32 %v17684_v47, %v20784_v36 }
 0x6bf   : > { %9268 = vst [vmem:[#allocation3 + $0x78] sm:$0xff] %v9204_v10  ;;  %v8833_v25 = vmul.f32 %v17685_v53, %v20784_v36  ;;  %v8967_v57 = vadd.f32 %v20791_v9, %v8832_v48 }
 0x6c0   : > { %9266 = vst [vmem:[#allocation3 + $0x68] sm:$0xff] %v9202_v58  ;;  %v20921_v52 = vld [vmem:[#allocation2 + $0x81] sm:$0xff]  ;;  %v8831_v50 = vmul.f32 %v17686_v27, %v20784_v36  ;;  %v8965_v16 = vadd.f32 %v20791_v9, %v8830_v3  ;;  %v22513_v27 = vld [vmem:[#allocation19_spill] sm:$0xff] }
 0x6c1   : > { %v20917_v31 = vld [vmem:[#allocation2 + $0x78] sm:$0xff]  ;;  %v20919_v11 = vld [vmem:[#allocation2 + $0x80] sm:$0xff]  ;;  %22507 = vst [vmem:[#allocation8_spill] sm:$0xff] %v20921_v52  ;;  %v8968_v33 = vadd.f32 %v20791_v9, %v8833_v25  ;;  %v9095_v13 = vmax.f32 %v8967_v57, 0.0 }
 0x6c2   : > { %v16838_v7 = vpop.f32.mrb[36].mxu0  ;;  %v20924_v6 = vld [vmem:[#allocation2 + $0x7a] sm:$0xff]  ;;  %v8966_v60 = vadd.f32 %v20791_v9, %v8831_v50  ;;  %v9093_v47 = vmax.f32 %v8965_v16, 0.0 }
 0x6c3   : > { %v20926_v62 = vld [vmem:[#allocation2 + $0x79] sm:$0xff]  ;;  %v17687_v42 = vadd.f32 %v16838_v7, %v22509_v20  ;;  %v8296_v28 = vpop.f32.mrb[37].mxu0  ;;  %v9096_v2 = vmax.f32 %v8968_v33, 0.0  ;;  %v22520_v33 = vld [vmem:[#allocation21_spill] sm:$0xff] }
 0x6c4   : > { %v20928_v17 = vld [vmem:[#allocation2 + $0x7a] sm:$0xff]  ;;  %v17688_v12 = vadd.f32 %v8296_v28, %v22510_v35  ;;  %v16839_v49 = vpop.f32.mrb[38].mxu0  ;;  %v9094_v7 = vmax.f32 %v8966_v60, 0.0  ;;  %v22521_v60 = vld [vmem:[#allocation22_spill] sm:$0xff] }
 0x6c5   : > { %22508 = vst [vmem:[#allocation9_spill] sm:$0xff] %v20928_v17  ;;  %12426 = vst [vmem:[#allocation2 + $0x78] sm:$0xff] %v20854_v40  ;;  %v8836_v26 = vmul.f32 %v17687_v42, %v20784_v36  ;;  %v17689_v30 = vadd.f32 %v16839_v49, %v22511_v8  ;;  %v8299_v38 = vpop.f32.mrb[39].mxu0  ;;  %v22514_v42 = vld [vmem:[#allocation20_spill] sm:$0xff]  ;;  %v22516_v8 = vld [vmem:[#allocation33_spill] sm:$0xff] }
 0x6c6   : > { %12427 = vst [vmem:[#allocation2 + $0x80] sm:$0x3] %v20854_v40  ;;  %v9331_v1 = vld [vmem:[#allocation3 + $0x70] ss:$2 sm:$0xff]  ;;  %v9395_v5 = vld [vmem:[#allocation3 + $0x71] ss:$2 sm:$0xff]  ;;  %v8834_v61 = vmul.f32 %v17688_v12, %v20784_v36  ;;  %v17690_v0 = vadd.f32 %v8299_v38, %v22512_v4 }
 0x6c7   : > { %v9451_v51 = vmax.f32 %v9331_v1, %v9395_v5  ;;  %v9329_v24 = vld [vmem:[#allocation3 + $0x60] ss:$2 sm:$0xff]  ;;  %v9393_v56 = vld [vmem:[#allocation3 + $0x61] ss:$2 sm:$0xff]  ;;  %v8971_v44 = vadd.f32 %v20791_v9, %v8836_v26  ;;  %v8837_v29 = vmul.f32 %v17689_v30, %v20784_v36 }
 0x6c8   : > { %v9450_v55 = vmax.f32 %v9329_v24, %v9393_v56  ;;  %v8969_v19 = vadd.f32 %v20791_v9, %v8834_v61  ;;  %v8835_v59 = vmul.f32 %v17690_v0, %v20784_v36  ;;  %v22515_v12 = vld [vmem:[#allocation32_spill] sm:$0xff] }
 0x6c9   : > { %9537 = vst [vmem:[#allocation2 + $0xa9] sm:$0xff] %v9451_v51  ;;  %v9099_v37 = vmax.f32 %v8971_v44, 0.0  ;;  %v8972_v39 = vadd.f32 %v20791_v9, %v8837_v29 }
 0x6ca   : > { %9536 = vst [vmem:[#allocation2 + $0xa1] sm:$0xff] %v9450_v55  ;;  %v9097_v21 = vmax.f32 %v8969_v19, 0.0  ;;  %v8970_v10 = vadd.f32 %v20791_v9, %v8835_v59  ;;  %v16842_v41 = vpop.f32.mrb[40].mxu0  ;;  %v9663_v53 = vpack.c.bf16 %v9451_v51, %v9450_v55 }
 0x6cb   : > { %v9207_v58 = vmax.f32 %v9095_v13, %v9099_v37  ;;  %v9100_v32 = vmax.f32 %v8972_v39, 0.0  ;;  %v17691_v48 = vadd.f32 %v16842_v41, %v22513_v27  ;;  %v8312_v3 = vpop.f32.mrb[41].mxu0  ;;  %v22522_v39 = vld [vmem:[#allocation34_spill] sm:$0xff] }
 0x6cc   : > { %v9205_v25 = vmax.f32 %v9093_v47, %v9097_v21  ;;  %v9098_v20 = vmax.f32 %v8970_v10, 0.0  ;;  %v17692_v28 = vadd.f32 %v8312_v3, %v22514_v42  ;;  %v16843_v50 = vpop.f32.mrb[42].mxu0  ;;  %16952 = vmatprep.mubr.bf16.mxu1 %v9663_v53 }
 0x6cd   : > { %9271 = vst [vmem:[#allocation3 + $0x90] sm:$0xff] %v9207_v58  ;;  %v9208_v35 = vmax.f32 %v9096_v2, %v9100_v32  ;;  %v17693_v49 = vadd.f32 %v16843_v50, %v22515_v12  ;;  %v8315_v57 = vpop.f32.mrb[43].mxu0  ;;  %v8840_v38 = vmul.f32 %v17691_v48, %v20784_v36  ;;  %v22523_v58 = vld [vmem:[#allocation35_spill] sm:$0xff] }
 0x6ce   : > { %9269 = vst [vmem:[#allocation3 + $0x80] sm:$0xff] %v9205_v25  ;;  %v9206_v26 = vmax.f32 %v9094_v7, %v9098_v20  ;;  %v17694_v30 = vadd.f32 %v8315_v57, %v22516_v8  ;;  %v8838_v61 = vmul.f32 %v17692_v28, %v20784_v36 }
 0x6cf   : > { %9272 = vst [vmem:[#allocation3 + $0x98] sm:$0xff] %v9208_v35  ;;  %v8841_v56 = vmul.f32 %v17693_v49, %v20784_v36  ;;  %v8975_v13 = vadd.f32 %v20791_v9, %v8840_v38 }
 0x6d0   : > { %9270 = vst [vmem:[#allocation3 + $0x88] sm:$0xff] %v9206_v26  ;;  %v20959_v16 = vld [vmem:[#allocation2 + $0xa9] sm:$0xff]  ;;  %v8839_v55 = vmul.f32 %v17694_v30, %v20784_v36  ;;  %v8973_v53 = vadd.f32 %v20791_v9, %v8838_v61 }
 0x6d1   : > { %v20955_v1 = vld [vmem:[#allocation2 + $0xa0] sm:$0xff]  ;;  %v20957_v5 = vld [vmem:[#allocation2 + $0xa8] sm:$0xff]  ;;  %22517 = vst [vmem:[#allocation10_spill] sm:$0xff] %v20959_v16  ;;  %v8976_v7 = vadd.f32 %v20791_v9, %v8841_v56  ;;  %v9103_v12 = vmax.f32 %v8975_v13, 0.0 }
 0x6d2   : > { %v16846_v4 = vpop.f32.mrb[44].mxu0  ;;  %v20962_v0 = vld [vmem:[#allocation2 + $0xa2] sm:$0xff]  ;;  %v8974_v28 = vadd.f32 %v20791_v9, %v8839_v55  ;;  %v9101_v26 = vmax.f32 %v8973_v53, 0.0 }
 0x6d3   : > { %v20964_v51 = vld [vmem:[#allocation2 + $0xa1] sm:$0xff]  ;;  %v17695_v44 = vadd.f32 %v16846_v4, %v22520_v33  ;;  %v8328_v29 = vpop.f32.mrb[45].mxu0  ;;  %v9104_v56 = vmax.f32 %v8976_v7, 0.0 }
 0x6d4   : > { %22518 = vst [vmem:[#allocation11_spill] sm:$0xff] %v20964_v51  ;;  %v20966_v24 = vld [vmem:[#allocation2 + $0xa2] sm:$0xff]  ;;  %v17696_v19 = vadd.f32 %v8328_v29, %v22521_v60  ;;  %v16847_v59 = vpop.f32.mrb[46].mxu0  ;;  %v22524_v29 = vld [vmem:[#allocation23_spill] sm:$0xff] }
 0x6d5   : > { %22519 = vst [vmem:[#allocation12_spill] sm:$0xff] %v20966_v24  ;;  %12428 = vst [vmem:[#allocation2 + $0xa0] sm:$0xff] %v20854_v40  ;;  %v8844_v37 = vmul.f32 %v17695_v44, %v20784_v36  ;;  %v17697_v47 = vadd.f32 %v16847_v59, %v22522_v39  ;;  %v8331_v21 = vpop.f32.mrb[47].mxu0  ;;  %v19117_v4 = vld [vmem:[%s22321_s1 + $0x240] sm:$0xff]  }
 0x6d6   : > { %12429 = vst [vmem:[#allocation2 + $0xa8] sm:$0x3] %v20854_v40  ;;  %v9335_v10 = vld [vmem:[#allocation3 + $0x90] ss:$2 sm:$0xff]  ;;  %v9399_v41 = vld [vmem:[#allocation3 + $0x91] ss:$2 sm:$0xff]  ;;  %v8842_v2 = vmul.f32 %v17696_v19, %v20784_v36  ;;  %v17698_v32 = vadd.f32 %v8331_v21, %v22523_v58  ;;  %16976 = vmatprep.subr.bf16.mxu1 %v19117_v4 }
 0x6d7   : > { %v9453_v27 = vmax.f32 %v9335_v10, %v9399_v41  ;;  %v9333_v48 = vld [vmem:[#allocation3 + $0x80] ss:$2 sm:$0xff]  ;;  %v9397_v3 = vld [vmem:[#allocation3 + $0x81] ss:$2 sm:$0xff]  ;;  %v8979_v25 = vadd.f32 %v20791_v9, %v8844_v37  ;;  %v8845_v20 = vmul.f32 %v17697_v47, %v20784_v36  ;;  %v9102_v19 = vmax.f32 %v8974_v28, 0.0  ;;  %v22526_v10 = vld [vmem:[#allocation37_spill] sm:$0xff]  ;;  %16977 = vmatpush3.bf16.msra.mxu1 %v19117_v4 }
 0x6d8   : > { %v9452_v42 = vmax.f32 %v9333_v48, %v9397_v3  ;;  %v8977_v50 = vadd.f32 %v20791_v9, %v8842_v2  ;;  %v8843_v35 = vmul.f32 %v17698_v32, %v20784_v36  ;;  %v22525_v37 = vld [vmem:[#allocation36_spill] sm:$0xff]  ;;  %v22527_v58 = vld [vmem:[#allocation38_spill] sm:$0xff] }
 0x6d9   : > { %9539 = vst [vmem:[#allocation2 + $0xd1] sm:$0xff] %v9453_v27  ;;  %v9107_v49 = vmax.f32 %v8979_v25, 0.0  ;;  %v8980_v57 = vadd.f32 %v20791_v9, %v8845_v20 }
 0x6da   : > { %9538 = vst [vmem:[#allocation2 + $0xc9] sm:$0xff] %v9452_v42  ;;  %v9105_v8 = vmax.f32 %v8977_v50, 0.0  ;;  %v8978_v30 = vadd.f32 %v20791_v9, %v8843_v35  ;;  %v16850_v38 = vpop.f32.mrb[48].mxu0  ;;  %v9664_v61 = vpack.c.bf16 %v9453_v27, %v9452_v42 }
 0x6db   : > { %v9211_v33 = vmax.f32 %v9103_v12, %v9107_v49  ;;  %v9108_v44 = vmax.f32 %v8980_v57, 0.0  ;;  %v17699_v55 = vadd.f32 %v16850_v38, %v22524_v29  ;;  %v8344_v60 = vpop.f32.mrb[49].mxu0  ;;  %v22531_v12 = vld [vmem:[#allocation39_spill] sm:$0xff] }
 0x6dc   : > { %v9209_v59 = vmax.f32 %v9101_v26, %v9105_v8  ;;  %v9106_v13 = vmax.f32 %v8978_v30, 0.0  ;;  %v17700_v39 = vadd.f32 %v8344_v60, %v22525_v37  ;;  %v16851_v47 = vpop.f32.mrb[50].mxu0  ;;  %16953 = vmatmul.mubr.bf16.gmra.mrb[136].mxu1 %v9664_v61  ;;  %v22532_v8 = vld [vmem:[#allocation40_spill] sm:$0xff]  ;;  %v19118_v37 = vld [vmem:[%s22321_s1 + $0x248] sm:$0xff]  }
 0x6dd   : > { %9275 = vst [vmem:[#allocation3 + $0xb0] sm:$0xff] %v9211_v33  ;;  %v9212_v21 = vmax.f32 %v9104_v56, %v9108_v44  ;;  %v17701_v41 = vadd.f32 %v16851_v47, %v22526_v10  ;;  %v8347_v53 = vpop.f32.mrb[51].mxu0  ;;  %v8848_v27 = vmul.f32 %v17699_v55, %v20784_v36  ;;  %v22533_v56 = vld [vmem:[#allocation41_spill] sm:$0xff]  ;;  %16978 = vmatprep.subr.bf16.mxu1 %v19118_v37 }
 0x6de   : > { %9273 = vst [vmem:[#allocation3 + $0xa0] sm:$0xff] %v9209_v59  ;;  %v9210_v2 = vmax.f32 %v9102_v19, %v9106_v13  ;;  %v17702_v32 = vadd.f32 %v8347_v53, %v22527_v58  ;;  %v8846_v25 = vmul.f32 %v17700_v39, %v20784_v36  ;;  %v22534_v59 = vld [vmem:[#allocation42_spill] sm:$0xff]  ;;  %16979 = vmatpush3.bf16.msra.mxu1 %v19118_v37 }
 0x6df   : > { %9276 = vst [vmem:[#allocation3 + $0xb8] sm:$0xff] %v9212_v21  ;;  %v8849_v35 = vmul.f32 %v17701_v41, %v20784_v36  ;;  %v8983_v61 = vadd.f32 %v20791_v9, %v8848_v27 }
 0x6e0   : > { %9274 = vst [vmem:[#allocation3 + $0xa8] sm:$0xff] %v9210_v2  ;;  %v21000_v7 = vld [vmem:[#allocation2 + $0xd1] sm:$0xff]  ;;  %v8847_v26 = vmul.f32 %v17702_v32, %v20784_v36  ;;  %v8981_v60 = vadd.f32 %v20791_v9, %v8846_v25 }
 0x6e1   : > { %v20996_v48 = vld [vmem:[#allocation2 + $0xc8] sm:$0xff]  ;;  %v20998_v3 = vld [vmem:[#allocation2 + $0xd0] sm:$0xff]  ;;  %22528 = vst [vmem:[#allocation24_spill] sm:$0xff] %v21000_v7  ;;  %v8984_v10 = vadd.f32 %v20791_v9, %v8849_v35  ;;  %v9111_v25 = vmax.f32 %v8983_v61, 0.0 }
 0x6e2   : > { %v16854_v20 = vpop.f32.mrb[52].mxu0  ;;  %v21003_v42 = vld [vmem:[#allocation2 + $0xca] sm:$0xff]  ;;  %v8982_v58 = vadd.f32 %v20791_v9, %v8847_v26  ;;  %v9109_v35 = vmax.f32 %v8981_v60, 0.0 }
 0x6e3   : > { %v21005_v28 = vld [vmem:[#allocation2 + $0xc9] sm:$0xff]  ;;  %v17703_v49 = vadd.f32 %v16854_v20, %v22531_v12  ;;  %v8360_v57 = vpop.f32.mrb[53].mxu0 }
 0x6e4   : > { %22529 = vst [vmem:[#allocation25_spill] sm:$0xff] %v21005_v28  ;;  %v21007_v50 = vld [vmem:[#allocation2 + $0xca] sm:$0xff]  ;;  %v17704_v30 = vadd.f32 %v8360_v57, %v22532_v8  ;;  %v16855_v38 = vpop.f32.mrb[54].mxu0 }
 0x6e5   : > { %22530 = vst [vmem:[#allocation13_spill] sm:$0xff] %v21007_v50  ;;  %12430 = vst [vmem:[#allocation2 + $0xc8] sm:$0xff] %v20854_v40  ;;  %v8852_v4 = vmul.f32 %v17703_v49, %v20784_v36  ;;  %v17705_v33 = vadd.f32 %v16855_v38, %v22533_v56  ;;  %v8363_v44 = vpop.f32.mrb[55].mxu0  ;;  %v19119_v26 = vld [vmem:[%s22321_s1 + $0x250] sm:$0xff]   ;;  %v9112_v38 = vmax.f32 %v8984_v10, 0.0 }
 0x6e6   : > { %12431 = vst [vmem:[#allocation2 + $0xd0] sm:$0x3] %v20854_v40  ;;  %v9339_v29 = vld [vmem:[#allocation3 + $0xb0] ss:$2 sm:$0xff]  ;;  %v9403_v55 = vld [vmem:[#allocation3 + $0xb1] ss:$2 sm:$0xff]  ;;  %v8850_v19 = vmul.f32 %v17704_v30, %v20784_v36  ;;  %v17706_v13 = vadd.f32 %v8363_v44, %v22534_v59  ;;  %16980 = vmatprep.subr.bf16.mxu1 %v19119_v26 }
 0x6e7   : > { %v9455_v39 = vmax.f32 %v9339_v29, %v9403_v55  ;;  %v9337_v47 = vld [vmem:[#allocation3 + $0xa0] ss:$2 sm:$0xff]  ;;  %v9401_v21 = vld [vmem:[#allocation3 + $0xa1] ss:$2 sm:$0xff]  ;;  %v8987_v41 = vadd.f32 %v20791_v9, %v8852_v4  ;;  %v8853_v53 = vmul.f32 %v17705_v33, %v20784_v36  ;;  %v9110_v29 = vmax.f32 %v8982_v58, 0.0  ;;  %16981 = vmatpush3.bf16.msra.mxu1 %v19119_v26 }
 0x6e8   : > { %v9454_v2 = vmax.f32 %v9337_v47, %v9401_v21  ;;  %v8985_v32 = vadd.f32 %v20791_v9, %v8850_v19  ;;  %v8851_v27 = vmul.f32 %v17706_v13, %v20784_v36  ;;  %v22535_v33 = vld [vmem:[#allocation43_spill] sm:$0xff]  ;;  %v22536_v59 = vld [vmem:[#allocation44_spill] sm:$0xff] }
 0x6e9   : > { %9541 = vst [vmem:[#allocation2 + $0xf9] sm:$0xff] %v9455_v39  ;;  %v9115_v20 = vmax.f32 %v8987_v41, 0.0  ;;  %v8988_v12 = vadd.f32 %v20791_v9, %v8853_v53  ;;  %v22538_v41 = vld [vmem:[#allocation46_spill] sm:$0xff]  ;;  %v22542_v26 = vld [vmem:[#allocation47_spill] sm:$0xff] }
 0x6ea   : > { %9540 = vst [vmem:[#allocation2 + $0xf1] sm:$0xff] %v9454_v2  ;;  %v9113_v49 = vmax.f32 %v8985_v32, 0.0  ;;  %v8986_v57 = vadd.f32 %v20791_v9, %v8851_v27  ;;  %v16858_v8 = vpop.f32.mrb[56].mxu0  ;;  %v9665_v30 = vpack.c.bf16 %v9455_v39, %v9454_v2  ;;  %v22537_v39 = vld [vmem:[#allocation45_spill] sm:$0xff]  ;;  %v19120_v2 = vld [vmem:[%s22321_s1 + $0x258] sm:$0xff]  }
 0x6eb   : > { %v9215_v4 = vmax.f32 %v9111_v25, %v9115_v20  ;;  %v9116_v56 = vmax.f32 %v8988_v12, 0.0  ;;  %v17707_v61 = vadd.f32 %v16858_v8, %v22535_v33  ;;  %v8376_v44 = vpop.f32.mrb[57].mxu0  ;;  %16982 = vmatprep.subr.bf16.mxu1 %v19120_v2  ;;  %v22543_v33 = vld [vmem:[#allocation48_spill] sm:$0xff] }
 0x6ec   : > { %v9213_v55 = vmax.f32 %v9109_v35, %v9113_v49  ;;  %v9114_v19 = vmax.f32 %v8986_v57, 0.0  ;;  %v17708_v60 = vadd.f32 %v8376_v44, %v22536_v59  ;;  %v16859_v13 = vpop.f32.mrb[58].mxu0  ;;  %16956 = vmatprep.mubr.bf16.mxu1 %v9665_v30  ;;  %16983 = vmatpush3.bf16.msra.mxu1 %v19120_v2  ;;  %v19121_v49 = vld [vmem:[%s22321_s1 + $0x260] sm:$0xff]  }
 0x6ed   : > { %9279 = vst [vmem:[#allocation3 + $0xd0] sm:$0xff] %v9215_v4  ;;  %v9216_v37 = vmax.f32 %v9112_v38, %v9116_v56  ;;  %v17709_v47 = vadd.f32 %v16859_v13, %v22537_v39  ;;  %v8379_v21 = vpop.f32.mrb[59].mxu0  ;;  %v8856_v32 = vmul.f32 %v17707_v61, %v20784_v36  ;;  %16984 = vmatprep.subr.bf16.mxu1 %v19121_v49 }
 0x6ee   : > { %9277 = vst [vmem:[#allocation3 + $0xc0] sm:$0xff] %v9213_v55  ;;  %v9214_v10 = vmax.f32 %v9110_v29, %v9114_v19  ;;  %v17710_v53 = vadd.f32 %v8379_v21, %v22538_v41  ;;  %v8854_v12 = vmul.f32 %v17708_v60, %v20784_v36  ;;  %v22544_v19 = vld [vmem:[#allocation49_spill] sm:$0xff]  ;;  %v22545_v21 = vld [vmem:[#allocation50_spill] sm:$0xff] }
 0x6ef   : > { %9280 = vst [vmem:[#allocation3 + $0xd8] sm:$0xff] %v9216_v37  ;;  %v8857_v30 = vmul.f32 %v17709_v47, %v20784_v36  ;;  %v8991_v29 = vadd.f32 %v20791_v9, %v8856_v32  ;;  %v19122_v41 = vld [vmem:[%s22321_s1 + $0x268] sm:$0xff]  }
 0x6f0   : > { %9278 = vst [vmem:[#allocation3 + $0xc8] sm:$0xff] %v9214_v10  ;;  %v21042_v58 = vld [vmem:[#allocation2 + $0xf9] sm:$0xff]  ;;  %v8855_v56 = vmul.f32 %v17710_v53, %v20784_v36  ;;  %16985 = vmatpush3.bf16.msra.mxu1 %v19121_v49  ;;  %v8989_v39 = vadd.f32 %v20791_v9, %v8854_v12 }
 0x6f1   : > { %22539 = vst [vmem:[#allocation14_spill] sm:$0xff] %v21042_v58  ;;  %v21045_v27 = vld [vmem:[#allocation2 + $0xf0] sm:$0xff]  ;;  %v21047_v25 = vld [vmem:[#allocation2 + $0xf8] sm:$0xff]  ;;  %v21079_v49 = vld [vmem:[%s22322_s2] ss:$0 sm:$0xff]  ;;  %16986 = vmatprep.subr.bf16.mxu1 %v19122_v41 }
 0x6f2   : > { %v21049_v20 = vld [vmem:[#allocation2 + $0xf2] sm:$0xff]  ;;  %v16862_v35 = vpop.f32.mrb[60].mxu0 }
 0x6f3   : > { %v21055_v57 = vld [vmem:[#allocation2 + $0xf1] sm:$0xff]  ;;  %v17711_v38 = vadd.f32 %v16862_v35, %v22542_v26  ;;  %v8392_v4 = vpop.f32.mrb[61].mxu0  ;;  %v8992_v35 = vadd.f32 %v20791_v9, %v8857_v30 }
 0x6f4   : > { %22540 = vst [vmem:[#allocation26_spill] sm:$0xff] %v21055_v57  ;;  %v21057_v8 = vld [vmem:[#allocation2 + $0xf2] sm:$0xff]  ;;  %v17712_v61 = vadd.f32 %v8392_v4, %v22543_v33  ;;  %v16863_v44 = vpop.f32.mrb[62].mxu0  ;;  %16987 = vmatpush3.bf16.msra.mxu1 %v19122_v41 }
 0x6f5   : > { %22541 = vst [vmem:[#allocation27_spill] sm:$0xff] %v21057_v8  ;;  %12432 = vst [vmem:[#allocation2 + $0xf0] sm:$0xff] %v20854_v40  ;;  %v8860_v55 = vmul.f32 %v17711_v38, %v20784_v36  ;;  %v17713_v59 = vadd.f32 %v16863_v44, %v22544_v19  ;;  %v8395_v60 = vpop.f32.mrb[63].mxu0  ;;  %v8990_v38 = vadd.f32 %v20791_v9, %v8855_v56  ;;  %v21088_v44 = vld [vmem:[%s22323_s3] ss:$0 sm:$0xff]  ;;  %v9117_v19 = vmax.f32 %v8989_v39, 0.0 }
 0x6f6   : > { %12433 = vst [vmem:[#allocation2 + $0xf8] sm:$0x3] %v20854_v40  ;;  %v9343_v13 = vld [vmem:[#allocation3 + $0xd0] ss:$2 sm:$0xff]  ;;  %v9407_v37 = vld [vmem:[#allocation3 + $0xd1] ss:$2 sm:$0xff]  ;;  %v8858_v47 = vmul.f32 %v17712_v61, %v20784_v36  ;;  %v17714_v10 = vadd.f32 %v8395_v60, %v22545_v21 }
 0x6f7   : > { %v9457_v53 = vmax.f32 %v9343_v13, %v9407_v37  ;;  %v9341_v2 = vld [vmem:[#allocation3 + $0xc0] ss:$2 sm:$0xff]  ;;  %v9405_v32 = vld [vmem:[#allocation3 + $0xc1] ss:$2 sm:$0xff]  ;;  %v8995_v26 = vadd.f32 %v20791_v9, %v8860_v55  ;;  %v8861_v36 = vmul.f32 %v21079_v49, %v17713_v59  ;;  %v9119_v61 = vmax.f32 %v8991_v29, 0.0 }
 0x6f8   : > { %v9456_v12 = vmax.f32 %v9341_v2, %v9405_v32  ;;  %v8993_v4 = vadd.f32 %v20791_v9, %v8858_v47  ;;  %v8859_v33 = vmul.f32 %v21079_v49, %v17714_v10  ;;  %v19123_v29 = vld [vmem:[%s22321_s1 + $0x270] sm:$0xff]   ;;  %v9120_v13 = vmax.f32 %v8992_v35, 0.0 }
 0x6f9   : > { %9543 = vst [vmem:[#allocation2 + $0x121] sm:$0xff] %v9457_v53  ;;  %v9123_v30 = vmax.f32 %v8995_v26, 0.0  ;;  %v8996_v55 = vadd.f32 %v21088_v44, %v8861_v36  ;;  %v22546_v21 = vld [vmem:[#allocation51_spill] sm:$0xff]  ;;  %v9118_v32 = vmax.f32 %v8990_v38, 0.0  ;;  %v22547_v36 = vld [vmem:[#allocation52_spill] sm:$0xff]  ;;  %16988 = vmatprep.subr.bf16.mxu1 %v19123_v29 }
 0x6fa   : > { %9542 = vst [vmem:[#allocation2 + $0x119] sm:$0xff] %v9456_v12  ;;  %v9121_v59 = vmax.f32 %v8993_v4, 0.0  ;;  %v8994_v56 = vadd.f32 %v21088_v44, %v8859_v33  ;;  %v16866_v9 = vpop.f32.mrb[64].mxu0  ;;  %v9666_v60 = vpack.c.bf16 %v9457_v53, %v9456_v12  ;;  %v22548_v12 = vld [vmem:[#allocation53_spill] sm:$0xff]  ;;  %16989 = vmatpush3.bf16.msra.mxu1 %v19123_v29  ;;  %v19124_v38 = vld [vmem:[%s22321_s1 + $0x278] sm:$0xff]  }
 0x6fb   : > { %v9219_v37 = vmax.f32 %v9119_v61, %v9123_v30  ;;  %v9124_v47 = vmax.f32 %v8996_v55, 0.0  ;;  %v17715_v10 = vadd.f32 %v16866_v9, %v22546_v21  ;;  %v8408_v2 = vpop.f32.mrb[65].mxu0  ;;  %v22549_v61 = vld [vmem:[#allocation54_spill] sm:$0xff]  ;;  %16990 = vmatprep.subr.bf16.mxu1 %v19124_v38 }
 0x6fc   : > { %v9217_v26 = vmax.f32 %v9117_v19, %v9121_v59  ;;  %v9122_v41 = vmax.f32 %v8994_v56, 0.0  ;;  %v17716_v39 = vadd.f32 %v8408_v2, %v22547_v36  ;;  %v16867_v4 = vpop.f32.mrb[66].mxu0  ;;  %16957 = vmatmul.mubr.bf16.gmra.mrb[140].mxu1 %v9666_v60 }
 0x6fd   : > { %9283 = vst [vmem:[#allocation3 + $0xf0] sm:$0xff] %v9219_v37  ;;  %v9220_v53 = vmax.f32 %v9120_v13, %v9124_v47  ;;  %v17717_v33 = vadd.f32 %v16867_v4, %v22548_v12  ;;  %v8411_v8 = vpop.f32.mrb[67].mxu0  ;;  %v8864_v55 = vmul.f32 %v21079_v49, %v17715_v10  ;;  %v22553_v47 = vld [vmem:[#allocation55_spill] sm:$0xff]  ;;  %v22555_v4 = vld [vmem:[#allocation57_spill] sm:$0xff] }
 0x6fe   : > { %9281 = vst [vmem:[#allocation3 + $0xe0] sm:$0xff] %v9217_v26  ;;  %v9218_v35 = vmax.f32 %v9118_v32, %v9122_v41  ;;  %v17718_v30 = vadd.f32 %v8411_v8, %v22549_v61  ;;  %16991 = vmatpush3.bf16.msra.mxu1 %v19124_v38  ;;  %v8862_v9 = vmul.f32 %v21079_v49, %v17716_v39  ;;  %v22554_v32 = vld [vmem:[#allocation56_spill] sm:$0xff] }
 0x6ff   : > { %9284 = vst [vmem:[#allocation3 + $0xf8] sm:$0xff] %v9220_v53  ;;  %v8865_v37 = vmul.f32 %v21079_v49, %v17717_v33  ;;  %v8999_v36 = vadd.f32 %v21088_v44, %v8864_v55 }
 0x700   : > { %9282 = vst [vmem:[#allocation3 + $0xe8] sm:$0xff] %v9218_v35  ;;  %v21107_v56 = vld [vmem:[#allocation2 + $0x121] sm:$0xff]  ;;  %v8863_v2 = vmul.f32 %v21079_v49, %v17718_v30  ;;  %v8997_v61 = vadd.f32 %v21088_v44, %v8862_v9 }
 0x701   : > { %v21103_v19 = vld [vmem:[#allocation2 + $0x118] sm:$0xff]  ;;  %v21105_v59 = vld [vmem:[#allocation2 + $0x120] sm:$0xff]  ;;  %22550 = vst [vmem:[#allocation15_spill] sm:$0xff] %v21107_v56 }
 0x702   : > { %v16870_v60 = vpop.f32.mrb[68].mxu0  ;;  %v21110_v8 = vld [vmem:[#allocation2 + $0x11a] sm:$0xff] }
 0x703   : > { %v21112_v29 = vld [vmem:[#allocation2 + $0x119] sm:$0xff]  ;;  %v17719_v21 = vadd.f32 %v16870_v60, %v22553_v47  ;;  %v8424_v10 = vpop.f32.mrb[69].mxu0  ;;  %v22556_v60 = vld [vmem:[#allocation58_spill] sm:$0xff] }
 0x704   : > { %22551 = vst [vmem:[#allocation16_spill] sm:$0xff] %v21112_v29  ;;  %v21114_v13 = vld [vmem:[#allocation2 + $0x11a] sm:$0xff]  ;;  %v17720_v26 = vadd.f32 %v8424_v10, %v22554_v32  ;;  %v16871_v41 = vpop.f32.mrb[70].mxu0  ;;  %v9000_v10 = vadd.f32 %v21088_v44, %v8865_v37 }
 0x705   : > { %22552 = vst [vmem:[#allocation28_spill] sm:$0xff] %v21114_v13  ;;  %12434 = vst [vmem:[#allocation2 + $0x118] sm:$0xff] %v20854_v40  ;;  %v8868_v39 = vmul.f32 %v21079_v49, %v17719_v21  ;;  %v17721_v53 = vadd.f32 %v16871_v41, %v22555_v4  ;;  %v8427_v12 = vpop.f32.mrb[71].mxu0  ;;  %v8998_v41 = vadd.f32 %v21088_v44, %v8863_v2 }
 0x706   : > { %12435 = vst [vmem:[#allocation2 + $0x120] sm:$0x3] %v20854_v40  ;;  %v9347_v33 = vld [vmem:[#allocation3 + $0xf0] ss:$2 sm:$0xff]  ;;  %v9411_v35 = vld [vmem:[#allocation3 + $0xf1] ss:$2 sm:$0xff]  ;;  %v8866_v38 = vmul.f32 %v21079_v49, %v17720_v26  ;;  %v17722_v47 = vadd.f32 %v8427_v12, %v22556_v60 }
 0x707   : > { %v9459_v13 = vmax.f32 %v9347_v33, %v9411_v35  ;;  %v9345_v30 = vld [vmem:[#allocation3 + $0xe0] ss:$2 sm:$0xff]  ;;  %v9409_v50 = vld [vmem:[#allocation3 + $0xe1] ss:$2 sm:$0xff]  ;;  %v9003_v55 = vadd.f32 %v21088_v44, %v8868_v39  ;;  %v8869_v21 = vmul.f32 %v21079_v49, %v17721_v53  ;;  %v9127_v26 = vmax.f32 %v8999_v36, 0.0 }
 0x708   : > { %v9458_v32 = vmax.f32 %v9345_v30, %v9409_v50  ;;  %v9001_v4 = vadd.f32 %v21088_v44, %v8866_v38  ;;  %v8867_v9 = vmul.f32 %v21079_v49, %v17722_v47  ;;  %v9125_v33 = vmax.f32 %v8997_v61, 0.0  ;;  %v21139_v50 = vld [vmem:[%s22321_s1 + $0x2c0] sm:$0xff]   ;;  %v22557_v47 = vld [vmem:[#allocation59_spill] sm:$0xff] }
 0x709   : > { %9545 = vst [vmem:[#allocation2 + $0x149] sm:$0xff] %v9459_v13  ;;  %v9131_v24 = vmax.f32 %v9003_v55, 0.0  ;;  %v9004_v12 = vadd.f32 %v21088_v44, %v8869_v21  ;;  %v9128_v2 = vmax.f32 %v9000_v10, 0.0  ;;  %v9126_v55 = vmax.f32 %v8998_v41, 0.0  ;;  %v22558_v61 = vld [vmem:[#allocation60_spill] sm:$0xff]  ;;  %17024 = vmatprep.subr.bf16.mxu1 %v21139_v50  ;;  %v22560_v10 = vld [vmem:[#allocation62_spill] sm:$0xff] }
 0x70a   : > { %9544 = vst [vmem:[#allocation2 + $0x141] sm:$0xff] %v9458_v32  ;;  %v9129_v35 = vmax.f32 %v9001_v4, 0.0  ;;  %v9002_v37 = vadd.f32 %v21088_v44, %v8867_v9  ;;  %v16874_v39 = vpop.f32.mrb[72].mxu0  ;;  %v9667_v60 = vpack.c.bf16 %v9459_v13, %v9458_v32  ;;  %v22559_v32 = vld [vmem:[#allocation61_spill] sm:$0xff] }
 0x70b   : > { %v9223_v53 = vmax.f32 %v9127_v26, %v9131_v24  ;;  %v9132_v38 = vmax.f32 %v9004_v12, 0.0  ;;  %v17723_v36 = vadd.f32 %v16874_v39, %v22557_v47  ;;  %v8440_v30 = vpop.f32.mrb[73].mxu0 }
 0x70c   : > { %v9221_v21 = vmax.f32 %v9125_v33, %v9129_v35  ;;  %v9130_v17 = vmax.f32 %v9002_v37, 0.0  ;;  %v17724_v4 = vadd.f32 %v8440_v30, %v22558_v61  ;;  %v16875_v46 = vpop.f32.mrb[74].mxu0  ;;  %16960 = vmatprep.mubr.bf16.mxu1 %v9667_v60 }
 0x70d   : > { %9287 = vst [vmem:[#allocation3 + $0x110] sm:$0xff] %v9223_v53  ;;  %v9224_v13 = vmax.f32 %v9128_v2, %v9132_v38  ;;  %v17725_v9 = vadd.f32 %v16875_v46, %v22559_v32  ;;  %v8443_v56 = vpop.f32.mrb[75].mxu0  ;;  %v8872_v41 = vmul.f32 %v21079_v49, %v17723_v36  ;;  %v22564_v2 = vld [vmem:[#allocation63_spill] sm:$0xff]  ;;  %v22565_v36 = vld [vmem:[#allocation64_spill] sm:$0xff] }
 0x70e   : > { %9285 = vst [vmem:[#allocation3 + $0x100] sm:$0xff] %v9221_v21  ;;  %v9222_v24 = vmax.f32 %v9126_v55, %v9130_v17  ;;  %v17726_v26 = vadd.f32 %v8443_v56, %v22560_v10  ;;  %v8870_v37 = vmul.f32 %v21079_v49, %v17724_v4  ;;  %v22566_v4 = vld [vmem:[#allocation65_spill] sm:$0xff] }
 0x70f   : > { %9288 = vst [vmem:[#allocation3 + $0x118] sm:$0xff] %v9224_v13  ;;  %v8873_v56 = vmul.f32 %v21079_v49, %v17725_v9  ;;  %v9007_v21 = vadd.f32 %v21088_v44, %v8872_v41 }
 0x710   : > { %9286 = vst [vmem:[#allocation3 + $0x108] sm:$0xff] %v9222_v24  ;;  %v21151_v35 = vld [vmem:[#allocation2 + $0x149] sm:$0xff]  ;;  %v8871_v47 = vmul.f32 %v21079_v49, %v17726_v26  ;;  %v9005_v10 = vadd.f32 %v21088_v44, %v8870_v37 }
 0x711   : > { %v21147_v12 = vld [vmem:[#allocation2 + $0x140] sm:$0xff]  ;;  %v21149_v33 = vld [vmem:[#allocation2 + $0x148] sm:$0xff]  ;;  %22561 = vst [vmem:[#allocation29_spill] sm:$0xff] %v21151_v35 }
 0x712   : > { %v16878_v39 = vpop.f32.mrb[76].mxu0  ;;  %v21154_v60 = vld [vmem:[#allocation2 + $0x142] sm:$0xff] }
 0x713   : > { %v21156_v46 = vld [vmem:[#allocation2 + $0x141] sm:$0xff]  ;;  %v17727_v53 = vadd.f32 %v16878_v39, %v22564_v2  ;;  %v8456_v38 = vpop.f32.mrb[77].mxu0  ;;  %v22567_v2 = vld [vmem:[#allocation66_spill] sm:$0xff] }
 0x714   : > { %22562 = vst [vmem:[#allocation17_spill] sm:$0xff] %v21156_v46  ;;  %v21158_v17 = vld [vmem:[#allocation2 + $0x142] sm:$0xff]  ;;  %v17728_v30 = vadd.f32 %v8456_v38, %v22565_v36  ;;  %v16879_v55 = vpop.f32.mrb[78].mxu0  ;;  %v9008_v38 = vadd.f32 %v21088_v44, %v8873_v56 }
 0x715   : > { %22563 = vst [vmem:[#allocation18_spill] sm:$0xff] %v21158_v17  ;;  %12437 = vst [vmem:[#allocation2 + $0x148] sm:$0x3] %v20854_v40  ;;  %v8876_v61 = vmul.f32 %v21079_v49, %v17727_v53  ;;  %v17729_v13 = vadd.f32 %v16879_v55, %v22566_v4  ;;  %v8459_v32 = vpop.f32.mrb[79].mxu0  ;;  %v9006_v55 = vadd.f32 %v21088_v44, %v8871_v47  ;;  %v22568_v47 = vld [vmem:[#allocation67_spill] sm:$0xff] }
 0x716   : > { %12436 = vst [vmem:[#allocation2 + $0x140] sm:$0xff] %v20854_v40  ;;  %v9351_v9 = vld [vmem:[#allocation3 + $0x110] ss:$2 sm:$0xff]  ;;  %v9415_v24 = vld [vmem:[#allocation3 + $0x111] ss:$2 sm:$0xff]  ;;  %v8874_v39 = vmul.f32 %v21079_v49, %v17728_v30  ;;  %v17730_v40 = vadd.f32 %v8459_v32, %v22567_v2  ;;  %v9135_v30 = vmax.f32 %v9007_v21, 0.0 }
 0x717   : > { %v9461_v17 = vmax.f32 %v9351_v9, %v9415_v24  ;;  %v9349_v26 = vld [vmem:[#allocation3 + $0x100] ss:$2 sm:$0xff]  ;;  %v9413_v35 = vld [vmem:[#allocation3 + $0x101] ss:$2 sm:$0xff]  ;;  %v9011_v41 = vadd.f32 %v21088_v44, %v8876_v61  ;;  %v8877_v53 = vmul.f32 %v21079_v49, %v17729_v13  ;;  %v9133_v9 = vmax.f32 %v9005_v10, 0.0 }
 0x718   : > { %v9460_v36 = vmax.f32 %v9349_v26, %v9413_v35  ;;  %v9009_v4 = vadd.f32 %v21088_v44, %v8874_v39  ;;  %v8875_v37 = vmul.f32 %v21079_v49, %v17730_v40  ;;  %v9136_v13 = vmax.f32 %v9008_v38, 0.0  ;;  %v22569_v21 = vld [vmem:[#allocation68_spill] sm:$0xff]  ;;  %v22571_v38 = vld [vmem:[#allocation70_spill] sm:$0xff] }
 0x719   : > { %9547 = vst [vmem:[#allocation2 + $0x171] sm:$0xff] %v9461_v17  ;;  %v9139_v46 = vmax.f32 %v9011_v41, 0.0  ;;  %v9012_v32 = vadd.f32 %v21088_v44, %v8877_v53  ;;  %v9134_v58 = vmax.f32 %v9006_v55, 0.0  ;;  %v22570_v53 = vld [vmem:[#allocation69_spill] sm:$0xff] }
 0x71a   : > { %9546 = vst [vmem:[#allocation2 + $0x169] sm:$0xff] %v9460_v36  ;;  %v9137_v24 = vmax.f32 %v9009_v4, 0.0  ;;  %v9010_v56 = vadd.f32 %v21088_v44, %v8875_v37  ;;  %v16882_v61 = vpop.f32.mrb[80].mxu0  ;;  %v9668_v2 = vpack.c.bf16 %v9461_v17, %v9460_v36 }
 0x71b   : > { %v9227_v35 = vmax.f32 %v9135_v30, %v9139_v46  ;;  %v9140_v26 = vmax.f32 %v9012_v32, 0.0  ;;  %v17731_v29 = vadd.f32 %v16882_v61, %v22568_v47  ;;  %v8472_v39 = vpop.f32.mrb[81].mxu0 }
 0x71c   : > { %v9225_v40 = vmax.f32 %v9133_v9, %v9137_v24  ;;  %v9138_v57 = vmax.f32 %v9010_v56, 0.0  ;;  %v17732_v41 = vadd.f32 %v8472_v39, %v22569_v21  ;;  %v16883_v7 = vpop.f32.mrb[82].mxu0  ;;  %16961 = vmatmul.mubr.bf16.gmra.mrb[144].mxu1 %v9668_v2  ;;  %v22575_v39 = vld [vmem:[#allocation72_spill] sm:$0xff] }
 0x71d   : > { %9291 = vst [vmem:[#allocation3 + $0x130] sm:$0xff] %v9227_v35  ;;  %v9228_v10 = vmax.f32 %v9136_v13, %v9140_v26  ;;  %v17733_v4 = vadd.f32 %v16883_v7, %v22570_v53  ;;  %v8475_v37 = vpop.f32.mrb[83].mxu0  ;;  %v8880_v55 = vmul.f32 %v21079_v49, %v17731_v29  ;;  %v21196_v29 = vld [vmem:[#allocation2 + $0x18] sm:$0xff]  ;;  %v22576_v53 = vld [vmem:[#allocation73_spill] sm:$0xff] }
 0x71e   : > { %9289 = vst [vmem:[#allocation3 + $0x120] sm:$0xff] %v9225_v40  ;;  %v9226_v17 = vmax.f32 %v9134_v58, %v9138_v57  ;;  %v17734_v46 = vadd.f32 %v8475_v37, %v22571_v38  ;;  %v8878_v9 = vmul.f32 %v21079_v49, %v17732_v41  ;;  %v22573_v57 = vld [vmem:[#allocation71_spill] sm:$0xff] }
 0x71f   : > { %9292 = vst [vmem:[#allocation3 + $0x138] sm:$0xff] %v9228_v10  ;;  %v8881_v58 = vmul.f32 %v21079_v49, %v17733_v4  ;;  %v9015_v41 = vadd.f32 %v21088_v44, %v8880_v55 }
 0x720   : > { %9290 = vst [vmem:[#allocation3 + $0x128] sm:$0xff] %v9226_v17  ;;  %v10739_v36 = vld [vmem:[#allocation2 + $0x171] sm:$0xff]  ;;  %v8879_v47 = vmul.f32 %v21079_v49, %v17734_v46 }
 0x721   : > { %v9580_v30 = vld [vmem:[#allocation2 + $0x168] sm:$0xff]  ;;  %v9581_v32 = vld [vmem:[#allocation2 + $0x170] sm:$0xff] }
 0x722   : > { %v16886_v24 = vpop.f32.mrb[84].mxu0  ;;  %v21186_v56 = vpack.c.bf16 %v9581_v32, %v9580_v30  ;;  %v21188_v61 = vld [vmem:[#allocation2 + $0x16a] sm:$0xff] }
 0x723   : > { %v10738_v7 = vld [vmem:[#allocation2 + $0x169] sm:$0xff]  ;;  %v17735_v13 = vadd.f32 %v16886_v24, %v22573_v57  ;;  %v8488_v35 = vpop.f32.mrb[85].mxu0 }
 0x724   : > { %v21190_v2 = vld [vmem:[#allocation2 + $0x16a] sm:$0xff]  ;;  %v21194_v26 = vpack.c.bf16 %v10739_v36, %v10738_v7  ;;  %v17736_v40 = vadd.f32 %v8488_v35, %v22575_v39  ;;  %v16887_v21 = vpop.f32.mrb[86].mxu0  ;;  %v9013_v36 = vadd.f32 %v21088_v44, %v8878_v9  ;;  %v9016_v35 = vadd.f32 %v21088_v44, %v8881_v58 }
 0x725   : > { %22572 = vst [vmem:[#allocation30_spill] sm:$0xff] %v21190_v2  ;;  %12438 = vst [vmem:[#allocation2 + $0x168] sm:$0xff] %v21196_v29  ;;  %v8884_v10 = vmul.f32 %v21079_v49, %v17735_v13  ;;  %v17737_v4 = vadd.f32 %v16887_v21, %v22576_v53  ;;  %v8491_v37 = vpop.f32.mrb[87].mxu0  ;;  %v22577_v32 = vld [vmem:[#allocation74_spill] sm:$0xff]  ;;  %v9014_v21 = vadd.f32 %v21088_v44, %v8879_v47  ;;  %v22578_v47 = vld [vmem:[#allocation75_spill] sm:$0xff] }
 0x726   : > { %22574 = vst [vmem:[#allocation31_spill] sm:$0xff] %v21194_v26  ;;  %12439 = vst [vmem:[#allocation2 + $0x170] sm:$0x3] %v21196_v29  ;;  %v9355_v17 = vld [vmem:[#allocation3 + $0x130] ss:$2 sm:$0xff]  ;;  %v8882_v30 = vmul.f32 %v21079_v49, %v17736_v40  ;;  %v17738_v24 = vadd.f32 %v8491_v37, %v22577_v32  ;;  %v9143_v40 = vmax.f32 %v9015_v41, 0.0 }
 0x727   : > { %v9419_v38 = vld [vmem:[#allocation3 + $0x131] ss:$2 sm:$0xff]  ;;  %v9353_v46 = vld [vmem:[#allocation3 + $0x120] ss:$2 sm:$0xff]  ;;  %v9417_v57 = vld [vmem:[#allocation3 + $0x121] ss:$2 sm:$0xff]  ;;  %v9019_v55 = vadd.f32 %v21088_v44, %v8884_v10  ;;  %v8885_v13 = vmul.f32 %v21079_v49, %v17737_v4 }
 0x728   : > { %v9463_v7 = vmax.f32 %v9355_v17, %v9419_v38  ;;  %v9462_v39 = vmax.f32 %v9353_v46, %v9417_v57  ;;  %v9017_v53 = vadd.f32 %v21088_v44, %v8882_v30  ;;  %v8883_v9 = vmul.f32 %v21079_v49, %v17738_v24  ;;  %v22579_v41 = vld [vmem:[#allocation76_spill] sm:$0xff] }
 0x729   : > { %v9147_v2 = vmax.f32 %v9019_v55, 0.0  ;;  %v9020_v37 = vadd.f32 %v21088_v44, %v8885_v13  ;;  %v9141_v17 = vmax.f32 %v9013_v36, 0.0  ;;  %v9144_v4 = vmax.f32 %v9016_v35, 0.0  ;;  %v22580_v13 = vld [vmem:[#allocation77_spill] sm:$0xff]  ;;  %v22581_v35 = vld [vmem:[#allocation78_spill] sm:$0xff] }
 0x72a   : > { %9549 = vst [vmem:[#allocation2 + $0x199] sm:$0xff] %v9463_v7  ;;  %9548 = vst [vmem:[#allocation2 + $0x191] sm:$0xff] %v9462_v39  ;;  %v9145_v38 = vmax.f32 %v9017_v53, 0.0  ;;  %v9018_v58 = vadd.f32 %v21088_v44, %v8883_v9  ;;  %v16890_v10 = vpop.f32.mrb[88].mxu0  ;;  %v9669_v32 = vpack.c.bf16 %v9463_v7, %v9462_v39  ;;  %v9142_v28 = vmax.f32 %v9014_v21, 0.0 }
 0x72b   : > { %v9231_v46 = vmax.f32 %v9143_v40, %v9147_v2  ;;  %v9148_v57 = vmax.f32 %v9020_v37, 0.0  ;;  %v17739_v26 = vadd.f32 %v16890_v10, %v22578_v47  ;;  %v8504_v30 = vpop.f32.mrb[89].mxu0 }
 0x72c   : > { %v9229_v24 = vmax.f32 %v9141_v17, %v9145_v38  ;;  %v9146_v16 = vmax.f32 %v9018_v58, 0.0  ;;  %v17740_v55 = vadd.f32 %v8504_v30, %v22579_v41  ;;  %v16891_v51 = vpop.f32.mrb[90].mxu0  ;;  %16964 = vmatprep.mubr.bf16.mxu1 %v9669_v32  ;;  %v22582_v17 = vld [vmem:[#allocation79_spill] sm:$0xff] }
 0x72d   : > { %9295 = vst [vmem:[#allocation3 + $0x150] sm:$0xff] %v9231_v46  ;;  %v9232_v36 = vmax.f32 %v9144_v4, %v9148_v57  ;;  %v17741_v53 = vadd.f32 %v16891_v51, %v22580_v13  ;;  %v8507_v9 = vpop.f32.mrb[91].mxu0  ;;  %v8888_v39 = vmul.f32 %v21079_v49, %v17739_v26  ;;  %v22583_v51 = vld [vmem:[#allocation80_spill] sm:$0xff]  ;;  %v22584_v46 = vld [vmem:[#allocation81_spill] sm:$0xff] }
 0x72e   : > { %9293 = vst [vmem:[#allocation3 + $0x140] sm:$0xff] %v9229_v24  ;;  %v9230_v7 = vmax.f32 %v9142_v28, %v9146_v16  ;;  %v17742_v2 = vadd.f32 %v8507_v9, %v22581_v35  ;;  %v8886_v21 = vmul.f32 %v21079_v49, %v17740_v55  ;;  %v22585_v55 = vld [vmem:[#allocation82_spill] sm:$0xff] }
 0x72f   : > { %9296 = vst [vmem:[#allocation3 + $0x158] sm:$0xff] %v9232_v36  ;;  %v8889_v37 = vmul.f32 %v21079_v49, %v17741_v53  ;;  %v9023_v16 = vadd.f32 %v21088_v44, %v8888_v39 }
 0x730   : > { %9294 = vst [vmem:[#allocation3 + $0x148] sm:$0xff] %v9230_v7  ;;  %v8887_v10 = vmul.f32 %v21079_v49, %v17742_v2  ;;  %v9021_v24 = vadd.f32 %v21088_v44, %v8886_v21 }
 0x731   : > { %v9024_v7 = vadd.f32 %v21088_v44, %v8889_v37 }
 0x732   : > { %v16894_v40 = vpop.f32.mrb[92].mxu0 }
 0x733   : > { %v17743_v38 = vadd.f32 %v16894_v40, %v22582_v17  ;;  %v8520_v58 = vpop.f32.mrb[93].mxu0  ;;  %v9022_v40 = vadd.f32 %v21088_v44, %v8887_v10  ;;  %v22586_v10 = vld [vmem:[#allocation83_spill] sm:$0xff] }
 0x734   : > { %v17744_v32 = vadd.f32 %v8520_v58, %v22583_v51  ;;  %v16895_v4 = vpop.f32.mrb[94].mxu0 }
 0x735   : > { %v8892_v28 = vmul.f32 %v21079_v49, %v17743_v38  ;;  %v17745_v57 = vadd.f32 %v16895_v4, %v22584_v46  ;;  %v8523_v26 = vpop.f32.mrb[95].mxu0  ;;  %v9151_v38 = vmax.f32 %v9023_v16, 0.0  ;;  %v22587_v16 = vld [vmem:[#allocation84_spill] sm:$0xff] }
 0x736   : > { %v9359_v47 = vld [vmem:[#allocation3 + $0x150] ss:$2 sm:$0xff]  ;;  %v9423_v30 = vld [vmem:[#allocation3 + $0x151] ss:$2 sm:$0xff]  ;;  %v8890_v41 = vmul.f32 %v21079_v49, %v17744_v32  ;;  %v17746_v36 = vadd.f32 %v8523_v26, %v22585_v55  ;;  %v9149_v32 = vmax.f32 %v9021_v24, 0.0  ;;  %v9150_v55 = vmax.f32 %v9022_v40, 0.0 }
 0x737   : > { %v9465_v13 = vmax.f32 %v9359_v47, %v9423_v30  ;;  %v9357_v53 = vld [vmem:[#allocation3 + $0x140] ss:$2 sm:$0xff]  ;;  %v9421_v9 = vld [vmem:[#allocation3 + $0x141] ss:$2 sm:$0xff]  ;;  %v9027_v35 = vadd.f32 %v21088_v44, %v8892_v28  ;;  %v8893_v2 = vmul.f32 %v21079_v49, %v17745_v57  ;;  %v9152_v57 = vmax.f32 %v9024_v7, 0.0 }
 0x738   : > { %v9464_v39 = vmax.f32 %v9357_v53, %v9421_v9  ;;  %v9025_v17 = vadd.f32 %v21088_v44, %v8890_v41  ;;  %v8891_v21 = vmul.f32 %v21079_v49, %v17746_v36 }
 0x739   : > { %9551 = vst [vmem:[#allocation2 + $0x1c1] sm:$0xff] %v9465_v13  ;;  %v9155_v58 = vmax.f32 %v9027_v35, 0.0  ;;  %v9028_v51 = vadd.f32 %v21088_v44, %v8893_v2  ;;  %v21242_v2 = vld [vmem:[#allocation2 + $0x2] sm:$0xff] }
 0x73a   : > { %9550 = vst [vmem:[#allocation2 + $0x1b9] sm:$0xff] %v9464_v39  ;;  %v9153_v4 = vmax.f32 %v9025_v17, 0.0  ;;  %v9026_v37 = vadd.f32 %v21088_v44, %v8891_v21  ;;  %v16898_v28 = vpop.f32.mrb[96].mxu0  ;;  %v9670_v46 = vpack.c.bf16 %v9465_v13, %v9464_v39  ;;  %v22588_v17 = vld [vmem:[#allocation85_spill] sm:$0xff]  ;;  %12420 = vst [vmem:[#allocation2] sm:$0xff] %v21196_v29  ;;  %v22589_v39 = vld [vmem:[#allocation86_spill] sm:$0xff] }
 0x73b   : > { %v9235_v26 = vmax.f32 %v9151_v38, %v9155_v58  ;;  %v9156_v47 = vmax.f32 %v9028_v51, 0.0  ;;  %v17747_v30 = vadd.f32 %v16898_v28, %v22586_v10  ;;  %v8536_v41 = vpop.f32.mrb[97].mxu0  ;;  %12421 = vst [vmem:[#allocation2 + $0x8] sm:$0x3] %v21196_v29 }
 0x73c   : > { %v9233_v36 = vmax.f32 %v9149_v32, %v9153_v4  ;;  %v9154_v53 = vmax.f32 %v9026_v37, 0.0  ;;  %v17748_v9 = vadd.f32 %v8536_v41, %v22587_v16  ;;  %v16899_v35 = vpop.f32.mrb[98].mxu0  ;;  %16965 = vmatmul.mubr.bf16.gmra.mrb[148].mxu1 %v9670_v46  ;;  %v22590_v4 = vld [vmem:[#allocation87_spill] sm:$0xff] }
 0x73d   : > { %9299 = vst [vmem:[#allocation3 + $0x170] sm:$0xff] %v9235_v26  ;;  %v9236_v24 = vmax.f32 %v9152_v57, %v9156_v47  ;;  %v17749_v21 = vadd.f32 %v16899_v35, %v22588_v17  ;;  %v8539_v13 = vpop.f32.mrb[99].mxu0  ;;  %v8896_v38 = vmul.f32 %v21079_v49, %v17747_v30  ;;  %v22591_v57 = vld [vmem:[#allocation88_spill] sm:$0xff] }
 0x73e   : > { %9297 = vst [vmem:[#allocation3 + $0x160] sm:$0xff] %v9233_v36  ;;  %v9234_v7 = vmax.f32 %v9150_v55, %v9154_v53  ;;  %v17750_v40 = vadd.f32 %v8539_v13, %v22589_v39  ;;  %v8894_v58 = vmul.f32 %v21079_v49, %v17748_v9  ;;  %v22592_v55 = vld [vmem:[#allocation89_spill] sm:$0xff] }
 0x73f   : > { %9300 = vst [vmem:[#allocation3 + $0x178] sm:$0xff] %v9236_v24  ;;  %v8897_v32 = vmul.f32 %v21079_v49, %v17749_v21  ;;  %v9031_v10 = vadd.f32 %v21088_v44, %v8896_v38  ;;  %v22593_v24 = vld [vmem:[#allocation90_spill] sm:$0xff] }
 0x740   : > { %9298 = vst [vmem:[#allocation3 + $0x168] sm:$0xff] %v9234_v7  ;;  %v8895_v46 = vmul.f32 %v21079_v49, %v17750_v40  ;;  %v9029_v9 = vadd.f32 %v21088_v44, %v8894_v58 }
 0x741   : > { %v9032_v39 = vadd.f32 %v21088_v44, %v8897_v32 }
 0x742   : > { %v16902_v51 = vpop.f32.mrb[100].mxu0 }
 0x743   : > { %v17751_v37 = vadd.f32 %v16902_v51, %v22590_v4  ;;  %v8552_v28 = vpop.f32.mrb[101].mxu0  ;;  %v9030_v4 = vadd.f32 %v21088_v44, %v8895_v46  ;;  %v22594_v46 = vld [vmem:[#allocation91_spill] sm:$0xff] }
 0x744   : > { %v17752_v26 = vadd.f32 %v8552_v28, %v22591_v57  ;;  %v16903_v47 = vpop.f32.mrb[102].mxu0  ;;  %v9159_v28 = vmax.f32 %v9031_v10, 0.0  ;;  %v22595_v10 = vld [vmem:[#allocation92_spill] sm:$0xff] }
 0x745   : > { %v8900_v41 = vmul.f32 %v21079_v49, %v17751_v37  ;;  %v17753_v36 = vadd.f32 %v16903_v47, %v22592_v55  ;;  %v8555_v30 = vpop.f32.mrb[103].mxu0  ;;  %v9157_v47 = vmax.f32 %v9029_v9, 0.0 }
 0x746   : > { %v9363_v53 = vld [vmem:[#allocation3 + $0x170] ss:$2 sm:$0xff]  ;;  %v9427_v16 = vld [vmem:[#allocation3 + $0x171] ss:$2 sm:$0xff]  ;;  %v8898_v35 = vmul.f32 %v21079_v49, %v17752_v26  ;;  %v17754_v17 = vadd.f32 %v8555_v30, %v22593_v24 }
 0x747   : > { %v9467_v21 = vmax.f32 %v9363_v53, %v9427_v16  ;;  %v9361_v13 = vld [vmem:[#allocation3 + $0x160] ss:$2 sm:$0xff]  ;;  %v9425_v7 = vld [vmem:[#allocation3 + $0x161] ss:$2 sm:$0xff]  ;;  %v9035_v40 = vadd.f32 %v21088_v44, %v8900_v41  ;;  %v8901_v38 = vmul.f32 %v21079_v49, %v17753_v36  ;;  %v9160_v36 = vmax.f32 %v9032_v39, 0.0 }
 0x748   : > { %v9466_v51 = vmax.f32 %v9361_v13, %v9425_v7  ;;  %v9033_v37 = vadd.f32 %v21088_v44, %v8898_v35  ;;  %v8899_v58 = vmul.f32 %v21079_v49, %v17754_v17  ;;  %v9158_v13 = vmax.f32 %v9030_v4, 0.0  ;;  %v22597_v39 = vld [vmem:[#allocation94_spill] sm:$0xff] }
 0x749   : > { %9553 = vst [vmem:[#allocation2 + $0x1e9] sm:$0xff] %v9467_v21  ;;  %v9163_v57 = vmax.f32 %v9035_v40, 0.0  ;;  %v9036_v26 = vadd.f32 %v21088_v44, %v8901_v38  ;;  %v22596_v38 = vld [vmem:[#allocation93_spill] sm:$0xff] }
 0x74a   : > { %9552 = vst [vmem:[#allocation2 + $0x1e1] sm:$0xff] %v9466_v51  ;;  %v9161_v55 = vmax.f32 %v9033_v37, 0.0  ;;  %v9034_v32 = vadd.f32 %v21088_v44, %v8899_v58  ;;  %v16906_v41 = vpop.f32.mrb[104].mxu0  ;;  %v9671_v30 = vpack.c.bf16 %v9467_v21, %v9466_v51 }
 0x74b   : > { %v9239_v53 = vmax.f32 %v9159_v28, %v9163_v57  ;;  %v9164_v16 = vmax.f32 %v9036_v26, 0.0  ;;  %v17755_v24 = vadd.f32 %v16906_v41, %v22594_v46  ;;  %v8568_v35 = vpop.f32.mrb[105].mxu0  ;;  %v22600_v46 = vld [vmem:[#allocation97_spill] sm:$0xff] }
 0x74c   : > { %v9237_v17 = vmax.f32 %v9157_v47, %v9161_v55  ;;  %v9162_v7 = vmax.f32 %v9034_v32, 0.0  ;;  %v17756_v40 = vadd.f32 %v8568_v35, %v22595_v10  ;;  %v16907_v52 = vpop.f32.mrb[106].mxu0  ;;  %16968 = vmatprep.mubr.bf16.mxu1 %v9671_v30  ;;  %v22598_v47 = vld [vmem:[#allocation95_spill] sm:$0xff] }
 0x74d   : > { %9303 = vst [vmem:[#allocation3 + $0x190] sm:$0xff] %v9239_v53  ;;  %v9240_v9 = vmax.f32 %v9160_v36, %v9164_v16  ;;  %v17757_v37 = vadd.f32 %v16907_v52, %v22596_v38  ;;  %v8571_v58 = vpop.f32.mrb[107].mxu0  ;;  %v8904_v28 = vmul.f32 %v21079_v49, %v17755_v24  ;;  %v22599_v52 = vld [vmem:[#allocation96_spill] sm:$0xff] }
 0x74e   : > { %9301 = vst [vmem:[#allocation3 + $0x180] sm:$0xff] %v9237_v17  ;;  %v9238_v21 = vmax.f32 %v9158_v13, %v9162_v7  ;;  %v17758_v51 = vadd.f32 %v8571_v58, %v22597_v39  ;;  %v8902_v4 = vmul.f32 %v21079_v49, %v17756_v40  ;;  %v22601_v40 = vld [vmem:[#allocation98_spill] sm:$0xff] }
 0x74f   : > { %9304 = vst [vmem:[#allocation3 + $0x198] sm:$0xff] %v9240_v9  ;;  %v8905_v26 = vmul.f32 %v21079_v49, %v17757_v37  ;;  %v9039_v53 = vadd.f32 %v21088_v44, %v8904_v28 }
 0x750   : > { %9302 = vst [vmem:[#allocation3 + $0x188] sm:$0xff] %v9238_v21  ;;  %v8903_v41 = vmul.f32 %v21079_v49, %v17758_v51  ;;  %v9037_v7 = vadd.f32 %v21088_v44, %v8902_v4 }
 0x751   : > { %v9040_v21 = vadd.f32 %v21088_v44, %v8905_v26 }
 0x752   : > { %v16910_v57 = vpop.f32.mrb[108].mxu0 }
 0x753   : > { %v17759_v55 = vadd.f32 %v16910_v57, %v22598_v47  ;;  %v8584_v32 = vpop.f32.mrb[109].mxu0  ;;  %v9038_v57 = vadd.f32 %v21088_v44, %v8903_v41  ;;  %v22602_v41 = vld [vmem:[#allocation99_spill] sm:$0xff] }
 0x754   : > { %v17760_v30 = vadd.f32 %v8584_v32, %v22599_v52  ;;  %v16911_v36 = vpop.f32.mrb[110].mxu0 }
 0x755   : > { %v8908_v16 = vmul.f32 %v21079_v49, %v17759_v55  ;;  %v17761_v35 = vadd.f32 %v16911_v36, %v22600_v46  ;;  %v8587_v24 = vpop.f32.mrb[111].mxu0  ;;  %v9167_v55 = vmax.f32 %v9039_v53, 0.0  ;;  %v22603_v53 = vld [vmem:[#allocation100_spill] sm:$0xff] }
 0x756   : > { %v9367_v13 = vld [vmem:[#allocation3 + $0x190] ss:$2 sm:$0xff]  ;;  %v9431_v17 = vld [vmem:[#allocation3 + $0x191] ss:$2 sm:$0xff]  ;;  %v8906_v10 = vmul.f32 %v21079_v49, %v17760_v30  ;;  %v17762_v9 = vadd.f32 %v8587_v24, %v22601_v40  ;;  %v9165_v30 = vmax.f32 %v9037_v7, 0.0  ;;  %v9166_v40 = vmax.f32 %v9038_v57, 0.0 }
 0x757   : > { %v9469_v38 = vmax.f32 %v9367_v13, %v9431_v17  ;;  %v9365_v37 = vld [vmem:[#allocation3 + $0x180] ss:$2 sm:$0xff]  ;;  %v9429_v58 = vld [vmem:[#allocation3 + $0x181] ss:$2 sm:$0xff]  ;;  %v9043_v39 = vadd.f32 %v21088_v44, %v8908_v16  ;;  %v8909_v51 = vmul.f32 %v21079_v49, %v17761_v35  ;;  %v9168_v35 = vmax.f32 %v9040_v21, 0.0 }
 0x758   : > { %v9468_v28 = vmax.f32 %v9365_v37, %v9429_v58  ;;  %v9041_v47 = vadd.f32 %v21088_v44, %v8906_v10  ;;  %v8907_v4 = vmul.f32 %v21079_v49, %v17762_v9  ;;  %v22605_v21 = vld [vmem:[#allocation102_spill] sm:$0xff] }
 0x759   : > { %9555 = vst [vmem:[#allocation2 + $0x211] sm:$0xff] %v9469_v38  ;;  %v9171_v32 = vmax.f32 %v9043_v39, 0.0  ;;  %v9044_v52 = vadd.f32 %v21088_v44, %v8909_v51  ;;  %v22604_v51 = vld [vmem:[#allocation101_spill] sm:$0xff] }
 0x75a   : > { %9554 = vst [vmem:[#allocation2 + $0x209] sm:$0xff] %v9468_v28  ;;  %v9169_v36 = vmax.f32 %v9041_v47, 0.0  ;;  %v9042_v26 = vadd.f32 %v21088_v44, %v8907_v4  ;;  %v16914_v16 = vpop.f32.mrb[112].mxu0  ;;  %v9672_v46 = vpack.c.bf16 %v9469_v38, %v9468_v28 }
 0x75b   : > { %v9243_v24 = vmax.f32 %v9167_v55, %v9171_v32  ;;  %v9172_v13 = vmax.f32 %v9044_v52, 0.0  ;;  %v17763_v17 = vadd.f32 %v16914_v16, %v22602_v41  ;;  %v8600_v10 = vpop.f32.mrb[113].mxu0 }
 0x75c   : > { %v9241_v9 = vmax.f32 %v9165_v30, %v9169_v36  ;;  %v9170_v37 = vmax.f32 %v9042_v26, 0.0  ;;  %v17764_v58 = vadd.f32 %v8600_v10, %v22603_v53  ;;  %v16915_v39 = vpop.f32.mrb[114].mxu0  ;;  %16969 = vmatmul.mubr.bf16.gmra.mrb[152].mxu1 %v9672_v46  ;;  %v22606_v30 = vld [vmem:[#allocation103_spill] sm:$0xff]  ;;  %v22607_v46 = vld [vmem:[#allocation104_spill] sm:$0xff]  ;;  %v22608_v10 = vld [vmem:[#allocation105_spill] sm:$0xff] }
 0x75d   : > { %9307 = vst [vmem:[#allocation3 + $0x1b0] sm:$0xff] %v9243_v24  ;;  %v9244_v7 = vmax.f32 %v9168_v35, %v9172_v13  ;;  %v17765_v47 = vadd.f32 %v16915_v39, %v22604_v51  ;;  %v8603_v4 = vpop.f32.mrb[115].mxu0  ;;  %v8912_v55 = vmul.f32 %v21079_v49, %v17763_v17  ;;  %v22609_v39 = vld [vmem:[#allocation106_spill] sm:$0xff] }
 0x75e   : > { %9305 = vst [vmem:[#allocation3 + $0x1a0] sm:$0xff] %v9241_v9  ;;  %v9242_v38 = vmax.f32 %v9166_v40, %v9170_v37  ;;  %v17766_v28 = vadd.f32 %v8603_v4, %v22605_v21  ;;  %v8910_v57 = vmul.f32 %v21079_v49, %v17764_v58 }
 0x75f   : > { %9308 = vst [vmem:[#allocation3 + $0x1b8] sm:$0xff] %v9244_v7  ;;  %v8913_v52 = vmul.f32 %v21079_v49, %v17765_v47  ;;  %v9047_v13 = vadd.f32 %v21088_v44, %v8912_v55 }
 0x760   : > { %9306 = vst [vmem:[#allocation3 + $0x1a8] sm:$0xff] %v9242_v38  ;;  %v8911_v16 = vmul.f32 %v21079_v49, %v17766_v28  ;;  %v9045_v53 = vadd.f32 %v21088_v44, %v8910_v57 }
 0x761   : > { %v9048_v38 = vadd.f32 %v21088_v44, %v8913_v52 }
 0x762   : > { %v16918_v32 = vpop.f32.mrb[116].mxu0 }
 0x763   : > { %v17767_v36 = vadd.f32 %v16918_v32, %v22606_v30  ;;  %v8616_v26 = vpop.f32.mrb[117].mxu0  ;;  %v9046_v32 = vadd.f32 %v21088_v44, %v8911_v16  ;;  %v22610_v16 = vld [vmem:[#allocation107_spill] sm:$0xff] }
 0x764   : > { %v17768_v35 = vadd.f32 %v8616_v26, %v22607_v46  ;;  %v16919_v24 = vpop.f32.mrb[118].mxu0 }
 0x765   : > { %v8916_v41 = vmul.f32 %v21079_v49, %v17767_v36  ;;  %v17769_v40 = vadd.f32 %v16919_v24, %v22608_v10  ;;  %v8619_v17 = vpop.f32.mrb[119].mxu0  ;;  %v9175_v36 = vmax.f32 %v9047_v13, 0.0  ;;  %v22611_v13 = vld [vmem:[#allocation108_spill] sm:$0xff] }
 0x766   : > { %v9371_v9 = vld [vmem:[#allocation3 + $0x1b0] ss:$2 sm:$0xff]  ;;  %v9435_v37 = vld [vmem:[#allocation3 + $0x1b1] ss:$2 sm:$0xff]  ;;  %v8914_v58 = vmul.f32 %v21079_v49, %v17768_v35  ;;  %v17770_v7 = vadd.f32 %v8619_v17, %v22609_v39  ;;  %v9173_v35 = vmax.f32 %v9045_v53, 0.0  ;;  %v9174_v39 = vmax.f32 %v9046_v32, 0.0 }
 0x767   : > { %v9471_v51 = vmax.f32 %v9371_v9, %v9435_v37  ;;  %v9369_v47 = vld [vmem:[#allocation3 + $0x1a0] ss:$2 sm:$0xff]  ;;  %v9433_v4 = vld [vmem:[#allocation3 + $0x1a1] ss:$2 sm:$0xff]  ;;  %v9051_v21 = vadd.f32 %v21088_v44, %v8916_v41  ;;  %v8917_v28 = vmul.f32 %v21079_v49, %v17769_v40  ;;  %v9176_v40 = vmax.f32 %v9048_v38, 0.0 }
 0x768   : > { %v9470_v55 = vmax.f32 %v9369_v47, %v9433_v4  ;;  %v9049_v30 = vadd.f32 %v21088_v44, %v8914_v58  ;;  %v8915_v57 = vmul.f32 %v21079_v49, %v17770_v7  ;;  %v22613_v38 = vld [vmem:[#allocation110_spill] sm:$0xff] }
 0x769   : > { %9557 = vst [vmem:[#allocation2 + $0x239] sm:$0xff] %v9471_v51  ;;  %v9179_v26 = vmax.f32 %v9051_v21, 0.0  ;;  %v9052_v46 = vadd.f32 %v21088_v44, %v8917_v28  ;;  %v22612_v28 = vld [vmem:[#allocation109_spill] sm:$0xff] }
 0x76a   : > { %9556 = vst [vmem:[#allocation2 + $0x231] sm:$0xff] %v9470_v55  ;;  %v9177_v24 = vmax.f32 %v9049_v30, 0.0  ;;  %v9050_v52 = vadd.f32 %v21088_v44, %v8915_v57  ;;  %v16922_v41 = vpop.f32.mrb[120].mxu0  ;;  %v9673_v10 = vpack.c.bf16 %v9471_v51, %v9470_v55 }
 0x76b   : > { %v9247_v17 = vmax.f32 %v9175_v36, %v9179_v26  ;;  %v9180_v9 = vmax.f32 %v9052_v46, 0.0  ;;  %v17771_v37 = vadd.f32 %v16922_v41, %v22610_v16  ;;  %v8632_v58 = vpop.f32.mrb[121].mxu0 }
 0x76c   : > { %v9245_v7 = vmax.f32 %v9173_v35, %v9177_v24  ;;  %v9178_v47 = vmax.f32 %v9050_v52, 0.0  ;;  %v17772_v4 = vadd.f32 %v8632_v58, %v22611_v13  ;;  %v16923_v21 = vpop.f32.mrb[122].mxu0  ;;  %16972 = vmatprep.mubr.bf16.mxu1 %v9673_v10  ;;  %v22614_v35 = vld [vmem:[#allocation111_spill] sm:$0xff]  ;;  %v22615_v10 = vld [vmem:[#allocation112_spill] sm:$0xff]  ;;  %v22616_v58 = vld [vmem:[#allocation113_spill] sm:$0xff] }
 0x76d   : > { %9311 = vst [vmem:[#allocation3 + $0x1d0] sm:$0xff] %v9247_v17  ;;  %v9248_v53 = vmax.f32 %v9176_v40, %v9180_v9  ;;  %v17773_v30 = vadd.f32 %v16923_v21, %v22612_v28  ;;  %v8635_v57 = vpop.f32.mrb[123].mxu0  ;;  %v8920_v36 = vmul.f32 %v21079_v49, %v17771_v37  ;;  %v22617_v21 = vld [vmem:[#allocation114_spill] sm:$0xff] }
 0x76e   : > { %9309 = vst [vmem:[#allocation3 + $0x1c0] sm:$0xff] %v9245_v7  ;;  %v9246_v51 = vmax.f32 %v9174_v39, %v9178_v47  ;;  %v17774_v55 = vadd.f32 %v8635_v57, %v22613_v38  ;;  %v8918_v32 = vmul.f32 %v21079_v49, %v17772_v4 }
 0x76f   : > { %9312 = vst [vmem:[#allocation3 + $0x1d8] sm:$0xff] %v9248_v53  ;;  %v8921_v46 = vmul.f32 %v21079_v49, %v17773_v30  ;;  %v9055_v9 = vadd.f32 %v21088_v44, %v8920_v36 }
 0x770   : > { %9310 = vst [vmem:[#allocation3 + $0x1c8] sm:$0xff] %v9246_v51  ;;  %v8919_v41 = vmul.f32 %v21079_v49, %v17774_v55  ;;  %v9053_v13 = vadd.f32 %v21088_v44, %v8918_v32 }
 0x771   : > { %v9056_v51 = vadd.f32 %v21088_v44, %v8921_v46 }
 0x772   : > { %v16926_v26 = vpop.f32.mrb[124].mxu0  ;;  %v9181_v46 = vmax.f32 %v9053_v13, 0.0  ;;  %v19126_v13 = vld [vmem:[%s22321_s1 + $0x2c8] sm:$0xff]  }
 0x773   : > { %v17775_v24 = vadd.f32 %v16926_v26, %v22614_v35  ;;  %v8648_v52 = vpop.f32.mrb[125].mxu0  ;;  %v9054_v26 = vadd.f32 %v21088_v44, %v8919_v41  ;;  %v9184_v41 = vmax.f32 %v9056_v51, 0.0  ;;  %v21379_v51 = vpack.c.bf16 %v20957_v5, %v20955_v1  ;;  %v19130_v1 = vld [vmem:[%s22321_s1 + $0x2e8] sm:$0xff]  }
 0x774   : > { %v17776_v40 = vadd.f32 %v8648_v52, %v22615_v10  ;;  %v16927_v17 = vpop.f32.mrb[126].mxu0  ;;  %v21395_v5 = vpack.c.bf16 %v21047_v25, %v21045_v27  ;;  %v19132_v27 = vld [vmem:[%s22321_s1 + $0x2f8] sm:$0xff]   ;;  %v21411_v25 = vpack.c.bf16 %v21149_v33, %v21147_v12  ;;  %v9585_v33 = vld [vmem:[#allocation2 + $0x1c0] sm:$0xff] }
 0x775   : > { %v8924_v16 = vmul.f32 %v21079_v49, %v17775_v24  ;;  %v17777_v39 = vadd.f32 %v16927_v17, %v22616_v58  ;;  %v8651_v37 = vpop.f32.mrb[127].mxu0  ;;  %v9183_v24 = vmax.f32 %v9055_v9, 0.0  ;;  %v9584_v12 = vld [vmem:[#allocation2 + $0x1b8] sm:$0xff] }
 0x776   : > { %v9375_v7 = vld [vmem:[#allocation3 + $0x1d0] ss:$2 sm:$0xff]  ;;  %v9439_v47 = vld [vmem:[#allocation3 + $0x1d1] ss:$2 sm:$0xff]  ;;  %v8922_v4 = vmul.f32 %v21079_v49, %v17776_v40  ;;  %v17778_v53 = vadd.f32 %v8651_v37, %v22617_v21  ;;  %v9594_v40 = vpack.c.bf16 %v21196_v29, %v21196_v29 }
 0x777   : > { %v9473_v28 = vmax.f32 %v9375_v7, %v9439_v47  ;;  %v9373_v30 = vld [vmem:[#allocation3 + $0x1c0] ss:$2 sm:$0xff]  ;;  %v9437_v57 = vld [vmem:[#allocation3 + $0x1c1] ss:$2 sm:$0xff]  ;;  %v9059_v38 = vadd.f32 %v21088_v44, %v8924_v16  ;;  %v8925_v55 = vmul.f32 %v21079_v49, %v17777_v39  ;;  %v9182_v7 = vmax.f32 %v9054_v26, 0.0  ;;  %v9587_v26 = vld [vmem:[#allocation2 + $0x1e8] sm:$0xff] }
 0x778   : > { %v9472_v36 = vmax.f32 %v9373_v30, %v9437_v57  ;;  %v9057_v35 = vadd.f32 %v21088_v44, %v8922_v4  ;;  %v8923_v32 = vmul.f32 %v21079_v49, %v17778_v53  ;;  %v21354_v4 = vpack.c.bf16 %v20881_v23, %v20879_v43  ;;  %v19128_v23 = vld [vmem:[%s22321_s1 + $0x2d8] sm:$0xff]  }
 0x779   : > { %9559 = vst [vmem:[#allocation2 + $0x261] sm:$0xff] %v9473_v28  ;;  %v9187_v52 = vmax.f32 %v9059_v38, 0.0  ;;  %v9060_v10 = vadd.f32 %v21088_v44, %v8925_v55  ;;  %v21370_v43 = vpack.c.bf16 %v20919_v11, %v20917_v31  ;;  %v19129_v31 = vld [vmem:[%s22321_s1 + $0x2e0] sm:$0xff]   ;;  %v21388_v11 = vpack.c.bf16 %v20998_v3, %v20996_v48  ;;  %v19131_v48 = vld [vmem:[%s22321_s1 + $0x2f0] sm:$0xff]   ;;  %v9583_v38 = vld [vmem:[#allocation2 + $0x198] sm:$0xff] }
 0x77a   : > { %9558 = vst [vmem:[#allocation2 + $0x259] sm:$0xff] %v9472_v36  ;;  %v9185_v17 = vmax.f32 %v9057_v35, 0.0  ;;  %v9058_v16 = vadd.f32 %v21088_v44, %v8923_v32  ;;  %v21342_v58 = vpack.c.bf16 %v9473_v28, %v9472_v36  ;;  %v21347_v44 = vpack.c.bf16 %v20846_v14, %v20841_v45  ;;  %v19127_v45 = vld [vmem:[%s22321_s1 + $0x2d0] sm:$0xff]   ;;  %v9586_v36 = vld [vmem:[#allocation2 + $0x1e0] sm:$0xff] }
 0x77b   : > { %v9251_v39 = vmax.f32 %v9183_v24, %v9187_v52  ;;  %v9188_v37 = vmax.f32 %v9060_v10, 0.0  ;;  %v21404_v3 = vpack.c.bf16 %v21105_v59, %v21103_v19  ;;  %v19133_v19 = vld [vmem:[%s22321_s1 + $0x300] sm:$0xff]   ;;  %v9582_v59 = vld [vmem:[#allocation2 + $0x190] sm:$0xff]  ;;  %v21422_v35 = vpack.c.bf16 %v9585_v33, %v9584_v12  ;;  %v9588_v24 = vld [vmem:[#allocation2 + $0x208] sm:$0xff] }
 0x77c   : > { %v9249_v49 = vmax.f32 %v9181_v46, %v9185_v17  ;;  %v9186_v47 = vmax.f32 %v9058_v16, 0.0  ;;  %16973 = vmatmul.mubr.bf16.gmra.mrb[156].mxu1 %v21342_v58  ;;  %v21418_v55 = vpack.c.bf16 %v9583_v38, %v9582_v59  ;;  %v21424_v32 = vpack.c.bf16 %v9587_v26, %v9586_v36  ;;  %v9589_v52 = vld [vmem:[#allocation2 + $0x210] sm:$0xff]  ;;  %v19141_v59 = vld [vmem:[%s22321_s1 + $0x340] sm:$0xff]  }
 0x77d   : > { %9315 = vst [vmem:[#allocation3 + $0x1f0] sm:$0xff] %v9251_v39  ;;  %v9252_v9 = vmax.f32 %v9184_v41, %v9188_v37  ;;  %16992 = vmatprep.mubr.bf16.mxu1 %v9594_v40  ;;  %v9590_v10 = vld [vmem:[#allocation2 + $0x230] sm:$0xff]  ;;  %v9591_v40 = vld [vmem:[#allocation2 + $0x238] sm:$0xff]  ;;  %v21428_v46 = vpack.c.bf16 %v9589_v52, %v9588_v24  ;;  %v10133_v26 = vld [vmem:[#allocation2 + $0x1c2] sm:$0xff] }
 0x77e   : > { %9313 = vst [vmem:[#allocation3 + $0x1e0] sm:$0xff] %v9249_v49  ;;  %v9250_v29 = vmax.f32 %v9182_v7, %v9186_v47  ;;  %v21430_v17 = vpack.c.bf16 %v9591_v40, %v9590_v10  ;;  %v10111_v16 = vld [vmem:[#allocation2 + $0xa] sm:$0xff]  ;;  %v10113_v49 = vld [vmem:[#allocation2 + $0x32] sm:$0xff]  ;;  %v10115_v47 = vld [vmem:[#allocation2 + $0x5a] sm:$0xff] }
 0x77f   : > { %9316 = vst [vmem:[#allocation3 + $0x1f8] sm:$0xff] %v9252_v9  ;;  %v10142_v37 = vpack.c.bf16 %v10111_v16, %v21242_v2  ;;  %v21439_v9 = vpack.c.bf16 %v10113_v49, %v20848_v15  ;;  %v19135_v2 = vld [vmem:[%s22321_s1 + $0x310] sm:$0xff]   ;;  %v10131_v12 = vld [vmem:[#allocation2 + $0x19a] sm:$0xff]  ;;  %v10134_v24 = vld [vmem:[#allocation2 + $0x1e2] sm:$0xff] }
 0x780   : > { %9314 = vst [vmem:[#allocation3 + $0x1e8] sm:$0xff] %v9250_v29  ;;  %v19134_v29 = vld [vmem:[%s22321_s1 + $0x308] sm:$0xff]   ;;  %v10130_v38 = vld [vmem:[#allocation2 + $0x192] sm:$0xff]  ;;  %v10132_v36 = vld [vmem:[#allocation2 + $0x1ba] sm:$0xff] }
 0x781   : > { %v9592_v41 = vld [vmem:[#allocation2 + $0x258] sm:$0xff]  ;;  %v9593_v39 = vld [vmem:[#allocation2 + $0x260] sm:$0xff]  ;;  %v10119_v15 = vld [vmem:[#allocation2 + $0xaa] sm:$0xff]  ;;  %v21501_v10 = vpack.c.bf16 %v10133_v26, %v10132_v36 }
 0x782   : > { %v21435_v7 = vpack.c.bf16 %v9593_v39, %v9592_v41  ;;  %v10135_v52 = vld [vmem:[#allocation2 + $0x1ea] sm:$0xff]  ;;  %v10137_v16 = vld [vmem:[#allocation2 + $0x212] sm:$0xff]  ;;  %v10139_v39 = vld [vmem:[#allocation2 + $0x23a] sm:$0xff] }
 0x783   : > { %v21503_v40 = vpack.c.bf16 %v10135_v52, %v10134_v24  ;;  %v10138_v41 = vld [vmem:[#allocation2 + $0x232] sm:$0xff]  ;;  %v22621_v36 = vld [vmem:[#allocation25_spill] sm:$0xff]  ;;  %v22622_v26 = vld [vmem:[#allocation24_spill] sm:$0xff] }
 0x784   : > { %16993 = vmatmul.mubr.bf16.vlgmr.msra.gmra.mrb[128].mxu1 %v21347_v44  ;;  %v21509_v49 = vpack.c.bf16 %v10139_v39, %v10138_v41  ;;  %v21585_v24 = vpack.c.bf16 %v22622_v26, %v22621_v36  ;;  %v19153_v52 = vld [vmem:[%s22321_s1 + $0x3a0] sm:$0xff]   ;;  %v19154_v39 = vld [vmem:[%s22321_s1 + $0x3a8] sm:$0xff]   ;;  %v10747_v36 = vld [vmem:[#allocation2 + $0x211] sm:$0xff] }
 0x785   : > { %16996 = vmatprep.mubr.bf16.mxu1 %v21354_v4  ;;  %17025 = vmatpush3.bf16.msra.mxu1 %v21139_v50 }
 0x786   : > { %v9379_v21 = vld [vmem:[#allocation3 + $0x1f0] ss:$2 sm:$0xff]  ;;  %v9443_v53 = vld [vmem:[#allocation3 + $0x1f1] ss:$2 sm:$0xff]  ;;  %17026 = vmatprep.subr.bf16.mxu1 %v19126_v13 }
 0x787   : > { %v21362_v14 = vmax.f32 %v9379_v21, %v9443_v53  ;;  %v9377_v28 = vld [vmem:[#allocation3 + $0x1e0] ss:$2 sm:$0xff]  ;;  %v9441_v30 = vld [vmem:[#allocation3 + $0x1e1] ss:$2 sm:$0xff]  ;;  %v10117_v21 = vld [vmem:[#allocation2 + $0x82] sm:$0xff] }
 0x788   : > { %v21364_v57 = vmax.f32 %v9377_v28, %v9441_v30  ;;  %v21453_v53 = vpack.c.bf16 %v10117_v21, %v20924_v6  ;;  %v19137_v28 = vld [vmem:[%s22321_s1 + $0x320] sm:$0xff]   ;;  %v10121_v6 = vld [vmem:[#allocation2 + $0xd2] sm:$0xff]  ;;  %v19142_v21 = vld [vmem:[%s22321_s1 + $0x348] sm:$0xff]  }
 0x789   : > { %9561 = vst [vmem:[#allocation2 + $0x289] sm:$0xff] %v21362_v14  ;;  %17027 = vmatpush3.bf16.msra.mxu1 %v19126_v13  ;;  %v21445_v13 = vpack.c.bf16 %v10115_v47, %v20886_v18  ;;  %v19136_v18 = vld [vmem:[%s22321_s1 + $0x318] sm:$0xff]  }
 0x78a   : > { %9560 = vst [vmem:[#allocation2 + $0x281] sm:$0xff] %v21364_v57  ;;  %17028 = vmatprep.subr.bf16.mxu1 %v19127_v45  ;;  %v10769_v50 = vpack.c.bf16 %v21362_v14, %v21364_v57  ;;  %v10123_v30 = vld [vmem:[#allocation2 + $0xfa] sm:$0xff] }
 0x78b   : > { %v10140_v47 = vld [vmem:[#allocation2 + $0x25a] sm:$0xff] }
 0x78c   : > { %16997 = vmatmul.mubr.bf16.gmra.mrb[132].mxu1 %v21370_v43  ;;  %v19160_v14 = vld [vmem:[%s22321_s1 + $0x3d8] sm:$0xff]   ;;  %v19161_v57 = vld [vmem:[%s22321_s1 + $0x3e0] sm:$0xff]  }
 0x78d   : > { %17000 = vmatprep.mubr.bf16.mxu1 %v21379_v51  ;;  %17029 = vmatpush3.bf16.msra.mxu1 %v19127_v45  ;;  %v21459_v45 = vpack.c.bf16 %v10119_v15, %v20962_v0  ;;  %v19138_v0 = vld [vmem:[%s22321_s1 + $0x328] sm:$0xff]   ;;  %v19143_v15 = vld [vmem:[%s22321_s1 + $0x350] sm:$0xff]  }
 0x78e   : > { %17030 = vmatprep.subr.bf16.mxu1 %v19128_v23 }
 0x791   : > { %17031 = vmatpush3.bf16.msra.mxu1 %v19128_v23  ;;  %v21467_v23 = vpack.c.bf16 %v10121_v6, %v21003_v42  ;;  %v10125_v42 = vld [vmem:[#allocation2 + $0x122] sm:$0xff]  ;;  %v19147_v6 = vld [vmem:[%s22321_s1 + $0x370] sm:$0xff]  }
 0x792   : > { %17032 = vmatprep.subr.bf16.mxu1 %v19129_v31 }
 0x794   : > { %17001 = vmatmul.mubr.bf16.gmra.mrb[136].mxu1 %v21388_v11 }
 0x795   : > { %17004 = vmatprep.mubr.bf16.mxu1 %v21395_v5  ;;  %17033 = vmatpush3.bf16.msra.mxu1 %v19129_v31  ;;  %v21473_v31 = vpack.c.bf16 %v10123_v30, %v21049_v20  ;;  %v19140_v20 = vld [vmem:[%s22321_s1 + $0x338] sm:$0xff]  }
 0x796   : > { %17034 = vmatprep.subr.bf16.mxu1 %v19130_v1  ;;  %v19148_v30 = vld [vmem:[%s22321_s1 + $0x378] sm:$0xff]  }
 0x799   : > { %17035 = vmatpush3.bf16.msra.mxu1 %v19130_v1  ;;  %v19139_v1 = vld [vmem:[%s22321_s1 + $0x330] sm:$0xff]  }
 0x79a   : > { %17036 = vmatprep.subr.bf16.mxu1 %v19131_v48 }
 0x79c   : > { %17005 = vmatmul.mubr.bf16.gmra.mrb[140].mxu1 %v21404_v3 }
 0x79d   : > { %17008 = vmatprep.mubr.bf16.mxu1 %v21411_v25  ;;  %17037 = vmatpush3.bf16.msra.mxu1 %v19131_v48  ;;  %v10127_v48 = vld [vmem:[#allocation2 + $0x14a] sm:$0xff] }
 0x79e   : > { %17038 = vmatprep.subr.bf16.mxu1 %v19132_v27 }
 0x7a1   : > { %17039 = vmatpush3.bf16.msra.mxu1 %v19132_v27  ;;  %v21481_v27 = vpack.c.bf16 %v10125_v42, %v21110_v8  ;;  %v10129_v8 = vld [vmem:[#allocation2 + $0x172] sm:$0xff]  ;;  %v10447_v42 = vld [vmem:[#allocation2 + $0x288] sm:$0xff] }
 0x7a2   : > { %17072 = vmatprep.subr.bf16.mxu1 %v19133_v19  ;;  %v21495_v33 = vpack.c.bf16 %v10129_v8, %v21188_v61  ;;  %v10136_v61 = vld [vmem:[#allocation2 + $0x20a] sm:$0xff] }
 0x7a3   : > { %v19150_v8 = vld [vmem:[%s22321_s1 + $0x388] sm:$0xff]  }
 0x7a4   : > { %17009 = vmatmul.mubr.bf16.gmra.mrb[144].mxu1 %v21186_v56 }
 0x7a5   : > { %17012 = vmatprep.mubr.bf16.mxu1 %v21418_v55 }
 0x7ac   : > { %17013 = vmatmul.mubr.bf16.gmra.mrb[148].mxu1 %v21422_v35 }
 0x7ad   : > { %17016 = vmatprep.mubr.bf16.mxu1 %v21424_v32 }
 0x7b4   : > { %17017 = vmatmul.mubr.bf16.gmra.mrb[152].mxu1 %v21428_v46 }
 0x7b5   : > { %17020 = vmatprep.mubr.bf16.mxu1 %v21430_v17 }
 0x7bc   : > { %17021 = vmatmul.mubr.bf16.gmra.mrb[156].mxu1 %v21435_v7 }
 0x7bd   : > { %17040 = vmatprep.mubr.bf16.mxu1 %v10142_v37  ;;  %v21507_v37 = vpack.c.bf16 %v10137_v16, %v10136_v61  ;;  %v22623_v61 = vld [vmem:[#allocation26_spill] sm:$0xff] }
 0x7be   : > { %v22624_v16 = vld [vmem:[#allocation14_spill] sm:$0xff] }
 0x7bf   : > { %v21594_v41 = vpack.c.bf16 %v22624_v16, %v22623_v61  ;;  %v10748_v61 = vld [vmem:[#allocation2 + $0x231] sm:$0xff]  ;;  %v10749_v16 = vld [vmem:[#allocation2 + $0x239] sm:$0xff] }
 0x7c4   : > { %17041 = vmatmul.mubr.bf16.vlgmr.msra.gmra.mrb[128].mxu1 %v21439_v9 }
 0x7c5   : > { %17044 = vmatprep.mubr.bf16.mxu1 %v21445_v13  ;;  %17073 = vmatpush3.bf16.msra.mxu1 %v19133_v19  ;;  %v21487_v19 = vpack.c.bf16 %v10127_v48, %v21154_v60  ;;  %v21497_v60 = vpack.c.bf16 %v10131_v12, %v10130_v38  ;;  %v22618_v38 = vld [vmem:[#allocation8_spill] sm:$0xff] }
 0x7c6   : > { %17074 = vmatprep.subr.bf16.mxu1 %v19134_v29  ;;  %v21569_v12 = vpack.c.bf16 %v22618_v38, %v20926_v62  ;;  %v19152_v62 = vld [vmem:[%s22321_s1 + $0x398] sm:$0xff]  }
 0x7c9   : > { %17075 = vmatpush3.bf16.msra.mxu1 %v19134_v29  ;;  %v10141_v29 = vld [vmem:[#allocation2 + $0x262] sm:$0xff] }
 0x7ca   : > { %17076 = vmatprep.subr.bf16.mxu1 %v19135_v2 }
 0x7cc   : > { %17045 = vmatmul.mubr.bf16.gmra.mrb[132].mxu1 %v21453_v53 }
 0x7cd   : > { %17048 = vmatprep.mubr.bf16.mxu1 %v21459_v45  ;;  %17077 = vmatpush3.bf16.msra.mxu1 %v19135_v2  ;;  %v21513_v2 = vpack.c.bf16 %v10141_v29, %v10140_v47  ;;  %v22625_v47 = vld [vmem:[#allocation16_spill] sm:$0xff]  ;;  %v22626_v29 = vld [vmem:[#allocation15_spill] sm:$0xff] }
 0x7ce   : > { %17078 = vmatprep.subr.bf16.mxu1 %v19136_v18 }
 0x7d1   : > { %17079 = vmatpush3.bf16.msra.mxu1 %v19136_v18  ;;  %v19145_v18 = vld [vmem:[%s22321_s1 + $0x360] sm:$0xff]  }
 0x7d2   : > { %17080 = vmatprep.subr.bf16.mxu1 %v19137_v28 }
 0x7d4   : > { %17049 = vmatmul.mubr.bf16.gmra.mrb[136].mxu1 %v21467_v23 }
 0x7d5   : > { %17052 = vmatprep.mubr.bf16.mxu1 %v21473_v31  ;;  %17081 = vmatpush3.bf16.msra.mxu1 %v19137_v28  ;;  %v19146_v28 = vld [vmem:[%s22321_s1 + $0x368] sm:$0xff]  }
 0x7d6   : > { %17082 = vmatprep.subr.bf16.mxu1 %v19138_v0 }
 0x7d9   : > { %17083 = vmatpush3.bf16.msra.mxu1 %v19138_v0  ;;  %v19149_v0 = vld [vmem:[%s22321_s1 + $0x380] sm:$0xff]  }
 0x7da   : > { %17084 = vmatprep.subr.bf16.mxu1 %v19139_v1 }
 0x7dc   : > { %17053 = vmatmul.mubr.bf16.gmra.mrb[140].mxu1 %v21481_v27 }
 0x7dd   : > { %17056 = vmatprep.mubr.bf16.mxu1 %v21487_v19  ;;  %17085 = vmatpush3.bf16.msra.mxu1 %v19139_v1  ;;  %v10446_v1 = vld [vmem:[#allocation2 + $0x280] sm:$0xff] }
 0x7de   : > { %17086 = vmatprep.subr.bf16.mxu1 %v19140_v20  ;;  %v21555_v48 = vpack.c.bf16 %v10447_v42, %v10446_v1  ;;  %v10740_v1 = vld [vmem:[#allocation2 + $0x191] sm:$0xff]  ;;  %v10741_v42 = vld [vmem:[#allocation2 + $0x199] sm:$0xff] }
 0x7df   : > { %v21620_v38 = vpack.c.bf16 %v10741_v42, %v10740_v1  ;;  %v22633_v1 = vld [vmem:[#allocation13_spill] sm:$0xff] }
 0x7e1   : > { %17087 = vmatpush3.bf16.msra.mxu1 %v19140_v20  ;;  %v10754_v20 = vpack.c.bf16 %v20843_v63, %v20850_v22  ;;  %v19151_v63 = vld [vmem:[%s22321_s1 + $0x390] sm:$0xff]  }
 0x7e2   : > { %17120 = vmatprep.subr.bf16.mxu1 %v19141_v59  ;;  %v22619_v22 = vld [vmem:[#allocation11_spill] sm:$0xff] }
 0x7e4   : > { %17057 = vmatmul.mubr.bf16.gmra.mrb[144].mxu1 %v21495_v33 }
 0x7e5   : > { %17060 = vmatprep.mubr.bf16.mxu1 %v21497_v60 }
 0x7ec   : > { %17061 = vmatmul.mubr.bf16.gmra.mrb[148].mxu1 %v21501_v10 }
 0x7ed   : > { %17064 = vmatprep.mubr.bf16.mxu1 %v21503_v40 }
 0x7f4   : > { %17065 = vmatmul.mubr.bf16.gmra.mrb[152].mxu1 %v21507_v37 }
 0x7f5   : > { %17068 = vmatprep.mubr.bf16.mxu1 %v21509_v49 }
 0x7fc   : > { %17069 = vmatmul.mubr.bf16.gmra.mrb[156].mxu1 %v21513_v2 }
 0x7fd   : > { %17088 = vmatprep.mubr.bf16.mxu1 %v21347_v44  ;;  %v19144_v44 = vld [vmem:[%s22321_s1 + $0x358] sm:$0xff]  }
 0x804   : > { %17089 = vmatmul.mubr.bf16.vlgmr.msra.gmra.mrb[128].mxu1 %v21354_v4 }
 0x805   : > { %17092 = vmatprep.mubr.bf16.mxu1 %v21370_v43  ;;  %17121 = vmatpush3.bf16.msra.mxu1 %v19141_v59  ;;  %v21562_v59 = vpack.c.bf16 %v20883_v34, %v20888_v54  ;;  %v22620_v34 = vld [vmem:[#allocation10_spill] sm:$0xff] }
 0x806   : > { %17122 = vmatprep.subr.bf16.mxu1 %v19142_v21  ;;  %v21578_v54 = vpack.c.bf16 %v22620_v34, %v22619_v22  ;;  %v10744_v22 = vld [vmem:[#allocation2 + $0x1e1] sm:$0xff]  ;;  %v10745_v34 = vld [vmem:[#allocation2 + $0x1e9] sm:$0xff] }
 0x807   : > { %v21626_v26 = vpack.c.bf16 %v10745_v34, %v10744_v22  ;;  %v22635_v22 = vld [vmem:[#allocation28_spill] sm:$0xff] }
 0x809   : > { %17123 = vmatpush3.bf16.msra.mxu1 %v19142_v21  ;;  %v21601_v21 = vpack.c.bf16 %v22626_v29, %v22625_v47  ;;  %v19158_v47 = vld [vmem:[%s22321_s1 + $0x3c8] sm:$0xff]  }
 0x80a   : > { %17124 = vmatprep.subr.bf16.mxu1 %v19143_v15 }
 0x80c   : > { %17093 = vmatmul.mubr.bf16.gmra.mrb[132].mxu1 %v21379_v51 }
 0x80d   : > { %17096 = vmatprep.mubr.bf16.mxu1 %v21388_v11  ;;  %17125 = vmatpush3.bf16.msra.mxu1 %v19143_v15  ;;  %v19155_v15 = vld [vmem:[%s22321_s1 + $0x3b0] sm:$0xff]  }
 0x80e   : > { %17126 = vmatprep.subr.bf16.mxu1 %v19144_v44 }
 0x811   : > { %17127 = vmatpush3.bf16.msra.mxu1 %v19144_v44  ;;  %v22627_v44 = vld [vmem:[#allocation17_spill] sm:$0xff] }
 0x812   : > { %17128 = vmatprep.subr.bf16.mxu1 %v19145_v18 }
 0x814   : > { %17097 = vmatmul.mubr.bf16.gmra.mrb[136].mxu1 %v21395_v5 }
 0x815   : > { %17100 = vmatprep.mubr.bf16.mxu1 %v21404_v3  ;;  %17129 = vmatpush3.bf16.msra.mxu1 %v19145_v18  ;;  %v22628_v18 = vld [vmem:[#allocation29_spill] sm:$0xff] }
 0x816   : > { %17130 = vmatprep.subr.bf16.mxu1 %v19146_v28 }
 0x819   : > { %17131 = vmatpush3.bf16.msra.mxu1 %v19146_v28  ;;  %v21610_v28 = vpack.c.bf16 %v22628_v18, %v22627_v44  ;;  %v22631_v44 = vld [vmem:[#allocation9_spill] sm:$0xff] }
 0x81a   : > { %17132 = vmatprep.subr.bf16.mxu1 %v19147_v6 }
 0x81c   : > { %17101 = vmatmul.mubr.bf16.gmra.mrb[140].mxu1 %v21411_v25 }
 0x81d   : > { %17104 = vmatprep.mubr.bf16.mxu1 %v21186_v56  ;;  %17133 = vmatpush3.bf16.msra.mxu1 %v19147_v6  ;;  %v19156_v6 = vld [vmem:[%s22321_s1 + $0x3b8] sm:$0xff]  }
 0x81e   : > { %17134 = vmatprep.subr.bf16.mxu1 %v19148_v30 }
 0x821   : > { %17135 = vmatpush3.bf16.msra.mxu1 %v19148_v30  ;;  %v22629_v30 = vld [vmem:[#allocation31_spill] sm:$0xff] }
 0x822   : > { %17168 = vmatprep.subr.bf16.mxu1 %v19149_v0 }
 0x824   : > { %17105 = vmatmul.mubr.bf16.gmra.mrb[144].mxu1 %v21418_v55 }
 0x825   : > { %17108 = vmatprep.mubr.bf16.mxu1 %v21422_v35 }
 0x82c   : > { %17109 = vmatmul.mubr.bf16.gmra.mrb[148].mxu1 %v21424_v32 }
 0x82d   : > { %17112 = vmatprep.mubr.bf16.mxu1 %v21428_v46 }
 0x834   : > { %17113 = vmatmul.mubr.bf16.gmra.mrb[152].mxu1 %v21430_v17 }
 0x835   : > { %17116 = vmatprep.mubr.bf16.mxu1 %v21435_v7 }
 0x83c   : > { %17117 = vmatmul.mubr.bf16.gmra.mrb[156].mxu1 %v21555_v48 }
 0x83d   : > { %17136 = vmatprep.mubr.bf16.mxu1 %v10754_v20  ;;  %v10742_v20 = vld [vmem:[#allocation2 + $0x1b9] sm:$0xff] }
 0x844   : > { %17137 = vmatmul.mubr.bf16.vlgmr.msra.gmra.mrb[128].mxu1 %v21562_v59 }
 0x845   : > { %17140 = vmatprep.mubr.bf16.mxu1 %v21569_v12  ;;  %17169 = vmatpush3.bf16.msra.mxu1 %v19149_v0  ;;  %v19157_v0 = vld [vmem:[%s22321_s1 + $0x3c0] sm:$0xff]  }
 0x846   : > { %17170 = vmatprep.subr.bf16.mxu1 %v19150_v8 }
 0x849   : > { %17171 = vmatpush3.bf16.msra.mxu1 %v19150_v8  ;;  %v10743_v8 = vld [vmem:[#allocation2 + $0x1c1] sm:$0xff] }
 0x84a   : > { %17172 = vmatprep.subr.bf16.mxu1 %v19151_v63 }
 0x84c   : > { %17141 = vmatmul.mubr.bf16.gmra.mrb[132].mxu1 %v21578_v54 }
 0x84d   : > { %17144 = vmatprep.mubr.bf16.mxu1 %v21585_v24  ;;  %17173 = vmatpush3.bf16.msra.mxu1 %v19151_v63  ;;  %v21622_v63 = vpack.c.bf16 %v10743_v8, %v10742_v20  ;;  %v22634_v20 = vld [vmem:[#allocation27_spill] sm:$0xff] }
 0x84e   : > { %17174 = vmatprep.subr.bf16.mxu1 %v19152_v62 }
 0x851   : > { %17175 = vmatpush3.bf16.msra.mxu1 %v19152_v62  ;;  %v10746_v62 = vld [vmem:[#allocation2 + $0x209] sm:$0xff] }
 0x852   : > { %17176 = vmatprep.subr.bf16.mxu1 %v19153_v52 }
 0x854   : > { %17145 = vmatmul.mubr.bf16.gmra.mrb[136].mxu1 %v21594_v41 }
 0x855   : > { %17148 = vmatprep.mubr.bf16.mxu1 %v21601_v21  ;;  %17177 = vmatpush3.bf16.msra.mxu1 %v19153_v52  ;;  %v21628_v52 = vpack.c.bf16 %v10747_v36, %v10746_v62  ;;  %v22636_v62 = vld [vmem:[#allocation18_spill] sm:$0xff] }
 0x856   : > { %17178 = vmatprep.subr.bf16.mxu1 %v19154_v39 }
 0x859   : > { %17179 = vmatpush3.bf16.msra.mxu1 %v19154_v39  ;;  %v21632_v39 = vpack.c.bf16 %v10749_v16, %v10748_v61  ;;  %v11963_v61 = vld [vmem:[#allocation2 + $0x19a] sm:$0xff]  ;;  %v22637_v16 = vld [vmem:[#allocation30_spill] sm:$0xff] }
 0x85a   : > { %17180 = vmatprep.subr.bf16.mxu1 %v19155_v15 }
 0x85c   : > { %17149 = vmatmul.mubr.bf16.gmra.mrb[140].mxu1 %v21610_v28 }
 0x85d   : > { %17152 = vmatprep.mubr.bf16.mxu1 %v22629_v30  ;;  %17181 = vmatpush3.bf16.msra.mxu1 %v19155_v15  ;;  %v11951_v15 = vld [vmem:[#allocation2 + $0xaa] sm:$0xff] }
 0x85e   : > { %17182 = vmatprep.subr.bf16.mxu1 %v19156_v6 }
 0x861   : > { %17183 = vmatpush3.bf16.msra.mxu1 %v19156_v6 }
 0x862   : > { %17216 = vmatprep.subr.bf16.mxu1 %v19157_v0 }
 0x864   : > { %17153 = vmatmul.mubr.bf16.gmra.mrb[144].mxu1 %v21620_v38 }
 0x865   : > { %17156 = vmatprep.mubr.bf16.mxu1 %v21622_v63 }
 0x86c   : > { %17157 = vmatmul.mubr.bf16.gmra.mrb[148].mxu1 %v21626_v26 }
 0x86d   : > { %17160 = vmatprep.mubr.bf16.mxu1 %v21628_v52 }
 0x874   : > { %17161 = vmatmul.mubr.bf16.gmra.mrb[152].mxu1 %v21632_v39 }
 0x875   : > { %17164 = vmatprep.mubr.bf16.mxu1 %v21342_v58  ;;  %v19159_v58 = vld [vmem:[%s22321_s1 + $0x3d0] sm:$0xff]  }
 0x87c   : > { %17165 = vmatmul.mubr.bf16.gmra.mrb[156].mxu1 %v10769_v50  ;;  %v19162_v50 = vld [vmem:[%s22321_s1 + $0x3e8] sm:$0xff]  }
 0x87d   : > { %17184 = vmatprep.mubr.bf16.mxu1 %v21439_v9  ;;  %v19163_v9 = vld [vmem:[%s22321_s1 + $0x3f0] sm:$0xff]  }
 0x884   : > { %17185 = vmatmul.mubr.bf16.vlgmr.msra.gmra.mrb[128].mxu1 %v21445_v13  ;;  %v19164_v13 = vld [vmem:[%s22321_s1 + $0x3f8] sm:$0xff]  }
 0x885   : > { %17188 = vmatprep.mubr.bf16.mxu1 %v21453_v53  ;;  %17217 = vmatpush3.bf16.msra.mxu1 %v19157_v0  ;;  %v19165_v53 = vld [vmem:[%s22321_s1 + $0x400] sm:$0xff]  }
 0x886   : > { %17218 = vmatprep.subr.bf16.mxu1 %v19158_v47  ;;  %v11955_v0 = vld [vmem:[#allocation2 + $0xfa] sm:$0xff] }
 0x887   : > { %v11982_v8 = vpack.c.bf16 %v11955_v0, %v22634_v20 }
 0x889   : > { %17219 = vmatpush3.bf16.msra.mxu1 %v19158_v47 }
 0x88a   : > { %17220 = vmatprep.subr.bf16.mxu1 %v19159_v58 }
 0x88c   : > { %17189 = vmatmul.mubr.bf16.gmra.mrb[132].mxu1 %v21459_v45  ;;  %v11058_v45 = vld [vmem:[#allocation2 + $0x282] sm:$0xff] }
 0x88d   : > { %17192 = vmatprep.mubr.bf16.mxu1 %v21467_v23  ;;  %17221 = vmatpush3.bf16.msra.mxu1 %v19159_v58  ;;  %v11059_v23 = vld [vmem:[#allocation2 + $0x28a] sm:$0xff]  ;;  %v11964_v58 = vld [vmem:[#allocation2 + $0x1ba] sm:$0xff] }
 0x88e   : > { %17222 = vmatprep.subr.bf16.mxu1 %v19160_v14 }
 0x891   : > { %17223 = vmatpush3.bf16.msra.mxu1 %v19160_v14  ;;  %v11965_v14 = vld [vmem:[#allocation2 + $0x1c2] sm:$0xff] }
 0x892   : > { %17224 = vmatprep.subr.bf16.mxu1 %v19161_v57 }
 0x894   : > { %17193 = vmatmul.mubr.bf16.gmra.mrb[136].mxu1 %v21473_v31  ;;  %v21678_v31 = vpack.c.bf16 %v11059_v23, %v11058_v45  ;;  %v11969_v45 = vld [vmem:[#allocation2 + $0x212] sm:$0xff] }
 0x895   : > { %17196 = vmatprep.mubr.bf16.mxu1 %v21481_v27  ;;  %17225 = vmatpush3.bf16.msra.mxu1 %v19161_v57  ;;  %v19166_v27 = vld [vmem:[%s22321_s1 + $0x408] sm:$0xff]   ;;  %v11970_v23 = vld [vmem:[#allocation2 + $0x232] sm:$0xff] }
 0x896   : > { %17226 = vmatprep.subr.bf16.mxu1 %v19162_v50  ;;  %v11966_v57 = vld [vmem:[#allocation2 + $0x1e2] sm:$0xff] }
 0x899   : > { %17227 = vmatpush3.bf16.msra.mxu1 %v19162_v50  ;;  %v11967_v50 = vld [vmem:[#allocation2 + $0x1ea] sm:$0xff] }
 0x89a   : > { %17228 = vmatprep.subr.bf16.mxu1 %v19163_v9 }
 0x89c   : > { %17197 = vmatmul.mubr.bf16.gmra.mrb[140].mxu1 %v21487_v19  ;;  %v19167_v19 = vld [vmem:[%s22321_s1 + $0x410] sm:$0xff]  }
 0x89d   : > { %17200 = vmatprep.mubr.bf16.mxu1 %v21495_v33  ;;  %17229 = vmatpush3.bf16.msra.mxu1 %v19163_v9  ;;  %v19180_v33 = vld [vmem:[%s22321_s1 + $0x478] sm:$0xff]   ;;  %v11987_v9 = vpack.c.bf16 %v11965_v14, %v11964_v58 }
 0x89e   : > { %17230 = vmatprep.subr.bf16.mxu1 %v19164_v13 }
 0x8a1   : > { %17231 = vmatpush3.bf16.msra.mxu1 %v19164_v13  ;;  %v11988_v13 = vpack.c.bf16 %v11967_v50, %v11966_v57 }
 0x8a2   : > { %17264 = vmatprep.subr.bf16.mxu1 %v19165_v53 }
 0x8a4   : > { %17201 = vmatmul.mubr.bf16.gmra.mrb[144].mxu1 %v21497_v60  ;;  %v19181_v60 = vld [vmem:[%s22321_s1 + $0x4c0] sm:$0xff]  }
 0x8a5   : > { %17204 = vmatprep.mubr.bf16.mxu1 %v21501_v10  ;;  %v11666_v10 = vld [vmem:[#allocation2 + $0x259] sm:$0xff] }
 0x8ac   : > { %17205 = vmatmul.mubr.bf16.gmra.mrb[148].mxu1 %v21503_v40  ;;  %v11667_v40 = vld [vmem:[#allocation2 + $0x261] sm:$0xff] }
 0x8ad   : > { %17208 = vmatprep.mubr.bf16.mxu1 %v21507_v37  ;;  %v11668_v37 = vld [vmem:[#allocation2 + $0x281] sm:$0xff] }
 0x8b4   : > { %17209 = vmatmul.mubr.bf16.gmra.mrb[152].mxu1 %v21509_v49  ;;  %v11669_v49 = vld [vmem:[#allocation2 + $0x289] sm:$0xff] }
 0x8b5   : > { %17212 = vmatprep.mubr.bf16.mxu1 %v21513_v2  ;;  %v11685_v2 = vpack.c.bf16 %v11667_v40, %v11666_v10  ;;  %v21805_v40 = vld [vmem:[%s22323_s3 + $0x1] ss:$0 sm:$0xff] }
 0x8bc   : > { %17213 = vmatmul.mubr.bf16.gmra.mrb[156].mxu1 %v21678_v31 }
 0x8bd   : > { %17232 = vmatprep.mubr.bf16.mxu1 %v21354_v4  ;;  %v19168_v4 = vld [vmem:[%s22321_s1 + $0x418] sm:$0xff]  }
 0x8c4   : > { %17233 = vmatmul.mubr.bf16.vlgmr.msra.gmra.mrb[128].mxu1 %v21370_v43  ;;  %v19169_v43 = vld [vmem:[%s22321_s1 + $0x420] sm:$0xff]  }
 0x8c5   : > { %17236 = vmatprep.mubr.bf16.mxu1 %v21379_v51  ;;  %17265 = vmatpush3.bf16.msra.mxu1 %v19165_v53  ;;  %v19170_v51 = vld [vmem:[%s22321_s1 + $0x428] sm:$0xff]  }
 0x8c6   : > { %17266 = vmatprep.subr.bf16.mxu1 %v19166_v27  ;;  %v11968_v53 = vld [vmem:[#allocation2 + $0x20a] sm:$0xff] }
 0x8c9   : > { %17267 = vmatpush3.bf16.msra.mxu1 %v19166_v27  ;;  %v11971_v27 = vld [vmem:[#allocation2 + $0x23a] sm:$0xff] }
 0x8ca   : > { %17268 = vmatprep.subr.bf16.mxu1 %v19167_v19 }
 0x8cc   : > { %17237 = vmatmul.mubr.bf16.gmra.mrb[132].mxu1 %v21388_v11  ;;  %v19171_v11 = vld [vmem:[%s22321_s1 + $0x430] sm:$0xff]  }
 0x8cd   : > { %17240 = vmatprep.mubr.bf16.mxu1 %v21395_v5  ;;  %17269 = vmatpush3.bf16.msra.mxu1 %v19167_v19  ;;  %v19172_v5 = vld [vmem:[%s22321_s1 + $0x438] sm:$0xff]   ;;  %v11989_v19 = vpack.c.bf16 %v11969_v45, %v11968_v53 }
 0x8ce   : > { %17270 = vmatprep.subr.bf16.mxu1 %v19168_v4 }
 0x8d1   : > { %17271 = vmatpush3.bf16.msra.mxu1 %v19168_v4  ;;  %v11990_v4 = vpack.c.bf16 %v11971_v27, %v11970_v23 }
 0x8d2   : > { %17272 = vmatprep.subr.bf16.mxu1 %v19169_v43 }
 0x8d4   : > { %17241 = vmatmul.mubr.bf16.gmra.mrb[136].mxu1 %v21404_v3  ;;  %v19173_v3 = vld [vmem:[%s22321_s1 + $0x440] sm:$0xff]  }
 0x8d5   : > { %17244 = vmatprep.mubr.bf16.mxu1 %v21411_v25  ;;  %17273 = vmatpush3.bf16.msra.mxu1 %v19169_v43  ;;  %v11972_v43 = vld [vmem:[#allocation2 + $0x25a] sm:$0xff] }
 0x8d6   : > { %17274 = vmatprep.subr.bf16.mxu1 %v19170_v51 }
 0x8d9   : > { %17275 = vmatpush3.bf16.msra.mxu1 %v19170_v51  ;;  %v11973_v51 = vld [vmem:[#allocation2 + $0x262] sm:$0xff] }
 0x8da   : > { %17276 = vmatprep.subr.bf16.mxu1 %v19171_v11 }
 0x8dc   : > { %17245 = vmatmul.mubr.bf16.gmra.mrb[140].mxu1 %v21186_v56  ;;  %v21720_v56 = vld [vmem:[#allocation2 + $0x18] sm:$0xff] }
 0x8dd   : > { %17248 = vmatprep.mubr.bf16.mxu1 %v21418_v55  ;;  %17277 = vmatpush3.bf16.msra.mxu1 %v19171_v11  ;;  %v11381_v25 = vpack.c.bf16 %v21720_v56, %v21720_v56  ;;  %v19174_v55 = vld [vmem:[%s22321_s1 + $0x448] sm:$0xff]   ;;  %v11991_v11 = vpack.c.bf16 %v11973_v51, %v11972_v43 }
 0x8de   : > { %17278 = vmatprep.subr.bf16.mxu1 %v19172_v5 }
 0x8e1   : > { %17279 = vmatpush3.bf16.msra.mxu1 %v19172_v5  ;;  %v11976_v5 = vld [vmem:[#allocation2 + $0x2aa] sm:$0xff] }
 0x8e2   : > { %17312 = vmatprep.subr.bf16.mxu1 %v19173_v3 }
 0x8e4   : > { %17249 = vmatmul.mubr.bf16.gmra.mrb[144].mxu1 %v21422_v35  ;;  %v19175_v35 = vld [vmem:[%s22321_s1 + $0x450] sm:$0xff]  }
 0x8e5   : > { %17252 = vmatprep.mubr.bf16.mxu1 %v21424_v32  ;;  %v19176_v32 = vld [vmem:[%s22321_s1 + $0x458] sm:$0xff]  }
 0x8ec   : > { %17253 = vmatmul.mubr.bf16.gmra.mrb[148].mxu1 %v21428_v46  ;;  %v19177_v46 = vld [vmem:[%s22321_s1 + $0x460] sm:$0xff]  }
 0x8ed   : > { %17256 = vmatprep.mubr.bf16.mxu1 %v21430_v17  ;;  %v19178_v17 = vld [vmem:[%s22321_s1 + $0x468] sm:$0xff]  }
 0x8f4   : > { %17257 = vmatmul.mubr.bf16.gmra.mrb[152].mxu1 %v21435_v7  ;;  %v19179_v7 = vld [vmem:[%s22321_s1 + $0x470] sm:$0xff]  }
 0x8f5   : > { %17260 = vmatprep.mubr.bf16.mxu1 %v21555_v48  ;;  %v11686_v48 = vpack.c.bf16 %v11669_v49, %v11668_v37 }
 0x8fc   : > { %17261 = vmatmul.mubr.bf16.gmra.mrb[156].mxu1 %v11381_v25 }
 0x8fd   : > { %17280 = vmatprep.mubr.bf16.mxu1 %v21562_v59  ;;  %v11670_v59 = vld [vmem:[#allocation2 + $0x2a9] sm:$0xff] }
 0x904   : > { %17281 = vmatmul.mubr.bf16.vlgmr.msra.gmra.mrb[128].mxu1 %v21569_v12  ;;  %v11671_v12 = vld [vmem:[#allocation2 + $0x2b1] sm:$0xff] }
 0x905   : > { %17284 = vmatprep.mubr.bf16.mxu1 %v21578_v54  ;;  %17313 = vmatpush3.bf16.msra.mxu1 %v19173_v3  ;;  %v11687_v54 = vpack.c.bf16 %v11671_v12, %v11670_v59  ;;  %v11977_v3 = vld [vmem:[#allocation2 + $0x2b2] sm:$0xff] }
 0x906   : > { %17314 = vmatprep.subr.bf16.mxu1 %v19174_v55  ;;  %v11993_v25 = vpack.c.bf16 %v11977_v3, %v11976_v5 }
 0x909   : > { %17315 = vmatpush3.bf16.msra.mxu1 %v19174_v55  ;;  %v19182_v55 = vld [vmem:[%s22321_s1 + $0x4c8] sm:$0xff]  }
 0x90a   : > { %17316 = vmatprep.subr.bf16.mxu1 %v19175_v35 }
 0x90c   : > { %17285 = vmatmul.mubr.bf16.gmra.mrb[132].mxu1 %v21585_v24  ;;  %v11947_v24 = vld [vmem:[#allocation2 + $0x5a] sm:$0xff] }
 0x90d   : > { %17288 = vmatprep.mubr.bf16.mxu1 %v21594_v41  ;;  %17317 = vmatpush3.bf16.msra.mxu1 %v19175_v35  ;;  %v22630_v41 = vld [vmem:[#allocation7_spill] sm:$0xff] }
 0x90e   : > { %17318 = vmatprep.subr.bf16.mxu1 %v19176_v32  ;;  %v11978_v29 = vpack.c.bf16 %v11947_v24, %v22630_v41  ;;  %v19183_v35 = vld [vmem:[%s22321_s1 + $0x4d0] sm:$0xff]  }
 0x911   : > { %17319 = vmatpush3.bf16.msra.mxu1 %v19176_v32  ;;  %v19185_v32 = vld [vmem:[%s22321_s1 + $0x4e0] sm:$0xff]  }
 0x912   : > { %17320 = vmatprep.subr.bf16.mxu1 %v19177_v46 }
 0x914   : > { %17289 = vmatmul.mubr.bf16.gmra.mrb[136].mxu1 %v21601_v21  ;;  %v11949_v21 = vld [vmem:[#allocation2 + $0x82] sm:$0xff] }
 0x915   : > { %17292 = vmatprep.mubr.bf16.mxu1 %v21610_v28  ;;  %17321 = vmatpush3.bf16.msra.mxu1 %v19177_v46  ;;  %v11979_v18 = vpack.c.bf16 %v11949_v21, %v22631_v44  ;;  %v22632_v28 = vld [vmem:[#allocation12_spill] sm:$0xff]  ;;  %v19186_v46 = vld [vmem:[%s22321_s1 + $0x4e8] sm:$0xff]  }
 0x916   : > { %17322 = vmatprep.subr.bf16.mxu1 %v19178_v17  ;;  %v11980_v6 = vpack.c.bf16 %v11951_v15, %v22632_v28 }
 0x919   : > { %17323 = vmatpush3.bf16.msra.mxu1 %v19178_v17  ;;  %v19187_v17 = vld [vmem:[%s22321_s1 + $0x4f0] sm:$0xff]  }
 0x91a   : > { %17324 = vmatprep.subr.bf16.mxu1 %v19179_v7 }
 0x91c   : > { %17293 = vmatmul.mubr.bf16.gmra.mrb[140].mxu1 %v22629_v30  ;;  %v11953_v30 = vld [vmem:[#allocation2 + $0xd2] sm:$0xff] }
 0x91d   : > { %17296 = vmatprep.mubr.bf16.mxu1 %v21620_v38  ;;  %17325 = vmatpush3.bf16.msra.mxu1 %v19179_v7  ;;  %v11981_v42 = vpack.c.bf16 %v11953_v30, %v22633_v1  ;;  %v11957_v38 = vld [vmem:[#allocation2 + $0x122] sm:$0xff]  ;;  %v19188_v7 = vld [vmem:[%s22321_s1 + $0x4f8] sm:$0xff]  }
 0x91e   : > { %17326 = vmatprep.subr.bf16.mxu1 %v19180_v33  ;;  %v11983_v34 = vpack.c.bf16 %v11957_v38, %v22635_v22 }
 0x921   : > { %17327 = vmatpush3.bf16.msra.mxu1 %v19180_v33  ;;  %v21794_v33 = vld [vmem:[%s22321_s1 + $0x480] sm:$0xff]  }
 0x922   : > { %17360 = vmatprep.subr.bf16.mxu1 %v19181_v60 }
 0x924   : > { %17297 = vmatmul.mubr.bf16.gmra.mrb[144].mxu1 %v21622_v63  ;;  %v11959_v63 = vld [vmem:[#allocation2 + $0x14a] sm:$0xff] }
 0x925   : > { %17300 = vmatprep.mubr.bf16.mxu1 %v21626_v26  ;;  %v11984_v36 = vpack.c.bf16 %v11959_v63, %v22636_v62  ;;  %v11961_v26 = vld [vmem:[#allocation2 + $0x172] sm:$0xff] }
 0x92c   : > { %17301 = vmatmul.mubr.bf16.gmra.mrb[148].mxu1 %v21628_v52  ;;  %v11962_v52 = vld [vmem:[#allocation2 + $0x192] sm:$0xff] }
 0x92d   : > { %17304 = vmatprep.mubr.bf16.mxu1 %v21632_v39  ;;  %v11985_v39 = vpack.c.bf16 %v11961_v26, %v22637_v16  ;;  %v11986_v47 = vpack.c.bf16 %v11963_v61, %v11962_v52 }
 0x934   : > { %17305 = vmatmul.mubr.bf16.gmra.mrb[152].mxu1 %v11685_v2 }
 0x935   : > { %17308 = vmatprep.mubr.bf16.mxu1 %v11686_v48 }
 0x93c   : > { %17309 = vmatmul.mubr.bf16.gmra.mrb[156].mxu1 %v11687_v54 }
 0x93d   : > { %17328 = vmatprep.mubr.bf16.mxu1 %v11978_v29 }
 0x944   : > { %17329 = vmatmul.mubr.bf16.vlgmr.msra.gmra.mrb[128].mxu1 %v11979_v18 }
 0x945   : > { %17332 = vmatprep.mubr.bf16.mxu1 %v11980_v6  ;;  %17361 = vmatpush3.bf16.msra.mxu1 %v19181_v60  ;;  %v21800_v60 = vld [vmem:[%s22322_s2 + $0x1] ss:$0 sm:$0xff] }
 0x946   : > { %17362 = vmatprep.subr.bf16.mxu1 %v19182_v55 }
 0x949   : > { %17363 = vmatpush3.bf16.msra.mxu1 %v19182_v55 }
 0x94a   : > { %17364 = vmatprep.subr.bf16.mxu1 %v19183_v35 }
 0x94c   : > { %17333 = vmatmul.mubr.bf16.gmra.mrb[132].mxu1 %v11981_v42 }
 0x94d   : > { %17336 = vmatprep.mubr.bf16.mxu1 %v11982_v8  ;;  %17365 = vmatpush3.bf16.msra.mxu1 %v19183_v35 }
 0x954   : > { %17337 = vmatmul.mubr.bf16.gmra.mrb[136].mxu1 %v11983_v34 }
 0x955   : > { %17340 = vmatprep.mubr.bf16.mxu1 %v11984_v36 }
 0x95c   : > { %17341 = vmatmul.mubr.bf16.gmra.mrb[140].mxu1 %v11985_v39 }
 0x95d   : > { %17344 = vmatprep.mubr.bf16.mxu1 %v11986_v47 }
 0x964   : > { %17345 = vmatmul.mubr.bf16.gmra.mrb[144].mxu1 %v11987_v9 }
 0x965   : > { %17348 = vmatprep.mubr.bf16.mxu1 %v11988_v13 }
 0x96c   : > { %17349 = vmatmul.mubr.bf16.gmra.mrb[148].mxu1 %v11989_v19 }
 0x96d   : > { %17352 = vmatprep.mubr.bf16.mxu1 %v11990_v4  ;;  %v12477_v4 = vld [vmem:[#allocation2 + $0x1] sm:$0xff] }
 0x974   : > { %17353 = vmatmul.mubr.bf16.gmra.mrb[152].mxu1 %v11991_v11 }
 0x975   : > { %17356 = vmatprep.mubr.bf16.mxu1 %v21678_v31  ;;  %v19184_v31 = vld [vmem:[%s22321_s1 + $0x4d8] sm:$0xff]  }
 0x976   : > { %17366 = vmatprep.subr.bf16.mxu1 %v19184_v31 }
 0x977   : > { %17367 = vmatpush3.bf16.msra.mxu1 %v19184_v31 }
 0x978   : > { %17368 = vmatprep.subr.bf16.mxu1 %v19185_v32 }
 0x97b   : > { %17369 = vmatpush3.bf16.msra.mxu1 %v19185_v32 }
 0x97c   : > { %17357 = vmatmul.mubr.bf16.gmra.mrb[156].mxu1 %v11993_v25  ;;  %17370 = vmatprep.subr.bf16.mxu1 %v19186_v46 }
 0x97f   : > { %17371 = vmatpush3.bf16.msra.mxu1 %v19186_v46 }
 0x980   : > { %17372 = vmatprep.subr.bf16.mxu1 %v19187_v17 }
 0x983   : > { %17373 = vmatpush3.bf16.msra.mxu1 %v19187_v17 }
 0x984   : > { %17374 = vmatprep.subr.bf16.mxu1 %v19188_v7 }
 0x987   : > { %17375 = vmatpush3.bf16.msra.mxu1 %v19188_v7 }
 0x988   : > { %17384 = vmatprep.subr.bf16.mxu1 %v21794_v33 }
 0xa17   : > { %v17330_v10 = vpop.f32.mrb[128].mxu1 }
 0xa18   : > { %v12262_v37 = vmul.f32 %v17330_v10, %v21800_v60  ;;  %v12093_v49 = vpop.f32.mrb[129].mxu1 }
 0xa19   : > { %v12260_v2 = vmul.f32 %v21800_v60, %v12093_v49  ;;  %v17331_v48 = vpop.f32.mrb[130].mxu1 }
 0xa1a   : > { %v12302_v59 = vadd.f32 %v21805_v40, %v12262_v37  ;;  %v12263_v12 = vmul.f32 %v17331_v48, %v21800_v60  ;;  %v12096_v54 = vpop.f32.mrb[131].mxu1 }
 0xa1b   : > { %v12300_v24 = vadd.f32 %v21805_v40, %v12260_v2  ;;  %v12261_v41 = vmul.f32 %v21800_v60, %v12096_v54 }
 0xa1c   : > { %v12334_v29 = vmax.f32 %v12302_v59, 0.0  ;;  %v12303_v21 = vadd.f32 %v21805_v40, %v12263_v12 }
 0xa1d   : > { %v12332_v15 = vmax.f32 %v12300_v24, 0.0  ;;  %v12301_v44 = vadd.f32 %v21805_v40, %v12261_v41 }
 0xa1e   : > { %v12335_v18 = vmax.f32 %v12303_v21, 0.0 }
 0xa1f   : > { %v12364_v28 = vmax.f32 %v12332_v15, %v12334_v29  ;;  %v12333_v6 = vmax.f32 %v12301_v44, 0.0  ;;  %v17334_v30 = vpop.f32.mrb[132].mxu1 }
 0xa20   : > { %v12266_v0 = vmul.f32 %v17334_v30, %v21800_v60  ;;  %v12109_v1 = vpop.f32.mrb[133].mxu1 }
 0xa21   : > { %12380 = vst [vmem:[#allocation3] sm:$0xff] %v12364_v28  ;;  %v12365_v42 = vmax.f32 %v12333_v6, %v12335_v18  ;;  %v12264_v20 = vmul.f32 %v21800_v60, %v12109_v1  ;;  %v17335_v8 = vpop.f32.mrb[134].mxu1 }
 0xa22   : > { %v12306_v38 = vadd.f32 %v21805_v40, %v12266_v0  ;;  %v12267_v63 = vmul.f32 %v17335_v8, %v21800_v60  ;;  %v12112_v22 = vpop.f32.mrb[135].mxu1 }
 0xa23   : > { %12381 = vst [vmem:[#allocation3 + $0x8] sm:$0xff] %v12365_v42  ;;  %v12304_v34 = vadd.f32 %v21805_v40, %v12264_v20  ;;  %v12265_v62 = vmul.f32 %v21800_v60, %v12112_v22 }
 0xa24   : > { %v12338_v36 = vmax.f32 %v12306_v38, 0.0  ;;  %v12307_v26 = vadd.f32 %v21805_v40, %v12267_v63 }
 0xa25   : > { %v12336_v52 = vmax.f32 %v12304_v34, 0.0  ;;  %v12305_v61 = vadd.f32 %v21805_v40, %v12265_v62 }
 0xa26   : > { %v12339_v16 = vmax.f32 %v12307_v26, 0.0 }
 0xa27   : > { %v12366_v39 = vmax.f32 %v12336_v52, %v12338_v36  ;;  %v12337_v47 = vmax.f32 %v12305_v61, 0.0  ;;  %v17338_v58 = vpop.f32.mrb[136].mxu1 }
 0xa28   : > { %v12270_v14 = vmul.f32 %v17338_v58, %v21800_v60  ;;  %v12125_v57 = vpop.f32.mrb[137].mxu1 }
 0xa29   : > { %12382 = vst [vmem:[#allocation3 + $0x20] sm:$0xff] %v12366_v39  ;;  %v12367_v50 = vmax.f32 %v12337_v47, %v12339_v16  ;;  %v12268_v9 = vmul.f32 %v21800_v60, %v12125_v57  ;;  %v17339_v13 = vpop.f32.mrb[138].mxu1 }
 0xa2a   : > { %v12396_v53 = vld [vmem:[#allocation3] ss:$2 sm:$0xff]  ;;  %v12404_v45 = vld [vmem:[#allocation3 + $0x1] ss:$2 sm:$0xff]  ;;  %v12310_v23 = vadd.f32 %v21805_v40, %v12270_v14  ;;  %v12271_v27 = vmul.f32 %v17339_v13, %v21800_v60  ;;  %v12128_v19 = vpop.f32.mrb[139].mxu1  ;;  %v19190_v13 = vld [vmem:[%s22321_s1 + $0x488] sm:$0xff]  }
 0xa2b   : > { %v21827_v43 = vmax.f32 %v12396_v53, %v12404_v45  ;;  %12383 = vst [vmem:[#allocation3 + $0x28] sm:$0xff] %v12367_v50  ;;  %v12308_v51 = vadd.f32 %v21805_v40, %v12268_v9  ;;  %v12269_v11 = vmul.f32 %v21800_v60, %v12128_v19 }
 0xa2c   : > { %v12342_v5 = vmax.f32 %v12310_v23, 0.0  ;;  %v12311_v3 = vadd.f32 %v21805_v40, %v12271_v27 }
 0xa2d   : > { %12440 = vst [vmem:[#allocation2 + $0x29] sm:$0xff] %v21827_v43  ;;  %v12340_v25 = vmax.f32 %v12308_v51, 0.0  ;;  %v12309_v55 = vadd.f32 %v21805_v40, %v12269_v11  ;;  %v12485_v35 = vpack.c.bf16 %v21827_v43, %v12477_v4 }
 0xa2e   : > { %v12343_v31 = vmax.f32 %v12311_v3, 0.0 }
 0xa2f   : > { %v12368_v32 = vmax.f32 %v12340_v25, %v12342_v5  ;;  %v12341_v46 = vmax.f32 %v12309_v55, 0.0  ;;  %v17342_v17 = vpop.f32.mrb[140].mxu1  ;;  %17376 = vmatprep.mubr.bf16.mxu1 %v12485_v35  ;;  %v19191_v55 = vld [vmem:[%s22321_s1 + $0x490] sm:$0xff]  }
 0xa30   : > { %v12274_v7 = vmul.f32 %v17342_v17, %v21800_v60  ;;  %v12141_v10 = vpop.f32.mrb[141].mxu1 }
 0xa31   : > { %12384 = vst [vmem:[#allocation3 + $0x40] sm:$0xff] %v12368_v32  ;;  %v12369_v37 = vmax.f32 %v12341_v46, %v12343_v31  ;;  %v12272_v49 = vmul.f32 %v21800_v60, %v12141_v10  ;;  %v17343_v2 = vpop.f32.mrb[142].mxu1 }
 0xa32   : > { %v12397_v48 = vld [vmem:[#allocation3 + $0x20] ss:$2 sm:$0xff]  ;;  %v12405_v59 = vld [vmem:[#allocation3 + $0x21] ss:$2 sm:$0xff]  ;;  %v12314_v12 = vadd.f32 %v21805_v40, %v12274_v7  ;;  %v12275_v54 = vmul.f32 %v17343_v2, %v21800_v60  ;;  %v12144_v24 = vpop.f32.mrb[143].mxu1 }
 0xa33   : > { %v21839_v41 = vmax.f32 %v12397_v48, %v12405_v59  ;;  %12385 = vst [vmem:[#allocation3 + $0x48] sm:$0xff] %v12369_v37  ;;  %v12312_v29 = vadd.f32 %v21805_v40, %v12272_v49  ;;  %v12273_v21 = vmul.f32 %v21800_v60, %v12144_v24  ;;  %v19192_v59 = vld [vmem:[%s22321_s1 + $0x498] sm:$0xff]  }
 0xa34   : > { %v12346_v15 = vmax.f32 %v12314_v12, 0.0  ;;  %v12315_v44 = vadd.f32 %v21805_v40, %v12275_v54  ;;  %v21866_v53 = vld [vmem:[#allocation2 + $0x2a] sm:$0xff] }
 0xa35   : > { %12441 = vst [vmem:[#allocation2 + $0x51] sm:$0xff] %v21839_v41  ;;  %v12344_v18 = vmax.f32 %v12312_v29, 0.0  ;;  %v12313_v28 = vadd.f32 %v21805_v40, %v12273_v21  ;;  %v13040_v30 = vpack.c.bf16 %v21839_v41, %v21827_v43  ;;  %v19220_v43 = vld [vmem:[%s22321_s1 + $0x5b8] sm:$0xff]  }
 0xa36   : > { %v12347_v6 = vmax.f32 %v12315_v44, 0.0 }
 0xa37   : > { %v12370_v0 = vmax.f32 %v12344_v18, %v12346_v15  ;;  %v12345_v1 = vmax.f32 %v12313_v28, 0.0  ;;  %v17346_v42 = vpop.f32.mrb[144].mxu1 }
 0xa38   : > { %v12278_v20 = vmul.f32 %v17346_v42, %v21800_v60  ;;  %v12157_v8 = vpop.f32.mrb[145].mxu1 }
 0xa39   : > { %12386 = vst [vmem:[#allocation3 + $0x60] sm:$0xff] %v12370_v0  ;;  %v12371_v38 = vmax.f32 %v12345_v1, %v12347_v6  ;;  %v12276_v63 = vmul.f32 %v21800_v60, %v12157_v8  ;;  %v17347_v22 = vpop.f32.mrb[146].mxu1  ;;  %v19193_v0 = vld [vmem:[%s22321_s1 + $0x4a0] sm:$0xff]  }
 0xa3a   : > { %v12398_v34 = vld [vmem:[#allocation3 + $0x40] ss:$2 sm:$0xff]  ;;  %v12406_v62 = vld [vmem:[#allocation3 + $0x41] ss:$2 sm:$0xff]  ;;  %v12318_v36 = vadd.f32 %v21805_v40, %v12278_v20  ;;  %v12279_v26 = vmul.f32 %v17347_v22, %v21800_v60  ;;  %v12160_v52 = vpop.f32.mrb[147].mxu1 }
 0xa3b   : > { %v21852_v61 = vmax.f32 %v12398_v34, %v12406_v62  ;;  %12387 = vst [vmem:[#allocation3 + $0x68] sm:$0xff] %v12371_v38  ;;  %v12316_v16 = vadd.f32 %v21805_v40, %v12276_v63  ;;  %v12277_v39 = vmul.f32 %v21800_v60, %v12160_v52 }
 0xa3c   : > { %v12350_v47 = vmax.f32 %v12318_v36, 0.0  ;;  %v12319_v58 = vadd.f32 %v21805_v40, %v12279_v26  ;;  %v21857_v14 = vld [vmem:[#allocation2 + $0x52] sm:$0xff] }
 0xa3d   : > { %12442 = vst [vmem:[#allocation2 + $0x79] sm:$0xff] %v21852_v61  ;;  %v12348_v57 = vmax.f32 %v12316_v16, 0.0  ;;  %v12317_v50 = vadd.f32 %v21805_v40, %v12277_v39  ;;  %v12486_v9 = vpack.c.bf16 %v21852_v61, %v21839_v41  ;;  %v13190_v23 = vpack.c.bf16 %v21857_v14, %v21866_v53  ;;  %v19221_v41 = vld [vmem:[%s22321_s1 + $0x5c0] sm:$0xff]  }
 0xa3e   : > { %v12351_v45 = vmax.f32 %v12319_v58, 0.0 }
 0xa3f   : > { %v12372_v27 = vmax.f32 %v12348_v57, %v12350_v47  ;;  %v12349_v19 = vmax.f32 %v12317_v50, 0.0  ;;  %v17350_v4 = vpop.f32.mrb[148].mxu1  ;;  %17377 = vmatmul.mubr.bf16.vlgmr.msra.gmra.mrb[160].mxu1 %v12486_v9  ;;  %v19194_v47 = vld [vmem:[%s22321_s1 + $0x4a8] sm:$0xff]  }
 0xa40   : > { %v12282_v51 = vmul.f32 %v17350_v4, %v21800_v60  ;;  %v12173_v11 = vpop.f32.mrb[149].mxu1  ;;  %17385 = vmatpush3.bf16.msra.mxu1 %v21794_v33 }
 0xa41   : > { %12388 = vst [vmem:[#allocation3 + $0x80] sm:$0xff] %v12372_v27  ;;  %v12373_v5 = vmax.f32 %v12349_v19, %v12351_v45  ;;  %v12280_v3 = vmul.f32 %v21800_v60, %v12173_v11  ;;  %v17351_v25 = vpop.f32.mrb[150].mxu1  ;;  %17386 = vmatprep.subr.bf16.mxu1 %v19190_v13 }
 0xa42   : > { %v12399_v35 = vld [vmem:[#allocation3 + $0x60] ss:$2 sm:$0xff]  ;;  %v12407_v31 = vld [vmem:[#allocation3 + $0x61] ss:$2 sm:$0xff]  ;;  %v12322_v32 = vadd.f32 %v21805_v40, %v12282_v51  ;;  %v12283_v46 = vmul.f32 %v17351_v25, %v21800_v60  ;;  %v12176_v17 = vpop.f32.mrb[151].mxu1 }
 0xa43   : > { %v21878_v7 = vmax.f32 %v12399_v35, %v12407_v31  ;;  %12389 = vst [vmem:[#allocation3 + $0x88] sm:$0xff] %v12373_v5  ;;  %v12320_v33 = vadd.f32 %v21805_v40, %v12280_v3  ;;  %v12281_v10 = vmul.f32 %v21800_v60, %v12176_v17  ;;  %v19195_v5 = vld [vmem:[%s22321_s1 + $0x4b0] sm:$0xff]  }
 0xa44   : > { %v12354_v37 = vmax.f32 %v12322_v32, 0.0  ;;  %v12323_v49 = vadd.f32 %v21805_v40, %v12283_v46  ;;  %17387 = vmatpush3.bf16.msra.mxu1 %v19190_v13  ;;  %v21913_v58 = vld [vmem:[#allocation2 + $0x7a] sm:$0xff] }
 0xa45   : > { %12443 = vst [vmem:[#allocation2 + $0xa1] sm:$0xff] %v21878_v7  ;;  %v12352_v2 = vmax.f32 %v12320_v33, 0.0  ;;  %v12321_v48 = vadd.f32 %v21805_v40, %v12281_v10  ;;  %17388 = vmatprep.subr.bf16.mxu1 %v19191_v55  ;;  %v13041_v54 = vpack.c.bf16 %v21878_v7, %v21852_v61 }
 0xa46   : > { %v12355_v12 = vmax.f32 %v12323_v49, 0.0 }
 0xa47   : > { %v12374_v24 = vmax.f32 %v12352_v2, %v12354_v37  ;;  %v12353_v29 = vmax.f32 %v12321_v48, 0.0  ;;  %v17354_v21 = vpop.f32.mrb[152].mxu1  ;;  %v19196_v2 = vld [vmem:[%s22321_s1 + $0x4b8] sm:$0xff]  }
 0xa48   : > { %v12286_v15 = vmul.f32 %v17354_v21, %v21800_v60  ;;  %v12189_v44 = vpop.f32.mrb[153].mxu1  ;;  %17389 = vmatpush3.bf16.msra.mxu1 %v19191_v55 }
 0xa49   : > { %12390 = vst [vmem:[#allocation3 + $0xa0] sm:$0xff] %v12374_v24  ;;  %v12375_v18 = vmax.f32 %v12353_v29, %v12355_v12  ;;  %v12284_v28 = vmul.f32 %v21800_v60, %v12189_v44  ;;  %v17355_v6 = vpop.f32.mrb[154].mxu1  ;;  %17390 = vmatprep.subr.bf16.mxu1 %v19192_v59  ;;  %v19197_v29 = vld [vmem:[%s22321_s1 + $0x500] sm:$0xff]   ;;  %v21942_v44 = vld [vmem:[#allocation2 + $0x28] sm:$0xff] }
 0xa4a   : > { %v12400_v1 = vld [vmem:[#allocation3 + $0x80] ss:$2 sm:$0xff]  ;;  %v12408_v42 = vld [vmem:[#allocation3 + $0x81] ss:$2 sm:$0xff]  ;;  %v12326_v20 = vadd.f32 %v21805_v40, %v12286_v15  ;;  %v12287_v8 = vmul.f32 %v17355_v6, %v21800_v60  ;;  %v12192_v38 = vpop.f32.mrb[155].mxu1 }
 0xa4b   : > { %v21897_v63 = vmax.f32 %v12400_v1, %v12408_v42  ;;  %12391 = vst [vmem:[#allocation3 + $0xa8] sm:$0xff] %v12375_v18  ;;  %v12324_v22 = vadd.f32 %v21805_v40, %v12284_v28  ;;  %v12285_v34 = vmul.f32 %v21800_v60, %v12192_v38  ;;  %v12456_v1 = vpack.c.bf16 %v21942_v44, %v21720_v56  ;;  %v19198_v56 = vld [vmem:[%s22321_s1 + $0x508] sm:$0xff]  }
 0xa4c   : > { %v12358_v62 = vmax.f32 %v12326_v20, 0.0  ;;  %v12327_v36 = vadd.f32 %v21805_v40, %v12287_v8  ;;  %17391 = vmatpush3.bf16.msra.mxu1 %v19192_v59  ;;  %v21902_v26 = vld [vmem:[#allocation2 + $0xa2] sm:$0xff]  ;;  %v21958_v8 = vld [vmem:[#allocation2 + $0x78] sm:$0xff] }
 0xa4d   : > { %12444 = vst [vmem:[#allocation2 + $0xc9] sm:$0xff] %v21897_v63  ;;  %v12356_v52 = vmax.f32 %v12324_v22, 0.0  ;;  %v12325_v16 = vadd.f32 %v21805_v40, %v12285_v34  ;;  %v21908_v39 = vpack.c.bf16 %v21897_v63, %v21878_v7  ;;  %17392 = vmatprep.subr.bf16.mxu1 %v19193_v0  ;;  %v13191_v50 = vpack.c.bf16 %v21902_v26, %v21913_v58  ;;  %v12450_v34 = vld [vmem:[#allocation2 + $0x50] sm:$0xff]  ;;  %v19225_v7 = vld [vmem:[%s22321_s1 + $0x5e0] sm:$0xff]  }
 0xa4e   : > { %v12359_v57 = vmax.f32 %v12327_v36, 0.0  ;;  %v21968_v36 = vld [vmem:[#allocation2 + $0xa0] sm:$0xff] }
 0xa4f   : > { %v12376_v9 = vmax.f32 %v12356_v52, %v12358_v62  ;;  %v12357_v13 = vmax.f32 %v12325_v16, 0.0  ;;  %v17358_v45 = vpop.f32.mrb[156].mxu1  ;;  %17380 = vmatprep.mubr.bf16.mxu1 %v21908_v39  ;;  %v21966_v62 = vpack.c.bf16 %v21958_v8, %v12450_v34 }
 0xa50   : > { %v12290_v27 = vmul.f32 %v17358_v45, %v21800_v60  ;;  %v12205_v19 = vpop.f32.mrb[157].mxu1  ;;  %17393 = vmatpush3.bf16.msra.mxu1 %v19193_v0 }
 0xa51   : > { %12392 = vst [vmem:[#allocation3 + $0xc0] sm:$0xff] %v12376_v9  ;;  %v12377_v4 = vmax.f32 %v12357_v13, %v12359_v57  ;;  %v12288_v51 = vmul.f32 %v21800_v60, %v12205_v19  ;;  %v17359_v11 = vpop.f32.mrb[158].mxu1  ;;  %17394 = vmatprep.subr.bf16.mxu1 %v19194_v47  ;;  %v12732_v9 = vld [vmem:[#allocation2 + $0x2] sm:$0xff] }
 0xa52   : > { %v12401_v3 = vld [vmem:[#allocation3 + $0xa0] ss:$2 sm:$0xff]  ;;  %v12409_v25 = vld [vmem:[#allocation3 + $0xa1] ss:$2 sm:$0xff]  ;;  %v12330_v55 = vadd.f32 %v21805_v40, %v12290_v27  ;;  %v12291_v35 = vmul.f32 %v17359_v11, %v21800_v60  ;;  %v12208_v31 = vpop.f32.mrb[159].mxu1  ;;  %v12740_v19 = vpack.c.bf16 %v21866_v53, %v12732_v9  ;;  %v19229_v53 = vld [vmem:[%s22321_s1 + $0x600] sm:$0xff]  }
 0xa53   : > { %v21925_v32 = vmax.f32 %v12401_v3, %v12409_v25  ;;  %12393 = vst [vmem:[#allocation3 + $0xc8] sm:$0xff] %v12377_v4  ;;  %v12328_v46 = vadd.f32 %v21805_v40, %v12288_v51  ;;  %v12289_v17 = vmul.f32 %v21800_v60, %v12208_v31  ;;  %v19200_v27 = vld [vmem:[%s22321_s1 + $0x518] sm:$0xff]   ;;  %v19201_v4 = vld [vmem:[%s22321_s1 + $0x520] sm:$0xff]   ;;  %v19202_v51 = vld [vmem:[%s22321_s1 + $0x528] sm:$0xff]   ;;  %v22011_v25 = vpack.c.bf16 %v21913_v58, %v21857_v14 }
 0xa54   : > { %v12362_v33 = vmax.f32 %v12330_v55, 0.0  ;;  %v12331_v10 = vadd.f32 %v21805_v40, %v12291_v35  ;;  %17395 = vmatpush3.bf16.msra.mxu1 %v19194_v47  ;;  %v21944_v18 = vld [vmem:[#allocation2 + $0xca] sm:$0xff]  ;;  %v19205_v3 = vld [vmem:[%s22321_s1 + $0x540] sm:$0xff]   ;;  %v19228_v14 = vld [vmem:[%s22321_s1 + $0x5f8] sm:$0xff]  }
 0xa55   : > { %12445 = vst [vmem:[#allocation2 + $0xf1] sm:$0xff] %v21925_v32  ;;  %v12360_v37 = vmax.f32 %v12328_v46, 0.0  ;;  %v12329_v49 = vadd.f32 %v21805_v40, %v12289_v17  ;;  %17396 = vmatprep.subr.bf16.mxu1 %v19195_v5  ;;  %v13042_v59 = vpack.c.bf16 %v21925_v32, %v21897_v63  ;;  %v21962_v22 = vld [vmem:[#allocation2 + $0xc8] sm:$0xff]  ;;  %v19199_v47 = vld [vmem:[%s22321_s1 + $0x510] sm:$0xff]   ;;  %v22018_v35 = vpack.c.bf16 %v21944_v18, %v21902_v26  ;;  %v19232_v26 = vld [vmem:[%s22321_s1 + $0x618] sm:$0xff]  }
 0xa56   : > { %v12363_v48 = vmax.f32 %v12331_v10, 0.0  ;;  %v21977_v16 = vpack.c.bf16 %v21962_v22, %v21968_v36  ;;  %v19203_v11 = vld [vmem:[%s22321_s1 + $0x530] sm:$0xff]   ;;  %v19206_v55 = vld [vmem:[%s22321_s1 + $0x548] sm:$0xff]   ;;  %v12890_v10 = vpack.c.bf16 %v12450_v34, %v21942_v44  ;;  %v19224_v34 = vld [vmem:[%s22321_s1 + $0x5d8] sm:$0xff]  }
 0xa57   : > { %v12378_v12 = vmax.f32 %v12360_v37, %v12362_v33  ;;  %v12361_v60 = vmax.f32 %v12329_v49, 0.0  ;;  %v19207_v31 = vld [vmem:[%s22321_s1 + $0x550] sm:$0xff]   ;;  %v19208_v33 = vld [vmem:[%s22321_s1 + $0x558] sm:$0xff]   ;;  %v19209_v37 = vld [vmem:[%s22321_s1 + $0x560] sm:$0xff]  }
 0xa58   : > { %17397 = vmatpush3.bf16.msra.mxu1 %v19195_v5  ;;  %v19204_v5 = vld [vmem:[%s22321_s1 + $0x538] sm:$0xff]   ;;  %v19210_v49 = vld [vmem:[%s22321_s1 + $0x568] sm:$0xff]   ;;  %v19227_v63 = vld [vmem:[%s22321_s1 + $0x5f0] sm:$0xff]  }
 0xa59   : > { %12394 = vst [vmem:[#allocation3 + $0xe0] sm:$0xff] %v12378_v12  ;;  %v12379_v24 = vmax.f32 %v12361_v60, %v12363_v48  ;;  %17398 = vmatprep.subr.bf16.mxu1 %v19196_v2  ;;  %v19212_v48 = vld [vmem:[%s22321_s1 + $0x578] sm:$0xff]   ;;  %v19213_v12 = vld [vmem:[%s22321_s1 + $0x580] sm:$0xff]   ;;  %v12891_v60 = vpack.c.bf16 %v21968_v36, %v21958_v8  ;;  %v19219_v8 = vld [vmem:[%s22321_s1 + $0x5b0] sm:$0xff]  }
 0xa5a   : > { %v12402_v40 = vld [vmem:[#allocation3 + $0xc0] ss:$2 sm:$0xff]  ;;  %v12410_v21 = vld [vmem:[#allocation3 + $0xc1] ss:$2 sm:$0xff]  ;;  %v19233_v58 = vld [vmem:[%s22321_s1 + $0x620] sm:$0xff]  }
 0xa5b   : > { %v21940_v15 = vmax.f32 %v12402_v40, %v12410_v21  ;;  %12395 = vst [vmem:[#allocation3 + $0xe8] sm:$0xff] %v12379_v24  ;;  %v19214_v24 = vld [vmem:[%s22321_s1 + $0x588] sm:$0xff]   ;;  %v19215_v40 = vld [vmem:[%s22321_s1 + $0x590] sm:$0xff]   ;;  %v19241_v9 = vld [vmem:[%s22321_s1 + $0x660] sm:$0xff]  }
 0xa5c   : > { %17399 = vmatpush3.bf16.msra.mxu1 %v19196_v2  ;;  %v21946_v28 = vld [vmem:[#allocation2 + $0xf2] sm:$0xff] }
 0xa5d   : > { %12446 = vst [vmem:[#allocation2 + $0x119] sm:$0xff] %v21940_v15  ;;  %v21951_v6 = vpack.c.bf16 %v21940_v15, %v21925_v32  ;;  %17408 = vmatprep.subr.bf16.mxu1 %v19197_v29  ;;  %v13192_v0 = vpack.c.bf16 %v21946_v28, %v21944_v18  ;;  %v12454_v13 = vld [vmem:[#allocation2 + $0xf0] sm:$0xff] }
 0xa5e   : > { %v19211_v2 = vld [vmem:[%s22321_s1 + $0x570] sm:$0xff]  }
 0xa5f   : > { %17381 = vmatmul.mubr.bf16.gmra.mrb[164].mxu1 %v21951_v6  ;;  %v19231_v32 = vld [vmem:[%s22321_s1 + $0x610] sm:$0xff]  }
 0xa60   : > { %17400 = vmatprep.mubr.bf16.mxu1 %v12456_v1  ;;  %v19216_v1 = vld [vmem:[%s22321_s1 + $0x598] sm:$0xff]   ;;  %v19235_v18 = vld [vmem:[%s22321_s1 + $0x630] sm:$0xff]  }
 0xa61   : > { %v19239_v36 = vld [vmem:[%s22321_s1 + $0x650] sm:$0xff]  }
 0xa62   : > { %v12403_v42 = vld [vmem:[#allocation3 + $0xe0] ss:$2 sm:$0xff]  ;;  %v12411_v20 = vld [vmem:[#allocation3 + $0xe1] ss:$2 sm:$0xff] }
 0xa63   : > { %v21960_v38 = vmax.f32 %v12403_v42, %v12411_v20  ;;  %v19217_v42 = vld [vmem:[%s22321_s1 + $0x5a0] sm:$0xff]   ;;  %v19218_v20 = vld [vmem:[%s22321_s1 + $0x5a8] sm:$0xff]  }
 0xa64   : > { %v21984_v57 = vld [vmem:[#allocation2 + $0x118] sm:$0xff] }
 0xa65   : > { %12447 = vst [vmem:[#allocation2 + $0x141] sm:$0xff] %v21960_v38  ;;  %v13043_v52 = vpack.c.bf16 %v21960_v38, %v21940_v15  ;;  %v21987_v45 = vpack.c.bf16 %v21984_v57, %v12454_v13  ;;  %v22025_v46 = vld [vmem:[#allocation2 + $0x11a] sm:$0xff] }
 0xa66   : > { %v22029_v17 = vpack.c.bf16 %v22025_v46, %v21946_v28  ;;  %v19236_v28 = vld [vmem:[%s22321_s1 + $0x638] sm:$0xff]  }
 0xa67   : > { %17401 = vmatmul.mubr.bf16.vlgmr.msra.gmra.mrb[160].mxu1 %v21966_v62 }
 0xa68   : > { %17409 = vmatpush3.bf16.msra.mxu1 %v19197_v29  ;;  %17404 = vmatprep.mubr.bf16.mxu1 %v21977_v16  ;;  %v12892_v29 = vpack.c.bf16 %v12454_v13, %v21962_v22  ;;  %v19223_v22 = vld [vmem:[%s22321_s1 + $0x5d0] sm:$0xff]   ;;  %v19242_v13 = vld [vmem:[%s22321_s1 + $0x668] sm:$0xff]  }
 0xa69   : > { %17410 = vmatprep.subr.bf16.mxu1 %v19198_v56 }
 0xa6c   : > { %17411 = vmatpush3.bf16.msra.mxu1 %v19198_v56  ;;  %v22060_v21 = vld [vmem:[#allocation2 + $0x140] sm:$0xff]  ;;  %v13482_v56 = vld [vmem:[#allocation2 + $0x51] sm:$0xff] }
 0xa6d   : > { %17412 = vmatprep.subr.bf16.mxu1 %v19199_v47  ;;  %v12893_v44 = vpack.c.bf16 %v22060_v21, %v21984_v57  ;;  %v13490_v57 = vpack.c.bf16 %v21852_v61, %v13482_v56  ;;  %v19243_v61 = vld [vmem:[%s22321_s1 + $0x670] sm:$0xff]  }
 0xa6f   : > { %17405 = vmatmul.mubr.bf16.gmra.mrb[164].mxu1 %v21987_v45 }
 0xa70   : > { %17413 = vmatpush3.bf16.msra.mxu1 %v19199_v47  ;;  %17424 = vmatprep.mubr.bf16.mxu1 %v12740_v19  ;;  %v19246_v19 = vld [vmem:[%s22321_s1 + $0x688] sm:$0xff]  }
 0xa71   : > { %17414 = vmatprep.subr.bf16.mxu1 %v19200_v27 }
 0xa74   : > { %17415 = vmatpush3.bf16.msra.mxu1 %v19200_v27  ;;  %v19245_v27 = vld [vmem:[%s22321_s1 + $0x680] sm:$0xff]  }
 0xa75   : > { %17416 = vmatprep.subr.bf16.mxu1 %v19201_v4 }
 0xa78   : > { %17417 = vmatpush3.bf16.msra.mxu1 %v19201_v4  ;;  %v19247_v4 = vld [vmem:[%s22321_s1 + $0x690] sm:$0xff]  }
 0xa79   : > { %17418 = vmatprep.subr.bf16.mxu1 %v19202_v51 }
 0xa7c   : > { %17419 = vmatpush3.bf16.msra.mxu1 %v19202_v51  ;;  %v13489_v51 = vld [vmem:[#allocation2 + $0x169] sm:$0xff] }
 0xa7d   : > { %17420 = vmatprep.subr.bf16.mxu1 %v19203_v11 }
 0xa80   : > { %17421 = vmatpush3.bf16.msra.mxu1 %v19203_v11  ;;  %v13493_v11 = vpack.c.bf16 %v13489_v51, %v21960_v38  ;;  %v19251_v38 = vld [vmem:[%s22321_s1 + $0x6b0] sm:$0xff]  }
 0xa81   : > { %17422 = vmatprep.subr.bf16.mxu1 %v19204_v5 }
 0xa84   : > { %17423 = vmatpush3.bf16.msra.mxu1 %v19204_v5  ;;  %v19248_v5 = vld [vmem:[%s22321_s1 + $0x698] sm:$0xff]  }
 0xa85   : > { %17432 = vmatprep.subr.bf16.mxu1 %v19205_v3 }
 0xa87   : > { %17425 = vmatmul.mubr.bf16.vlgmr.msra.gmra.mrb[160].mxu1 %v22011_v25 }
 0xa88   : > { %17428 = vmatprep.mubr.bf16.mxu1 %v22018_v35  ;;  %17433 = vmatpush3.bf16.msra.mxu1 %v19205_v3  ;;  %v19252_v3 = vld [vmem:[%s22321_s1 + $0x6b8] sm:$0xff]  }
 0xa89   : > { %17434 = vmatprep.subr.bf16.mxu1 %v19206_v55 }
 0xa8c   : > { %17435 = vmatpush3.bf16.msra.mxu1 %v19206_v55 }
 0xa8d   : > { %17436 = vmatprep.subr.bf16.mxu1 %v19207_v31 }
 0xa8f   : > { %17429 = vmatmul.mubr.bf16.gmra.mrb[164].mxu1 %v22029_v17 }
 0xa90   : > { %17437 = vmatpush3.bf16.msra.mxu1 %v19207_v31  ;;  %17448 = vmatprep.mubr.bf16.mxu1 %v12890_v10  ;;  %v13835_v31 = vld [vmem:[%s22324_s4] sm:$0xff]  ;;  %v19438_v10 = vmov 0.0|0.0  }
 0xa91   : > { %17438 = vmatprep.subr.bf16.mxu1 %v19208_v33 }
 0xa94   : > { %17439 = vmatpush3.bf16.msra.mxu1 %v19208_v33 }
 0xa95   : > { %17440 = vmatprep.subr.bf16.mxu1 %v19209_v37 }
 0xa98   : > { %17441 = vmatpush3.bf16.msra.mxu1 %v19209_v37 }
 0xa99   : > { %17442 = vmatprep.subr.bf16.mxu1 %v19210_v49 }
 0xa9c   : > { %17443 = vmatpush3.bf16.msra.mxu1 %v19210_v49  ;;  %v13839_v49 = vld [vmem:[%s22324_s4 + $0x20] sm:$0xff] }
 0xa9d   : > { %17444 = vmatprep.subr.bf16.mxu1 %v19211_v2 }
 0xaa0   : > { %17445 = vmatpush3.bf16.msra.mxu1 %v19211_v2  ;;  %v13840_v2 = vld [vmem:[%s22324_s4 + $0x28] sm:$0xff] }
 0xaa1   : > { %17446 = vmatprep.subr.bf16.mxu1 %v19212_v48 }
 0xaa4   : > { %17447 = vmatpush3.bf16.msra.mxu1 %v19212_v48  ;;  %v17618_v48 = vpack.c.bf16 %v13840_v2, %v13839_v49  ;;  %v13851_v2 = vld [vmem:[%s22325_s5] sm:$0x1] }
 0xaa5   : > { %17456 = vmatprep.subr.bf16.mxu1 %v19213_v12 }
 0xaa7   : > { %17449 = vmatmul.mubr.bf16.vlgmr.msra.gmra.mrb[160].mxu1 %v12891_v60  ;;  %v13842_v60 = vld [vmem:[%s22324_s4 + $0x38] sm:$0xff] }
 0xaa8   : > { %17452 = vmatprep.mubr.bf16.mxu1 %v12892_v29  ;;  %17457 = vmatpush3.bf16.msra.mxu1 %v19213_v12  ;;  %v13841_v12 = vld [vmem:[%s22324_s4 + $0x30] sm:$0xff]  ;;  %v13843_v29 = vld [vmem:[%s22324_s4 + $0x40] sm:$0xff] }
 0xaa9   : > { %17458 = vmatprep.subr.bf16.mxu1 %v19214_v24 }
 0xaac   : > { %17459 = vmatpush3.bf16.msra.mxu1 %v19214_v24  ;;  %v17621_v24 = vpack.c.bf16 %v13842_v60, %v13841_v12 }
 0xaad   : > { %17460 = vmatprep.subr.bf16.mxu1 %v19215_v40 }
 0xaaf   : > { %17453 = vmatmul.mubr.bf16.gmra.mrb[164].mxu1 %v12893_v44  ;;  %v13845_v44 = vld [vmem:[%s22324_s4 + $0x50] sm:$0xff] }
 0xab0   : > { %17461 = vmatpush3.bf16.msra.mxu1 %v19215_v40  ;;  %17472 = vmatprep.mubr.bf16.mxu1 %v13040_v30  ;;  %v19222_v30 = vld [vmem:[%s22321_s1 + $0x5c8] sm:$0xff]  }
 0xab1   : > { %17462 = vmatprep.subr.bf16.mxu1 %v19216_v1  ;;  %v13844_v40 = vld [vmem:[%s22324_s4 + $0x48] sm:$0xff] }
 0xab4   : > { %17463 = vmatpush3.bf16.msra.mxu1 %v19216_v1  ;;  %v13846_v1 = vld [vmem:[%s22324_s4 + $0x58] sm:$0xff] }
 0xab5   : > { %17464 = vmatprep.subr.bf16.mxu1 %v19217_v42 }
 0xab8   : > { %17465 = vmatpush3.bf16.msra.mxu1 %v19217_v42  ;;  %v17627_v42 = vpack.c.bf16 %v13846_v1, %v13845_v44 }
 0xab9   : > { %17466 = vmatprep.subr.bf16.mxu1 %v19218_v20 }
 0xabc   : > { %17467 = vmatpush3.bf16.msra.mxu1 %v19218_v20  ;;  %v13847_v20 = vld [vmem:[%s22324_s4 + $0x60] sm:$0xff] }
 0xabd   : > { %17468 = vmatprep.subr.bf16.mxu1 %v19219_v8 }
 0xac0   : > { %17469 = vmatpush3.bf16.msra.mxu1 %v19219_v8  ;;  %v13848_v8 = vld [vmem:[%s22324_s4 + $0x68] sm:$0xff] }
 0xac1   : > { %17470 = vmatprep.subr.bf16.mxu1 %v19220_v43 }
 0xac4   : > { %17471 = vmatpush3.bf16.msra.mxu1 %v19220_v43  ;;  %v17630_v43 = vpack.c.bf16 %v13848_v8, %v13847_v20 }
 0xac5   : > { %17480 = vmatprep.subr.bf16.mxu1 %v19221_v41 }
 0xac7   : > { %17473 = vmatmul.mubr.bf16.vlgmr.msra.gmra.mrb[160].mxu1 %v13041_v54  ;;  %v19226_v54 = vld [vmem:[%s22321_s1 + $0x5e8] sm:$0xff]  }
 0xac8   : > { %17476 = vmatprep.mubr.bf16.mxu1 %v13042_v59  ;;  %17481 = vmatpush3.bf16.msra.mxu1 %v19221_v41  ;;  %v22133_v59 = vld [vmem:[#allocation2 + $0x142] sm:$0xff]  ;;  %v13849_v41 = vld [vmem:[%s22324_s4 + $0x70] sm:$0xff] }
 0xac9   : > { %17482 = vmatprep.subr.bf16.mxu1 %v19222_v30  ;;  %v13193_v15 = vpack.c.bf16 %v22133_v59, %v22025_v46  ;;  %v13836_v46 = vld [vmem:[%s22324_s4 + $0x8] sm:$0xff] }
 0xaca   : > { %v17612_v33 = vpack.c.bf16 %v13836_v46, %v13835_v31 }
 0xacc   : > { %17483 = vmatpush3.bf16.msra.mxu1 %v19222_v30  ;;  %v13850_v30 = vld [vmem:[%s22324_s4 + $0x78] sm:$0xff] }
 0xacd   : > { %17484 = vmatprep.subr.bf16.mxu1 %v19223_v22 }
 0xacf   : > { %17477 = vmatmul.mubr.bf16.gmra.mrb[164].mxu1 %v13043_v52  ;;  %v22164_v52 = vld [vmem:[#allocation2 + $0x18] sm:$0xff] }
 0xad0   : > { %17485 = vmatpush3.bf16.msra.mxu1 %v19223_v22  ;;  %17496 = vmatprep.mubr.bf16.mxu1 %v13190_v23  ;;  %v19230_v23 = vld [vmem:[%s22321_s1 + $0x608] sm:$0xff]   ;;  %v13343_v47 = vpack.c.bf16 %v22164_v52, %v22060_v21  ;;  %v17624_v21 = vpack.c.bf16 %v13844_v40, %v13843_v29  ;;  %v17633_v22 = vpack.c.bf16 %v13850_v30, %v13849_v41 }
 0xad1   : > { %17486 = vmatprep.subr.bf16.mxu1 %v19224_v34 }
 0xad4   : > { %17487 = vmatpush3.bf16.msra.mxu1 %v19224_v34  ;;  %v14636_v34 = vld [vmem:[%s22322_s2 + $0x2] ss:$0 sm:$0xff] }
 0xad5   : > { %17488 = vmatprep.subr.bf16.mxu1 %v19225_v7 }
 0xad8   : > { %17489 = vmatpush3.bf16.msra.mxu1 %v19225_v7 }
 0xad9   : > { %17490 = vmatprep.subr.bf16.mxu1 %v19226_v54 }
 0xadc   : > { %17491 = vmatpush3.bf16.msra.mxu1 %v19226_v54  ;;  %v14638_v54 = vld [vmem:[%s22323_s3 + $0x2] ss:$0 sm:$0xff] }
 0xadd   : > { %17492 = vmatprep.subr.bf16.mxu1 %v19227_v63 }
 0xae0   : > { %17493 = vmatpush3.bf16.msra.mxu1 %v19227_v63 }
 0xae1   : > { %17494 = vmatprep.subr.bf16.mxu1 %v19228_v14 }
 0xae4   : > { %17495 = vmatpush3.bf16.msra.mxu1 %v19228_v14 }
 0xae5   : > { %17504 = vmatprep.subr.bf16.mxu1 %v19229_v53 }
 0xae7   : > { %17497 = vmatmul.mubr.bf16.vlgmr.msra.gmra.mrb[160].mxu1 %v13191_v50  ;;  %v19234_v50 = vld [vmem:[%s22321_s1 + $0x628] sm:$0xff]  }
 0xae8   : > { %17500 = vmatprep.mubr.bf16.mxu1 %v13192_v0  ;;  %17505 = vmatpush3.bf16.msra.mxu1 %v19229_v53  ;;  %v19237_v0 = vld [vmem:[%s22321_s1 + $0x640] sm:$0xff]  }
 0xae9   : > { %17506 = vmatprep.subr.bf16.mxu1 %v19230_v23 }
 0xaec   : > { %17507 = vmatpush3.bf16.msra.mxu1 %v19230_v23 }
 0xaed   : > { %17508 = vmatprep.subr.bf16.mxu1 %v19231_v32 }
 0xaef   : > { %17501 = vmatmul.mubr.bf16.gmra.mrb[164].mxu1 %v13193_v15 }
 0xaf0   : > { %17509 = vmatpush3.bf16.msra.mxu1 %v19231_v32  ;;  %17520 = vmatprep.mubr.bf16.mxu1 %v21966_v62  ;;  %v19238_v62 = vld [vmem:[%s22321_s1 + $0x648] sm:$0xff]  }
 0xaf1   : > { %17510 = vmatprep.subr.bf16.mxu1 %v19232_v26 }
 0xaf4   : > { %17511 = vmatpush3.bf16.msra.mxu1 %v19232_v26 }
 0xaf5   : > { %17512 = vmatprep.subr.bf16.mxu1 %v19233_v58 }
 0xaf8   : > { %17513 = vmatpush3.bf16.msra.mxu1 %v19233_v58 }
 0xaf9   : > { %17514 = vmatprep.subr.bf16.mxu1 %v19234_v50 }
 0xafc   : > { %17515 = vmatpush3.bf16.msra.mxu1 %v19234_v50 }
 0xafd   : > { %17516 = vmatprep.subr.bf16.mxu1 %v19235_v18 }
 0xb00   : > { %17517 = vmatpush3.bf16.msra.mxu1 %v19235_v18 }
 0xb01   : > { %17518 = vmatprep.subr.bf16.mxu1 %v19236_v28 }
 0xb04   : > { %17519 = vmatpush3.bf16.msra.mxu1 %v19236_v28 }
 0xb05   : > { %17528 = vmatprep.subr.bf16.mxu1 %v19237_v0 }
 0xb07   : > { %17521 = vmatmul.mubr.bf16.vlgmr.msra.gmra.mrb[160].mxu1 %v21977_v16  ;;  %v19240_v16 = vld [vmem:[%s22321_s1 + $0x658] sm:$0xff]  }
 0xb08   : > { %17524 = vmatprep.mubr.bf16.mxu1 %v21987_v45  ;;  %17529 = vmatpush3.bf16.msra.mxu1 %v19237_v0  ;;  %v19244_v45 = vld [vmem:[%s22321_s1 + $0x678] sm:$0xff]  }
 0xb09   : > { %17530 = vmatprep.subr.bf16.mxu1 %v19238_v62 }
 0xb0c   : > { %17531 = vmatpush3.bf16.msra.mxu1 %v19238_v62 }
 0xb0d   : > { %17532 = vmatprep.subr.bf16.mxu1 %v19239_v36 }
 0xb0f   : > { %17525 = vmatmul.mubr.bf16.gmra.mrb[164].mxu1 %v13343_v47 }
 0xb10   : > { %17533 = vmatpush3.bf16.msra.mxu1 %v19239_v36  ;;  %17544 = vmatprep.mubr.bf16.mxu1 %v13490_v57 }
 0xb11   : > { %17534 = vmatprep.subr.bf16.mxu1 %v19240_v16 }
 0xb14   : > { %17535 = vmatpush3.bf16.msra.mxu1 %v19240_v16 }
 0xb15   : > { %17536 = vmatprep.subr.bf16.mxu1 %v19241_v9 }
 0xb18   : > { %17537 = vmatpush3.bf16.msra.mxu1 %v19241_v9 }
 0xb19   : > { %17538 = vmatprep.subr.bf16.mxu1 %v19242_v13 }
 0xb1c   : > { %17539 = vmatpush3.bf16.msra.mxu1 %v19242_v13 }
 0xb1d   : > { %17540 = vmatprep.subr.bf16.mxu1 %v19243_v61 }
 0xb20   : > { %17541 = vmatpush3.bf16.msra.mxu1 %v19243_v61 }
 0xb21   : > { %17542 = vmatprep.subr.bf16.mxu1 %v19244_v45 }
 0xb24   : > { %17543 = vmatpush3.bf16.msra.mxu1 %v19244_v45 }
 0xb25   : > { %17552 = vmatprep.subr.bf16.mxu1 %v19245_v27 }
 0xb27   : > { %17545 = vmatmul.mubr.bf16.vlgmr.msra.gmra.mrb[160].mxu1 %v21908_v39  ;;  %v19249_v39 = vld [vmem:[%s22321_s1 + $0x6a0] sm:$0xff]  }
 0xb28   : > { %17548 = vmatprep.mubr.bf16.mxu1 %v21951_v6  ;;  %17553 = vmatpush3.bf16.msra.mxu1 %v19245_v27  ;;  %v19250_v6 = vld [vmem:[%s22321_s1 + $0x6a8] sm:$0xff]  }
 0xb29   : > { %17554 = vmatprep.subr.bf16.mxu1 %v19246_v19 }
 0xb2c   : > { %17555 = vmatpush3.bf16.msra.mxu1 %v19246_v19 }
 0xb2d   : > { %17556 = vmatprep.subr.bf16.mxu1 %v19247_v4 }
 0xb2f   : > { %17549 = vmatmul.mubr.bf16.gmra.mrb[164].mxu1 %v13493_v11 }
 0xb30   : > { %17557 = vmatpush3.bf16.msra.mxu1 %v19247_v4  ;;  %17568 = vmatprep.mubr.bf16.mxu1 %v22011_v25  ;;  %v13639_v25 = vld [vmem:[#allocation2 + $0x16a] sm:$0xff] }
 0xb31   : > { %17558 = vmatprep.subr.bf16.mxu1 %v19248_v5  ;;  %v13643_v55 = vpack.c.bf16 %v13639_v25, %v22133_v59 }
 0xb34   : > { %17559 = vmatpush3.bf16.msra.mxu1 %v19248_v5 }
 0xb35   : > { %17560 = vmatprep.subr.bf16.mxu1 %v19249_v39 }
 0xb38   : > { %17561 = vmatpush3.bf16.msra.mxu1 %v19249_v39 }
 0xb39   : > { %17562 = vmatprep.subr.bf16.mxu1 %v19250_v6 }
 0xb3c   : > { %17563 = vmatpush3.bf16.msra.mxu1 %v19250_v6 }
 0xb3d   : > { %17564 = vmatprep.subr.bf16.mxu1 %v19251_v38 }
 0xb40   : > { %17565 = vmatpush3.bf16.msra.mxu1 %v19251_v38 }
 0xb41   : > { %17566 = vmatprep.subr.bf16.mxu1 %v19252_v3 }
 0xb44   : > { %17567 = vmatpush3.bf16.msra.mxu1 %v19252_v3 }
 0xb45   : > { %17611 = vmatprep.subr.bf16.mxu1 %v19438_v10 }
 0xb47   : > { %17569 = vmatmul.mubr.bf16.vlgmr.msra.gmra.mrb[160].mxu1 %v22018_v35  ;;  %v13837_v35 = vld [vmem:[%s22324_s4 + $0x10] sm:$0xff] }
 0xb48   : > { %17572 = vmatprep.mubr.bf16.mxu1 %v22029_v17  ;;  %17613 = vmatpush3.bf16.msra.mxu1 %v17612_v33  ;;  %v13838_v17 = vld [vmem:[%s22324_s4 + $0x18] sm:$0xff] }
 0xb49   : > { %17614 = vmatprep.subr.bf16.mxu1 %v19438_v10  ;;  %v17615_v37 = vpack.c.bf16 %v13838_v17, %v13837_v35 }
 0xb4c   : > { %17616 = vmatpush3.bf16.msra.mxu1 %v17615_v37 }
 0xb4d   : > { %17617 = vmatprep.subr.bf16.mxu1 %v19438_v10 }
 0xb4f   : > { %17573 = vmatmul.mubr.bf16.gmra.mrb[164].mxu1 %v13643_v55 }
 0xb50   : > { %17619 = vmatpush3.bf16.msra.mxu1 %v17618_v48  ;;  %17608 = vmatprep.mubr.msk.f32.mxu1 %vm19439_vm0, %v22164_v52 }
 0xb51   : > { %17620 = vmatprep.subr.bf16.mxu1 %v19438_v10 }
 0xb54   : > { %17622 = vmatpush3.bf16.msra.mxu1 %v17621_v24 }
 0xb55   : > { %17623 = vmatprep.subr.bf16.mxu1 %v19438_v10 }
 0xb58   : > { %17625 = vmatpush3.bf16.msra.mxu1 %v17624_v21 }
 0xb59   : > { %17626 = vmatprep.subr.bf16.mxu1 %v19438_v10 }
 0xb5c   : > { %17628 = vmatpush3.bf16.msra.mxu1 %v17627_v42 }
 0xb5d   : > { %17629 = vmatprep.subr.bf16.mxu1 %v19438_v10 }
 0xb60   : > { %17631 = vmatpush3.bf16.msra.mxu1 %v17630_v43 }
 0xb61   : > { %17632 = vmatprep.subr.bf16.mxu1 %v19438_v10 }
 0xb64   : > { %17634 = vmatpush3.bf16.msra.mxu1 %v17633_v22 }
 0xc1a   : > { %v17570_v7 = vpop.f32.mrb[160].mxu1 }
 0xc1b   : > { %v13743_v63 = vpop.f32.mrb[161].mxu1  ;;  %v13792_v14 = vmul.f32 %v17570_v7, %v14636_v34 }
 0xc1c   : > { %v13790_v53 = vmul.f32 %v14636_v34, %v13743_v63  ;;  %v17571_v23 = vpop.f32.mrb[162].mxu1 }
 0xc1d   : > { %v13793_v32 = vmul.f32 %v17571_v23, %v14636_v34  ;;  %v13746_v59 = vpop.f32.mrb[163].mxu1  ;;  %v13808_v58 = vadd.f32 %v14638_v54, %v13792_v14 }
 0xc1e   : > { %v13806_v15 = vadd.f32 %v14638_v54, %v13790_v53  ;;  %v13791_v26 = vmul.f32 %v14636_v34, %v13746_v59 }
 0xc1f   : > { %v13809_v18 = vadd.f32 %v14638_v54, %v13793_v32  ;;  %v13816_v56 = vmax.f32 %v13808_v58, 0.0 }
 0xc20   : > { %v13807_v50 = vadd.f32 %v14638_v54, %v13791_v26  ;;  %v13814_v28 = vmax.f32 %v13806_v15, 0.0 }
 0xc21   : > { %v13817_v9 = vmax.f32 %v13809_v18, 0.0 }
 0xc22   : > { %v13815_v0 = vmax.f32 %v13807_v50, 0.0  ;;  %v17574_v62 = vpop.f32.mrb[164].mxu1 }
 0xc23   : > { %v13759_v36 = vpop.f32.mrb[165].mxu1  ;;  %v13796_v47 = vmul.f32 %v17574_v62, %v14636_v34 }
 0xc24   : > { %v13822_v52 = vadd.f32 %v13815_v0, %v13814_v28  ;;  %v13794_v16 = vmul.f32 %v14636_v34, %v13759_v36  ;;  %v17575_v57 = vpop.f32.mrb[166].mxu1 }
 0xc25   : > { %v13762_v13 = vpop.f32.mrb[167].mxu1  ;;  %v13797_v27 = vmul.f32 %v17575_v57, %v14636_v34  ;;  %v13812_v4 = vadd.f32 %v14638_v54, %v13796_v47 }
 0xc26   : > { %v13823_v61 = vadd.f32 %v13822_v52, %v13816_v56  ;;  %v13810_v45 = vadd.f32 %v14638_v54, %v13794_v16  ;;  %v13795_v19 = vmul.f32 %v14636_v34, %v13762_v13 }
 0xc27   : > { %v13813_v6 = vadd.f32 %v14638_v54, %v13797_v27  ;;  %v13820_v3 = vmax.f32 %v13812_v4, 0.0 }
 0xc28   : > { %v13818_v51 = vmax.f32 %v13810_v45, 0.0  ;;  %v13824_v11 = vadd.f32 %v13823_v61, %v13817_v9  ;;  %v13811_v5 = vadd.f32 %v14638_v54, %v13795_v19 }
 0xc29   : > { %v13821_v55 = vmax.f32 %v13813_v6, 0.0 }
 0xc2a   : > { %v13825_v39 = vadd.f32 %v13824_v11, %v13818_v51  ;;  %v13819_v38 = vmax.f32 %v13811_v5, 0.0 }
 0xc2c   : > { %v13826_v25 = vadd.f32 %v13825_v39, %v13819_v38 }
 0xc2e   : > { %v13827_v31 = vadd.f32 %v13826_v25, %v13820_v3 }
 0xc30   : > { %v13828_v46 = vadd.f32 %v13827_v31, %v13821_v55 }
 0xc32   : > { %v13829_v33 = vrot.slane %v13828_v46, 4 }
 0xc34   : > { %v13830_v10 = vadd.f32 %v13829_v33, %v13828_v46 }
 0xc36   : > { %v13831_v35 = vrot.slane %v13830_v10, 2 }
 0xc38   : > { %v13832_v17 = vadd.f32 %v13831_v35, %v13830_v10 }
 0xc3a   : > { %v13833_v37 = vrot.slane %v13832_v17, 1 }
 0xc3c   : > { %v13834_v49 = vadd.f32 %v13833_v37, %v13832_v17 }
 0xc3e   : > { %17609 = vmatmul.mubr.f32.vlgmr.msra.gmra.mrb[168].mxu1 %v13834_v49 }
 0xd11   : > { %v13918_v48 = vpop.f32.mrb[168].mxu1 }
 0xd12   : > { %v13919_v12 = vadd.f32 %v13918_v48, %v13851_v2  ;;  %v17610_v60 = vpop.f32.mrb[169].mxu1 }
 0xd14   : > { %13922 = vst [vmem:[%s243_s26] sm:$0x1] %v13919_v12 }
 0xd15   : > { %19386 = shalt.err (!%p19383_p3)
}
 0xd16   : > { %s19387_s15 = scalar_lea.hbm %s22278_s10, 16  ;;  %s19391_s18 = scalar_lea.hbm %s22326_s6, 32 }
 0xd17   : > { %p19388_p4 = scmp.ne.s32.totalorder %s22278_s10, %s19387_s15  ;;  %p19392_p9 = scmp.lt.u32.totalorder %s22278_s10, %s22326_s6 }
 0xd18   : > { %p19393_p10 = scmp.lt.u32.totalorder %s19391_s18, %s19387_s15  ;;  %p19395_p12 = scmp.lt.u32.totalorder %s19387_s15, %s22278_s10 }
 0xd19   : > { %p19389_p7 = pnand %p19388_p4, %p19514_p5 }
 0xd1a   : > { %p19394_p11 = por %p19393_p10, %p19392_p9 }
 0xd1b   : > { %p19390_p8 = pneg %p19389_p7 }
 0xd1c   : > { %p19396_p13 = por %p19395_p12, %p19394_p11 }
 0xd1e   : > { %p19397_p0 = pnand %p19396_p13, %p19390_p8 }
 0xd20   : > { %19400 = shalt.err (!%p19397_p0)
}
 0xd21   : > { %18995 = dma.vmem_to_hbm [thread:$0]  (%p19514_p5), %s22280_s28, 16, %s22278_s10, %s13924_s11  }
 0xd22 PF: > { %p19001_p1 = scmp.ge.s32.totalorder %s19435_s24, 2  ;;  %s13948_s26 = sand.u32 1, %s19423_s21  }
 0xd23   : > { %s13949_s29 = scalar_lea.sflag [#allocation5], %s13948_s26 }
 0xd24   : > { %p18998_p2 = pnand %p19001_p1, %p19518_p6 }
 0xd26   : > { %19418 = dma.done.wait (!%p18998_p2), %s13949_s29, 16  }
 0xd27   : > { %19420 = vsyncadd (!%p18998_p2), %s13949_s29, 4294967280  ;;  %p16_p3 = scmp.ge.s32.totalorder %s19501_s27, 4   ;;  %s22638_s21 = smov %s19427_s22 }
 0xd28   : > { %s22639_s22 = smov %s19431_s23  ;;  %s22640_s23 = smov %s19512_s30 }
 0xd29   : > { %s22641_s24 = smov %s19501_s27  ;;  %18 = sbr.rel (!%p16_p3) target bundleno = 3 (0x3), region = 174 }
 0xd30   :  { %13953 = vsyncpa [#allocation5], 1 }
 0xd31   :  { %13955 = vsyncpa [#allocation5 + $0x1], 1 }

</bundles_post_ra>
